<compile_context>
chip_gen: v7x
topology: tpu7x:2x2x1
jax: 0.10.0
libtpu: 0.0.40
codegen_flags: <defaults>
</compile_context>

<pallas_src>
import functools

import jax
import jax.numpy as jnp
from jax.experimental import pallas as pl
from jax.experimental.pallas import tpu as pltpu


_TAPS3 = tuple((kh, kw) for kh in range(3) for kw in range(3))
_CONV1_KPAD = 160  # 7*7*3 = 147 padded up for aligned MXU operand loads.


# ----------------------------------------------------------------------------
# Padded-flat layout helpers.
#
# An (N, H, W, C) activation is stored as (N, (H+2)*(W+2), C): the spatially
# zero-padded image, flattened row-major.  A 3x3/s1/p1 conv output at spatial
# (i, j) lives at flat row (i+1)*(W+2) + (j+1); its 9 taps are plain row-offset
# slices of the input, so the whole conv is 9 (L, C) @ (C, Cout) matmuls.
# Rows of the output slab that fall on the left/right pad columns are junk and
# are zeroed with a precomputed mask so the slab can be written straight back
# into the padded-flat layout for the next conv / block.
# ----------------------------------------------------------------------------
def _seam_mask(H, W):
    Wp = W + 2
    first = Wp + 1
    L = H * Wp - 2
    col = (jnp.arange(L) + first) % Wp
    valid = (col >= 1) & (col <= W)
    return valid.astype(jnp.float32).reshape(L, 1)


def to_padded_flat(x_nhwc):
    N, H, W, C = x_nhwc.shape
    xp = jnp.pad(x_nhwc, ((0, 0), (1, 1), (1, 1), (0, 0)))
    return xp.reshape(N, (H + 2) * (W + 2), C)


# ----------------------------------------------------------------------------
# Stem kernel: conv1 7x7/s2 (patch matmul) + folded-BN bias + ReLU
# ----------------------------------------------------------------------------
def _stem_kernel(a_ref, w_ref, b_ref, o_ref):
    # a: (1, M, K) bf16 patches, w: (K, 64) bf16, b: (1, 64) f32.
    y = jnp.dot(a_ref[0], w_ref[...], preferred_element_type=jnp.float32)
    o_ref[0, :, :] = jnp.maximum(y + b_ref[...], 0.0)


def stem_conv(a_patches, w, b):
    N, M, K = a_patches.shape
    Cout = w.shape[1]
    return pl.pallas_call(
        _stem_kernel,
        out_shape=jax.ShapeDtypeStruct((N, M, Cout), jnp.float32),
        grid=(N,),
        in_specs=[
            pl.BlockSpec((1, M, K), lambda i: (i, 0, 0)),
            pl.BlockSpec((K, Cout), lambda i: (0, 0)),
            pl.BlockSpec((1, Cout), lambda i: (0, 0)),
        ],
        out_specs=pl.BlockSpec((1, M, Cout), lambda i: (i, 0, 0)),
        compiler_params=pltpu.CompilerParams(
            dimension_semantics=("parallel",)),
    )(a_patches, w, b)


def conv1_patches(x_nhwc, ksize=7, stride=2, pad=3):
    """JAX-side im2col for the single 7x7/s2 stem conv (patch order kh, kw, cin).

    Kept outside Pallas deliberately: it runs once per forward and the 3-channel
    input makes an in-kernel 49-tap accumulation MXU-hostile.
    """
    N, H, W, C = x_nhwc.shape
    Ho = (H + 2 * pad - ksize) // stride + 1
    Wo = (W + 2 * pad - ksize) // stride + 1
    xp = jnp.pad(x_nhwc, ((0, 0), (pad, pad), (pad, pad), (0, 0)))
    cols = []
    for kh in range(ksize):
        for kw in range(ksize):
            cols.append(xp[:, kh:kh + stride * Ho:stride,
                           kw:kw + stride * Wo:stride, :])
    p = jnp.stack(cols, axis=3).reshape(N, Ho * Wo, ksize * ksize * C)
    p = jnp.pad(p, ((0, 0), (0, 0), (0, _CONV1_KPAD - ksize * ksize * C)))
    return p.astype(jnp.bfloat16), Ho, Wo


# ----------------------------------------------------------------------------
# 3x3/s2/p1 max pool as a shifted-maximum tree (pure element-wise XLA work;
# post-ReLU values are >= 0 so zero padding is equivalent to -inf padding).
# ----------------------------------------------------------------------------
def maxpool_3x3_s2(x):
    N, H, W, C = x.shape
    Ho = (H + 2 - 3) // 2 + 1
    Wo = (W + 2 - 3) // 2 + 1
    xp = jnp.pad(x, ((0, 0), (1, 1), (1, 1), (0, 0)))
    m = None
    for kh in range(3):
        for kw in range(3):
            win = xp[:, kh:kh + 2 * Ho:2, kw:kw + 2 * Wo:2, :]
            m = win if m is None else jnp.maximum(m, win)
    return m


# ----------------------------------------------------------------------------
# Fused stride-1 BasicBlock kernel (conv3x3 + ReLU + conv3x3 + residual + ReLU),
# optionally with the global-avg-pool + fc head fused into the epilogue.
# ----------------------------------------------------------------------------
def _make_block_kernel(H, W, C, num_classes=None):
    Wp = W + 2
    P = (H + 2) * Wp
    first = Wp + 1
    L = H * Wp - 2

    def kernel(*refs):
        if num_classes is None:
            (x_ref, w1_ref, b1_ref, w2_ref, b2_ref, mask_ref,
             o_ref, mid_ref) = refs
        else:
            (x_ref, w1_ref, b1_ref, w2_ref, b2_ref, mask_ref,
             fcw_ref, fcb_ref, o_ref, mid_ref) = refs

        # ---- conv1 (3x3/s1/p1): accumulate 9 shifted-window taps on the MXU.
        acc = jnp.zeros((L, C), jnp.float32)
        for t, (kh, kw) in enumerate(_TAPS3):
            src = kh * Wp + kw
            a = x_ref[0, src:src + L, :].astype(jnp.bfloat16)
            acc = acc + jnp.dot(a, w1_ref[t * C:(t + 1) * C, :],
                                preferred_element_type=jnp.float32)
        hid = jnp.maximum(acc + b1_ref[...], 0.0) * mask_ref[...]

        # ---- intermediate stays in VMEM, in padded-flat layout (borders = 0).
        mid_ref[...] = jnp.zeros_like(mid_ref)
        mid_ref[first:first + L, :] = hid

        # ---- conv2 (3x3/s1/p1) + residual + ReLU.
        acc2 = jnp.zeros((L, C), jnp.float32)
        for t, (kh, kw) in enumerate(_TAPS3):
            src = kh * Wp + kw
            a = mid_ref[src:src + L, :].astype(jnp.bfloat16)
            acc2 = acc2 + jnp.dot(a, w2_ref[t * C:(t + 1) * C, :],
                                  preferred_element_type=jnp.float32)
        resid = x_ref[0, first:first + L, :]
        out = jnp.maximum(acc2 + b2_ref[...] + resid, 0.0) * mask_ref[...]

        if num_classes is None:
            # write back in padded-flat layout, ready for the next block.
            o_ref[0, 0:first, :] = jnp.zeros((first, C), jnp.float32)
            o_ref[0, first:first + L, :] = out
            o_ref[0, first + L:P, :] = jnp.zeros((P - first - L, C),
                                                 jnp.float32)
        else:
            # fused global-avg-pool + fc (seam/pad rows are already zero, so a
            # full-slab sum equals the interior spatial sum).
            pooled = jnp.sum(out, axis=0, keepdims=True) * (1.0 / (H * W))
            logits = (jnp.dot(pooled.astype(jnp.bfloat16), fcw_ref[...],
                              preferred_element_type=jnp.float32)
                      + fcb_ref[...])
            o_ref[0, :, :] = logits

    return kernel


def basic_block(x_flat, p, H, W, C, head=None):
    """Fused stride-1 BasicBlock.  x_flat: (N, (H+2)*(W+2), C) padded-flat f32."""
    N = x_flat.shape[0]
    Wp = W + 2
    P = (H + 2) * Wp
    L = H * Wp - 2
    mask = _seam_mask(H, W)

    in_specs = [
        pl.BlockSpec((1, P, C), lambda i: (i, 0, 0)),
        pl.BlockSpec((9 * C, C), lambda i: (0, 0)),
        pl.BlockSpec((1, C), lambda i: (0, 0)),
        pl.BlockSpec((9 * C, C), lambda i: (0, 0)),
        pl.BlockSpec((1, C), lambda i: (0, 0)),
        pl.BlockSpec((L, 1), lambda i: (0, 0)),
    ]
    args = [x_flat, p["w1"], p["b1"], p["w2"], p["b2"], mask]

    if head is None:
        num_classes = None
        out_shape = jax.ShapeDtypeStruct((N, P, C), jnp.float32)
        out_specs = pl.BlockSpec((1, P, C), lambda i: (i, 0, 0))
    else:
        fc_w, fc_b = head
        num_classes = fc_w.shape[1]
        in_specs += [pl.BlockSpec((C, num_classes), lambda i: (0, 0)),
                     pl.BlockSpec((1, num_classes), lambda i: (0, 0))]
        args += [fc_w, fc_b]
        out_shape = jax.ShapeDtypeStruct((N, 1, num_classes), jnp.float32)
        out_specs = pl.BlockSpec((1, 1, num_classes), lambda i: (i, 0, 0))

    out = pl.pallas_call(
        _make_block_kernel(H, W, C, num_classes),
        out_shape=out_shape,
        grid=(N,),
        in_specs=in_specs,
        out_specs=out_specs,
        scratch_shapes=[pltpu.VMEM((P, C), jnp.float32)],
        compiler_params=pltpu.CompilerParams(
            dimension_semantics=("parallel",)),
    )(*args)
    if head is not None:
        out = out.reshape(N, num_classes)
    return out


# ----------------------------------------------------------------------------
# Fused stride-2 BasicBlock kernel (conv 3x3/s2 + 1x1/s2 downsample + conv
# 3x3/s1 + residual + ReLU).  The stride-2 convs take pre-extracted patches
# (small, one-time JAX glue); the second conv and the residual add run on the
# VMEM-resident intermediate in padded-flat layout.
# ----------------------------------------------------------------------------
def _make_down_block_kernel(Ho, Wo, Cout):
    Wp = Wo + 2
    P = (Ho + 2) * Wp
    first = Wp + 1
    L = Ho * Wp - 2

    def kernel(a1_ref, ads_ref, w1_ref, b1_ref, wds_ref, bds_ref,
               w2_ref, b2_ref, mask_ref, o_ref, mid_ref, res_ref):
        # conv1 (3x3/s2) + ReLU on pre-extracted patches.
        y1 = jnp.maximum(
            jnp.dot(a1_ref[0], w1_ref[...], preferred_element_type=jnp.float32)
            + b1_ref[...], 0.0)                                  # (Ho*Wo, Cout)
        # 1x1/s2 downsample path (identity), no ReLU.
        ident = (jnp.dot(ads_ref[0], wds_ref[...],
                         preferred_element_type=jnp.float32) + bds_ref[...])

        # scatter conv1 output / identity into padded-flat layout (VMEM).
        mid_ref[...] = jnp.zeros_like(mid_ref)
        res_ref[...] = jnp.zeros_like(res_ref)
        for i in range(Ho):
            mid_ref[first + Wp * i: first + Wp * i + Wo, :] = \
                y1[Wo * i: Wo * i + Wo, :]
            res_ref[Wp * i: Wp * i + Wo, :] = ident[Wo * i: Wo * i + Wo, :]

        # conv2 (3x3/s1/p1) + residual + ReLU.
        acc = jnp.zeros((L, Cout), jnp.float32)
        for t, (kh, kw) in enumerate(_TAPS3):
            src = kh * Wp + kw
            a = mid_ref[src:src + L, :].astype(jnp.bfloat16)
            acc = acc + jnp.dot(a, w2_ref[t * Cout:(t + 1) * Cout, :],
                                preferred_element_type=jnp.float32)
        out = jnp.maximum(acc + b2_ref[...] + res_ref[...], 0.0) * mask_ref[...]
        o_ref[0, 0:first, :] = jnp.zeros((first, Cout), jnp.float32)
        o_ref[0, first:first + L, :] = out
        o_ref[0, first + L:P, :] = jnp.zeros((P - first - L, Cout), jnp.float32)

    return kernel


def down_block(x_flat, p, H, W, Cin, Cout):
    N = x_flat.shape[0]
    Ho, Wo = H // 2, W // 2
    xp = x_flat.reshape(N, H + 2, W + 2, Cin)   # padded-flat is already padded
    # patches for the 3x3/s2 conv (tap order kh, kw, cin) and the 1x1/s2 input.
    cols = []
    for kh in range(3):
        for kw in range(3):
            cols.append(xp[:, kh:kh + 2 * Ho:2, kw:kw + 2 * Wo:2, :])
    a1 = jnp.stack(cols, axis=3).reshape(N, Ho * Wo, 9 * Cin).astype(jnp.bfloat16)
    ads = xp[:, 1:1 + 2 * Ho:2, 1:1 + 2 * Wo:2, :]
    ads = ads.reshape(N, Ho * Wo, Cin).astype(jnp.bfloat16)

    Wp = Wo + 2
    P = (Ho + 2) * Wp
    L = Ho * Wp - 2
    M = Ho * Wo
    mask = _seam_mask(Ho, Wo)

    return pl.pallas_call(
        _make_down_block_kernel(Ho, Wo, Cout),
        out_shape=jax.ShapeDtypeStruct((N, P, Cout), jnp.float32),
        grid=(N,),
        in_specs=[
            pl.BlockSpec((1, M, 9 * Cin), lambda i: (i, 0, 0)),
            pl.BlockSpec((1, M, Cin), lambda i: (i, 0, 0)),
            pl.BlockSpec((9 * Cin, Cout), lambda i: (0, 0)),
            pl.BlockSpec((1, Cout), lambda i: (0, 0)),
            pl.BlockSpec((Cin, Cout), lambda i: (0, 0)),
            pl.BlockSpec((1, Cout), lambda i: (0, 0)),
            pl.BlockSpec((9 * Cout, Cout), lambda i: (0, 0)),
            pl.BlockSpec((1, Cout), lambda i: (0, 0)),
            pl.BlockSpec((L, 1), lambda i: (0, 0)),
        ],
        out_specs=pl.BlockSpec((1, P, Cout), lambda i: (i, 0, 0)),
        scratch_shapes=[pltpu.VMEM((P, Cout), jnp.float32),
                        pltpu.VMEM((L, Cout), jnp.float32)],
        compiler_params=pltpu.CompilerParams(
            dimension_semantics=("parallel",)),
    )(a1, ads, p["w1"], p["b1"], p["wds"], p["bds"], p["w2"], p["b2"], mask)


# ----------------------------------------------------------------------------
# Full forward pass
# ----------------------------------------------------------------------------
def elim_resnet18_forward(x_nchw, fp):
    # accept NCHW (PyTorch convention), compute in NHWC.
    x = jnp.transpose(x_nchw, (0, 2, 3, 1)).astype(jnp.float32)
    N = x.shape[0]

    # stem: conv1 7x7/s2 + folded BN + ReLU (Pallas), then 3x3/s2 max pool.
    a1, Ho, Wo = conv1_patches(x)
    y = stem_conv(a1, fp["conv1_w"], fp["conv1_b"]).reshape(N, Ho, Wo, 64)
    y = maxpool_3x3_s2(y)
    H, W = y.shape[1], y.shape[2]
    xf = to_padded_flat(y)                                # (N, (H+2)*(W+2), 64)

    # layer1: two fused stride-1 BasicBlocks (64 -> 64).
    xf = basic_block(xf, fp["layer1"][0], H, W, 64)
    xf = basic_block(xf, fp["layer1"][1], H, W, 64)

    # layer2 block 0: fused stride-2 BasicBlock with 1x1 downsample (64 -> 128).
    xf = down_block(xf, fp["layer2"][0], H, W, 64, 128)
    H, W = H // 2, W // 2

    # layer2 block 1: fused stride-1 BasicBlock + avgpool + fc(128 -> 6).
    logits = basic_block(xf, fp["layer2"][1], H, W, 128,
                         head=(fp["fc_w"], fp["fc_b"]))
    return logits


# ----------------------------------------------------------------------------
# Deterministic synthetic parameters (torchvision resnet18 shapes minus
# layer3/layer4, fc -> Linear(128, 6)), then BN folding into Pallas-ready form.
# ----------------------------------------------------------------------------
def init_params(key):
    """Raw params: conv weights as (k*k*cin, cout) with (kh, kw, cin) row order,
    BN as (gamma, beta, running_mean, running_var)."""
    keys = list(jax.random.split(key, 64))
    it = iter(keys)

    def conv_w(k, cin, cout):
        fan_in = k * k * cin
        return (jax.random.normal(next(it), (fan_in, cout), jnp.float32)
                / jnp.sqrt(jnp.float32(fan_in)))

    def bn(c):
        k1, k2 = jax.random.split(next(it))
        gamma = 1.0 + 0.1 * jax.random.normal(k1, (c,), jnp.float32)
        beta = 0.1 * jax.random.normal(k2, (c,), jnp.float32)
        return (gamma, beta, jnp.zeros((c,), jnp.float32),
                jnp.ones((c,), jnp.float32))

    def block(cin, cout, downsample):
        p = {"w1": conv_w(3, cin, cout), "bn1": bn(cout),
             "w2": conv_w(3, cout, cout), "bn2": bn(cout)}
        if downsample:
            p["down_w"] = conv_w(1, cin, cout)
            p["down_bn"] = bn(cout)
        return p

    return {
        "conv1_w": conv_w(7, 3, 64), "bn1": bn(64),
        "layer1": [block(64, 64, False), block(64, 64, False)],
        "layer2": [block(64, 128, True), block(128, 128, False)],
        "fc_w": (jax.random.normal(next(it), (128, 6), jnp.float32)
                 / jnp.sqrt(128.0)),
        "fc_b": 0.01 * jax.random.normal(next(it), (6,), jnp.float32),
    }


def fold_params(params):
    """Fold eval-mode BatchNorm into bf16 MXU weights + f32 bias."""
    def fold(w, bn):
        gamma, beta, mean, var = bn
        scale = gamma / jnp.sqrt(var + 1e-5)
        shift = beta - mean * scale
        return ((w * scale[None, :]).astype(jnp.bfloat16),
                shift.reshape(1, -1).astype(jnp.float32))

    def fold_block(p):
        w1, b1 = fold(p["w1"], p["bn1"])
        w2, b2 = fold(p["w2"], p["bn2"])
        out = {"w1": w1, "b1": b1, "w2": w2, "b2": b2}
        if "down_w" in p:
            out["wds"], out["bds"] = fold(p["down_w"], p["down_bn"])
        return out

    w1, b1 = fold(params["conv1_w"], params["bn1"])
    w1 = jnp.pad(w1, ((0, _CONV1_KPAD - w1.shape[0]), (0, 0)))
    return {
        "conv1_w": w1, "conv1_b": b1,
        "layer1": [fold_block(p) for p in params["layer1"]],
        "layer2": [fold_block(p) for p in params["layer2"]],
        "fc_w": params["fc_w"].astype(jnp.bfloat16),
        "fc_b": params["fc_b"].reshape(1, -1).astype(jnp.float32),
    }


if __name__ == "__main__":
    key = jax.random.PRNGKey(0)
    k_param, k_input = jax.random.split(key)
    fparams = fold_params(init_params(k_param))
    # Small NCHW input (batch=2, 3 channels, 32x32 spatial).
    x = jax.random.normal(k_input, (2, 3, 32, 32), jnp.float32)

    fwd = jax.jit(functools.partial(elim_resnet18_forward, fp=fparams))
    out = jax.block_until_ready(fwd(x))
    assert out.shape == (2, 6), out.shape
    print("KERNEL_OK")
</pallas_src>

<mosaic_0001>
module attributes {stable_mosaic.version = 11 : i64} {
  func.func @_stem_kernel(%arg0: i32, %arg1: memref<1x256x160xbf16, #tpu.memory_space<vmem>>, %arg2: memref<160x64xbf16, #tpu.memory_space<vmem>>, %arg3: memref<1x64xf32, #tpu.memory_space<vmem>>, %arg4: memref<1x256x64xf32, #tpu.memory_space<vmem>>) attributes {dimension_semantics = [#tpu.dimension_semantics<parallel>], iteration_bounds = array<i64: 2>, scalar_prefetch = 0 : i64, scratch_operands = 0 : i64, tpu.core_type = #tpu.core_type<tc>, window_params = [{transform_indices = @transform_0, window_bounds = array<i64: 1, 256, 160>}, {pipeline_mode = #tpu.pipeline_mode<synchronous>, transform_indices = @transform_1, window_bounds = array<i64: 160, 64>}, {pipeline_mode = #tpu.pipeline_mode<synchronous>, transform_indices = @transform_2, window_bounds = array<i64: 1, 64>}, {transform_indices = @transform_3, window_bounds = array<i64: 1, 256, 64>}]} {
    %c0 = arith.constant 0 : index
    %c0_0 = arith.constant 0 : index
    %c0_1 = arith.constant 0 : index
    %0 = vector.load %arg1[%c0, %c0_0, %c0_1] : memref<1x256x160xbf16, #tpu.memory_space<vmem>>, vector<1x256x160xbf16>
    %1 = vector.shape_cast %0 : vector<1x256x160xbf16> to vector<256x160xbf16>
    %c0_2 = arith.constant 0 : index
    %c0_3 = arith.constant 0 : index
    %2 = vector.load %arg2[%c0_2, %c0_3] : memref<160x64xbf16, #tpu.memory_space<vmem>>, vector<160x64xbf16>
    %cst = arith.constant dense<0.000000e+00> : vector<256x64xf32>
    %3 = tpu.matmul %1, %2, %cst {dimension_numbers = #tpu.dot_dimension_numbers<[1], [0], [0], [1], [0, 0, 1, 1], [], []>} : vector<256x160xbf16>, vector<160x64xbf16>, vector<256x64xf32> -> vector<256x64xf32>
    %c0_4 = arith.constant 0 : index
    %c0_5 = arith.constant 0 : index
    %4 = vector.load %arg3[%c0_4, %c0_5] : memref<1x64xf32, #tpu.memory_space<vmem>>, vector<1x64xf32>
    %5 = vector.broadcast %4 : vector<1x64xf32> to vector<256x64xf32>
    %6 = arith.addf %3, %5 : vector<256x64xf32>
    %cst_6 = arith.constant 0.000000e+00 : f32
    %7 = vector.broadcast %cst_6 : f32 to vector<256x64xf32>
    %8 = arith.maximumf %6, %7 : vector<256x64xf32>
    %c0_7 = arith.constant 0 : index
    %c0_8 = arith.constant 0 : index
    %c0_9 = arith.constant 0 : index
    %9 = vector.load %arg4[%c0_7, %c0_8, %c0_9] : memref<1x256x64xf32, #tpu.memory_space<vmem>>, vector<1x256x64xf32>
    %10 = vector.shape_cast %9 : vector<1x256x64xf32> to vector<256x64xf32>
    %11 = vector.shape_cast %8 : vector<256x64xf32> to vector<1x256x64xf32>
    tpu.vector_store %arg4[%c0_7, %c0_8, %c0_9], %11 {strides = array<i32>} : memref<1x256x64xf32, #tpu.memory_space<vmem>>, vector<1x256x64xf32>,
    return
  }
  func.func @transform_0(%arg0: i32) -> (i32, i32, i32) {
    %c0_i32 = arith.constant 0 : i32
    %c0_i32_0 = arith.constant 0 : i32
    %c0_i32_1 = arith.constant 0 : i32
    return %arg0, %c0_i32, %c0_i32_0 : i32, i32, i32
  }
  func.func @transform_1(%arg0: i32) -> (i32, i32) {
    %c0_i32 = arith.constant 0 : i32
    %c0_i32_0 = arith.constant 0 : i32
    %c0_i32_1 = arith.constant 0 : i32
    return %c0_i32, %c0_i32_0 : i32, i32
  }
  func.func @transform_2(%arg0: i32) -> (i32, i32) {
    %c0_i32 = arith.constant 0 : i32
    %c0_i32_0 = arith.constant 0 : i32
    %c0_i32_1 = arith.constant 0 : i32
    return %c0_i32, %c0_i32_0 : i32, i32
  }
  func.func @transform_3(%arg0: i32) -> (i32, i32, i32) {
    %c0_i32 = arith.constant 0 : i32
    %c0_i32_0 = arith.constant 0 : i32
    %c0_i32_1 = arith.constant 0 : i32
    return %arg0, %c0_i32, %c0_i32_0 : i32, i32, i32
  }
}

module attributes {stable_mosaic.version = 11 : i64} {
  func.func @kernel(%arg0: i32, %arg1: memref<1x100x64xf32, #tpu.memory_space<vmem>>, %arg2: memref<576x64xbf16, #tpu.memory_space<vmem>>, %arg3: memref<1x64xf32, #tpu.memory_space<vmem>>, %arg4: memref<576x64xbf16, #tpu.memory_space<vmem>>, %arg5: memref<1x64xf32, #tpu.memory_space<vmem>>, %arg6: memref<78x1xf32, #tpu.memory_space<vmem>>, %arg7: memref<1x100x64xf32, #tpu.memory_space<vmem>>, %arg8: memref<100x64xf32, #tpu.memory_space<vmem>>) attributes {dimension_semantics = [#tpu.dimension_semantics<parallel>], iteration_bounds = array<i64: 2>, scalar_prefetch = 0 : i64, scratch_operands = 1 : i64, tpu.core_type = #tpu.core_type<tc>, window_params = [{transform_indices = @transform_0, window_bounds = array<i64: 1, 100, 64>}, {pipeline_mode = #tpu.pipeline_mode<synchronous>, transform_indices = @transform_1, window_bounds = array<i64: 576, 64>}, {pipeline_mode = #tpu.pipeline_mode<synchronous>, transform_indices = @transform_2, window_bounds = array<i64: 1, 64>}, {pipeline_mode = #tpu.pipeline_mode<synchronous>, transform_indices = @transform_3, window_bounds = array<i64: 576, 64>}, {pipeline_mode = #tpu.pipeline_mode<synchronous>, transform_indices = @transform_4, window_bounds = array<i64: 1, 64>}, {pipeline_mode = #tpu.pipeline_mode<synchronous>, transform_indices = @transform_5, window_bounds = array<i64: 78, 1>}, {transform_indices = @transform_6, window_bounds = array<i64: 1, 100, 64>}]} {
    %cst = arith.constant 0.000000e+00 : f32
    %0 = vector.broadcast %cst : f32 to vector<78x64xf32>
    %c0 = arith.constant 0 : index
    %c0_0 = arith.constant 0 : index
    %c0_1 = arith.constant 0 : index
    %1 = vector.load %arg1[%c0, %c0_0, %c0_1] : memref<1x100x64xf32, #tpu.memory_space<vmem>>, vector<1x78x64xf32>
    %2 = vector.shape_cast %1 : vector<1x78x64xf32> to vector<78x64xf32>
    %3 = arith.truncf %2 : vector<78x64xf32> to vector<78x64xbf16>
    %c0_2 = arith.constant 0 : index
    %c0_3 = arith.constant 0 : index
    %4 = vector.load %arg2[%c0_2, %c0_3] : memref<576x64xbf16, #tpu.memory_space<vmem>>, vector<64x64xbf16>
    %cst_4 = arith.constant dense<0.000000e+00> : vector<78x64xf32>
    %5 = tpu.matmul %3, %4, %cst_4 {dimension_numbers = #tpu.dot_dimension_numbers<[1], [0], [0], [1], [0, 0, 1, 1], [], []>} : vector<78x64xbf16>, vector<64x64xbf16>, vector<78x64xf32> -> vector<78x64xf32>
    %6 = arith.addf %0, %5 : vector<78x64xf32>
    %c0_5 = arith.constant 0 : index
    %c1 = arith.constant 1 : index
    %c0_6 = arith.constant 0 : index
    %7 = vector.load %arg1[%c0_5, %c1, %c0_6] : memref<1x100x64xf32, #tpu.memory_space<vmem>>, vector<1x78x64xf32>
    %8 = vector.shape_cast %7 : vector<1x78x64xf32> to vector<78x64xf32>
    %9 = arith.truncf %8 : vector<78x64xf32> to vector<78x64xbf16>
    %c64 = arith.constant 64 : index
    %c0_7 = arith.constant 0 : index
    %10 = vector.load %arg2[%c64, %c0_7] : memref<576x64xbf16, #tpu.memory_space<vmem>>, vector<64x64xbf16>
    %cst_8 = arith.constant dense<0.000000e+00> : vector<78x64xf32>
    %11 = tpu.matmul %9, %10, %cst_8 {dimension_numbers = #tpu.dot_dimension_numbers<[1], [0], [0], [1], [0, 0, 1, 1], [], []>} : vector<78x64xbf16>, vector<64x64xbf16>, vector<78x64xf32> -> vector<78x64xf32>
    %12 = arith.addf %6, %11 : vector<78x64xf32>
    %c0_9 = arith.constant 0 : index
    %c2 = arith.constant 2 : index
    %c0_10 = arith.constant 0 : index
    %13 = vector.load %arg1[%c0_9, %c2, %c0_10] : memref<1x100x64xf32, #tpu.memory_space<vmem>>, vector<1x78x64xf32>
    %14 = vector.shape_cast %13 : vector<1x78x64xf32> to vector<78x64xf32>
    %15 = arith.truncf %14 : vector<78x64xf32> to vector<78x64xbf16>
    %c128 = arith.constant 128 : index
    %c0_11 = arith.constant 0 : index
    %16 = vector.load %arg2[%c128, %c0_11] : memref<576x64xbf16, #tpu.memory_space<vmem>>, vector<64x64xbf16>
    %cst_12 = arith.constant dense<0.000000e+00> : vector<78x64xf32>
    %17 = tpu.matmul %15, %16, %cst_12 {dimension_numbers = #tpu.dot_dimension_numbers<[1], [0], [0], [1], [0, 0, 1, 1], [], []>} : vector<78x64xbf16>, vector<64x64xbf16>, vector<78x64xf32> -> vector<78x64xf32>
    %18 = arith.addf %12, %17 : vector<78x64xf32>
    %c0_13 = arith.constant 0 : index
    %c10 = arith.constant 10 : index
    %c0_14 = arith.constant 0 : index
    %19 = vector.load %arg1[%c0_13, %c10, %c0_14] : memref<1x100x64xf32, #tpu.memory_space<vmem>>, vector<1x78x64xf32>
    %20 = vector.shape_cast %19 : vector<1x78x64xf32> to vector<78x64xf32>
    %21 = arith.truncf %20 : vector<78x64xf32> to vector<78x64xbf16>
    %c192 = arith.constant 192 : index
    %c0_15 = arith.constant 0 : index
    %22 = vector.load %arg2[%c192, %c0_15] : memref<576x64xbf16, #tpu.memory_space<vmem>>, vector<64x64xbf16>
    %cst_16 = arith.constant dense<0.000000e+00> : vector<78x64xf32>
    %23 = tpu.matmul %21, %22, %cst_16 {dimension_numbers = #tpu.dot_dimension_numbers<[1], [0], [0], [1], [0, 0, 1, 1], [], []>} : vector<78x64xbf16>, vector<64x64xbf16>, vector<78x64xf32> -> vector<78x64xf32>
    %24 = arith.addf %18, %23 : vector<78x64xf32>
    %c0_17 = arith.constant 0 : index
    %c11 = arith.constant 11 : index
    %c0_18 = arith.constant 0 : index
    %25 = vector.load %arg1[%c0_17, %c11, %c0_18] : memref<1x100x64xf32, #tpu.memory_space<vmem>>, vector<1x78x64xf32>
    %26 = vector.shape_cast %25 : vector<1x78x64xf32> to vector<78x64xf32>
    %27 = arith.truncf %26 : vector<78x64xf32> to vector<78x64xbf16>
    %c256 = arith.constant 256 : index
    %c0_19 = arith.constant 0 : index
    %28 = vector.load %arg2[%c256, %c0_19] : memref<576x64xbf16, #tpu.memory_space<vmem>>, vector<64x64xbf16>
    %cst_20 = arith.constant dense<0.000000e+00> : vector<78x64xf32>
    %29 = tpu.matmul %27, %28, %cst_20 {dimension_numbers = #tpu.dot_dimension_numbers<[1], [0], [0], [1], [0, 0, 1, 1], [], []>} : vector<78x64xbf16>, vector<64x64xbf16>, vector<78x64xf32> -> vector<78x64xf32>
    %30 = arith.addf %24, %29 : vector<78x64xf32>
    %c0_21 = arith.constant 0 : index
    %c12 = arith.constant 12 : index
    %c0_22 = arith.constant 0 : index
    %31 = vector.load %arg1[%c0_21, %c12, %c0_22] : memref<1x100x64xf32, #tpu.memory_space<vmem>>, vector<1x78x64xf32>
    %32 = vector.shape_cast %31 : vector<1x78x64xf32> to vector<78x64xf32>
    %33 = arith.truncf %32 : vector<78x64xf32> to vector<78x64xbf16>
    %c320 = arith.constant 320 : index
    %c0_23 = arith.constant 0 : index
    %34 = vector.load %arg2[%c320, %c0_23] : memref<576x64xbf16, #tpu.memory_space<vmem>>, vector<64x64xbf16>
    %cst_24 = arith.constant dense<0.000000e+00> : vector<78x64xf32>
    %35 = tpu.matmul %33, %34, %cst_24 {dimension_numbers = #tpu.dot_dimension_numbers<[1], [0], [0], [1], [0, 0, 1, 1], [], []>} : vector<78x64xbf16>, vector<64x64xbf16>, vector<78x64xf32> -> vector<78x64xf32>
    %36 = arith.addf %30, %35 : vector<78x64xf32>
    %c0_25 = arith.constant 0 : index
    %c20 = arith.constant 20 : index
    %c0_26 = arith.constant 0 : index
    %37 = vector.load %arg1[%c0_25, %c20, %c0_26] : memref<1x100x64xf32, #tpu.memory_space<vmem>>, vector<1x78x64xf32>
    %38 = vector.shape_cast %37 : vector<1x78x64xf32> to vector<78x64xf32>
    %39 = arith.truncf %38 : vector<78x64xf32> to vector<78x64xbf16>
    %c384 = arith.constant 384 : index
    %c0_27 = arith.constant 0 : index
    %40 = vector.load %arg2[%c384, %c0_27] : memref<576x64xbf16, #tpu.memory_space<vmem>>, vector<64x64xbf16>
    %cst_28 = arith.constant dense<0.000000e+00> : vector<78x64xf32>
    %41 = tpu.matmul %39, %40, %cst_28 {dimension_numbers = #tpu.dot_dimension_numbers<[1], [0], [0], [1], [0, 0, 1, 1], [], []>} : vector<78x64xbf16>, vector<64x64xbf16>, vector<78x64xf32> -> vector<78x64xf32>
    %42 = arith.addf %36, %41 : vector<78x64xf32>
    %c0_29 = arith.constant 0 : index
    %c21 = arith.constant 21 : index
    %c0_30 = arith.constant 0 : index
    %43 = vector.load %arg1[%c0_29, %c21, %c0_30] : memref<1x100x64xf32, #tpu.memory_space<vmem>>, vector<1x78x64xf32>
    %44 = vector.shape_cast %43 : vector<1x78x64xf32> to vector<78x64xf32>
    %45 = arith.truncf %44 : vector<78x64xf32> to vector<78x64xbf16>
    %c448 = arith.constant 448 : index
    %c0_31 = arith.constant 0 : index
    %46 = vector.load %arg2[%c448, %c0_31] : memref<576x64xbf16, #tpu.memory_space<vmem>>, vector<64x64xbf16>
    %cst_32 = arith.constant dense<0.000000e+00> : vector<78x64xf32>
    %47 = tpu.matmul %45, %46, %cst_32 {dimension_numbers = #tpu.dot_dimension_numbers<[1], [0], [0], [1], [0, 0, 1, 1], [], []>} : vector<78x64xbf16>, vector<64x64xbf16>, vector<78x64xf32> -> vector<78x64xf32>
    %48 = arith.addf %42, %47 : vector<78x64xf32>
    %c0_33 = arith.constant 0 : index
    %c22 = arith.constant 22 : index
    %c0_34 = arith.constant 0 : index
    %49 = vector.load %arg1[%c0_33, %c22, %c0_34] : memref<1x100x64xf32, #tpu.memory_space<vmem>>, vector<1x78x64xf32>
    %50 = vector.shape_cast %49 : vector<1x78x64xf32> to vector<78x64xf32>
    %51 = arith.truncf %50 : vector<78x64xf32> to vector<78x64xbf16>
    %c512 = arith.constant 512 : index
    %c0_35 = arith.constant 0 : index
    %52 = vector.load %arg2[%c512, %c0_35] : memref<576x64xbf16, #tpu.memory_space<vmem>>, vector<64x64xbf16>
    %cst_36 = arith.constant dense<0.000000e+00> : vector<78x64xf32>
    %53 = tpu.matmul %51, %52, %cst_36 {dimension_numbers = #tpu.dot_dimension_numbers<[1], [0], [0], [1], [0, 0, 1, 1], [], []>} : vector<78x64xbf16>, vector<64x64xbf16>, vector<78x64xf32> -> vector<78x64xf32>
    %54 = arith.addf %48, %53 : vector<78x64xf32>
    %c0_37 = arith.constant 0 : index
    %c0_38 = arith.constant 0 : index
    %55 = vector.load %arg3[%c0_37, %c0_38] : memref<1x64xf32, #tpu.memory_space<vmem>>, vector<1x64xf32>
    %56 = vector.broadcast %55 : vector<1x64xf32> to vector<78x64xf32>
    %57 = arith.addf %54, %56 : vector<78x64xf32>
    %cst_39 = arith.constant 0.000000e+00 : f32
    %58 = vector.broadcast %cst_39 : f32 to vector<78x64xf32>
    %59 = arith.maximumf %57, %58 : vector<78x64xf32>
    %c0_40 = arith.constant 0 : index
    %c0_41 = arith.constant 0 : index
    %60 = vector.load %arg6[%c0_40, %c0_41] : memref<78x1xf32, #tpu.memory_space<vmem>>, vector<78x1xf32>
    %61 = vector.broadcast %60 : vector<78x1xf32> to vector<78x64xf32>
    %62 = arith.mulf %59, %61 : vector<78x64xf32>
    %cst_42 = arith.constant 0.000000e+00 : f32
    %63 = vector.broadcast %cst_42 : f32 to vector<100x64xf32>
    %c0_43 = arith.constant 0 : index
    %c0_44 = arith.constant 0 : index
    %64 = vector.load %arg8[%c0_43, %c0_44] : memref<100x64xf32, #tpu.memory_space<vmem>>, vector<100x64xf32>
    tpu.vector_store %arg8[%c0_43, %c0_44], %63 {strides = array<i32>} : memref<100x64xf32, #tpu.memory_space<vmem>>, vector<100x64xf32>,
    %c11_45 = arith.constant 11 : index
    %c0_46 = arith.constant 0 : index
    %65 = vector.load %arg8[%c11_45, %c0_46] : memref<100x64xf32, #tpu.memory_space<vmem>>, vector<78x64xf32>
    tpu.vector_store %arg8[%c11_45, %c0_46], %62 {strides = array<i32>} : memref<100x64xf32, #tpu.memory_space<vmem>>, vector<78x64xf32>,
    %cst_47 = arith.constant 0.000000e+00 : f32
    %66 = vector.broadcast %cst_47 : f32 to vector<78x64xf32>
    %c0_48 = arith.constant 0 : index
    %c0_49 = arith.constant 0 : index
    %67 = vector.load %arg8[%c0_48, %c0_49] : memref<100x64xf32, #tpu.memory_space<vmem>>, vector<78x64xf32>
    %68 = arith.truncf %67 : vector<78x64xf32> to vector<78x64xbf16>
    %c0_50 = arith.constant 0 : index
    %c0_51 = arith.constant 0 : index
    %69 = vector.load %arg4[%c0_50, %c0_51] : memref<576x64xbf16, #tpu.memory_space<vmem>>, vector<64x64xbf16>
    %cst_52 = arith.constant dense<0.000000e+00> : vector<78x64xf32>
    %70 = tpu.matmul %68, %69, %cst_52 {dimension_numbers = #tpu.dot_dimension_numbers<[1], [0], [0], [1], [0, 0, 1, 1], [], []>} : vector<78x64xbf16>, vector<64x64xbf16>, vector<78x64xf32> -> vector<78x64xf32>
    %71 = arith.addf %66, %70 : vector<78x64xf32>
    %c1_53 = arith.constant 1 : index
    %c0_54 = arith.constant 0 : index
    %72 = vector.load %arg8[%c1_53, %c0_54] : memref<100x64xf32, #tpu.memory_space<vmem>>, vector<78x64xf32>
    %73 = arith.truncf %72 : vector<78x64xf32> to vector<78x64xbf16>
    %c64_55 = arith.constant 64 : index
    %c0_56 = arith.constant 0 : index
    %74 = vector.load %arg4[%c64_55, %c0_56] : memref<576x64xbf16, #tpu.memory_space<vmem>>, vector<64x64xbf16>
    %cst_57 = arith.constant dense<0.000000e+00> : vector<78x64xf32>
    %75 = tpu.matmul %73, %74, %cst_57 {dimension_numbers = #tpu.dot_dimension_numbers<[1], [0], [0], [1], [0, 0, 1, 1], [], []>} : vector<78x64xbf16>, vector<64x64xbf16>, vector<78x64xf32> -> vector<78x64xf32>
    %76 = arith.addf %71, %75 : vector<78x64xf32>
    %c2_58 = arith.constant 2 : index
    %c0_59 = arith.constant 0 : index
    %77 = vector.load %arg8[%c2_58, %c0_59] : memref<100x64xf32, #tpu.memory_space<vmem>>, vector<78x64xf32>
    %78 = arith.truncf %77 : vector<78x64xf32> to vector<78x64xbf16>
    %c128_60 = arith.constant 128 : index
    %c0_61 = arith.constant 0 : index
    %79 = vector.load %arg4[%c128_60, %c0_61] : memref<576x64xbf16, #tpu.memory_space<vmem>>, vector<64x64xbf16>
    %cst_62 = arith.constant dense<0.000000e+00> : vector<78x64xf32>
    %80 = tpu.matmul %78, %79, %cst_62 {dimension_numbers = #tpu.dot_dimension_numbers<[1], [0], [0], [1], [0, 0, 1, 1], [], []>} : vector<78x64xbf16>, vector<64x64xbf16>, vector<78x64xf32> -> vector<78x64xf32>
    %81 = arith.addf %76, %80 : vector<78x64xf32>
    %c10_63 = arith.constant 10 : index
    %c0_64 = arith.constant 0 : index
    %82 = vector.load %arg8[%c10_63, %c0_64] : memref<100x64xf32, #tpu.memory_space<vmem>>, vector<78x64xf32>
    %83 = arith.truncf %82 : vector<78x64xf32> to vector<78x64xbf16>
    %c192_65 = arith.constant 192 : index
    %c0_66 = arith.constant 0 : index
    %84 = vector.load %arg4[%c192_65, %c0_66] : memref<576x64xbf16, #tpu.memory_space<vmem>>, vector<64x64xbf16>
    %cst_67 = arith.constant dense<0.000000e+00> : vector<78x64xf32>
    %85 = tpu.matmul %83, %84, %cst_67 {dimension_numbers = #tpu.dot_dimension_numbers<[1], [0], [0], [1], [0, 0, 1, 1], [], []>} : vector<78x64xbf16>, vector<64x64xbf16>, vector<78x64xf32> -> vector<78x64xf32>
    %86 = arith.addf %81, %85 : vector<78x64xf32>
    %c11_68 = arith.constant 11 : index
    %c0_69 = arith.constant 0 : index
    %87 = vector.load %arg8[%c11_68, %c0_69] : memref<100x64xf32, #tpu.memory_space<vmem>>, vector<78x64xf32>
    %88 = arith.truncf %87 : vector<78x64xf32> to vector<78x64xbf16>
    %c256_70 = arith.constant 256 : index
    %c0_71 = arith.constant 0 : index
    %89 = vector.load %arg4[%c256_70, %c0_71] : memref<576x64xbf16, #tpu.memory_space<vmem>>, vector<64x64xbf16>
    %cst_72 = arith.constant dense<0.000000e+00> : vector<78x64xf32>
    %90 = tpu.matmul %88, %89, %cst_72 {dimension_numbers = #tpu.dot_dimension_numbers<[1], [0], [0], [1], [0, 0, 1, 1], [], []>} : vector<78x64xbf16>, vector<64x64xbf16>, vector<78x64xf32> -> vector<78x64xf32>
    %91 = arith.addf %86, %90 : vector<78x64xf32>
    %c12_73 = arith.constant 12 : index
    %c0_74 = arith.constant 0 : index
    %92 = vector.load %arg8[%c12_73, %c0_74] : memref<100x64xf32, #tpu.memory_space<vmem>>, vector<78x64xf32>
    %93 = arith.truncf %92 : vector<78x64xf32> to vector<78x64xbf16>
    %c320_75 = arith.constant 320 : index
    %c0_76 = arith.constant 0 : index
    %94 = vector.load %arg4[%c320_75, %c0_76] : memref<576x64xbf16, #tpu.memory_space<vmem>>, vector<64x64xbf16>
    %cst_77 = arith.constant dense<0.000000e+00> : vector<78x64xf32>
    %95 = tpu.matmul %93, %94, %cst_77 {dimension_numbers = #tpu.dot_dimension_numbers<[1], [0], [0], [1], [0, 0, 1, 1], [], []>} : vector<78x64xbf16>, vector<64x64xbf16>, vector<78x64xf32> -> vector<78x64xf32>
    %96 = arith.addf %91, %95 : vector<78x64xf32>
    %c20_78 = arith.constant 20 : index
    %c0_79 = arith.constant 0 : index
    %97 = vector.load %arg8[%c20_78, %c0_79] : memref<100x64xf32, #tpu.memory_space<vmem>>, vector<78x64xf32>
    %98 = arith.truncf %97 : vector<78x64xf32> to vector<78x64xbf16>
    %c384_80 = arith.constant 384 : index
    %c0_81 = arith.constant 0 : index
    %99 = vector.load %arg4[%c384_80, %c0_81] : memref<576x64xbf16, #tpu.memory_space<vmem>>, vector<64x64xbf16>
    %cst_82 = arith.constant dense<0.000000e+00> : vector<78x64xf32>
    %100 = tpu.matmul %98, %99, %cst_82 {dimension_numbers = #tpu.dot_dimension_numbers<[1], [0], [0], [1], [0, 0, 1, 1], [], []>} : vector<78x64xbf16>, vector<64x64xbf16>, vector<78x64xf32> -> vector<78x64xf32>
    %101 = arith.addf %96, %100 : vector<78x64xf32>
    %c21_83 = arith.constant 21 : index
    %c0_84 = arith.constant 0 : index
    %102 = vector.load %arg8[%c21_83, %c0_84] : memref<100x64xf32, #tpu.memory_space<vmem>>, vector<78x64xf32>
    %103 = arith.truncf %102 : vector<78x64xf32> to vector<78x64xbf16>
    %c448_85 = arith.constant 448 : index
    %c0_86 = arith.constant 0 : index
    %104 = vector.load %arg4[%c448_85, %c0_86] : memref<576x64xbf16, #tpu.memory_space<vmem>>, vector<64x64xbf16>
    %cst_87 = arith.constant dense<0.000000e+00> : vector<78x64xf32>
    %105 = tpu.matmul %103, %104, %cst_87 {dimension_numbers = #tpu.dot_dimension_numbers<[1], [0], [0], [1], [0, 0, 1, 1], [], []>} : vector<78x64xbf16>, vector<64x64xbf16>, vector<78x64xf32> -> vector<78x64xf32>
    %106 = arith.addf %101, %105 : vector<78x64xf32>
    %c22_88 = arith.constant 22 : index
    %c0_89 = arith.constant 0 : index
    %107 = vector.load %arg8[%c22_88, %c0_89] : memref<100x64xf32, #tpu.memory_space<vmem>>, vector<78x64xf32>
    %108 = arith.truncf %107 : vector<78x64xf32> to vector<78x64xbf16>
    %c512_90 = arith.constant 512 : index
    %c0_91 = arith.constant 0 : index
    %109 = vector.load %arg4[%c512_90, %c0_91] : memref<576x64xbf16, #tpu.memory_space<vmem>>, vector<64x64xbf16>
    %cst_92 = arith.constant dense<0.000000e+00> : vector<78x64xf32>
    %110 = tpu.matmul %108, %109, %cst_92 {dimension_numbers = #tpu.dot_dimension_numbers<[1], [0], [0], [1], [0, 0, 1, 1], [], []>} : vector<78x64xbf16>, vector<64x64xbf16>, vector<78x64xf32> -> vector<78x64xf32>
    %111 = arith.addf %106, %110 : vector<78x64xf32>
    %c0_93 = arith.constant 0 : index
    %c11_94 = arith.constant 11 : index
    %c0_95 = arith.constant 0 : index
    %112 = vector.load %arg1[%c0_93, %c11_94, %c0_95] : memref<1x100x64xf32, #tpu.memory_space<vmem>>, vector<1x78x64xf32>
    %113 = vector.shape_cast %112 : vector<1x78x64xf32> to vector<78x64xf32>
    %c0_96 = arith.constant 0 : index
    %c0_97 = arith.constant 0 : index
    %114 = vector.load %arg5[%c0_96, %c0_97] : memref<1x64xf32, #tpu.memory_space<vmem>>, vector<1x64xf32>
    %115 = vector.broadcast %114 : vector<1x64xf32> to vector<78x64xf32>
    %116 = arith.addf %111, %115 : vector<78x64xf32>
    %117 = arith.addf %116, %113 : vector<78x64xf32>
    %cst_98 = arith.constant 0.000000e+00 : f32
    %118 = vector.broadcast %cst_98 : f32 to vector<78x64xf32>
    %119 = arith.maximumf %117, %118 : vector<78x64xf32>
    %c0_99 = arith.constant 0 : index
    %c0_100 = arith.constant 0 : index
    %120 = vector.load %arg6[%c0_99, %c0_100] : memref<78x1xf32, #tpu.memory_space<vmem>>, vector<78x1xf32>
    %121 = vector.broadcast %120 : vector<78x1xf32> to vector<78x64xf32>
    %122 = arith.mulf %119, %121 : vector<78x64xf32>
    %cst_101 = arith.constant 0.000000e+00 : f32
    %123 = vector.broadcast %cst_101 : f32 to vector<11x64xf32>
    %c0_102 = arith.constant 0 : index
    %c0_103 = arith.constant 0 : index
    %c0_104 = arith.constant 0 : index
    %124 = vector.load %arg7[%c0_102, %c0_103, %c0_104] : memref<1x100x64xf32, #tpu.memory_space<vmem>>, vector<1x11x64xf32>
    %125 = vector.shape_cast %124 : vector<1x11x64xf32> to vector<11x64xf32>
    %126 = vector.shape_cast %123 : vector<11x64xf32> to vector<1x11x64xf32>
    tpu.vector_store %arg7[%c0_102, %c0_103, %c0_104], %126 {strides = array<i32>} : memref<1x100x64xf32, #tpu.memory_space<vmem>>, vector<1x11x64xf32>,
    %c0_105 = arith.constant 0 : index
    %c11_106 = arith.constant 11 : index
    %c0_107 = arith.constant 0 : index
    %127 = vector.load %arg7[%c0_105, %c11_106, %c0_107] : memref<1x100x64xf32, #tpu.memory_space<vmem>>, vector<1x78x64xf32>
    %128 = vector.shape_cast %127 : vector<1x78x64xf32> to vector<78x64xf32>
    %129 = vector.shape_cast %122 : vector<78x64xf32> to vector<1x78x64xf32>
    tpu.vector_store %arg7[%c0_105, %c11_106, %c0_107], %129 {strides = array<i32>} : memref<1x100x64xf32, #tpu.memory_space<vmem>>, vector<1x78x64xf32>,
    %cst_108 = arith.constant 0.000000e+00 : f32
    %130 = vector.broadcast %cst_108 : f32 to vector<11x64xf32>
    %c0_109 = arith.constant 0 : index
    %c89 = arith.constant 89 : index
    %c0_110 = arith.constant 0 : index
    %131 = vector.load %arg7[%c0_109, %c89, %c0_110] : memref<1x100x64xf32, #tpu.memory_space<vmem>>, vector<1x11x64xf32>
    %132 = vector.shape_cast %131 : vector<1x11x64xf32> to vector<11x64xf32>
    %133 = vector.shape_cast %130 : vector<11x64xf32> to vector<1x11x64xf32>
    tpu.vector_store %arg7[%c0_109, %c89, %c0_110], %133 {strides = array<i32>} : memref<1x100x64xf32, #tpu.memory_space<vmem>>, vector<1x11x64xf32>,
    return
  }
  func.func @transform_0(%arg0: i32) -> (i32, i32, i32) {
    %c0_i32 = arith.constant 0 : i32
    %c0_i32_0 = arith.constant 0 : i32
    %c0_i32_1 = arith.constant 0 : i32
    return %arg0, %c0_i32, %c0_i32_0 : i32, i32, i32
  }
  func.func @transform_1(%arg0: i32) -> (i32, i32) {
    %c0_i32 = arith.constant 0 : i32
    %c0_i32_0 = arith.constant 0 : i32
    %c0_i32_1 = arith.constant 0 : i32
    return %c0_i32, %c0_i32_0 : i32, i32
  }
  func.func @transform_2(%arg0: i32) -> (i32, i32) {
    %c0_i32 = arith.constant 0 : i32
    %c0_i32_0 = arith.constant 0 : i32
    %c0_i32_1 = arith.constant 0 : i32
    return %c0_i32, %c0_i32_0 : i32, i32
  }
  func.func @transform_3(%arg0: i32) -> (i32, i32) {
    %c0_i32 = arith.constant 0 : i32
    %c0_i32_0 = arith.constant 0 : i32
    %c0_i32_1 = arith.constant 0 : i32
    return %c0_i32, %c0_i32_0 : i32, i32
  }
  func.func @transform_4(%arg0: i32) -> (i32, i32) {
    %c0_i32 = arith.constant 0 : i32
    %c0_i32_0 = arith.constant 0 : i32
    %c0_i32_1 = arith.constant 0 : i32
    return %c0_i32, %c0_i32_0 : i32, i32
  }
  func.func @transform_5(%arg0: i32) -> (i32, i32) {
    %c0_i32 = arith.constant 0 : i32
    %c0_i32_0 = arith.constant 0 : i32
    %c0_i32_1 = arith.constant 0 : i32
    return %c0_i32, %c0_i32_0 : i32, i32
  }
  func.func @transform_6(%arg0: i32) -> (i32, i32, i32) {
    %c0_i32 = arith.constant 0 : i32
    %c0_i32_0 = arith.constant 0 : i32
    %c0_i32_1 = arith.constant 0 : i32
    return %arg0, %c0_i32, %c0_i32_0 : i32, i32, i32
  }
}

module attributes {stable_mosaic.version = 11 : i64} {
  func.func @kernel(%arg0: i32, %arg1: memref<1x36x128xf32, #tpu.memory_space<vmem>>, %arg2: memref<1152x128xbf16, #tpu.memory_space<vmem>>, %arg3: memref<1x128xf32, #tpu.memory_space<vmem>>, %arg4: memref<1152x128xbf16, #tpu.memory_space<vmem>>, %arg5: memref<1x128xf32, #tpu.memory_space<vmem>>, %arg6: memref<22x1xf32, #tpu.memory_space<vmem>>, %arg7: memref<128x6xbf16, #tpu.memory_space<vmem>>, %arg8: memref<1x6xf32, #tpu.memory_space<vmem>>, %arg9: memref<1x1x6xf32, #tpu.memory_space<vmem>>, %arg10: memref<36x128xf32, #tpu.memory_space<vmem>>) attributes {dimension_semantics = [#tpu.dimension_semantics<parallel>], iteration_bounds = array<i64: 2>, scalar_prefetch = 0 : i64, scratch_operands = 1 : i64, tpu.core_type = #tpu.core_type<tc>, window_params = [{transform_indices = @transform_0, window_bounds = array<i64: 1, 36, 128>}, {pipeline_mode = #tpu.pipeline_mode<synchronous>, transform_indices = @transform_1, window_bounds = array<i64: 1152, 128>}, {pipeline_mode = #tpu.pipeline_mode<synchronous>, transform_indices = @transform_2, window_bounds = array<i64: 1, 128>}, {pipeline_mode = #tpu.pipeline_mode<synchronous>, transform_indices = @transform_3, window_bounds = array<i64: 1152, 128>}, {pipeline_mode = #tpu.pipeline_mode<synchronous>, transform_indices = @transform_4, window_bounds = array<i64: 1, 128>}, {pipeline_mode = #tpu.pipeline_mode<synchronous>, transform_indices = @transform_5, window_bounds = array<i64: 22, 1>}, {pipeline_mode = #tpu.pipeline_mode<synchronous>, transform_indices = @transform_6, window_bounds = array<i64: 128, 6>}, {pipeline_mode = #tpu.pipeline_mode<synchronous>, transform_indices = @transform_7, window_bounds = array<i64: 1, 6>}, {transform_indices = @transform_8, window_bounds = array<i64: 1, 1, 6>}]} {
    %cst = arith.constant 0.000000e+00 : f32
    %0 = vector.broadcast %cst : f32 to vector<22x128xf32>
    %c0 = arith.constant 0 : index
    %c0_0 = arith.constant 0 : index
    %c0_1 = arith.constant 0 : index
    %1 = vector.load %arg1[%c0, %c0_0, %c0_1] : memref<1x36x128xf32, #tpu.memory_space<vmem>>, vector<1x22x128xf32>
    %2 = vector.shape_cast %1 : vector<1x22x128xf32> to vector<22x128xf32>
    %3 = arith.truncf %2 : vector<22x128xf32> to vector<22x128xbf16>
    %c0_2 = arith.constant 0 : index
    %c0_3 = arith.constant 0 : index
    %4 = vector.load %arg2[%c0_2, %c0_3] : memref<1152x128xbf16, #tpu.memory_space<vmem>>, vector<128x128xbf16>
    %cst_4 = arith.constant dense<0.000000e+00> : vector<22x128xf32>
    %5 = tpu.matmul %3, %4, %cst_4 {dimension_numbers = #tpu.dot_dimension_numbers<[1], [0], [0], [1], [0, 0, 1, 1], [], []>} : vector<22x128xbf16>, vector<128x128xbf16>, vector<22x128xf32> -> vector<22x128xf32>
    %6 = arith.addf %0, %5 : vector<22x128xf32>
    %c0_5 = arith.constant 0 : index
    %c1 = arith.constant 1 : index
    %c0_6 = arith.constant 0 : index
    %7 = vector.load %arg1[%c0_5, %c1, %c0_6] : memref<1x36x128xf32, #tpu.memory_space<vmem>>, vector<1x22x128xf32>
    %8 = vector.shape_cast %7 : vector<1x22x128xf32> to vector<22x128xf32>
    %9 = arith.truncf %8 : vector<22x128xf32> to vector<22x128xbf16>
    %c128 = arith.constant 128 : index
    %c0_7 = arith.constant 0 : index
    %10 = vector.load %arg2[%c128, %c0_7] : memref<1152x128xbf16, #tpu.memory_space<vmem>>, vector<128x128xbf16>
    %cst_8 = arith.constant dense<0.000000e+00> : vector<22x128xf32>
    %11 = tpu.matmul %9, %10, %cst_8 {dimension_numbers = #tpu.dot_dimension_numbers<[1], [0], [0], [1], [0, 0, 1, 1], [], []>} : vector<22x128xbf16>, vector<128x128xbf16>, vector<22x128xf32> -> vector<22x128xf32>
    %12 = arith.addf %6, %11 : vector<22x128xf32>
    %c0_9 = arith.constant 0 : index
    %c2 = arith.constant 2 : index
    %c0_10 = arith.constant 0 : index
    %13 = vector.load %arg1[%c0_9, %c2, %c0_10] : memref<1x36x128xf32, #tpu.memory_space<vmem>>, vector<1x22x128xf32>
    %14 = vector.shape_cast %13 : vector<1x22x128xf32> to vector<22x128xf32>
    %15 = arith.truncf %14 : vector<22x128xf32> to vector<22x128xbf16>
    %c256 = arith.constant 256 : index
    %c0_11 = arith.constant 0 : index
    %16 = vector.load %arg2[%c256, %c0_11] : memref<1152x128xbf16, #tpu.memory_space<vmem>>, vector<128x128xbf16>
    %cst_12 = arith.constant dense<0.000000e+00> : vector<22x128xf32>
    %17 = tpu.matmul %15, %16, %cst_12 {dimension_numbers = #tpu.dot_dimension_numbers<[1], [0], [0], [1], [0, 0, 1, 1], [], []>} : vector<22x128xbf16>, vector<128x128xbf16>, vector<22x128xf32> -> vector<22x128xf32>
    %18 = arith.addf %12, %17 : vector<22x128xf32>
    %c0_13 = arith.constant 0 : index
    %c6 = arith.constant 6 : index
    %c0_14 = arith.constant 0 : index
    %19 = vector.load %arg1[%c0_13, %c6, %c0_14] : memref<1x36x128xf32, #tpu.memory_space<vmem>>, vector<1x22x128xf32>
    %20 = vector.shape_cast %19 : vector<1x22x128xf32> to vector<22x128xf32>
    %21 = arith.truncf %20 : vector<22x128xf32> to vector<22x128xbf16>
    %c384 = arith.constant 384 : index
    %c0_15 = arith.constant 0 : index
    %22 = vector.load %arg2[%c384, %c0_15] : memref<1152x128xbf16, #tpu.memory_space<vmem>>, vector<128x128xbf16>
    %cst_16 = arith.constant dense<0.000000e+00> : vector<22x128xf32>
    %23 = tpu.matmul %21, %22, %cst_16 {dimension_numbers = #tpu.dot_dimension_numbers<[1], [0], [0], [1], [0, 0, 1, 1], [], []>} : vector<22x128xbf16>, vector<128x128xbf16>, vector<22x128xf32> -> vector<22x128xf32>
    %24 = arith.addf %18, %23 : vector<22x128xf32>
    %c0_17 = arith.constant 0 : index
    %c7 = arith.constant 7 : index
    %c0_18 = arith.constant 0 : index
    %25 = vector.load %arg1[%c0_17, %c7, %c0_18] : memref<1x36x128xf32, #tpu.memory_space<vmem>>, vector<1x22x128xf32>
    %26 = vector.shape_cast %25 : vector<1x22x128xf32> to vector<22x128xf32>
    %27 = arith.truncf %26 : vector<22x128xf32> to vector<22x128xbf16>
    %c512 = arith.constant 512 : index
    %c0_19 = arith.constant 0 : index
    %28 = vector.load %arg2[%c512, %c0_19] : memref<1152x128xbf16, #tpu.memory_space<vmem>>, vector<128x128xbf16>
    %cst_20 = arith.constant dense<0.000000e+00> : vector<22x128xf32>
    %29 = tpu.matmul %27, %28, %cst_20 {dimension_numbers = #tpu.dot_dimension_numbers<[1], [0], [0], [1], [0, 0, 1, 1], [], []>} : vector<22x128xbf16>, vector<128x128xbf16>, vector<22x128xf32> -> vector<22x128xf32>
    %30 = arith.addf %24, %29 : vector<22x128xf32>
    %c0_21 = arith.constant 0 : index
    %c8 = arith.constant 8 : index
    %c0_22 = arith.constant 0 : index
    %31 = vector.load %arg1[%c0_21, %c8, %c0_22] : memref<1x36x128xf32, #tpu.memory_space<vmem>>, vector<1x22x128xf32>
    %32 = vector.shape_cast %31 : vector<1x22x128xf32> to vector<22x128xf32>
    %33 = arith.truncf %32 : vector<22x128xf32> to vector<22x128xbf16>
    %c640 = arith.constant 640 : index
    %c0_23 = arith.constant 0 : index
    %34 = vector.load %arg2[%c640, %c0_23] : memref<1152x128xbf16, #tpu.memory_space<vmem>>, vector<128x128xbf16>
    %cst_24 = arith.constant dense<0.000000e+00> : vector<22x128xf32>
    %35 = tpu.matmul %33, %34, %cst_24 {dimension_numbers = #tpu.dot_dimension_numbers<[1], [0], [0], [1], [0, 0, 1, 1], [], []>} : vector<22x128xbf16>, vector<128x128xbf16>, vector<22x128xf32> -> vector<22x128xf32>
    %36 = arith.addf %30, %35 : vector<22x128xf32>
    %c0_25 = arith.constant 0 : index
    %c12 = arith.constant 12 : index
    %c0_26 = arith.constant 0 : index
    %37 = vector.load %arg1[%c0_25, %c12, %c0_26] : memref<1x36x128xf32, #tpu.memory_space<vmem>>, vector<1x22x128xf32>
    %38 = vector.shape_cast %37 : vector<1x22x128xf32> to vector<22x128xf32>
    %39 = arith.truncf %38 : vector<22x128xf32> to vector<22x128xbf16>
    %c768 = arith.constant 768 : index
    %c0_27 = arith.constant 0 : index
    %40 = vector.load %arg2[%c768, %c0_27] : memref<1152x128xbf16, #tpu.memory_space<vmem>>, vector<128x128xbf16>
    %cst_28 = arith.constant dense<0.000000e+00> : vector<22x128xf32>
    %41 = tpu.matmul %39, %40, %cst_28 {dimension_numbers = #tpu.dot_dimension_numbers<[1], [0], [0], [1], [0, 0, 1, 1], [], []>} : vector<22x128xbf16>, vector<128x128xbf16>, vector<22x128xf32> -> vector<22x128xf32>
    %42 = arith.addf %36, %41 : vector<22x128xf32>
    %c0_29 = arith.constant 0 : index
    %c13 = arith.constant 13 : index
    %c0_30 = arith.constant 0 : index
    %43 = vector.load %arg1[%c0_29, %c13, %c0_30] : memref<1x36x128xf32, #tpu.memory_space<vmem>>, vector<1x22x128xf32>
    %44 = vector.shape_cast %43 : vector<1x22x128xf32> to vector<22x128xf32>
    %45 = arith.truncf %44 : vector<22x128xf32> to vector<22x128xbf16>
    %c896 = arith.constant 896 : index
    %c0_31 = arith.constant 0 : index
    %46 = vector.load %arg2[%c896, %c0_31] : memref<1152x128xbf16, #tpu.memory_space<vmem>>, vector<128x128xbf16>
    %cst_32 = arith.constant dense<0.000000e+00> : vector<22x128xf32>
    %47 = tpu.matmul %45, %46, %cst_32 {dimension_numbers = #tpu.dot_dimension_numbers<[1], [0], [0], [1], [0, 0, 1, 1], [], []>} : vector<22x128xbf16>, vector<128x128xbf16>, vector<22x128xf32> -> vector<22x128xf32>
    %48 = arith.addf %42, %47 : vector<22x128xf32>
    %c0_33 = arith.constant 0 : index
    %c14 = arith.constant 14 : index
    %c0_34 = arith.constant 0 : index
    %49 = vector.load %arg1[%c0_33, %c14, %c0_34] : memref<1x36x128xf32, #tpu.memory_space<vmem>>, vector<1x22x128xf32>
    %50 = vector.shape_cast %49 : vector<1x22x128xf32> to vector<22x128xf32>
    %51 = arith.truncf %50 : vector<22x128xf32> to vector<22x128xbf16>
    %c1024 = arith.constant 1024 : index
    %c0_35 = arith.constant 0 : index
    %52 = vector.load %arg2[%c1024, %c0_35] : memref<1152x128xbf16, #tpu.memory_space<vmem>>, vector<128x128xbf16>
    %cst_36 = arith.constant dense<0.000000e+00> : vector<22x128xf32>
    %53 = tpu.matmul %51, %52, %cst_36 {dimension_numbers = #tpu.dot_dimension_numbers<[1], [0], [0], [1], [0, 0, 1, 1], [], []>} : vector<22x128xbf16>, vector<128x128xbf16>, vector<22x128xf32> -> vector<22x128xf32>
    %54 = arith.addf %48, %53 : vector<22x128xf32>
    %c0_37 = arith.constant 0 : index
    %c0_38 = arith.constant 0 : index
    %55 = vector.load %arg3[%c0_37, %c0_38] : memref<1x128xf32, #tpu.memory_space<vmem>>, vector<1x128xf32>
    %56 = vector.broadcast %55 : vector<1x128xf32> to vector<22x128xf32>
    %57 = arith.addf %54, %56 : vector<22x128xf32>
    %cst_39 = arith.constant 0.000000e+00 : f32
    %58 = vector.broadcast %cst_39 : f32 to vector<22x128xf32>
    %59 = arith.maximumf %57, %58 : vector<22x128xf32>
    %c0_40 = arith.constant 0 : index
    %c0_41 = arith.constant 0 : index
    %60 = vector.load %arg6[%c0_40, %c0_41] : memref<22x1xf32, #tpu.memory_space<vmem>>, vector<22x1xf32>
    %61 = vector.broadcast %60 : vector<22x1xf32> to vector<22x128xf32>
    %62 = arith.mulf %59, %61 : vector<22x128xf32>
    %cst_42 = arith.constant 0.000000e+00 : f32
    %63 = vector.broadcast %cst_42 : f32 to vector<36x128xf32>
    %c0_43 = arith.constant 0 : index
    %c0_44 = arith.constant 0 : index
    %64 = vector.load %arg10[%c0_43, %c0_44] : memref<36x128xf32, #tpu.memory_space<vmem>>, vector<36x128xf32>
    tpu.vector_store %arg10[%c0_43, %c0_44], %63 {strides = array<i32>} : memref<36x128xf32, #tpu.memory_space<vmem>>, vector<36x128xf32>,
    %c7_45 = arith.constant 7 : index
    %c0_46 = arith.constant 0 : index
    %65 = vector.load %arg10[%c7_45, %c0_46] : memref<36x128xf32, #tpu.memory_space<vmem>>, vector<22x128xf32>
    tpu.vector_store %arg10[%c7_45, %c0_46], %62 {strides = array<i32>} : memref<36x128xf32, #tpu.memory_space<vmem>>, vector<22x128xf32>,
    %cst_47 = arith.constant 0.000000e+00 : f32
    %66 = vector.broadcast %cst_47 : f32 to vector<22x128xf32>
    %c0_48 = arith.constant 0 : index
    %c0_49 = arith.constant 0 : index
    %67 = vector.load %arg10[%c0_48, %c0_49] : memref<36x128xf32, #tpu.memory_space<vmem>>, vector<22x128xf32>
    %68 = arith.truncf %67 : vector<22x128xf32> to vector<22x128xbf16>
    %c0_50 = arith.constant 0 : index
    %c0_51 = arith.constant 0 : index
    %69 = vector.load %arg4[%c0_50, %c0_51] : memref<1152x128xbf16, #tpu.memory_space<vmem>>, vector<128x128xbf16>
    %cst_52 = arith.constant dense<0.000000e+00> : vector<22x128xf32>
    %70 = tpu.matmul %68, %69, %cst_52 {dimension_numbers = #tpu.dot_dimension_numbers<[1], [0], [0], [1], [0, 0, 1, 1], [], []>} : vector<22x128xbf16>, vector<128x128xbf16>, vector<22x128xf32> -> vector<22x128xf32>
    %71 = arith.addf %66, %70 : vector<22x128xf32>
    %c1_53 = arith.constant 1 : index
    %c0_54 = arith.constant 0 : index
    %72 = vector.load %arg10[%c1_53, %c0_54] : memref<36x128xf32, #tpu.memory_space<vmem>>, vector<22x128xf32>
    %73 = arith.truncf %72 : vector<22x128xf32> to vector<22x128xbf16>
    %c128_55 = arith.constant 128 : index
    %c0_56 = arith.constant 0 : index
    %74 = vector.load %arg4[%c128_55, %c0_56] : memref<1152x128xbf16, #tpu.memory_space<vmem>>, vector<128x128xbf16>
    %cst_57 = arith.constant dense<0.000000e+00> : vector<22x128xf32>
    %75 = tpu.matmul %73, %74, %cst_57 {dimension_numbers = #tpu.dot_dimension_numbers<[1], [0], [0], [1], [0, 0, 1, 1], [], []>} : vector<22x128xbf16>, vector<128x128xbf16>, vector<22x128xf32> -> vector<22x128xf32>
    %76 = arith.addf %71, %75 : vector<22x128xf32>
    %c2_58 = arith.constant 2 : index
    %c0_59 = arith.constant 0 : index
    %77 = vector.load %arg10[%c2_58, %c0_59] : memref<36x128xf32, #tpu.memory_space<vmem>>, vector<22x128xf32>
    %78 = arith.truncf %77 : vector<22x128xf32> to vector<22x128xbf16>
    %c256_60 = arith.constant 256 : index
    %c0_61 = arith.constant 0 : index
    %79 = vector.load %arg4[%c256_60, %c0_61] : memref<1152x128xbf16, #tpu.memory_space<vmem>>, vector<128x128xbf16>
    %cst_62 = arith.constant dense<0.000000e+00> : vector<22x128xf32>
    %80 = tpu.matmul %78, %79, %cst_62 {dimension_numbers = #tpu.dot_dimension_numbers<[1], [0], [0], [1], [0, 0, 1, 1], [], []>} : vector<22x128xbf16>, vector<128x128xbf16>, vector<22x128xf32> -> vector<22x128xf32>
    %81 = arith.addf %76, %80 : vector<22x128xf32>
    %c6_63 = arith.constant 6 : index
    %c0_64 = arith.constant 0 : index
    %82 = vector.load %arg10[%c6_63, %c0_64] : memref<36x128xf32, #tpu.memory_space<vmem>>, vector<22x128xf32>
    %83 = arith.truncf %82 : vector<22x128xf32> to vector<22x128xbf16>
    %c384_65 = arith.constant 384 : index
    %c0_66 = arith.constant 0 : index
    %84 = vector.load %arg4[%c384_65, %c0_66] : memref<1152x128xbf16, #tpu.memory_space<vmem>>, vector<128x128xbf16>
    %cst_67 = arith.constant dense<0.000000e+00> : vector<22x128xf32>
    %85 = tpu.matmul %83, %84, %cst_67 {dimension_numbers = #tpu.dot_dimension_numbers<[1], [0], [0], [1], [0, 0, 1, 1], [], []>} : vector<22x128xbf16>, vector<128x128xbf16>, vector<22x128xf32> -> vector<22x128xf32>
    %86 = arith.addf %81, %85 : vector<22x128xf32>
    %c7_68 = arith.constant 7 : index
    %c0_69 = arith.constant 0 : index
    %87 = vector.load %arg10[%c7_68, %c0_69] : memref<36x128xf32, #tpu.memory_space<vmem>>, vector<22x128xf32>
    %88 = arith.truncf %87 : vector<22x128xf32> to vector<22x128xbf16>
    %c512_70 = arith.constant 512 : index
    %c0_71 = arith.constant 0 : index
    %89 = vector.load %arg4[%c512_70, %c0_71] : memref<1152x128xbf16, #tpu.memory_space<vmem>>, vector<128x128xbf16>
    %cst_72 = arith.constant dense<0.000000e+00> : vector<22x128xf32>
    %90 = tpu.matmul %88, %89, %cst_72 {dimension_numbers = #tpu.dot_dimension_numbers<[1], [0], [0], [1], [0, 0, 1, 1], [], []>} : vector<22x128xbf16>, vector<128x128xbf16>, vector<22x128xf32> -> vector<22x128xf32>
    %91 = arith.addf %86, %90 : vector<22x128xf32>
    %c8_73 = arith.constant 8 : index
    %c0_74 = arith.constant 0 : index
    %92 = vector.load %arg10[%c8_73, %c0_74] : memref<36x128xf32, #tpu.memory_space<vmem>>, vector<22x128xf32>
    %93 = arith.truncf %92 : vector<22x128xf32> to vector<22x128xbf16>
    %c640_75 = arith.constant 640 : index
    %c0_76 = arith.constant 0 : index
    %94 = vector.load %arg4[%c640_75, %c0_76] : memref<1152x128xbf16, #tpu.memory_space<vmem>>, vector<128x128xbf16>
    %cst_77 = arith.constant dense<0.000000e+00> : vector<22x128xf32>
    %95 = tpu.matmul %93, %94, %cst_77 {dimension_numbers = #tpu.dot_dimension_numbers<[1], [0], [0], [1], [0, 0, 1, 1], [], []>} : vector<22x128xbf16>, vector<128x128xbf16>, vector<22x128xf32> -> vector<22x128xf32>
    %96 = arith.addf %91, %95 : vector<22x128xf32>
    %c12_78 = arith.constant 12 : index
    %c0_79 = arith.constant 0 : index
    %97 = vector.load %arg10[%c12_78, %c0_79] : memref<36x128xf32, #tpu.memory_space<vmem>>, vector<22x128xf32>
    %98 = arith.truncf %97 : vector<22x128xf32> to vector<22x128xbf16>
    %c768_80 = arith.constant 768 : index
    %c0_81 = arith.constant 0 : index
    %99 = vector.load %arg4[%c768_80, %c0_81] : memref<1152x128xbf16, #tpu.memory_space<vmem>>, vector<128x128xbf16>
    %cst_82 = arith.constant dense<0.000000e+00> : vector<22x128xf32>
    %100 = tpu.matmul %98, %99, %cst_82 {dimension_numbers = #tpu.dot_dimension_numbers<[1], [0], [0], [1], [0, 0, 1, 1], [], []>} : vector<22x128xbf16>, vector<128x128xbf16>, vector<22x128xf32> -> vector<22x128xf32>
    %101 = arith.addf %96, %100 : vector<22x128xf32>
    %c13_83 = arith.constant 13 : index
    %c0_84 = arith.constant 0 : index
    %102 = vector.load %arg10[%c13_83, %c0_84] : memref<36x128xf32, #tpu.memory_space<vmem>>, vector<22x128xf32>
    %103 = arith.truncf %102 : vector<22x128xf32> to vector<22x128xbf16>
    %c896_85 = arith.constant 896 : index
    %c0_86 = arith.constant 0 : index
    %104 = vector.load %arg4[%c896_85, %c0_86] : memref<1152x128xbf16, #tpu.memory_space<vmem>>, vector<128x128xbf16>
    %cst_87 = arith.constant dense<0.000000e+00> : vector<22x128xf32>
    %105 = tpu.matmul %103, %104, %cst_87 {dimension_numbers = #tpu.dot_dimension_numbers<[1], [0], [0], [1], [0, 0, 1, 1], [], []>} : vector<22x128xbf16>, vector<128x128xbf16>, vector<22x128xf32> -> vector<22x128xf32>
    %106 = arith.addf %101, %105 : vector<22x128xf32>
    %c14_88 = arith.constant 14 : index
    %c0_89 = arith.constant 0 : index
    %107 = vector.load %arg10[%c14_88, %c0_89] : memref<36x128xf32, #tpu.memory_space<vmem>>, vector<22x128xf32>
    %108 = arith.truncf %107 : vector<22x128xf32> to vector<22x128xbf16>
    %c1024_90 = arith.constant 1024 : index
    %c0_91 = arith.constant 0 : index
    %109 = vector.load %arg4[%c1024_90, %c0_91] : memref<1152x128xbf16, #tpu.memory_space<vmem>>, vector<128x128xbf16>
    %cst_92 = arith.constant dense<0.000000e+00> : vector<22x128xf32>
    %110 = tpu.matmul %108, %109, %cst_92 {dimension_numbers = #tpu.dot_dimension_numbers<[1], [0], [0], [1], [0, 0, 1, 1], [], []>} : vector<22x128xbf16>, vector<128x128xbf16>, vector<22x128xf32> -> vector<22x128xf32>
    %111 = arith.addf %106, %110 : vector<22x128xf32>
    %c0_93 = arith.constant 0 : index
    %c7_94 = arith.constant 7 : index
    %c0_95 = arith.constant 0 : index
    %112 = vector.load %arg1[%c0_93, %c7_94, %c0_95] : memref<1x36x128xf32, #tpu.memory_space<vmem>>, vector<1x22x128xf32>
    %113 = vector.shape_cast %112 : vector<1x22x128xf32> to vector<22x128xf32>
    %c0_96 = arith.constant 0 : index
    %c0_97 = arith.constant 0 : index
    %114 = vector.load %arg5[%c0_96, %c0_97] : memref<1x128xf32, #tpu.memory_space<vmem>>, vector<1x128xf32>
    %115 = vector.broadcast %114 : vector<1x128xf32> to vector<22x128xf32>
    %116 = arith.addf %111, %115 : vector<22x128xf32>
    %117 = arith.addf %116, %113 : vector<22x128xf32>
    %cst_98 = arith.constant 0.000000e+00 : f32
    %118 = vector.broadcast %cst_98 : f32 to vector<22x128xf32>
    %119 = arith.maximumf %117, %118 : vector<22x128xf32>
    %c0_99 = arith.constant 0 : index
    %c0_100 = arith.constant 0 : index
    %120 = vector.load %arg6[%c0_99, %c0_100] : memref<22x1xf32, #tpu.memory_space<vmem>>, vector<22x1xf32>
    %121 = vector.broadcast %120 : vector<22x1xf32> to vector<22x128xf32>
    %122 = arith.mulf %119, %121 : vector<22x128xf32>
    %cst_101 = arith.constant dense<0.000000e+00> : vector<128xf32>
    %123 = vector.multi_reduction <add>, %122, %cst_101 [0] : vector<22x128xf32> to vector<128xf32>
    %124 = vector.shape_cast %123 : vector<128xf32> to vector<1x128xf32>
    %cst_102 = arith.constant 6.250000e-02 : f32
    %125 = vector.broadcast %cst_102 : f32 to vector<1x128xf32>
    %126 = arith.mulf %124, %125 : vector<1x128xf32>
    %127 = arith.truncf %126 : vector<1x128xf32> to vector<1x128xbf16>
    %c0_103 = arith.constant 0 : index
    %c0_104 = arith.constant 0 : index
    %128 = vector.load %arg7[%c0_103, %c0_104] : memref<128x6xbf16, #tpu.memory_space<vmem>>, vector<128x6xbf16>
    %cst_105 = arith.constant dense<0.000000e+00> : vector<1x6xf32>
    %129 = tpu.matmul %127, %128, %cst_105 {dimension_numbers = #tpu.dot_dimension_numbers<[1], [0], [0], [1], [0, 0, 1, 1], [], []>} : vector<1x128xbf16>, vector<128x6xbf16>, vector<1x6xf32> -> vector<1x6xf32>
    %c0_106 = arith.constant 0 : index
    %c0_107 = arith.constant 0 : index
    %130 = vector.load %arg8[%c0_106, %c0_107] : memref<1x6xf32, #tpu.memory_space<vmem>>, vector<1x6xf32>
    %131 = arith.addf %129, %130 : vector<1x6xf32>
    %c0_108 = arith.constant 0 : index
    %c0_109 = arith.constant 0 : index
    %c0_110 = arith.constant 0 : index
    %132 = vector.load %arg9[%c0_108, %c0_109, %c0_110] : memref<1x1x6xf32, #tpu.memory_space<vmem>>, vector<1x1x6xf32>
    %133 = vector.shape_cast %132 : vector<1x1x6xf32> to vector<1x6xf32>
    %134 = vector.shape_cast %131 : vector<1x6xf32> to vector<1x1x6xf32>
    tpu.vector_store %arg9[%c0_108, %c0_109, %c0_110], %134 {strides = array<i32>} : memref<1x1x6xf32, #tpu.memory_space<vmem>>, vector<1x1x6xf32>,
    return
  }
  func.func @transform_0(%arg0: i32) -> (i32, i32, i32) {
    %c0_i32 = arith.constant 0 : i32
    %c0_i32_0 = arith.constant 0 : i32
    %c0_i32_1 = arith.constant 0 : i32
    return %arg0, %c0_i32, %c0_i32_0 : i32, i32, i32
  }
  func.func @transform_1(%arg0: i32) -> (i32, i32) {
    %c0_i32 = arith.constant 0 : i32
    %c0_i32_0 = arith.constant 0 : i32
    %c0_i32_1 = arith.constant 0 : i32
    return %c0_i32, %c0_i32_0 : i32, i32
  }
  func.func @transform_2(%arg0: i32) -> (i32, i32) {
    %c0_i32 = arith.constant 0 : i32
    %c0_i32_0 = arith.constant 0 : i32
    %c0_i32_1 = arith.constant 0 : i32
    return %c0_i32, %c0_i32_0 : i32, i32
  }
  func.func @transform_3(%arg0: i32) -> (i32, i32) {
    %c0_i32 = arith.constant 0 : i32
    %c0_i32_0 = arith.constant 0 : i32
    %c0_i32_1 = arith.constant 0 : i32
    return %c0_i32, %c0_i32_0 : i32, i32
  }
  func.func @transform_4(%arg0: i32) -> (i32, i32) {
    %c0_i32 = arith.constant 0 : i32
    %c0_i32_0 = arith.constant 0 : i32
    %c0_i32_1 = arith.constant 0 : i32
    return %c0_i32, %c0_i32_0 : i32, i32
  }
  func.func @transform_5(%arg0: i32) -> (i32, i32) {
    %c0_i32 = arith.constant 0 : i32
    %c0_i32_0 = arith.constant 0 : i32
    %c0_i32_1 = arith.constant 0 : i32
    return %c0_i32, %c0_i32_0 : i32, i32
  }
  func.func @transform_6(%arg0: i32) -> (i32, i32) {
    %c0_i32 = arith.constant 0 : i32
    %c0_i32_0 = arith.constant 0 : i32
    %c0_i32_1 = arith.constant 0 : i32
    return %c0_i32, %c0_i32_0 : i32, i32
  }
  func.func @transform_7(%arg0: i32) -> (i32, i32) {
    %c0_i32 = arith.constant 0 : i32
    %c0_i32_0 = arith.constant 0 : i32
    %c0_i32_1 = arith.constant 0 : i32
    return %c0_i32, %c0_i32_0 : i32, i32
  }
  func.func @transform_8(%arg0: i32) -> (i32, i32, i32) {
    %c0_i32 = arith.constant 0 : i32
    %c0_i32_0 = arith.constant 0 : i32
    %c0_i32_1 = arith.constant 0 : i32
    return %arg0, %c0_i32, %c0_i32_0 : i32, i32, i32
  }
}

module attributes {stable_mosaic.version = 11 : i64} {
  func.func @kernel(%arg0: i32, %arg1: memref<1x16x576xbf16, #tpu.memory_space<vmem>>, %arg2: memref<1x16x64xbf16, #tpu.memory_space<vmem>>, %arg3: memref<576x128xbf16, #tpu.memory_space<vmem>>, %arg4: memref<1x128xf32, #tpu.memory_space<vmem>>, %arg5: memref<64x128xbf16, #tpu.memory_space<vmem>>, %arg6: memref<1x128xf32, #tpu.memory_space<vmem>>, %arg7: memref<1152x128xbf16, #tpu.memory_space<vmem>>, %arg8: memref<1x128xf32, #tpu.memory_space<vmem>>, %arg9: memref<22x1xf32, #tpu.memory_space<vmem>>, %arg10: memref<1x36x128xf32, #tpu.memory_space<vmem>>, %arg11: memref<36x128xf32, #tpu.memory_space<vmem>>, %arg12: memref<22x128xf32, #tpu.memory_space<vmem>>) attributes {dimension_semantics = [#tpu.dimension_semantics<parallel>], iteration_bounds = array<i64: 2>, scalar_prefetch = 0 : i64, scratch_operands = 2 : i64, tpu.core_type = #tpu.core_type<tc>, window_params = [{transform_indices = @transform_0, window_bounds = array<i64: 1, 16, 576>}, {transform_indices = @transform_1, window_bounds = array<i64: 1, 16, 64>}, {pipeline_mode = #tpu.pipeline_mode<synchronous>, transform_indices = @transform_2, window_bounds = array<i64: 576, 128>}, {pipeline_mode = #tpu.pipeline_mode<synchronous>, transform_indices = @transform_3, window_bounds = array<i64: 1, 128>}, {pipeline_mode = #tpu.pipeline_mode<synchronous>, transform_indices = @transform_4, window_bounds = array<i64: 64, 128>}, {pipeline_mode = #tpu.pipeline_mode<synchronous>, transform_indices = @transform_5, window_bounds = array<i64: 1, 128>}, {pipeline_mode = #tpu.pipeline_mode<synchronous>, transform_indices = @transform_6, window_bounds = array<i64: 1152, 128>}, {pipeline_mode = #tpu.pipeline_mode<synchronous>, transform_indices = @transform_7, window_bounds = array<i64: 1, 128>}, {pipeline_mode = #tpu.pipeline_mode<synchronous>, transform_indices = @transform_8, window_bounds = array<i64: 22, 1>}, {transform_indices = @transform_9, window_bounds = array<i64: 1, 36, 128>}]} {
    %c0 = arith.constant 0 : index
    %c0_0 = arith.constant 0 : index
    %c0_1 = arith.constant 0 : index
    %0 = vector.load %arg1[%c0, %c0_0, %c0_1] : memref<1x16x576xbf16, #tpu.memory_space<vmem>>, vector<1x16x576xbf16>
    %1 = vector.shape_cast %0 : vector<1x16x576xbf16> to vector<16x576xbf16>
    %c0_2 = arith.constant 0 : index
    %c0_3 = arith.constant 0 : index
    %2 = vector.load %arg3[%c0_2, %c0_3] : memref<576x128xbf16, #tpu.memory_space<vmem>>, vector<576x128xbf16>
    %cst = arith.constant dense<0.000000e+00> : vector<16x128xf32>
    %3 = tpu.matmul %1, %2, %cst {dimension_numbers = #tpu.dot_dimension_numbers<[1], [0], [0], [1], [0, 0, 1, 1], [], []>} : vector<16x576xbf16>, vector<576x128xbf16>, vector<16x128xf32> -> vector<16x128xf32>
    %c0_4 = arith.constant 0 : index
    %c0_5 = arith.constant 0 : index
    %4 = vector.load %arg4[%c0_4, %c0_5] : memref<1x128xf32, #tpu.memory_space<vmem>>, vector<1x128xf32>
    %5 = vector.broadcast %4 : vector<1x128xf32> to vector<16x128xf32>
    %6 = arith.addf %3, %5 : vector<16x128xf32>
    %cst_6 = arith.constant 0.000000e+00 : f32
    %7 = vector.broadcast %cst_6 : f32 to vector<16x128xf32>
    %8 = arith.maximumf %6, %7 : vector<16x128xf32>
    %c0_7 = arith.constant 0 : index
    %c0_8 = arith.constant 0 : index
    %c0_9 = arith.constant 0 : index
    %9 = vector.load %arg2[%c0_7, %c0_8, %c0_9] : memref<1x16x64xbf16, #tpu.memory_space<vmem>>, vector<1x16x64xbf16>
    %10 = vector.shape_cast %9 : vector<1x16x64xbf16> to vector<16x64xbf16>
    %c0_10 = arith.constant 0 : index
    %c0_11 = arith.constant 0 : index
    %11 = vector.load %arg5[%c0_10, %c0_11] : memref<64x128xbf16, #tpu.memory_space<vmem>>, vector<64x128xbf16>
    %cst_12 = arith.constant dense<0.000000e+00> : vector<16x128xf32>
    %12 = tpu.matmul %10, %11, %cst_12 {dimension_numbers = #tpu.dot_dimension_numbers<[1], [0], [0], [1], [0, 0, 1, 1], [], []>} : vector<16x64xbf16>, vector<64x128xbf16>, vector<16x128xf32> -> vector<16x128xf32>
    %c0_13 = arith.constant 0 : index
    %c0_14 = arith.constant 0 : index
    %13 = vector.load %arg6[%c0_13, %c0_14] : memref<1x128xf32, #tpu.memory_space<vmem>>, vector<1x128xf32>
    %14 = vector.broadcast %13 : vector<1x128xf32> to vector<16x128xf32>
    %15 = arith.addf %12, %14 : vector<16x128xf32>
    %cst_15 = arith.constant 0.000000e+00 : f32
    %16 = vector.broadcast %cst_15 : f32 to vector<36x128xf32>
    %c0_16 = arith.constant 0 : index
    %c0_17 = arith.constant 0 : index
    %17 = vector.load %arg11[%c0_16, %c0_17] : memref<36x128xf32, #tpu.memory_space<vmem>>, vector<36x128xf32>
    tpu.vector_store %arg11[%c0_16, %c0_17], %16 {strides = array<i32>} : memref<36x128xf32, #tpu.memory_space<vmem>>, vector<36x128xf32>,
    %cst_18 = arith.constant 0.000000e+00 : f32
    %18 = vector.broadcast %cst_18 : f32 to vector<22x128xf32>
    %c0_19 = arith.constant 0 : index
    %c0_20 = arith.constant 0 : index
    %19 = vector.load %arg12[%c0_19, %c0_20] : memref<22x128xf32, #tpu.memory_space<vmem>>, vector<22x128xf32>
    tpu.vector_store %arg12[%c0_19, %c0_20], %18 {strides = array<i32>} : memref<22x128xf32, #tpu.memory_space<vmem>>, vector<22x128xf32>,
    %20 = vector.extract_strided_slice %8 {offsets = [0, 0], sizes = [4, 128], strides = [1, 1]} : vector<16x128xf32> to vector<4x128xf32>
    %c7 = arith.constant 7 : index
    %c0_21 = arith.constant 0 : index
    %21 = vector.load %arg11[%c7, %c0_21] : memref<36x128xf32, #tpu.memory_space<vmem>>, vector<4x128xf32>
    tpu.vector_store %arg11[%c7, %c0_21], %20 {strides = array<i32>} : memref<36x128xf32, #tpu.memory_space<vmem>>, vector<4x128xf32>,
    %22 = vector.extract_strided_slice %15 {offsets = [0, 0], sizes = [4, 128], strides = [1, 1]} : vector<16x128xf32> to vector<4x128xf32>
    %c0_22 = arith.constant 0 : index
    %c0_23 = arith.constant 0 : index
    %23 = vector.load %arg12[%c0_22, %c0_23] : memref<22x128xf32, #tpu.memory_space<vmem>>, vector<4x128xf32>
    tpu.vector_store %arg12[%c0_22, %c0_23], %22 {strides = array<i32>} : memref<22x128xf32, #tpu.memory_space<vmem>>, vector<4x128xf32>,
    %24 = vector.extract_strided_slice %8 {offsets = [4, 0], sizes = [4, 128], strides = [1, 1]} : vector<16x128xf32> to vector<4x128xf32>
    %c13 = arith.constant 13 : index
    %c0_24 = arith.constant 0 : index
    %25 = vector.load %arg11[%c13, %c0_24] : memref<36x128xf32, #tpu.memory_space<vmem>>, vector<4x128xf32>
    tpu.vector_store %arg11[%c13, %c0_24], %24 {strides = array<i32>} : memref<36x128xf32, #tpu.memory_space<vmem>>, vector<4x128xf32>,
    %26 = vector.extract_strided_slice %15 {offsets = [4, 0], sizes = [4, 128], strides = [1, 1]} : vector<16x128xf32> to vector<4x128xf32>
    %c6 = arith.constant 6 : index
    %c0_25 = arith.constant 0 : index
    %27 = vector.load %arg12[%c6, %c0_25] : memref<22x128xf32, #tpu.memory_space<vmem>>, vector<4x128xf32>
    tpu.vector_store %arg12[%c6, %c0_25], %26 {strides = array<i32>} : memref<22x128xf32, #tpu.memory_space<vmem>>, vector<4x128xf32>,
    %28 = vector.extract_strided_slice %8 {offsets = [8, 0], sizes = [4, 128], strides = [1, 1]} : vector<16x128xf32> to vector<4x128xf32>
    %c19 = arith.constant 19 : index
    %c0_26 = arith.constant 0 : index
    %29 = vector.load %arg11[%c19, %c0_26] : memref<36x128xf32, #tpu.memory_space<vmem>>, vector<4x128xf32>
    tpu.vector_store %arg11[%c19, %c0_26], %28 {strides = array<i32>} : memref<36x128xf32, #tpu.memory_space<vmem>>, vector<4x128xf32>,
    %30 = vector.extract_strided_slice %15 {offsets = [8, 0], sizes = [4, 128], strides = [1, 1]} : vector<16x128xf32> to vector<4x128xf32>
    %c12 = arith.constant 12 : index
    %c0_27 = arith.constant 0 : index
    %31 = vector.load %arg12[%c12, %c0_27] : memref<22x128xf32, #tpu.memory_space<vmem>>, vector<4x128xf32>
    tpu.vector_store %arg12[%c12, %c0_27], %30 {strides = array<i32>} : memref<22x128xf32, #tpu.memory_space<vmem>>, vector<4x128xf32>,
    %32 = vector.extract_strided_slice %8 {offsets = [12, 0], sizes = [4, 128], strides = [1, 1]} : vector<16x128xf32> to vector<4x128xf32>
    %c25 = arith.constant 25 : index
    %c0_28 = arith.constant 0 : index
    %33 = vector.load %arg11[%c25, %c0_28] : memref<36x128xf32, #tpu.memory_space<vmem>>, vector<4x128xf32>
    tpu.vector_store %arg11[%c25, %c0_28], %32 {strides = array<i32>} : memref<36x128xf32, #tpu.memory_space<vmem>>, vector<4x128xf32>,
    %34 = vector.extract_strided_slice %15 {offsets = [12, 0], sizes = [4, 128], strides = [1, 1]} : vector<16x128xf32> to vector<4x128xf32>
    %c18 = arith.constant 18 : index
    %c0_29 = arith.constant 0 : index
    %35 = vector.load %arg12[%c18, %c0_29] : memref<22x128xf32, #tpu.memory_space<vmem>>, vector<4x128xf32>
    tpu.vector_store %arg12[%c18, %c0_29], %34 {strides = array<i32>} : memref<22x128xf32, #tpu.memory_space<vmem>>, vector<4x128xf32>,
    %cst_30 = arith.constant 0.000000e+00 : f32
    %36 = vector.broadcast %cst_30 : f32 to vector<22x128xf32>
    %c0_31 = arith.constant 0 : index
    %c0_32 = arith.constant 0 : index
    %37 = vector.load %arg11[%c0_31, %c0_32] : memref<36x128xf32, #tpu.memory_space<vmem>>, vector<22x128xf32>
    %38 = arith.truncf %37 : vector<22x128xf32> to vector<22x128xbf16>
    %c0_33 = arith.constant 0 : index
    %c0_34 = arith.constant 0 : index
    %39 = vector.load %arg7[%c0_33, %c0_34] : memref<1152x128xbf16, #tpu.memory_space<vmem>>, vector<128x128xbf16>
    %cst_35 = arith.constant dense<0.000000e+00> : vector<22x128xf32>
    %40 = tpu.matmul %38, %39, %cst_35 {dimension_numbers = #tpu.dot_dimension_numbers<[1], [0], [0], [1], [0, 0, 1, 1], [], []>} : vector<22x128xbf16>, vector<128x128xbf16>, vector<22x128xf32> -> vector<22x128xf32>
    %41 = arith.addf %36, %40 : vector<22x128xf32>
    %c1 = arith.constant 1 : index
    %c0_36 = arith.constant 0 : index
    %42 = vector.load %arg11[%c1, %c0_36] : memref<36x128xf32, #tpu.memory_space<vmem>>, vector<22x128xf32>
    %43 = arith.truncf %42 : vector<22x128xf32> to vector<22x128xbf16>
    %c128 = arith.constant 128 : index
    %c0_37 = arith.constant 0 : index
    %44 = vector.load %arg7[%c128, %c0_37] : memref<1152x128xbf16, #tpu.memory_space<vmem>>, vector<128x128xbf16>
    %cst_38 = arith.constant dense<0.000000e+00> : vector<22x128xf32>
    %45 = tpu.matmul %43, %44, %cst_38 {dimension_numbers = #tpu.dot_dimension_numbers<[1], [0], [0], [1], [0, 0, 1, 1], [], []>} : vector<22x128xbf16>, vector<128x128xbf16>, vector<22x128xf32> -> vector<22x128xf32>
    %46 = arith.addf %41, %45 : vector<22x128xf32>
    %c2 = arith.constant 2 : index
    %c0_39 = arith.constant 0 : index
    %47 = vector.load %arg11[%c2, %c0_39] : memref<36x128xf32, #tpu.memory_space<vmem>>, vector<22x128xf32>
    %48 = arith.truncf %47 : vector<22x128xf32> to vector<22x128xbf16>
    %c256 = arith.constant 256 : index
    %c0_40 = arith.constant 0 : index
    %49 = vector.load %arg7[%c256, %c0_40] : memref<1152x128xbf16, #tpu.memory_space<vmem>>, vector<128x128xbf16>
    %cst_41 = arith.constant dense<0.000000e+00> : vector<22x128xf32>
    %50 = tpu.matmul %48, %49, %cst_41 {dimension_numbers = #tpu.dot_dimension_numbers<[1], [0], [0], [1], [0, 0, 1, 1], [], []>} : vector<22x128xbf16>, vector<128x128xbf16>, vector<22x128xf32> -> vector<22x128xf32>
    %51 = arith.addf %46, %50 : vector<22x128xf32>
    %c6_42 = arith.constant 6 : index
    %c0_43 = arith.constant 0 : index
    %52 = vector.load %arg11[%c6_42, %c0_43] : memref<36x128xf32, #tpu.memory_space<vmem>>, vector<22x128xf32>
    %53 = arith.truncf %52 : vector<22x128xf32> to vector<22x128xbf16>
    %c384 = arith.constant 384 : index
    %c0_44 = arith.constant 0 : index
    %54 = vector.load %arg7[%c384, %c0_44] : memref<1152x128xbf16, #tpu.memory_space<vmem>>, vector<128x128xbf16>
    %cst_45 = arith.constant dense<0.000000e+00> : vector<22x128xf32>
    %55 = tpu.matmul %53, %54, %cst_45 {dimension_numbers = #tpu.dot_dimension_numbers<[1], [0], [0], [1], [0, 0, 1, 1], [], []>} : vector<22x128xbf16>, vector<128x128xbf16>, vector<22x128xf32> -> vector<22x128xf32>
    %56 = arith.addf %51, %55 : vector<22x128xf32>
    %c7_46 = arith.constant 7 : index
    %c0_47 = arith.constant 0 : index
    %57 = vector.load %arg11[%c7_46, %c0_47] : memref<36x128xf32, #tpu.memory_space<vmem>>, vector<22x128xf32>
    %58 = arith.truncf %57 : vector<22x128xf32> to vector<22x128xbf16>
    %c512 = arith.constant 512 : index
    %c0_48 = arith.constant 0 : index
    %59 = vector.load %arg7[%c512, %c0_48] : memref<1152x128xbf16, #tpu.memory_space<vmem>>, vector<128x128xbf16>
    %cst_49 = arith.constant dense<0.000000e+00> : vector<22x128xf32>
    %60 = tpu.matmul %58, %59, %cst_49 {dimension_numbers = #tpu.dot_dimension_numbers<[1], [0], [0], [1], [0, 0, 1, 1], [], []>} : vector<22x128xbf16>, vector<128x128xbf16>, vector<22x128xf32> -> vector<22x128xf32>
    %61 = arith.addf %56, %60 : vector<22x128xf32>
    %c8 = arith.constant 8 : index
    %c0_50 = arith.constant 0 : index
    %62 = vector.load %arg11[%c8, %c0_50] : memref<36x128xf32, #tpu.memory_space<vmem>>, vector<22x128xf32>
    %63 = arith.truncf %62 : vector<22x128xf32> to vector<22x128xbf16>
    %c640 = arith.constant 640 : index
    %c0_51 = arith.constant 0 : index
    %64 = vector.load %arg7[%c640, %c0_51] : memref<1152x128xbf16, #tpu.memory_space<vmem>>, vector<128x128xbf16>
    %cst_52 = arith.constant dense<0.000000e+00> : vector<22x128xf32>
    %65 = tpu.matmul %63, %64, %cst_52 {dimension_numbers = #tpu.dot_dimension_numbers<[1], [0], [0], [1], [0, 0, 1, 1], [], []>} : vector<22x128xbf16>, vector<128x128xbf16>, vector<22x128xf32> -> vector<22x128xf32>
    %66 = arith.addf %61, %65 : vector<22x128xf32>
    %c12_53 = arith.constant 12 : index
    %c0_54 = arith.constant 0 : index
    %67 = vector.load %arg11[%c12_53, %c0_54] : memref<36x128xf32, #tpu.memory_space<vmem>>, vector<22x128xf32>
    %68 = arith.truncf %67 : vector<22x128xf32> to vector<22x128xbf16>
    %c768 = arith.constant 768 : index
    %c0_55 = arith.constant 0 : index
    %69 = vector.load %arg7[%c768, %c0_55] : memref<1152x128xbf16, #tpu.memory_space<vmem>>, vector<128x128xbf16>
    %cst_56 = arith.constant dense<0.000000e+00> : vector<22x128xf32>
    %70 = tpu.matmul %68, %69, %cst_56 {dimension_numbers = #tpu.dot_dimension_numbers<[1], [0], [0], [1], [0, 0, 1, 1], [], []>} : vector<22x128xbf16>, vector<128x128xbf16>, vector<22x128xf32> -> vector<22x128xf32>
    %71 = arith.addf %66, %70 : vector<22x128xf32>
    %c13_57 = arith.constant 13 : index
    %c0_58 = arith.constant 0 : index
    %72 = vector.load %arg11[%c13_57, %c0_58] : memref<36x128xf32, #tpu.memory_space<vmem>>, vector<22x128xf32>
    %73 = arith.truncf %72 : vector<22x128xf32> to vector<22x128xbf16>
    %c896 = arith.constant 896 : index
    %c0_59 = arith.constant 0 : index
    %74 = vector.load %arg7[%c896, %c0_59] : memref<1152x128xbf16, #tpu.memory_space<vmem>>, vector<128x128xbf16>
    %cst_60 = arith.constant dense<0.000000e+00> : vector<22x128xf32>
    %75 = tpu.matmul %73, %74, %cst_60 {dimension_numbers = #tpu.dot_dimension_numbers<[1], [0], [0], [1], [0, 0, 1, 1], [], []>} : vector<22x128xbf16>, vector<128x128xbf16>, vector<22x128xf32> -> vector<22x128xf32>
    %76 = arith.addf %71, %75 : vector<22x128xf32>
    %c14 = arith.constant 14 : index
    %c0_61 = arith.constant 0 : index
    %77 = vector.load %arg11[%c14, %c0_61] : memref<36x128xf32, #tpu.memory_space<vmem>>, vector<22x128xf32>
    %78 = arith.truncf %77 : vector<22x128xf32> to vector<22x128xbf16>
    %c1024 = arith.constant 1024 : index
    %c0_62 = arith.constant 0 : index
    %79 = vector.load %arg7[%c1024, %c0_62] : memref<1152x128xbf16, #tpu.memory_space<vmem>>, vector<128x128xbf16>
    %cst_63 = arith.constant dense<0.000000e+00> : vector<22x128xf32>
    %80 = tpu.matmul %78, %79, %cst_63 {dimension_numbers = #tpu.dot_dimension_numbers<[1], [0], [0], [1], [0, 0, 1, 1], [], []>} : vector<22x128xbf16>, vector<128x128xbf16>, vector<22x128xf32> -> vector<22x128xf32>
    %81 = arith.addf %76, %80 : vector<22x128xf32>
    %c0_64 = arith.constant 0 : index
    %c0_65 = arith.constant 0 : index
    %82 = vector.load %arg8[%c0_64, %c0_65] : memref<1x128xf32, #tpu.memory_space<vmem>>, vector<1x128xf32>
    %83 = vector.broadcast %82 : vector<1x128xf32> to vector<22x128xf32>
    %84 = arith.addf %81, %83 : vector<22x128xf32>
    %c0_66 = arith.constant 0 : index
    %c0_67 = arith.constant 0 : index
    %85 = vector.load %arg12[%c0_66, %c0_67] : memref<22x128xf32, #tpu.memory_space<vmem>>, vector<22x128xf32>
    %86 = arith.addf %84, %85 : vector<22x128xf32>
    %cst_68 = arith.constant 0.000000e+00 : f32
    %87 = vector.broadcast %cst_68 : f32 to vector<22x128xf32>
    %88 = arith.maximumf %86, %87 : vector<22x128xf32>
    %c0_69 = arith.constant 0 : index
    %c0_70 = arith.constant 0 : index
    %89 = vector.load %arg9[%c0_69, %c0_70] : memref<22x1xf32, #tpu.memory_space<vmem>>, vector<22x1xf32>
    %90 = vector.broadcast %89 : vector<22x1xf32> to vector<22x128xf32>
    %91 = arith.mulf %88, %90 : vector<22x128xf32>
    %cst_71 = arith.constant 0.000000e+00 : f32
    %92 = vector.broadcast %cst_71 : f32 to vector<7x128xf32>
    %c0_72 = arith.constant 0 : index
    %c0_73 = arith.constant 0 : index
    %c0_74 = arith.constant 0 : index
    %93 = vector.load %arg10[%c0_72, %c0_73, %c0_74] : memref<1x36x128xf32, #tpu.memory_space<vmem>>, vector<1x7x128xf32>
    %94 = vector.shape_cast %93 : vector<1x7x128xf32> to vector<7x128xf32>
    %95 = vector.shape_cast %92 : vector<7x128xf32> to vector<1x7x128xf32>
    tpu.vector_store %arg10[%c0_72, %c0_73, %c0_74], %95 {strides = array<i32>} : memref<1x36x128xf32, #tpu.memory_space<vmem>>, vector<1x7x128xf32>,
    %c0_75 = arith.constant 0 : index
    %c7_76 = arith.constant 7 : index
    %c0_77 = arith.constant 0 : index
    %96 = vector.load %arg10[%c0_75, %c7_76, %c0_77] : memref<1x36x128xf32, #tpu.memory_space<vmem>>, vector<1x22x128xf32>
    %97 = vector.shape_cast %96 : vector<1x22x128xf32> to vector<22x128xf32>
    %98 = vector.shape_cast %91 : vector<22x128xf32> to vector<1x22x128xf32>
    tpu.vector_store %arg10[%c0_75, %c7_76, %c0_77], %98 {strides = array<i32>} : memref<1x36x128xf32, #tpu.memory_space<vmem>>, vector<1x22x128xf32>,
    %cst_78 = arith.constant 0.000000e+00 : f32
    %99 = vector.broadcast %cst_78 : f32 to vector<7x128xf32>
    %c0_79 = arith.constant 0 : index
    %c29 = arith.constant 29 : index
    %c0_80 = arith.constant 0 : index
    %100 = vector.load %arg10[%c0_79, %c29, %c0_80] : memref<1x36x128xf32, #tpu.memory_space<vmem>>, vector<1x7x128xf32>
    %101 = vector.shape_cast %100 : vector<1x7x128xf32> to vector<7x128xf32>
    %102 = vector.shape_cast %99 : vector<7x128xf32> to vector<1x7x128xf32>
    tpu.vector_store %arg10[%c0_79, %c29, %c0_80], %102 {strides = array<i32>} : memref<1x36x128xf32, #tpu.memory_space<vmem>>, vector<1x7x128xf32>,
    return
  }
  func.func @transform_0(%arg0: i32) -> (i32, i32, i32) {
    %c0_i32 = arith.constant 0 : i32
    %c0_i32_0 = arith.constant 0 : i32
    %c0_i32_1 = arith.constant 0 : i32
    return %arg0, %c0_i32, %c0_i32_0 : i32, i32, i32
  }
  func.func @transform_1(%arg0: i32) -> (i32, i32, i32) {
    %c0_i32 = arith.constant 0 : i32
    %c0_i32_0 = arith.constant 0 : i32
    %c0_i32_1 = arith.constant 0 : i32
    return %arg0, %c0_i32, %c0_i32_0 : i32, i32, i32
  }
  func.func @transform_2(%arg0: i32) -> (i32, i32) {
    %c0_i32 = arith.constant 0 : i32
    %c0_i32_0 = arith.constant 0 : i32
    %c0_i32_1 = arith.constant 0 : i32
    return %c0_i32, %c0_i32_0 : i32, i32
  }
  func.func @transform_3(%arg0: i32) -> (i32, i32) {
    %c0_i32 = arith.constant 0 : i32
    %c0_i32_0 = arith.constant 0 : i32
    %c0_i32_1 = arith.constant 0 : i32
    return %c0_i32, %c0_i32_0 : i32, i32
  }
  func.func @transform_4(%arg0: i32) -> (i32, i32) {
    %c0_i32 = arith.constant 0 : i32
    %c0_i32_0 = arith.constant 0 : i32
    %c0_i32_1 = arith.constant 0 : i32
    return %c0_i32, %c0_i32_0 : i32, i32
  }
  func.func @transform_5(%arg0: i32) -> (i32, i32) {
    %c0_i32 = arith.constant 0 : i32
    %c0_i32_0 = arith.constant 0 : i32
    %c0_i32_1 = arith.constant 0 : i32
    return %c0_i32, %c0_i32_0 : i32, i32
  }
  func.func @transform_6(%arg0: i32) -> (i32, i32) {
    %c0_i32 = arith.constant 0 : i32
    %c0_i32_0 = arith.constant 0 : i32
    %c0_i32_1 = arith.constant 0 : i32
    return %c0_i32, %c0_i32_0 : i32, i32
  }
  func.func @transform_7(%arg0: i32) -> (i32, i32) {
    %c0_i32 = arith.constant 0 : i32
    %c0_i32_0 = arith.constant 0 : i32
    %c0_i32_1 = arith.constant 0 : i32
    return %c0_i32, %c0_i32_0 : i32, i32
  }
  func.func @transform_8(%arg0: i32) -> (i32, i32) {
    %c0_i32 = arith.constant 0 : i32
    %c0_i32_0 = arith.constant 0 : i32
    %c0_i32_1 = arith.constant 0 : i32
    return %c0_i32, %c0_i32_0 : i32, i32
  }
  func.func @transform_9(%arg0: i32) -> (i32, i32, i32) {
    %c0_i32 = arith.constant 0 : i32
    %c0_i32_0 = arith.constant 0 : i32
    %c0_i32_1 = arith.constant 0 : i32
    return %arg0, %c0_i32, %c0_i32_0 : i32, i32, i32
  }
}

</mosaic_0001>

<bundles_post_ra>
// kernel: elim_resnet18_forward.5
= control target key start
LH: loop header
LB: loop body
LE: loop exit
PB: predicated region body
PF: predicated region fallthrough
CT: control target
= control target key end

     0   :  { %s953_s12 = smov 0   ;;  %s1160_s0 = inlined_call_operand.vmem [shape: bf16[2,256,160], index: 0, kind: input, shape index: {}]   ;;  %s1161_s1 = inlined_call_operand.vmem [shape: bf16[160,64], index: 1, kind: input, shape index: {}]   ;;  %s1162_s2 = inlined_call_operand.vmem [shape: f32[1,64], index: 2, kind: input, shape index: {}]   ;;  %s1163_s3 = inlined_call_operand.vmem [shape: f32[2,256,64], index: 3, kind: output, shape index: {}]  }
   0x1 LB: > { %s765_s13 = sadd.s32 4294967295, %s930_s12   ;;  %p769_p0 = scmp.ge.s32.totalorder %s930_s12, 1  ;;  %s930_s12 = sphi %s953_s12, %s13_s12  }
   0x2   : > { %p137_p1 = scmp.lt.s32.totalorder %s930_s12, 3 }
   0x4   : > { %p138_p2 = pnand %p769_p0, %p137_p1 }
   0x5   : > { %v866_v0 = vld [vmem:[%s1161_s1] sm:$0xff] (!%p138_p2)   ;;  %v932_v1 = vmov (!%p138_p2), 0   ;;  %p161_p3 = scmp.lt.s32.totalorder (!%p138_p2), %s765_s13, 1  ;;  %v867_v2 = vld [vmem:[%s1161_s1 + $0x8] sm:$0xff] (!%p138_p2)   ;;  %v868_v3 = vld [vmem:[%s1161_s1 + $0x10] sm:$0xff] (!%p138_p2)   ;;  %vm435_vm0 = vcmask (!%p138_p2), 261120  }
   0x6   : > { %141 = sbr.rel (%p138_p2) target bundleno = 321 (0x141), region = 32  ;;  %484 = vmatprep.subr.bf16.mxu0 (!%p138_p2), %v932_v1  ;;  %837 = vmatprep.subr.bf16.mxu1 (!%p138_p2), %v932_v1  ;;  %v869_v4 = vld [vmem:[%s1161_s1 + $0x18] sm:$0xff] (!%p138_p2)   ;;  %v870_v7 = vld [vmem:[%s1161_s1 + $0x20] sm:$0xff] (!%p138_p2)   ;;  %v871_v8 = vld [vmem:[%s1161_s1 + $0x28] sm:$0xff] (!%p138_p2)   ;;  %vm677_vm1 = vcmask (!%p138_p2), 523264  }
   0x7   : > { %485 = vmatpush1.bf16.msra.mxu0 (!%p138_p2), %v866_v0  ;;  %847 = vmatpush1.bf16.msra.mxu1 (!%p138_p2), %v866_v0  ;;  %v872_v9 = vld [vmem:[%s1161_s1 + $0x30] sm:$0xff] (!%p138_p2)   ;;  %v873_v10 = vld [vmem:[%s1161_s1 + $0x38] sm:$0xff] (!%p138_p2)   ;;  %v874_v11 = vld [vmem:[%s1161_s1 + $0x40] sm:$0xff] (!%p138_p2)  }
   0x8   : > { %486 = vmatprep.subr.bf16.mxu0 (!%p138_p2), %v932_v1  ;;  %838 = vmatprep.subr.bf16.mxu1 (!%p138_p2), %v932_v1  ;;  %v875_v12 = vld [vmem:[%s1161_s1 + $0x48] sm:$0xff] (!%p138_p2)   ;;  %v1052_v43 = vld [vmem:[%s1162_s2] ss:$0 sm:$0xff] (!%p138_p2) }
   0xb   : > { %487 = vmatpush1.bf16.msra.mxu0 (!%p138_p2), %v867_v2  ;;  %848 = vmatpush1.bf16.msra.mxu1 (!%p138_p2), %v867_v2 }
   0xc   : > { %488 = vmatprep.subr.bf16.mxu0 (!%p138_p2), %v932_v1  ;;  %839 = vmatprep.subr.bf16.mxu1 (!%p138_p2), %v932_v1 }
   0xd   : > { %s1165_s13 = smov (!%p161_p3, %s765_s13), 1 }
   0xe   : > { %s835_s18 = sshll.u32 %s1165_s13, 8 }
   0xf   : > { %s978_s23 = scalar_lea.vmem %s1160_s0, %s835_s18  ;;  %489 = vmatpush1.bf16.msra.mxu0 %v868_v3  ;;  %849 = vmatpush1.bf16.msra.mxu1 %v868_v3  ;;  %s1061_s17 = scalar_lea.vmem %s1163_s3, %s835_s18 }
  0x10   : > { %490 = vmatprep.subr.bf16.mxu0 %v932_v1  ;;  %840 = vmatprep.subr.bf16.mxu1 %v932_v1  ;;  %v878_v5 = vld [vmem:[%s978_s23 + $0x4] ss:$8 sps:$4 sm:$0xff]   ;;  %v876_v13 = vld [vmem:[%s978_s23] ss:$8 sps:$4 sm:$0xff]   ;;  %v882_v15 = vld [vmem:[%s978_s23 + $0x14] ss:$8 sps:$4 sm:$0xff]  }
  0x11   : > { %v881_v6 = vld [vmem:[%s978_s23 + $0x84] ss:$8 sps:$4 sm:$0xff]   ;;  %817 = vmatprep.mubr.msk.bf16.mxu0 %vm435_vm0, %v878_v5  ;;  %v879_v14 = vld [vmem:[%s978_s23 + $0x80] ss:$8 sps:$4 sm:$0xff]   ;;  %v884_v16 = vld [vmem:[%s978_s23 + $0x94] ss:$8 sps:$4 sm:$0xff]  }
  0x12   : > { %825 = vmatprep.mubr.msk.bf16.mxu1 %vm435_vm0, %v881_v6  ;;  %v886_v17 = vld [vmem:[%s978_s23 + $0x10] ss:$8 sps:$4 sm:$0xff]   ;;  %v888_v19 = vld [vmem:[%s978_s23 + $0x24] ss:$8 sps:$4 sm:$0xff]   ;;  %v892_v21 = vld [vmem:[%s978_s23 + $0x20] ss:$8 sps:$4 sm:$0xff]  }
  0x13   : > { %491 = vmatpush1.bf16.msra.mxu0 %v869_v4  ;;  %850 = vmatpush1.bf16.msra.mxu1 %v869_v4  ;;  %v887_v18 = vld [vmem:[%s978_s23 + $0x90] ss:$8 sps:$4 sm:$0xff]   ;;  %v890_v20 = vld [vmem:[%s978_s23 + $0xa4] ss:$8 sps:$4 sm:$0xff]   ;;  %v893_v22 = vld [vmem:[%s978_s23 + $0xa0] ss:$8 sps:$4 sm:$0xff]  }
  0x14   : > { %492 = vmatprep.subr.bf16.mxu0 %v932_v1  ;;  %841 = vmatprep.subr.bf16.mxu1 %v932_v1  ;;  %v894_v23 = vld [vmem:[%s978_s23 + $0x34] ss:$8 sps:$4 sm:$0xff]   ;;  %v898_v25 = vld [vmem:[%s978_s23 + $0x30] ss:$8 sps:$4 sm:$0xff]   ;;  %v900_v27 = vld [vmem:[%s978_s23 + $0x44] ss:$8 sps:$4 sm:$0xff]  }
  0x15   : > { %v896_v24 = vld [vmem:[%s978_s23 + $0xb4] ss:$8 sps:$4 sm:$0xff]   ;;  %v899_v26 = vld [vmem:[%s978_s23 + $0xb0] ss:$8 sps:$4 sm:$0xff]   ;;  %v902_v28 = vld [vmem:[%s978_s23 + $0xc4] ss:$8 sps:$4 sm:$0xff]  }
  0x16   : > { %v904_v29 = vld [vmem:[%s978_s23 + $0x40] ss:$8 sps:$4 sm:$0xff]   ;;  %v906_v31 = vld [vmem:[%s978_s23 + $0x54] ss:$8 sps:$4 sm:$0xff]   ;;  %v910_v33 = vld [vmem:[%s978_s23 + $0x50] ss:$8 sps:$4 sm:$0xff]  }
  0x17   : > { %493 = vmatpush1.bf16.msra.mxu0 %v870_v7  ;;  %851 = vmatpush1.bf16.msra.mxu1 %v870_v7  ;;  %v905_v30 = vld [vmem:[%s978_s23 + $0xc0] ss:$8 sps:$4 sm:$0xff]   ;;  %v908_v32 = vld [vmem:[%s978_s23 + $0xd4] ss:$8 sps:$4 sm:$0xff]   ;;  %v911_v34 = vld [vmem:[%s978_s23 + $0xd0] ss:$8 sps:$4 sm:$0xff]  }
  0x18   : > { %494 = vmatprep.subr.bf16.mxu0 %v932_v1  ;;  %842 = vmatprep.subr.bf16.mxu1 %v932_v1  ;;  %v912_v35 = vld [vmem:[%s978_s23 + $0x64] ss:$8 sps:$4 sm:$0xff]   ;;  %v916_v37 = vld [vmem:[%s978_s23 + $0x60] ss:$8 sps:$4 sm:$0xff]   ;;  %v918_v39 = vld [vmem:[%s978_s23 + $0x74] ss:$8 sps:$4 sm:$0xff]  }
  0x19   : > { %v914_v36 = vld [vmem:[%s978_s23 + $0xe4] ss:$8 sps:$4 sm:$0xff]   ;;  %v917_v38 = vld [vmem:[%s978_s23 + $0xe0] ss:$8 sps:$4 sm:$0xff]   ;;  %v920_v40 = vld [vmem:[%s978_s23 + $0xf4] ss:$8 sps:$4 sm:$0xff]  }
  0x1a   : > { %v922_v41 = vld [vmem:[%s978_s23 + $0x70] ss:$8 sps:$4 sm:$0xff]  }
  0x1b   : > { %495 = vmatpush1.bf16.msra.mxu0 %v871_v8  ;;  %852 = vmatpush1.bf16.msra.mxu1 %v871_v8  ;;  %v923_v42 = vld [vmem:[%s978_s23 + $0xf0] ss:$8 sps:$4 sm:$0xff]  }
  0x1c   : > { %496 = vmatprep.subr.bf16.mxu0 %v932_v1  ;;  %843 = vmatprep.subr.bf16.mxu1 %v932_v1 }
  0x1f   : > { %497 = vmatpush1.bf16.msra.mxu0 %v872_v9  ;;  %853 = vmatpush1.bf16.msra.mxu1 %v872_v9 }
  0x20   : > { %498 = vmatprep.subr.bf16.mxu0 %v932_v1  ;;  %844 = vmatprep.subr.bf16.mxu1 %v932_v1 }
  0x23   : > { %499 = vmatpush1.bf16.msra.mxu0 %v873_v10  ;;  %854 = vmatpush1.bf16.msra.mxu1 %v873_v10 }
  0x24   : > { %500 = vmatprep.subr.bf16.mxu0 %v932_v1  ;;  %845 = vmatprep.subr.bf16.mxu1 %v932_v1 }
  0x27   : > { %501 = vmatpush1.bf16.msra.mxu0 %v874_v11  ;;  %855 = vmatpush1.bf16.msra.mxu1 %v874_v11 }
  0x28   : > { %502 = vmatprep.subr.bf16.mxu0 %v932_v1  ;;  %846 = vmatprep.subr.bf16.mxu1 %v932_v1 }
  0x2b   : > { %503 = vmatpush1.bf16.msra.mxu0 %v875_v12  ;;  %856 = vmatpush1.bf16.msra.mxu1 %v875_v12 }
  0x2e   : > { %517 = vmatmul.mubr.bf16.vlgmr.msra.gmra.mrb[0].mxu0 %v876_v13  ;;  %581 = vmatmul.mubr.bf16.vlgmr.msra.gmra.mrb[0].mxu1 %v879_v14 }
  0x2f   : > { %818 = vmatprep.mubr.msk.bf16.mxu0 %vm435_vm0, %v882_v15  ;;  %826 = vmatprep.mubr.msk.bf16.mxu1 %vm435_vm0, %v884_v16 }
  0x36   : > { %525 = vmatmul.mubr.bf16.gmra.mrb[4].mxu0 %v886_v17  ;;  %589 = vmatmul.mubr.bf16.gmra.mrb[4].mxu1 %v887_v18 }
  0x37   : > { %819 = vmatprep.mubr.msk.bf16.mxu0 %vm435_vm0, %v888_v19  ;;  %827 = vmatprep.mubr.msk.bf16.mxu1 %vm435_vm0, %v890_v20 }
  0x3e   : > { %533 = vmatmul.mubr.bf16.gmra.mrb[8].mxu0 %v892_v21  ;;  %597 = vmatmul.mubr.bf16.gmra.mrb[8].mxu1 %v893_v22 }
  0x3f   : > { %820 = vmatprep.mubr.msk.bf16.mxu0 %vm435_vm0, %v894_v23  ;;  %828 = vmatprep.mubr.msk.bf16.mxu1 %vm435_vm0, %v896_v24 }
  0x46   : > { %541 = vmatmul.mubr.bf16.gmra.mrb[12].mxu0 %v898_v25  ;;  %605 = vmatmul.mubr.bf16.gmra.mrb[12].mxu1 %v899_v26 }
  0x47   : > { %821 = vmatprep.mubr.msk.bf16.mxu0 %vm435_vm0, %v900_v27  ;;  %829 = vmatprep.mubr.msk.bf16.mxu1 %vm435_vm0, %v902_v28 }
  0x4e   : > { %549 = vmatmul.mubr.bf16.gmra.mrb[16].mxu0 %v904_v29  ;;  %613 = vmatmul.mubr.bf16.gmra.mrb[16].mxu1 %v905_v30 }
  0x4f   : > { %822 = vmatprep.mubr.msk.bf16.mxu0 %vm435_vm0, %v906_v31  ;;  %830 = vmatprep.mubr.msk.bf16.mxu1 %vm435_vm0, %v908_v32 }
  0x56   : > { %557 = vmatmul.mubr.bf16.gmra.mrb[20].mxu0 %v910_v33  ;;  %621 = vmatmul.mubr.bf16.gmra.mrb[20].mxu1 %v911_v34 }
  0x57   : > { %823 = vmatprep.mubr.msk.bf16.mxu0 %vm435_vm0, %v912_v35  ;;  %831 = vmatprep.mubr.msk.bf16.mxu1 %vm435_vm0, %v914_v36 }
  0x5e   : > { %565 = vmatmul.mubr.bf16.gmra.mrb[24].mxu0 %v916_v37  ;;  %629 = vmatmul.mubr.bf16.gmra.mrb[24].mxu1 %v917_v38 }
  0x5f   : > { %824 = vmatprep.mubr.msk.bf16.mxu0 %vm435_vm0, %v918_v39  ;;  %832 = vmatprep.mubr.msk.bf16.mxu1 %vm435_vm0, %v920_v40 }
  0x66   : > { %573 = vmatmul.mubr.bf16.gmra.mrb[28].mxu0 %v922_v41  ;;  %637 = vmatmul.mubr.bf16.gmra.mrb[28].mxu1 %v923_v42 }
 0x101   : > { %v518_v44 = vpop.f32.mrb[0].mxu0  ;;  %v582_v45 = vpop.f32.mrb[0].mxu1 }
 0x102   : > { %v519_v46 = vadd.f32 %v1052_v43, %v518_v44  ;;  %v583_v47 = vadd.f32 %v1052_v43, %v582_v45  ;;  %v520_v48 = vpop.f32.mrb[1].mxu0  ;;  %v584_v49 = vpop.f32.mrb[1].mxu1 }
 0x103   : > { %v521_v50 = vpop.f32.mrb[2].mxu0  ;;  %v585_v51 = vpop.f32.mrb[2].mxu1 }
 0x104   : > { %v645_v52 = vmax.f32 %v519_v46, 0.0  ;;  %v661_v53 = vmax.f32 %v583_v47, 0.0  ;;  %v522_v54 = vadd.f32 %v1052_v43, %v521_v50  ;;  %v586_v55 = vadd.f32 %v1052_v43, %v585_v51  ;;  %v523_v56 = vpop.f32.mrb[3].mxu0  ;;  %v587_v57 = vpop.f32.mrb[3].mxu1 }
 0x106   : > { %678 = vst.msk [vmem:[%s1061_s17] sm:$0xff] %vm677_vm1, %v645_v52  ;;  %694 = vst.msk [vmem:[%s1061_s17 + $0x80] sm:$0xff] %vm677_vm1, %v661_v53  ;;  %v646_v58 = vmax.f32 %v522_v54, 0.0  ;;  %v662_v59 = vmax.f32 %v586_v55, 0.0 }
 0x108   : > { %679 = vst.msk [vmem:[%s1061_s17 + $0x8] sm:$0xff] %vm677_vm1, %v646_v58  ;;  %695 = vst.msk [vmem:[%s1061_s17 + $0x88] sm:$0xff] %vm677_vm1, %v662_v59 }
 0x109   : > { %v526_v60 = vpop.f32.mrb[4].mxu0  ;;  %v590_v61 = vpop.f32.mrb[4].mxu1 }
 0x10a   : > { %v527_v62 = vadd.f32 %v1052_v43, %v526_v60  ;;  %v591_v63 = vadd.f32 %v1052_v43, %v590_v61  ;;  %v528_v0 = vpop.f32.mrb[5].mxu0  ;;  %v592_v1 = vpop.f32.mrb[5].mxu1 }
 0x10b   : > { %v529_v2 = vpop.f32.mrb[6].mxu0  ;;  %v593_v3 = vpop.f32.mrb[6].mxu1 }
 0x10c   : > { %v647_v4 = vmax.f32 %v527_v62, 0.0  ;;  %v663_v5 = vmax.f32 %v591_v63, 0.0  ;;  %v530_v6 = vadd.f32 %v1052_v43, %v529_v2  ;;  %v594_v7 = vadd.f32 %v1052_v43, %v593_v3  ;;  %v531_v8 = vpop.f32.mrb[7].mxu0  ;;  %v595_v9 = vpop.f32.mrb[7].mxu1 }
 0x10e   : > { %680 = vst.msk [vmem:[%s1061_s17 + $0x10] sm:$0xff] %vm677_vm1, %v647_v4  ;;  %696 = vst.msk [vmem:[%s1061_s17 + $0x90] sm:$0xff] %vm677_vm1, %v663_v5  ;;  %v648_v10 = vmax.f32 %v530_v6, 0.0  ;;  %v664_v11 = vmax.f32 %v594_v7, 0.0 }
 0x110   : > { %681 = vst.msk [vmem:[%s1061_s17 + $0x18] sm:$0xff] %vm677_vm1, %v648_v10  ;;  %697 = vst.msk [vmem:[%s1061_s17 + $0x98] sm:$0xff] %vm677_vm1, %v664_v11 }
 0x111   : > { %v534_v12 = vpop.f32.mrb[8].mxu0  ;;  %v598_v13 = vpop.f32.mrb[8].mxu1 }
 0x112   : > { %v535_v14 = vadd.f32 %v1052_v43, %v534_v12  ;;  %v599_v15 = vadd.f32 %v1052_v43, %v598_v13  ;;  %v536_v16 = vpop.f32.mrb[9].mxu0  ;;  %v600_v17 = vpop.f32.mrb[9].mxu1 }
 0x113   : > { %v537_v18 = vpop.f32.mrb[10].mxu0  ;;  %v601_v19 = vpop.f32.mrb[10].mxu1 }
 0x114   : > { %v649_v20 = vmax.f32 %v535_v14, 0.0  ;;  %v665_v21 = vmax.f32 %v599_v15, 0.0  ;;  %v538_v22 = vadd.f32 %v1052_v43, %v537_v18  ;;  %v602_v23 = vadd.f32 %v1052_v43, %v601_v19  ;;  %v539_v24 = vpop.f32.mrb[11].mxu0  ;;  %v603_v25 = vpop.f32.mrb[11].mxu1 }
 0x116   : > { %682 = vst.msk [vmem:[%s1061_s17 + $0x20] sm:$0xff] %vm677_vm1, %v649_v20  ;;  %698 = vst.msk [vmem:[%s1061_s17 + $0xa0] sm:$0xff] %vm677_vm1, %v665_v21  ;;  %v650_v26 = vmax.f32 %v538_v22, 0.0  ;;  %v666_v27 = vmax.f32 %v602_v23, 0.0 }
 0x118   : > { %683 = vst.msk [vmem:[%s1061_s17 + $0x28] sm:$0xff] %vm677_vm1, %v650_v26  ;;  %699 = vst.msk [vmem:[%s1061_s17 + $0xa8] sm:$0xff] %vm677_vm1, %v666_v27 }
 0x119   : > { %v542_v28 = vpop.f32.mrb[12].mxu0  ;;  %v606_v29 = vpop.f32.mrb[12].mxu1 }
 0x11a   : > { %v543_v30 = vadd.f32 %v1052_v43, %v542_v28  ;;  %v607_v31 = vadd.f32 %v1052_v43, %v606_v29  ;;  %v544_v32 = vpop.f32.mrb[13].mxu0  ;;  %v608_v33 = vpop.f32.mrb[13].mxu1 }
 0x11b   : > { %v545_v34 = vpop.f32.mrb[14].mxu0  ;;  %v609_v35 = vpop.f32.mrb[14].mxu1 }
 0x11c   : > { %v651_v36 = vmax.f32 %v543_v30, 0.0  ;;  %v667_v37 = vmax.f32 %v607_v31, 0.0  ;;  %v546_v38 = vadd.f32 %v1052_v43, %v545_v34  ;;  %v610_v39 = vadd.f32 %v1052_v43, %v609_v35  ;;  %v547_v40 = vpop.f32.mrb[15].mxu0  ;;  %v611_v41 = vpop.f32.mrb[15].mxu1 }
 0x11e   : > { %684 = vst.msk [vmem:[%s1061_s17 + $0x30] sm:$0xff] %vm677_vm1, %v651_v36  ;;  %700 = vst.msk [vmem:[%s1061_s17 + $0xb0] sm:$0xff] %vm677_vm1, %v667_v37  ;;  %v652_v42 = vmax.f32 %v546_v38, 0.0  ;;  %v668_v44 = vmax.f32 %v610_v39, 0.0 }
 0x120   : > { %685 = vst.msk [vmem:[%s1061_s17 + $0x38] sm:$0xff] %vm677_vm1, %v652_v42  ;;  %701 = vst.msk [vmem:[%s1061_s17 + $0xb8] sm:$0xff] %vm677_vm1, %v668_v44 }
 0x121   : > { %v550_v45 = vpop.f32.mrb[16].mxu0  ;;  %v614_v46 = vpop.f32.mrb[16].mxu1 }
 0x122   : > { %v551_v47 = vadd.f32 %v1052_v43, %v550_v45  ;;  %v615_v48 = vadd.f32 %v1052_v43, %v614_v46  ;;  %v552_v49 = vpop.f32.mrb[17].mxu0  ;;  %v616_v50 = vpop.f32.mrb[17].mxu1 }
 0x123   : > { %v553_v51 = vpop.f32.mrb[18].mxu0  ;;  %v617_v52 = vpop.f32.mrb[18].mxu1 }
 0x124   : > { %v653_v53 = vmax.f32 %v551_v47, 0.0  ;;  %v669_v54 = vmax.f32 %v615_v48, 0.0  ;;  %v554_v55 = vadd.f32 %v1052_v43, %v553_v51  ;;  %v618_v56 = vadd.f32 %v1052_v43, %v617_v52  ;;  %v555_v57 = vpop.f32.mrb[19].mxu0  ;;  %v619_v58 = vpop.f32.mrb[19].mxu1 }
 0x126   : > { %686 = vst.msk [vmem:[%s1061_s17 + $0x40] sm:$0xff] %vm677_vm1, %v653_v53  ;;  %702 = vst.msk [vmem:[%s1061_s17 + $0xc0] sm:$0xff] %vm677_vm1, %v669_v54  ;;  %v654_v59 = vmax.f32 %v554_v55, 0.0  ;;  %v670_v60 = vmax.f32 %v618_v56, 0.0 }
 0x128   : > { %687 = vst.msk [vmem:[%s1061_s17 + $0x48] sm:$0xff] %vm677_vm1, %v654_v59  ;;  %703 = vst.msk [vmem:[%s1061_s17 + $0xc8] sm:$0xff] %vm677_vm1, %v670_v60 }
 0x129   : > { %v558_v61 = vpop.f32.mrb[20].mxu0  ;;  %v622_v62 = vpop.f32.mrb[20].mxu1 }
 0x12a   : > { %v559_v63 = vadd.f32 %v1052_v43, %v558_v61  ;;  %v623_v0 = vadd.f32 %v1052_v43, %v622_v62  ;;  %v560_v1 = vpop.f32.mrb[21].mxu0  ;;  %v624_v2 = vpop.f32.mrb[21].mxu1 }
 0x12b   : > { %v561_v3 = vpop.f32.mrb[22].mxu0  ;;  %v625_v4 = vpop.f32.mrb[22].mxu1 }
 0x12c   : > { %v655_v5 = vmax.f32 %v559_v63, 0.0  ;;  %v671_v6 = vmax.f32 %v623_v0, 0.0  ;;  %v562_v7 = vadd.f32 %v1052_v43, %v561_v3  ;;  %v626_v8 = vadd.f32 %v1052_v43, %v625_v4  ;;  %v563_v9 = vpop.f32.mrb[23].mxu0  ;;  %v627_v10 = vpop.f32.mrb[23].mxu1 }
 0x12e   : > { %688 = vst.msk [vmem:[%s1061_s17 + $0x50] sm:$0xff] %vm677_vm1, %v655_v5  ;;  %704 = vst.msk [vmem:[%s1061_s17 + $0xd0] sm:$0xff] %vm677_vm1, %v671_v6  ;;  %v656_v11 = vmax.f32 %v562_v7, 0.0  ;;  %v672_v12 = vmax.f32 %v626_v8, 0.0 }
 0x130   : > { %689 = vst.msk [vmem:[%s1061_s17 + $0x58] sm:$0xff] %vm677_vm1, %v656_v11  ;;  %705 = vst.msk [vmem:[%s1061_s17 + $0xd8] sm:$0xff] %vm677_vm1, %v672_v12 }
 0x131   : > { %v566_v13 = vpop.f32.mrb[24].mxu0  ;;  %v630_v14 = vpop.f32.mrb[24].mxu1 }
 0x132   : > { %v567_v15 = vadd.f32 %v1052_v43, %v566_v13  ;;  %v631_v16 = vadd.f32 %v1052_v43, %v630_v14  ;;  %v568_v17 = vpop.f32.mrb[25].mxu0  ;;  %v632_v18 = vpop.f32.mrb[25].mxu1 }
 0x133   : > { %v569_v19 = vpop.f32.mrb[26].mxu0  ;;  %v633_v20 = vpop.f32.mrb[26].mxu1 }
 0x134   : > { %v657_v21 = vmax.f32 %v567_v15, 0.0  ;;  %v673_v22 = vmax.f32 %v631_v16, 0.0  ;;  %v570_v23 = vadd.f32 %v1052_v43, %v569_v19  ;;  %v634_v24 = vadd.f32 %v1052_v43, %v633_v20  ;;  %v571_v25 = vpop.f32.mrb[27].mxu0  ;;  %v635_v26 = vpop.f32.mrb[27].mxu1 }
 0x136   : > { %690 = vst.msk [vmem:[%s1061_s17 + $0x60] sm:$0xff] %vm677_vm1, %v657_v21  ;;  %706 = vst.msk [vmem:[%s1061_s17 + $0xe0] sm:$0xff] %vm677_vm1, %v673_v22  ;;  %v658_v27 = vmax.f32 %v570_v23, 0.0  ;;  %v674_v28 = vmax.f32 %v634_v24, 0.0 }
 0x138   : > { %691 = vst.msk [vmem:[%s1061_s17 + $0x68] sm:$0xff] %vm677_vm1, %v658_v27  ;;  %707 = vst.msk [vmem:[%s1061_s17 + $0xe8] sm:$0xff] %vm677_vm1, %v674_v28 }
 0x139   : > { %v574_v29 = vpop.f32.mrb[28].mxu0  ;;  %v638_v30 = vpop.f32.mrb[28].mxu1 }
 0x13a   : > { %v575_v31 = vadd.f32 %v1052_v43, %v574_v29  ;;  %v639_v32 = vadd.f32 %v1052_v43, %v638_v30  ;;  %v576_v33 = vpop.f32.mrb[29].mxu0  ;;  %v640_v34 = vpop.f32.mrb[29].mxu1 }
 0x13b   : > { %v577_v35 = vpop.f32.mrb[30].mxu0  ;;  %v641_v36 = vpop.f32.mrb[30].mxu1 }
 0x13c   : > { %v659_v37 = vmax.f32 %v575_v31, 0.0  ;;  %v675_v38 = vmax.f32 %v639_v32, 0.0  ;;  %v578_v39 = vadd.f32 %v1052_v43, %v577_v35  ;;  %v642_v40 = vadd.f32 %v1052_v43, %v641_v36  ;;  %v579_v41 = vpop.f32.mrb[31].mxu0  ;;  %v643_v42 = vpop.f32.mrb[31].mxu1 }
 0x13e   : > { %692 = vst.msk [vmem:[%s1061_s17 + $0x70] sm:$0xff] %vm677_vm1, %v659_v37  ;;  %708 = vst.msk [vmem:[%s1061_s17 + $0xf0] sm:$0xff] %vm677_vm1, %v675_v38  ;;  %v660_v44 = vmax.f32 %v578_v39, 0.0  ;;  %v676_v45 = vmax.f32 %v642_v40, 0.0 }
 0x140   : > { %693 = vst.msk [vmem:[%s1061_s17 + $0x78] sm:$0xff] %vm677_vm1, %v660_v44  ;;  %709 = vst.msk [vmem:[%s1061_s17 + $0xf8] sm:$0xff] %vm677_vm1, %v676_v45 }
 0x141 PF: > { %s13_s12 = sadd.s32 1, %s930_s12  }
 0x142   : > { %p10_p4 = scmp.ge.s32.totalorder %s13_s12, 4  }
 0x144   :  { %12 = sbr.rel (!%p10_p4) target bundleno = 1 (0x1), region = 62 }

// kernel: elim_resnet18_forward.6
= control target key start
LH: loop header
LB: loop body
LE: loop exit
PB: predicated region body
PF: predicated region fallthrough
CT: control target
= control target key end

     0   :  { %s4104_s21 = smov 0   ;;  %s5022_s0 = inlined_call_operand.vmem [shape: f32[2,100,64], index: 0, kind: input, shape index: {}]   ;;  %s5023_s1 = inlined_call_operand.vmem [shape: bf16[576,64], index: 1, kind: input, shape index: {}]   ;;  %s5024_s2 = inlined_call_operand.vmem [shape: f32[1,64], index: 2, kind: input, shape index: {}]   ;;  %s5025_s3 = inlined_call_operand.vmem [shape: bf16[576,64], index: 3, kind: input, shape index: {}]   ;;  %s5026_s4 = inlined_call_operand.vmem [shape: f32[1,64], index: 4, kind: input, shape index: {}]   ;;  %s5027_s5 = inlined_call_operand.vmem [shape: f32[78,1], index: 5, kind: input, shape index: {}]   ;;  %s5028_s6 = inlined_call_operand.vmem [shape: f32[2,100,64], index: 6, kind: output, shape index: {}]  }
   0x1 LB: > { %s3133_s22 = sadd.s32 4294967295, %s4064_s21   ;;  %p3137_p0 = scmp.ge.s32.totalorder %s4064_s21, 1  ;;  %s4064_s21 = sphi %s4104_s21, %s16_s21  }
   0x2   : > { %p212_p1 = scmp.lt.s32.totalorder %s4064_s21, 3 }
   0x4   : > { %p213_p2 = pnand %p3137_p0, %p212_p1 }
   0x5   : > { %v3986_v0 = vld [vmem:[%s5023_s1 + $0x20] sm:$0xff] (!%p213_p2)   ;;  %v4066_v1 = vmov (!%p213_p2), 0.0   ;;  %v3988_v3 = vld [vmem:[%s5023_s1 + $0x28] sm:$0xff] (!%p213_p2)   ;;  %vm4067_vm0 = vmmov (!%p213_p2), 0   ;;  %p242_p3 = scmp.lt.s32.totalorder (!%p213_p2), %s3133_s22, 1  ;;  %vm323_vm1 = vcmask (!%p213_p2), 523264  }
   0x6   : > { %216 = sbr.rel (%p213_p2) target bundleno = 829 (0x33d), region = 44  ;;  %3468 = vmatprep.subr.bf16.mxu0 (!%p213_p2), %v4066_v1  ;;  %3496 = vmatprep.subr.bf16.mxu1 (!%p213_p2), %v4066_v1  ;;  %v3987_v2 = vld [vmem:[%s5023_s1] sm:$0xff] (!%p213_p2)   ;;  %v3989_v4 = vld [vmem:[%s5023_s1 + $0x8] sm:$0xff] (!%p213_p2)   ;;  %1636 = vst.msk [vmem:[#allocation2] sm:$0xff] (!%p213_p2), %vm323_vm1, %v4066_v1  ;;  %1637 = vst.msk [vmem:[#allocation2 + $0x8] sm:$0xff] (!%p213_p2), %vm323_vm1, %v4066_v1  ;;  %vm1648_vm2 = vcmask (!%p213_p2), 519168  }
   0x7   : > { %3469 = vmatpush3.bf16.msra.mxu0 (!%p213_p2), %v3986_v0  ;;  %3476 = vmatprep.mubr.msk.bf16.mxu0 (!%p213_p2), %vm4067_vm0, %v4066_v1  ;;  %1638 = vst.msk [vmem:[#allocation2 + $0x10] sm:$0xff] (!%p213_p2), %vm323_vm1, %v4066_v1  ;;  %1639 = vst.msk [vmem:[#allocation2 + $0x18] sm:$0xff] (!%p213_p2), %vm323_vm1, %v4066_v1  ;;  %v3990_v5 = vld [vmem:[%s5023_s1 + $0x30] sm:$0xff] (!%p213_p2)   ;;  %v3992_v7 = vld [vmem:[%s5023_s1 + $0x38] sm:$0xff] (!%p213_p2)   ;;  %vm1659_vm3 = vcmask (!%p213_p2), 521216   ;;  %vm3064_vm4 = vcmask (!%p213_p2), 518144  }
   0x8   : > { %3497 = vmatpush3.bf16.msra.mxu1 (!%p213_p2), %v3987_v2  ;;  %3470 = vmatprep.subr.bf16.mxu0 (!%p213_p2), %v4066_v1  ;;  %1640 = vst.msk [vmem:[#allocation2 + $0x20] sm:$0xff] (!%p213_p2), %vm323_vm1, %v4066_v1  ;;  %1641 = vst.msk [vmem:[#allocation2 + $0x28] sm:$0xff] (!%p213_p2), %vm323_vm1, %v4066_v1  ;;  %v3991_v6 = vld [vmem:[%s5023_s1 + $0x10] sm:$0xff] (!%p213_p2)   ;;  %v3993_v8 = vld [vmem:[%s5023_s1 + $0x18] sm:$0xff] (!%p213_p2)  }
   0x9   : > { %3498 = vmatprep.subr.bf16.mxu1 (!%p213_p2), %v4066_v1  ;;  %3504 = vmatprep.mubr.msk.bf16.mxu1 (!%p213_p2), %vm4067_vm0, %v4066_v1  ;;  %1642 = vst.msk [vmem:[#allocation2 + $0x30] sm:$0xff] (!%p213_p2), %vm323_vm1, %v4066_v1  ;;  %1643 = vst.msk [vmem:[#allocation2 + $0x38] sm:$0xff] (!%p213_p2), %vm323_vm1, %v4066_v1  ;;  %v3994_v15 = vld [vmem:[%s5023_s1 + $0x40] sm:$0xff] (!%p213_p2)   ;;  %v3995_v19 = vld [vmem:[%s5023_s1 + $0x48] sm:$0xff] (!%p213_p2)  }
   0xa   : > { %1644 = vst.msk [vmem:[#allocation2 + $0x40] sm:$0xff] (!%p213_p2), %vm323_vm1, %v4066_v1  ;;  %1645 = vst.msk [vmem:[#allocation2 + $0x48] sm:$0xff] (!%p213_p2), %vm323_vm1, %v4066_v1  ;;  %v3997_v18 = vld [vmem:[%s5023_s1 + $0x60] sm:$0xff] (!%p213_p2)   ;;  %v3999_v22 = vld [vmem:[%s5023_s1 + $0x68] sm:$0xff] (!%p213_p2)  }
   0xb   : > { %1646 = vst.msk [vmem:[#allocation2 + $0x50] sm:$0xff] (!%p213_p2), %vm323_vm1, %v4066_v1  ;;  %1647 = vst.msk [vmem:[#allocation2 + $0x58] sm:$0xff] (!%p213_p2), %vm323_vm1, %v4066_v1  ;;  %3471 = vmatpush3.bf16.msra.mxu0 (!%p213_p2), %v3988_v3  ;;  %v3996_v25 = vld [vmem:[%s5023_s1 + $0x50] sm:$0xff] (!%p213_p2)   ;;  %v3998_v31 = vld [vmem:[%s5023_s1 + $0x58] sm:$0xff] (!%p213_p2)  }
   0xc   : > { %3499 = vmatpush3.bf16.msra.mxu1 (!%p213_p2), %v3989_v4  ;;  %3472 = vmatprep.subr.bf16.mxu0 (!%p213_p2), %v4066_v1  ;;  %v4000_v26 = vld [vmem:[%s5023_s1 + $0x70] sm:$0xff] (!%p213_p2)   ;;  %v4001_v32 = vld [vmem:[%s5023_s1 + $0x78] sm:$0xff] (!%p213_p2)   ;;  %v4002_v51 = vld [vmem:[%s5023_s1 + $0x80] sm:$0xff] (!%p213_p2)   ;;  %1649 = vst.msk [vmem:[#allocation2 + $0x60] sm:$0xf] (!%p213_p2), %vm1648_vm2, %v4066_v1 }
   0xd   : > { %s5030_s22 = smov (!%p242_p3, %s3133_s22), 1  ;;  %3500 = vmatprep.subr.bf16.mxu1 %v4066_v1  ;;  %v4005_v53 = vld [vmem:[%s5023_s1 + $0xa0] sm:$0xff]   ;;  %v4003_v56 = vld [vmem:[%s5023_s1 + $0x88] sm:$0xff]   ;;  %v4004_v59 = vld [vmem:[%s5023_s1 + $0x90] sm:$0xff]  }
   0xe   : > { %s3972_s9 = smul.u32 104, %s5030_s22  ;;  %v4007_v57 = vld [vmem:[%s5023_s1 + $0xa8] sm:$0xff]   ;;  %v4008_v61 = vld [vmem:[%s5023_s1 + $0xb0] sm:$0xff]   ;;  %v4006_v0 = vld [vmem:[%s5023_s1 + $0x98] sm:$0xff]  }
   0xf   : > { %3473 = vmatpush3.bf16.msra.mxu0 %v3990_v5  ;;  %v4009_v2 = vld [vmem:[%s5023_s1 + $0xb8] sm:$0xff]  }
  0x10   : > { %s4172_s14 = scalar_lea.vmem %s5022_s0, %s3972_s9  ;;  %3501 = vmatpush3.bf16.msra.mxu1 %v3991_v6  ;;  %3474 = vmatprep.subr.bf16.mxu0 %v4066_v1  ;;  %s4940_s12 = scalar_lea.vmem %s5028_s6, %s3972_s9 }
  0x11   : > { %v276_v9 = vld [vmem:[%s4172_s14 + $0x1] sm:$0xff]  ;;  %v277_v10 = vld [vmem:[%s4172_s14 + $0x9] sm:$0xff]  ;;  %3502 = vmatprep.subr.bf16.mxu1 %v4066_v1  ;;  %v278_v16 = vld [vmem:[%s4172_s14 + $0x11] sm:$0xff]  ;;  %3063 = vst.msk [vmem:[%s4940_s12] sm:$0xff] %vm323_vm1, %v4066_v1 }
  0x12   : > { %v253_v11 = vld [vmem:[%s4172_s14] sm:$0xff]  ;;  %v254_v12 = vld [vmem:[%s4172_s14 + $0x8] sm:$0xff]  ;;  %v286_v13 = vpack.c.bf16 %v277_v10, %v276_v9  ;;  %v255_v20 = vld [vmem:[%s4172_s14 + $0x10] sm:$0xff]  ;;  %3076 = vst.msk [vmem:[%s4940_s12 + $0x59] sm:$0xff] %vm323_vm1, %v4066_v1 }
  0x13   : > { %3475 = vmatpush3.bf16.msra.mxu0 %v3992_v7  ;;  %v263_v14 = vpack.c.bf16 %v254_v12, %v253_v11  ;;  %v279_v17 = vld [vmem:[%s4172_s14 + $0x19] sm:$0xff]  ;;  %v280_v27 = vld [vmem:[%s4172_s14 + $0x21] sm:$0xff]  ;;  %v281_v28 = vld [vmem:[%s4172_s14 + $0x29] sm:$0xff]  ;;  %3065 = vst.msk [vmem:[%s4940_s12 + $0x8] sm:$0x7] %vm3064_vm4, %v4066_v1 }
  0x14   : > { %3503 = vmatpush3.bf16.msra.mxu1 %v3993_v8  ;;  %3524 = vmatprep.subr.bf16.mxu0 %v4066_v1  ;;  %v256_v21 = vld [vmem:[%s4172_s14 + $0x18] sm:$0xff]  ;;  %v287_v23 = vpack.c.bf16 %v279_v17, %v278_v16  ;;  %v257_v29 = vld [vmem:[%s4172_s14 + $0x20] sm:$0xff]  ;;  %v258_v30 = vld [vmem:[%s4172_s14 + $0x28] sm:$0xff]  ;;  %v288_v33 = vpack.c.bf16 %v281_v28, %v280_v27  ;;  %3077 = vst.msk [vmem:[%s4940_s12 + $0x61] sm:$0x7] %vm3064_vm4, %v4066_v1 }
  0x15   : > { %3552 = vmatprep.subr.bf16.mxu1 %v4066_v1  ;;  %v264_v24 = vpack.c.bf16 %v256_v21, %v255_v20  ;;  %v265_v34 = vpack.c.bf16 %v258_v30, %v257_v29  ;;  %v282_v35 = vld [vmem:[%s4172_s14 + $0x31] sm:$0xff]  ;;  %v283_v36 = vld [vmem:[%s4172_s14 + $0x39] sm:$0xff]  ;;  %v284_v41 = vld [vmem:[%s4172_s14 + $0x41] sm:$0xff] }
  0x16   : > { %3477 = vmatmul.mubr.msk.bf16.vlgmr.msra.gmra.mrb[0].mxu0 %vm323_vm1, %v286_v13  ;;  %v259_v37 = vld [vmem:[%s4172_s14 + $0x30] sm:$0xff]  ;;  %v260_v38 = vld [vmem:[%s4172_s14 + $0x38] sm:$0xff]  ;;  %v289_v39 = vpack.c.bf16 %v283_v36, %v282_v35  ;;  %v285_v42 = vld [vmem:[%s4172_s14 + $0x49] sm:$0x3f] }
  0x17   : > { %3505 = vmatmul.mubr.msk.bf16.vlgmr.msra.gmra.mrb[0].mxu1 %vm323_vm1, %v263_v14  ;;  %3525 = vmatpush3.bf16.msra.mxu0 %v3994_v15  ;;  %v266_v40 = vpack.c.bf16 %v260_v38, %v259_v37  ;;  %v261_v43 = vld [vmem:[%s4172_s14 + $0x40] sm:$0xff]  ;;  %v262_v44 = vld [vmem:[%s4172_s14 + $0x48] sm:$0x3f]  ;;  %v290_v45 = vpack.c.bf16 %v285_v42, %v284_v41  ;;  %v670_v49 = vld [vmem:[%s4172_s14 + $0x12] sm:$0xff] }
  0x18   : > { %3480 = vmatprep.mubr.msk.bf16.mxu0 %vm4067_vm0, %v4066_v1  ;;  %3508 = vmatprep.mubr.msk.bf16.mxu1 %vm4067_vm0, %v4066_v1  ;;  %v267_v46 = vpack.c.bf16 %v262_v44, %v261_v43  ;;  %v524_v47 = vld [vmem:[%s4172_s14 + $0x2] sm:$0xff]  ;;  %v525_v48 = vld [vmem:[%s4172_s14 + $0xa] sm:$0xff]  ;;  %v527_v54 = vld [vmem:[%s4172_s14 + $0x1a] sm:$0xff] }
  0x19   : > { %3526 = vmatprep.subr.bf16.mxu0 %v4066_v1  ;;  %3553 = vmatpush3.bf16.msra.mxu1 %v3997_v18  ;;  %v534_v50 = vpack.c.bf16 %v525_v48, %v524_v47  ;;  %v679_v52 = vpack.c.bf16 %v670_v49, %v525_v48  ;;  %v672_v55 = vld [vmem:[%s4172_s14 + $0x22] sm:$0xff]  ;;  %v535_v58 = vpack.c.bf16 %v527_v54, %v670_v49  ;;  %v529_v62 = vld [vmem:[%s4172_s14 + $0x2a] sm:$0xff]  ;;  %v674_v63 = vld [vmem:[%s4172_s14 + $0x32] sm:$0xff] }
  0x1a   : > { %3554 = vmatprep.subr.bf16.mxu1 %v4066_v1  ;;  %v680_v60 = vpack.c.bf16 %v672_v55, %v527_v54  ;;  %v536_v3 = vpack.c.bf16 %v529_v62, %v672_v55  ;;  %v681_v4 = vpack.c.bf16 %v674_v63, %v529_v62  ;;  %v531_v5 = vld [vmem:[%s4172_s14 + $0x3a] sm:$0xff]  ;;  %v676_v6 = vld [vmem:[%s4172_s14 + $0x42] sm:$0xff]  ;;  %v533_v9 = vld [vmem:[%s4172_s14 + $0x4a] sm:$0x3f] }
  0x1b   : > { %3527 = vmatpush3.bf16.msra.mxu0 %v3995_v19  ;;  %v537_v7 = vpack.c.bf16 %v531_v5, %v674_v63  ;;  %v682_v8 = vpack.c.bf16 %v676_v6, %v531_v5  ;;  %v677_v10 = vld [vmem:[%s4172_s14 + $0x4a] sm:$0xff]  ;;  %v678_v11 = vld [vmem:[%s4172_s14 + $0x52] sm:$0x3f]  ;;  %v538_v12 = vpack.c.bf16 %v533_v9, %v676_v6  ;;  %v4010_v19 = vld [vmem:[%s5023_s1 + $0xc0] sm:$0xff]  }
  0x1c   : > { %3528 = vmatprep.subr.bf16.mxu0 %v4066_v1  ;;  %v683_v13 = vpack.c.bf16 %v678_v11, %v677_v10  ;;  %v814_v14 = vld [vmem:[%s4172_s14 + $0xb] sm:$0xff]  ;;  %v815_v15 = vld [vmem:[%s4172_s14 + $0x13] sm:$0xff]  ;;  %v4013_v21 = vld [vmem:[%s5023_s1 + $0xe0] sm:$0xff]  }
  0x1d   : > { %3555 = vmatpush3.bf16.msra.mxu1 %v3999_v22  ;;  %v959_v16 = vld [vmem:[%s4172_s14 + $0xc] sm:$0xff]  ;;  %v4344_v17 = vld [vmem:[%s4172_s14 + $0x14] sm:$0xff]  ;;  %v824_v18 = vpack.c.bf16 %v815_v15, %v814_v14  ;;  %v1570_v44 = vld [vmem:[%s5027_s5 + $0x20] sm:$0xff] }
  0x1e   : > { %3481 = vmatmul.mubr.msk.bf16.gmra.mrb[4].mxu0 %vm323_vm1, %v287_v23  ;;  %3556 = vmatprep.subr.bf16.mxu1 %v4066_v1  ;;  %v969_v20 = vpack.c.bf16 %v4344_v17, %v959_v16  ;;  %v816_v22 = vld [vmem:[%s4172_s14 + $0x1b] sm:$0xff]  ;;  %v817_v23 = vld [vmem:[%s4172_s14 + $0x23] sm:$0xff]  ;;  %v4012_v30 = vld [vmem:[%s5023_s1 + $0xd0] sm:$0xff]  }
  0x1f   : > { %3509 = vmatmul.mubr.msk.bf16.gmra.mrb[4].mxu1 %vm323_vm1, %v264_v24  ;;  %3484 = vmatprep.mubr.msk.bf16.mxu0 %vm4067_vm0, %v4066_v1  ;;  %v4011_v24 = vld [vmem:[%s5023_s1 + $0xc8] sm:$0xff]   ;;  %v825_v28 = vpack.c.bf16 %v817_v23, %v816_v22  ;;  %v819_v35 = vld [vmem:[%s4172_s14 + $0x33] sm:$0xff]  ;;  %v4437_v48 = vld [vmem:[%s4172_s14 + $0x3c] sm:$0xff] }
  0x20   : > { %3512 = vmatprep.mubr.msk.bf16.mxu1 %vm4067_vm0, %v4066_v1  ;;  %3529 = vmatpush3.bf16.msra.mxu0 %v3996_v25  ;;  %v4365_v25 = vld [vmem:[%s4172_s14 + $0x1c] sm:$0xff]  ;;  %v4015_v27 = vld [vmem:[%s5023_s1 + $0xe8] sm:$0xff]   ;;  %v4405_v38 = vld [vmem:[%s4172_s14 + $0x34] sm:$0xff] }
  0x21   : > { %3530 = vmatprep.subr.bf16.mxu0 %v4066_v1  ;;  %3557 = vmatpush3.bf16.msra.mxu1 %v4000_v26  ;;  %v4368_v26 = vld [vmem:[%s4172_s14 + $0x24] sm:$0xff]  ;;  %v4402_v37 = vld [vmem:[%s4172_s14 + $0x2c] sm:$0xff]  ;;  %v1569_v47 = vld [vmem:[%s5027_s5 + $0x18] sm:$0xff]  ;;  %v1116_v15 = vpack.c.bf16 %v4437_v48, %v4405_v38 }
  0x22   : > { %3558 = vmatprep.subr.bf16.mxu1 %v4066_v1  ;;  %v970_v29 = vpack.c.bf16 %v4368_v26, %v4365_v25  ;;  %v4397_v36 = vld [vmem:[%s5027_s5 + $0x8] sm:$0xff]  ;;  %v971_v42 = vpack.c.bf16 %v4405_v38, %v4402_v37  ;;  %v1568_v43 = vld [vmem:[%s5027_s5 + $0x10] sm:$0xff]  ;;  %v1574_v54 = vld [vmem:[%s5027_s5 + $0x40] sm:$0xff] }
  0x23   : > { %v4440_v49 = vld [vmem:[%s4172_s14 + $0x44] sm:$0xff]  ;;  %v1249_v63 = vld [vmem:[%s4172_s14 + $0x15] sm:$0xff] }
  0x24   : > { %3531 = vmatpush3.bf16.msra.mxu0 %v3998_v31  ;;  %v4068_v31 = vmov 0   ;;  %v822_v55 = vld [vmem:[%s4172_s14 + $0x4b] sm:$0xff]  ;;  %v4021_v14 = vld [vmem:[%s5023_s1 + $0x118] sm:$0xff]  }
  0x25   : > { %3559 = vmatpush3.bf16.msra.mxu1 %v4001_v32  ;;  %3580 = vmatprep.subr.bf16.mxu0 %v4066_v1  ;;  %v1566_v32 = vld [vmem:[%s5027_s5] sm:$0xff]  ;;  %v1575_v62 = vld [vmem:[%s5027_s5 + $0x48] sm:$0x3f]  ;;  %v4020_v10 = vld [vmem:[%s5023_s1 + $0x110] sm:$0xff]  }
  0x26   : > { %3485 = vmatmul.mubr.msk.bf16.gmra.mrb[8].mxu0 %vm323_vm1, %v288_v33  ;;  %3608 = vmatprep.subr.bf16.mxu1 %v4066_v1  ;;  %v4016_v33 = vld [vmem:[%s5023_s1 + $0xf0] sm:$0xff]   ;;  %v4019_v5 = vld [vmem:[%s5023_s1 + $0x108] sm:$0xff]   ;;  %v1113_v22 = vld [vmem:[%s4172_s14 + $0x5c] sm:$0x3f] }
  0x27   : > { %3513 = vmatmul.mubr.msk.bf16.gmra.mrb[8].mxu1 %vm323_vm1, %v265_v34  ;;  %3488 = vmatprep.mubr.msk.bf16.mxu0 %vm4067_vm0, %v4066_v1  ;;  %v818_v34 = vld [vmem:[%s4172_s14 + $0x2b] sm:$0xff]  ;;  %v1257_v23 = vld [vmem:[%s4172_s14 + $0x55] sm:$0xff] }
  0x28   : > { %3516 = vmatprep.mubr.msk.bf16.mxu1 %vm4067_vm0, %v4066_v1  ;;  %3984 = vset.pattern.permute.xlu0 %v4068_v31  ;;  %v826_v41 = vpack.c.bf16 %v819_v35, %v818_v34  ;;  %v1251_v6 = vld [vmem:[%s4172_s14 + $0x25] sm:$0xff] }
  0x29   : > { %1578 = vperm.xlu0 %3984, %v1566_v32   ;;  %3985 = vset.pattern.permute.xlu1 %v4068_v31  ;;  %v3002_v11 = vld [vmem:[%s5027_s5 + $0x48] sm:$0x3f]  ;;  %v1397_v31 = vld [vmem:[%s4172_s14 + $0x2e] sm:$0xff]  ;;  %v1399_v34 = vld [vmem:[%s4172_s14 + $0x3e] sm:$0xff] }
  0x2a   : > { %1588 = vperm.xlu1 %3985, %v1568_v43  }
  0x2d   : > { %1583 = vperm.xlu0 %3984, %v4397_v36  }
  0x2e   : > { %3489 = vmatmul.mubr.msk.bf16.gmra.mrb[12].mxu0 %vm323_vm1, %v289_v39  ;;  %v4014_v39 = vld [vmem:[%s5023_s1 + $0xd8] sm:$0xff]   ;;  %1593 = vperm.xlu1 %3985, %v1569_v47  }
  0x2f   : > { %3517 = vmatmul.mubr.msk.bf16.gmra.mrb[12].mxu1 %vm323_vm1, %v266_v40  ;;  %3492 = vmatprep.mubr.msk.bf16.mxu0 %vm4067_vm0, %v4066_v1  ;;  %v4017_v40 = vld [vmem:[%s5023_s1 + $0xf8] sm:$0xff]  }
  0x30   : > { %3520 = vmatprep.mubr.msk.bf16.mxu1 %vm4067_vm0, %v4066_v1 }
  0x31   : > { %1598 = vperm.xlu0 %3984, %v1570_v44  }
  0x36   : > { %3493 = vmatmul.mubr.msk.bf16.gmra.mrb[16].mxu0 %vm323_vm1, %v290_v45  ;;  %v820_v45 = vld [vmem:[%s4172_s14 + $0x3b] sm:$0xff] }
  0x37   : > { %3521 = vmatmul.mubr.msk.bf16.gmra.mrb[16].mxu1 %vm323_vm1, %v267_v46  ;;  %3532 = vmatprep.mubr.msk.bf16.mxu0 %vm4067_vm0, %v4066_v1  ;;  %v821_v46 = vld [vmem:[%s4172_s14 + $0x43] sm:$0xff] }
  0x38   : > { %3560 = vmatprep.mubr.msk.bf16.mxu1 %vm4067_vm0, %v4066_v1 }
  0x3e   : > { %3533 = vmatmul.mubr.msk.bf16.vlgmr.msra.gmra.mrb[20].mxu0 %vm323_vm1, %v534_v50  ;;  %v1572_v50 = vld [vmem:[%s5027_s5 + $0x30] sm:$0xff] }
  0x3f   : > { %3581 = vmatpush3.bf16.msra.mxu0 %v4002_v51  ;;  %3561 = vmatmul.mubr.msk.bf16.vlgmr.msra.gmra.mrb[20].mxu1 %vm323_vm1, %v679_v52  ;;  %v827_v51 = vpack.c.bf16 %v821_v46, %v820_v45  ;;  %v972_v52 = vpack.c.bf16 %v4440_v49, %v4437_v48 }
  0x40   : > { %3536 = vmatprep.mubr.msk.bf16.mxu0 %vm4067_vm0, %v4066_v1  ;;  %3564 = vmatprep.mubr.msk.bf16.mxu1 %vm4067_vm0, %v4066_v1 }
  0x41   : > { %3582 = vmatprep.subr.bf16.mxu0 %v4066_v1  ;;  %3609 = vmatpush3.bf16.msra.mxu1 %v4005_v53  ;;  %v1571_v53 = vld [vmem:[%s5027_s5 + $0x28] sm:$0xff] }
  0x42   : > { %3610 = vmatprep.subr.bf16.mxu1 %v4066_v1  ;;  %1608 = vperm.xlu0 %3984, %v1572_v50  }
  0x43   : > { %3583 = vmatpush3.bf16.msra.mxu0 %v4003_v56  ;;  %1603 = vperm.xlu1 %3985, %v1571_v53   ;;  %v823_v56 = vld [vmem:[%s4172_s14 + $0x53] sm:$0x3f] }
  0x44   : > { %3584 = vmatprep.subr.bf16.mxu0 %v4066_v1 }
  0x45   : > { %3611 = vmatpush3.bf16.msra.mxu1 %v4007_v57  ;;  %v1573_v57 = vld [vmem:[%s5027_s5 + $0x38] sm:$0xff] }
  0x46   : > { %3537 = vmatmul.mubr.msk.bf16.gmra.mrb[24].mxu0 %vm323_vm1, %v535_v58  ;;  %3612 = vmatprep.subr.bf16.mxu1 %v4066_v1  ;;  %v4466_v58 = vld [vmem:[%s4172_s14 + $0x4c] sm:$0xff] }
  0x47   : > { %3565 = vmatmul.mubr.msk.bf16.gmra.mrb[24].mxu1 %vm323_vm1, %v680_v60  ;;  %3540 = vmatprep.mubr.msk.bf16.mxu0 %vm4067_vm0, %v4066_v1  ;;  %v828_v60 = vpack.c.bf16 %v823_v56, %v822_v55 }
  0x48   : > { %3568 = vmatprep.mubr.msk.bf16.mxu1 %vm4067_vm0, %v4066_v1  ;;  %3585 = vmatpush3.bf16.msra.mxu0 %v4004_v59  ;;  %v968_v59 = vld [vmem:[%s4172_s14 + $0x54] sm:$0x3f] }
  0x49   : > { %3586 = vmatprep.subr.bf16.mxu0 %v4066_v1  ;;  %3613 = vmatpush3.bf16.msra.mxu1 %v4008_v61  ;;  %v973_v61 = vpack.c.bf16 %v968_v59, %v4466_v58 }
  0x4a   : > { %3614 = vmatprep.subr.bf16.mxu1 %v4066_v1  ;;  %1618 = vperm.xlu0 %3984, %v1574_v54  }
  0x4b   : > { %1613 = vperm.xlu1 %3985, %v1573_v57  }
  0x4c   : > { %3587 = vmatpush3.bf16.msra.mxu0 %v4006_v0  ;;  %v1250_v0 = vld [vmem:[%s4172_s14 + $0x1d] sm:$0xff] }
  0x4d   : > { %3615 = vmatpush3.bf16.msra.mxu1 %v4009_v2  ;;  %3636 = vmatprep.subr.bf16.mxu0 %v4066_v1  ;;  %v1114_v2 = vpack.c.bf16 %v4365_v25, %v4344_v17  ;;  %v1255_v17 = vld [vmem:[%s4172_s14 + $0x45] sm:$0xff] }
  0x4e   : > { %3541 = vmatmul.mubr.msk.bf16.gmra.mrb[28].mxu0 %vm323_vm1, %v536_v3  ;;  %3664 = vmatprep.subr.bf16.mxu1 %v4066_v1  ;;  %v4018_v3 = vld [vmem:[%s5023_s1 + $0x100] sm:$0xff]  }
  0x4f   : > { %3569 = vmatmul.mubr.msk.bf16.gmra.mrb[28].mxu1 %vm323_vm1, %v681_v4  ;;  %3544 = vmatprep.mubr.msk.bf16.mxu0 %vm4067_vm0, %v4066_v1  ;;  %v1259_v4 = vpack.c.bf16 %v1250_v0, %v1249_v63 }
  0x50   : > { %3572 = vmatprep.mubr.msk.bf16.mxu1 %vm4067_vm0, %v4066_v1  ;;  %3005 = vperm.xlu0 %3984, %v1566_v32  }
  0x51   : > { %1623 = vperm.xlu1 %3985, %v1575_v62   ;;  %v4022_v62 = vld [vmem:[%s5025_s3 + $0x20] sm:$0xff]  }
  0x54   : > { %3015 = vperm.xlu0 %3984, %v1568_v43  }
  0x55   : > { %3010 = vperm.xlu1 %3985, %v4397_v36   ;;  %v1400_v36 = vld [vmem:[%s4172_s14 + $0x46] sm:$0xff] }
  0x56   : > { %3545 = vmatmul.mubr.msk.bf16.gmra.mrb[32].mxu0 %vm323_vm1, %v537_v7  ;;  %v1252_v7 = vld [vmem:[%s4172_s14 + $0x2d] sm:$0xff] }
  0x57   : > { %3573 = vmatmul.mubr.msk.bf16.gmra.mrb[32].mxu1 %vm323_vm1, %v682_v8  ;;  %3548 = vmatprep.mubr.msk.bf16.mxu0 %vm4067_vm0, %v4066_v1  ;;  %v1115_v8 = vpack.c.bf16 %v4402_v37, %v4368_v26  ;;  %v1260_v9 = vpack.c.bf16 %v1252_v7, %v1251_v6  ;;  %v1401_v37 = vld [vmem:[%s4172_s14 + $0x4e] sm:$0xff] }
  0x58   : > { %3576 = vmatprep.mubr.msk.bf16.mxu1 %vm4067_vm0, %v4066_v1  ;;  %3025 = vperm.xlu0 %3984, %v1570_v44   ;;  %v1407_v38 = vpack.c.bf16 %v1401_v37, %v1400_v36  ;;  %v4024_v37 = vld [vmem:[%s5025_s3 + $0x30] sm:$0xff]  }
  0x59   : > { %3020 = vperm.xlu1 %3985, %v1569_v47  }
  0x5c   : > { %3035 = vperm.xlu0 %3984, %v1572_v50  }
  0x5d   : > { %3030 = vperm.xlu1 %3985, %v1571_v53  }
  0x5e   : > { %3549 = vmatmul.mubr.msk.bf16.gmra.mrb[36].mxu0 %vm323_vm1, %v538_v12  ;;  %v1253_v12 = vld [vmem:[%s4172_s14 + $0x35] sm:$0xff] }
  0x5f   : > { %3577 = vmatmul.mubr.msk.bf16.gmra.mrb[36].mxu1 %vm323_vm1, %v683_v13  ;;  %3588 = vmatprep.mubr.msk.bf16.mxu0 %vm4067_vm0, %v4066_v1  ;;  %v1254_v13 = vld [vmem:[%s4172_s14 + $0x3d] sm:$0xff] }
  0x60   : > { %3616 = vmatprep.mubr.msk.bf16.mxu1 %vm4067_vm0, %v4066_v1  ;;  %3045 = vperm.xlu0 %3984, %v1574_v54   ;;  %v1261_v16 = vpack.c.bf16 %v1254_v13, %v1253_v12 }
  0x61   : > { %3040 = vperm.xlu1 %3985, %v1573_v57  }
  0x65   : > { %3050 = vperm.xlu1 %3985, %v3002_v11  }
  0x66   : > { %3589 = vmatmul.mubr.msk.bf16.vlgmr.msra.gmra.mrb[40].mxu0 %vm323_vm1, %v824_v18  ;;  %v1256_v18 = vld [vmem:[%s4172_s14 + $0x4d] sm:$0xff] }
  0x67   : > { %3637 = vmatpush3.bf16.msra.mxu0 %v4010_v19  ;;  %3617 = vmatmul.mubr.msk.bf16.vlgmr.msra.gmra.mrb[40].mxu1 %vm323_vm1, %v969_v20  ;;  %v1117_v19 = vpack.c.bf16 %v4466_v58, %v4440_v49  ;;  %v1262_v20 = vpack.c.bf16 %v1256_v18, %v1255_v17 }
  0x68   : > { %3592 = vmatprep.mubr.msk.bf16.mxu0 %vm4067_vm0, %v4066_v1  ;;  %3620 = vmatprep.mubr.msk.bf16.mxu1 %vm4067_vm0, %v4066_v1 }
  0x69   : > { %3638 = vmatprep.subr.bf16.mxu0 %v4066_v1  ;;  %3665 = vmatpush3.bf16.msra.mxu1 %v4013_v21  ;;  %v1112_v21 = vld [vmem:[%s4172_s14 + $0x54] sm:$0xff] }
  0x6a   : > { %3666 = vmatprep.subr.bf16.mxu1 %v4066_v1  ;;  %v1118_v25 = vpack.c.bf16 %v1113_v22, %v1112_v21 }
  0x6b   : > { %3639 = vmatpush3.bf16.msra.mxu0 %v4011_v24  ;;  %v1258_v24 = vld [vmem:[%s4172_s14 + $0x5d] sm:$0x3f] }
  0x6c   : > { %3640 = vmatprep.subr.bf16.mxu0 %v4066_v1  ;;  %v1263_v26 = vpack.c.bf16 %v1258_v24, %v1257_v23 }
  0x6d   : > { %3667 = vmatpush3.bf16.msra.mxu1 %v4015_v27  ;;  %v1394_v27 = vld [vmem:[%s4172_s14 + $0x16] sm:$0xff] }
  0x6e   : > { %3593 = vmatmul.mubr.msk.bf16.gmra.mrb[44].mxu0 %vm323_vm1, %v825_v28  ;;  %3668 = vmatprep.subr.bf16.mxu1 %v4066_v1  ;;  %v1395_v28 = vld [vmem:[%s4172_s14 + $0x1e] sm:$0xff] }
  0x6f   : > { %3621 = vmatmul.mubr.msk.bf16.gmra.mrb[44].mxu1 %vm323_vm1, %v970_v29  ;;  %3596 = vmatprep.mubr.msk.bf16.mxu0 %vm4067_vm0, %v4066_v1  ;;  %v1404_v29 = vpack.c.bf16 %v1395_v28, %v1394_v27 }
  0x70   : > { %3624 = vmatprep.mubr.msk.bf16.mxu1 %vm4067_vm0, %v4066_v1  ;;  %3641 = vmatpush3.bf16.msra.mxu0 %v4012_v30  ;;  %v1396_v30 = vld [vmem:[%s4172_s14 + $0x26] sm:$0xff] }
  0x71   : > { %3642 = vmatprep.subr.bf16.mxu0 %v4066_v1  ;;  %3669 = vmatpush3.bf16.msra.mxu1 %v4016_v33  ;;  %v1405_v32 = vpack.c.bf16 %v1397_v31, %v1396_v30  ;;  %v1398_v33 = vld [vmem:[%s4172_s14 + $0x36] sm:$0xff] }
  0x72   : > { %3670 = vmatprep.subr.bf16.mxu1 %v4066_v1  ;;  %v1406_v35 = vpack.c.bf16 %v1399_v34, %v1398_v33 }
  0x74   : > { %3643 = vmatpush3.bf16.msra.mxu0 %v4014_v39  ;;  %v1402_v39 = vld [vmem:[%s4172_s14 + $0x56] sm:$0xff] }
  0x75   : > { %3671 = vmatpush3.bf16.msra.mxu1 %v4017_v40  ;;  %3692 = vmatprep.subr.bf16.mxu0 %v4066_v1  ;;  %v1403_v40 = vld [vmem:[%s4172_s14 + $0x5e] sm:$0x3f] }
  0x76   : > { %3597 = vmatmul.mubr.msk.bf16.gmra.mrb[48].mxu0 %vm323_vm1, %v826_v41  ;;  %3720 = vmatprep.subr.bf16.mxu1 %v4066_v1  ;;  %v1408_v41 = vpack.c.bf16 %v1403_v40, %v1402_v39 }
  0x77   : > { %3625 = vmatmul.mubr.msk.bf16.gmra.mrb[48].mxu1 %vm323_vm1, %v971_v42  ;;  %3600 = vmatprep.mubr.msk.bf16.mxu0 %vm4067_vm0, %v4066_v1 }
  0x78   : > { %3628 = vmatprep.mubr.msk.bf16.mxu1 %vm4067_vm0, %v4066_v1 }
  0x7e   : > { %3601 = vmatmul.mubr.msk.bf16.gmra.mrb[52].mxu0 %vm323_vm1, %v827_v51 }
  0x7f   : > { %3629 = vmatmul.mubr.msk.bf16.gmra.mrb[52].mxu1 %vm323_vm1, %v972_v52  ;;  %3604 = vmatprep.mubr.msk.bf16.mxu0 %vm4067_vm0, %v4066_v1 }
  0x80   : > { %3632 = vmatprep.mubr.msk.bf16.mxu1 %vm4067_vm0, %v4066_v1 }
  0x86   : > { %3605 = vmatmul.mubr.msk.bf16.gmra.mrb[56].mxu0 %vm323_vm1, %v828_v60 }
  0x87   : > { %3633 = vmatmul.mubr.msk.bf16.gmra.mrb[56].mxu1 %vm323_vm1, %v973_v61  ;;  %3644 = vmatprep.mubr.msk.bf16.mxu0 %vm4067_vm0, %v4066_v1 }
  0x88   : > { %3672 = vmatprep.mubr.msk.bf16.mxu1 %vm4067_vm0, %v4066_v1 }
  0x8e   : > { %3645 = vmatmul.mubr.msk.bf16.vlgmr.msra.gmra.mrb[60].mxu0 %vm323_vm1, %v1114_v2 }
  0x8f   : > { %3693 = vmatpush3.bf16.msra.mxu0 %v4018_v3  ;;  %3673 = vmatmul.mubr.msk.bf16.vlgmr.msra.gmra.mrb[60].mxu1 %vm323_vm1, %v1259_v4 }
  0x90   : > { %3648 = vmatprep.mubr.msk.bf16.mxu0 %vm4067_vm0, %v4066_v1  ;;  %3676 = vmatprep.mubr.msk.bf16.mxu1 %vm4067_vm0, %v4066_v1 }
  0x91   : > { %3694 = vmatprep.subr.bf16.mxu0 %v4066_v1  ;;  %3721 = vmatpush3.bf16.msra.mxu1 %v4022_v62 }
  0x92   : > { %3722 = vmatprep.subr.bf16.mxu1 %v4066_v1 }
  0x93   : > { %3695 = vmatpush3.bf16.msra.mxu0 %v4019_v5 }
  0x94   : > { %3696 = vmatprep.subr.bf16.mxu0 %v4066_v1 }
  0x96   : > { %3649 = vmatmul.mubr.msk.bf16.gmra.mrb[64].mxu0 %vm323_vm1, %v1115_v8 }
  0x97   : > { %3677 = vmatmul.mubr.msk.bf16.gmra.mrb[64].mxu1 %vm323_vm1, %v1260_v9  ;;  %3652 = vmatprep.mubr.msk.bf16.mxu0 %vm4067_vm0, %v4066_v1 }
  0x98   : > { %3680 = vmatprep.mubr.msk.bf16.mxu1 %vm4067_vm0, %v4066_v1  ;;  %3697 = vmatpush3.bf16.msra.mxu0 %v4020_v10  ;;  %v4023_v10 = vld [vmem:[%s5025_s3 + $0x28] sm:$0xff]  }
  0x99   : > { %3698 = vmatprep.subr.bf16.mxu0 %v4066_v1  ;;  %3723 = vmatpush3.bf16.msra.mxu1 %v4023_v10 }
  0x9a   : > { %3724 = vmatprep.subr.bf16.mxu1 %v4066_v1 }
  0x9c   : > { %3699 = vmatpush3.bf16.msra.mxu0 %v4021_v14 }
  0x9d   : > { %3748 = vmatprep.subr.bf16.mxu0 %v4066_v1  ;;  %3725 = vmatpush3.bf16.msra.mxu1 %v4024_v37 }
  0x9e   : > { %3653 = vmatmul.mubr.msk.bf16.gmra.mrb[68].mxu0 %vm323_vm1, %v1116_v15  ;;  %3726 = vmatprep.subr.bf16.mxu1 %v4066_v1 }
  0x9f   : > { %3681 = vmatmul.mubr.msk.bf16.gmra.mrb[68].mxu1 %vm323_vm1, %v1261_v16  ;;  %3656 = vmatprep.mubr.msk.bf16.mxu0 %vm4067_vm0, %v4066_v1 }
  0xa0   : > { %3684 = vmatprep.mubr.msk.bf16.mxu1 %vm4067_vm0, %v4066_v1 }
  0xa6   : > { %3657 = vmatmul.mubr.msk.bf16.gmra.mrb[72].mxu0 %vm323_vm1, %v1117_v19 }
  0xa7   : > { %3685 = vmatmul.mubr.msk.bf16.gmra.mrb[72].mxu1 %vm323_vm1, %v1262_v20  ;;  %3660 = vmatprep.mubr.msk.bf16.mxu0 %vm4067_vm0, %v4066_v1 }
  0xa8   : > { %3688 = vmatprep.mubr.msk.bf16.mxu1 %vm4067_vm0, %v4066_v1 }
  0xae   : > { %3661 = vmatmul.mubr.msk.bf16.gmra.mrb[76].mxu0 %vm323_vm1, %v1118_v25 }
  0xaf   : > { %3689 = vmatmul.mubr.msk.bf16.gmra.mrb[76].mxu1 %vm323_vm1, %v1263_v26  ;;  %3700 = vmatprep.mubr.msk.bf16.mxu0 %vm4067_vm0, %v4066_v1 }
  0xb0   : > { %3728 = vmatprep.mubr.msk.bf16.mxu1 %vm4067_vm0, %v4066_v1 }
  0xb6   : > { %3701 = vmatmul.mubr.msk.bf16.vlgmr.msra.gmra.mrb[80].mxu0 %vm323_vm1, %v1404_v29  ;;  %v4025_v29 = vld [vmem:[%s5025_s3] sm:$0xff]  }
  0xb7   : > { %3704 = vmatprep.mubr.msk.bf16.mxu0 %vm4067_vm0, %v4066_v1  ;;  %3749 = vmatpush3.bf16.msra.mxu0 %v4025_v29 }
  0xb8   : > { %3750 = vmatprep.subr.bf16.mxu0 %v4066_v1 }
  0xbe   : > { %3705 = vmatmul.mubr.msk.bf16.gmra.mrb[84].mxu0 %vm323_vm1, %v1405_v32  ;;  %v4026_v32 = vld [vmem:[%s5025_s3 + $0x8] sm:$0xff]  }
  0xbf   : > { %3708 = vmatprep.mubr.msk.bf16.mxu0 %vm4067_vm0, %v4066_v1  ;;  %3751 = vmatpush3.bf16.msra.mxu0 %v4026_v32 }
  0xc0   : > { %3752 = vmatprep.subr.bf16.mxu0 %v4066_v1 }
  0xc6   : > { %3709 = vmatmul.mubr.msk.bf16.gmra.mrb[88].mxu0 %vm323_vm1, %v1406_v35 }
  0xc7   : > { %3712 = vmatprep.mubr.msk.bf16.mxu0 %vm4067_vm0, %v4066_v1 }
  0xce   : > { %3713 = vmatmul.mubr.msk.bf16.gmra.mrb[92].mxu0 %vm323_vm1, %v1407_v38 }
  0xcf   : > { %3716 = vmatprep.mubr.msk.bf16.mxu0 %vm4067_vm0, %v4066_v1 }
  0xd6   : > { %3717 = vmatmul.mubr.msk.bf16.gmra.mrb[96].mxu0 %vm323_vm1, %v1408_v41 }
  0xd7   : > { %3756 = vmatprep.mubr.msk.bf16.mxu0 %vm4067_vm0, %v4066_v1 }
  0xe9   : > { %v373_v42 = vpop.f32.mrb[0].mxu0 }
  0xea   : > { %v485_v43 = vpop.f32.mrb[0].mxu1  ;;  %v3478_v44 = vpop.f32.mrb[1].mxu0 }
  0xeb   : > { %v486_v45 = vadd.f32 %v485_v43, %v373_v42  ;;  %v3506_v46 = vpop.f32.mrb[1].mxu1  ;;  %v376_v47 = vpop.f32.mrb[2].mxu0  ;;  %v4028_v44 = vld [vmem:[%s5025_s3 + $0x10] sm:$0xff]  }
  0xec   : > { %v488_v48 = vpop.f32.mrb[2].mxu1  ;;  %v3479_v49 = vpop.f32.mrb[3].mxu0  ;;  %3753 = vmatpush3.bf16.msra.mxu0 %v4028_v44 }
  0xed   : > { %v489_v50 = vadd.f32 %v488_v48, %v376_v47  ;;  %v3507_v51 = vpop.f32.mrb[3].mxu1  ;;  %3754 = vmatprep.subr.bf16.mxu0 %v4066_v1  ;;  %v4027_v47 = vld [vmem:[%s5025_s3 + $0x38] sm:$0xff]  }
  0xee   : > { %v4029_v48 = vld [vmem:[%s5025_s3 + $0x18] sm:$0xff]   ;;  %3727 = vmatpush3.bf16.msra.mxu1 %v4027_v47 }
  0xef   : > { %3776 = vmatprep.subr.bf16.mxu1 %v4066_v1 }
  0xf0   : > { %3755 = vmatpush3.bf16.msra.mxu0 %v4029_v48 }
  0xf1   : > { %v381_v52 = vpop.f32.mrb[4].mxu0  ;;  %3804 = vmatprep.subr.bf16.mxu0 %v4066_v1 }
  0xf2   : > { %v493_v53 = vpop.f32.mrb[4].mxu1  ;;  %v3482_v54 = vpop.f32.mrb[5].mxu0 }
  0xf3   : > { %v4574_v55 = vadd.f32 %v493_v53, %v381_v52  ;;  %v3510_v56 = vpop.f32.mrb[5].mxu1  ;;  %v384_v57 = vpop.f32.mrb[6].mxu0 }
  0xf4   : > { %v496_v58 = vpop.f32.mrb[6].mxu1  ;;  %v3483_v59 = vpop.f32.mrb[7].mxu0 }
  0xf5   : > { %v4576_v60 = vadd.f32 %v496_v58, %v384_v57  ;;  %v3511_v61 = vpop.f32.mrb[7].mxu1 }
  0xf9   : > { %v389_v63 = vpop.f32.mrb[8].mxu0 }
  0xfa   : > { %v501_v0 = vpop.f32.mrb[8].mxu1  ;;  %v3486_v2 = vpop.f32.mrb[9].mxu0 }
  0xfb   : > { %v4582_v3 = vadd.f32 %v501_v0, %v389_v63  ;;  %v3514_v4 = vpop.f32.mrb[9].mxu1  ;;  %v392_v5 = vpop.f32.mrb[10].mxu0 }
  0xfc   : > { %v504_v6 = vpop.f32.mrb[10].mxu1  ;;  %v3487_v7 = vpop.f32.mrb[11].mxu0 }
  0xfd   : > { %v4584_v8 = vadd.f32 %v504_v6, %v392_v5  ;;  %v3515_v9 = vpop.f32.mrb[11].mxu1 }
 0x101   : > { %v397_v11 = vpop.f32.mrb[12].mxu0 }
 0x102   : > { %v509_v12 = vpop.f32.mrb[12].mxu1  ;;  %v3490_v13 = vpop.f32.mrb[13].mxu0 }
 0x103   : > { %v4590_v14 = vadd.f32 %v509_v12, %v397_v11  ;;  %v3518_v15 = vpop.f32.mrb[13].mxu1  ;;  %v400_v16 = vpop.f32.mrb[14].mxu0 }
 0x104   : > { %v512_v17 = vpop.f32.mrb[14].mxu1  ;;  %v3491_v18 = vpop.f32.mrb[15].mxu0 }
 0x105   : > { %v4592_v19 = vadd.f32 %v512_v17, %v400_v16  ;;  %v3519_v20 = vpop.f32.mrb[15].mxu1 }
 0x109   : > { %v405_v21 = vpop.f32.mrb[16].mxu0 }
 0x10a   : > { %v517_v22 = vpop.f32.mrb[16].mxu1  ;;  %v3494_v23 = vpop.f32.mrb[17].mxu0 }
 0x10b   : > { %v4594_v24 = vadd.f32 %v517_v22, %v405_v21  ;;  %v3522_v25 = vpop.f32.mrb[17].mxu1  ;;  %v408_v26 = vpop.f32.mrb[18].mxu0 }
 0x10c   : > { %v520_v27 = vpop.f32.mrb[18].mxu1  ;;  %v3495_v28 = vpop.f32.mrb[19].mxu0 }
 0x10d   : > { %v4599_v30 = vadd.f32 %v520_v27, %v408_v26  ;;  %v3523_v31 = vpop.f32.mrb[19].mxu1 }
 0x111   : > { %v620_v33 = vpop.f32.mrb[20].mxu0 }
 0x112   : > { %v659_v34 = vadd.f32 %v620_v33, %v486_v45  ;;  %v3534_v35 = vpop.f32.mrb[21].mxu0  ;;  %v765_v36 = vpop.f32.mrb[20].mxu1 }
 0x113   : > { %v623_v38 = vpop.f32.mrb[22].mxu0  ;;  %v3562_v39 = vpop.f32.mrb[21].mxu1 }
 0x114   : > { %v660_v40 = vadd.f32 %v623_v38, %v489_v50  ;;  %v4609_v41 = vadd.f32 %v765_v36, %v659_v34  ;;  %v3535_v42 = vpop.f32.mrb[23].mxu0  ;;  %v768_v43 = vpop.f32.mrb[22].mxu1 }
 0x115   : > { %v3563_v45 = vpop.f32.mrb[23].mxu1 }
 0x116   : > { %v4615_v46 = vadd.f32 %v768_v43, %v660_v40 }
 0x119   : > { %v628_v49 = vpop.f32.mrb[24].mxu0 }
 0x11a   : > { %v661_v50 = vadd.f32 %v628_v49, %v4574_v55  ;;  %v3538_v51 = vpop.f32.mrb[25].mxu0  ;;  %v773_v52 = vpop.f32.mrb[24].mxu1 }
 0x11b   : > { %v631_v53 = vpop.f32.mrb[26].mxu0  ;;  %v3566_v54 = vpop.f32.mrb[25].mxu1 }
 0x11c   : > { %v662_v56 = vadd.f32 %v631_v53, %v4576_v60  ;;  %v806_v57 = vadd.f32 %v773_v52, %v661_v50  ;;  %v3539_v58 = vpop.f32.mrb[27].mxu0  ;;  %v776_v59 = vpop.f32.mrb[26].mxu1 }
 0x11d   : > { %v3567_v61 = vpop.f32.mrb[27].mxu1 }
 0x11e   : > { %v807_v62 = vadd.f32 %v776_v59, %v662_v56 }
 0x121   : > { %v636_v63 = vpop.f32.mrb[28].mxu0 }
 0x122   : > { %v663_v55 = vadd.f32 %v636_v63, %v4582_v3  ;;  %v3542_v0 = vpop.f32.mrb[29].mxu0  ;;  %v781_v2 = vpop.f32.mrb[28].mxu1 }
 0x123   : > { %v639_v4 = vpop.f32.mrb[30].mxu0  ;;  %v3570_v5 = vpop.f32.mrb[29].mxu1 }
 0x124   : > { %v664_v6 = vadd.f32 %v639_v4, %v4584_v8  ;;  %v808_v7 = vadd.f32 %v781_v2, %v663_v55  ;;  %v3543_v9 = vpop.f32.mrb[31].mxu0  ;;  %v784_v10 = vpop.f32.mrb[30].mxu1 }
 0x125   : > { %v3571_v11 = vpop.f32.mrb[31].mxu1 }
 0x126   : > { %v809_v12 = vadd.f32 %v784_v10, %v664_v6 }
 0x129   : > { %v644_v60 = vpop.f32.mrb[32].mxu0 }
 0x12a   : > { %v665_v13 = vadd.f32 %v644_v60, %v4590_v14  ;;  %v3546_v15 = vpop.f32.mrb[33].mxu0  ;;  %v789_v16 = vpop.f32.mrb[32].mxu1 }
 0x12b   : > { %v647_v17 = vpop.f32.mrb[34].mxu0  ;;  %v3574_v18 = vpop.f32.mrb[33].mxu1 }
 0x12c   : > { %v666_v3 = vadd.f32 %v647_v17, %v4592_v19  ;;  %v810_v20 = vadd.f32 %v789_v16, %v665_v13  ;;  %v3547_v21 = vpop.f32.mrb[35].mxu0  ;;  %v792_v22 = vpop.f32.mrb[34].mxu1 }
 0x12d   : > { %v3575_v23 = vpop.f32.mrb[35].mxu1 }
 0x12e   : > { %v811_v25 = vadd.f32 %v792_v22, %v666_v3 }
 0x131   : > { %v652_v8 = vpop.f32.mrb[36].mxu0 }
 0x132   : > { %v667_v26 = vadd.f32 %v652_v8, %v4594_v24  ;;  %v3550_v27 = vpop.f32.mrb[37].mxu0  ;;  %v797_v28 = vpop.f32.mrb[36].mxu1 }
 0x133   : > { %v655_v29 = vpop.f32.mrb[38].mxu0  ;;  %v3578_v31 = vpop.f32.mrb[37].mxu1 }
 0x134   : > { %v668_v14 = vadd.f32 %v655_v29, %v4599_v30  ;;  %v812_v32 = vadd.f32 %v797_v28, %v667_v26  ;;  %v3551_v33 = vpop.f32.mrb[39].mxu0  ;;  %v800_v34 = vpop.f32.mrb[38].mxu1 }
 0x135   : > { %v3579_v35 = vpop.f32.mrb[39].mxu1 }
 0x136   : > { %v813_v36 = vadd.f32 %v800_v34, %v668_v14 }
 0x139   : > { %v910_v19 = vpop.f32.mrb[40].mxu0 }
 0x13a   : > { %v949_v37 = vadd.f32 %v910_v19, %v4609_v41  ;;  %v3590_v38 = vpop.f32.mrb[41].mxu0  ;;  %v1055_v39 = vpop.f32.mrb[40].mxu1 }
 0x13b   : > { %v913_v24 = vpop.f32.mrb[42].mxu0  ;;  %v3618_v40 = vpop.f32.mrb[41].mxu1 }
 0x13c   : > { %v950_v42 = vadd.f32 %v913_v24, %v4615_v46  ;;  %v1094_v43 = vadd.f32 %v1055_v39, %v949_v37  ;;  %v3591_v44 = vpop.f32.mrb[43].mxu0  ;;  %v1058_v30 = vpop.f32.mrb[42].mxu1 }
 0x13d   : > { %v3619_v45 = vpop.f32.mrb[43].mxu1 }
 0x13e   : > { %v1095_v47 = vadd.f32 %v1058_v30, %v950_v42 }
 0x141   : > { %v918_v48 = vpop.f32.mrb[44].mxu0 }
 0x142   : > { %v951_v49 = vadd.f32 %v918_v48, %v806_v57  ;;  %v3594_v50 = vpop.f32.mrb[45].mxu0  ;;  %v1063_v51 = vpop.f32.mrb[44].mxu1 }
 0x143   : > { %v921_v52 = vpop.f32.mrb[46].mxu0  ;;  %v3622_v53 = vpop.f32.mrb[45].mxu1 }
 0x144   : > { %v952_v54 = vadd.f32 %v921_v52, %v807_v62  ;;  %v1096_v56 = vadd.f32 %v1063_v51, %v951_v49  ;;  %v3595_v41 = vpop.f32.mrb[47].mxu0  ;;  %v1066_v58 = vpop.f32.mrb[46].mxu1 }
 0x145   : > { %v3623_v59 = vpop.f32.mrb[47].mxu1 }
 0x146   : > { %v1097_v61 = vadd.f32 %v1066_v58, %v952_v54 }
 0x149   : > { %v926_v63 = vpop.f32.mrb[48].mxu0 }
 0x14a   : > { %v953_v55 = vadd.f32 %v926_v63, %v808_v7  ;;  %v3598_v46 = vpop.f32.mrb[49].mxu0  ;;  %v1071_v0 = vpop.f32.mrb[48].mxu1 }
 0x14b   : > { %v929_v2 = vpop.f32.mrb[50].mxu0  ;;  %v3626_v4 = vpop.f32.mrb[49].mxu1 }
 0x14c   : > { %v954_v5 = vadd.f32 %v929_v2, %v809_v12  ;;  %v1098_v6 = vadd.f32 %v1071_v0, %v953_v55  ;;  %v3599_v9 = vpop.f32.mrb[51].mxu0  ;;  %v1074_v57 = vpop.f32.mrb[50].mxu1 }
 0x14d   : > { %v3627_v10 = vpop.f32.mrb[51].mxu1 }
 0x14e   : > { %v1099_v11 = vadd.f32 %v1074_v57, %v954_v5 }
 0x151   : > { %v934_v60 = vpop.f32.mrb[52].mxu0 }
 0x152   : > { %v955_v13 = vadd.f32 %v934_v60, %v810_v20  ;;  %v3602_v62 = vpop.f32.mrb[53].mxu0  ;;  %v1079_v15 = vpop.f32.mrb[52].mxu1 }
 0x153   : > { %v937_v16 = vpop.f32.mrb[54].mxu0  ;;  %v3630_v17 = vpop.f32.mrb[53].mxu1 }
 0x154   : > { %v956_v18 = vadd.f32 %v937_v16, %v811_v25  ;;  %v1100_v3 = vadd.f32 %v1079_v15, %v955_v13  ;;  %v3603_v21 = vpop.f32.mrb[55].mxu0  ;;  %v1082_v7 = vpop.f32.mrb[54].mxu1 }
 0x155   : > { %v3631_v22 = vpop.f32.mrb[55].mxu1 }
 0x156   : > { %v1101_v23 = vadd.f32 %v1082_v7, %v956_v18 }
 0x159   : > { %v942_v8 = vpop.f32.mrb[56].mxu0 }
 0x15a   : > { %v957_v26 = vadd.f32 %v942_v8, %v812_v32  ;;  %v3606_v12 = vpop.f32.mrb[57].mxu0  ;;  %v1087_v27 = vpop.f32.mrb[56].mxu1 }
 0x15b   : > { %v945_v28 = vpop.f32.mrb[58].mxu0  ;;  %v3634_v29 = vpop.f32.mrb[57].mxu1 }
 0x15c   : > { %v958_v31 = vadd.f32 %v945_v28, %v813_v36  ;;  %v1102_v14 = vadd.f32 %v1087_v27, %v957_v26  ;;  %v3607_v33 = vpop.f32.mrb[59].mxu0  ;;  %v1090_v20 = vpop.f32.mrb[58].mxu1 }
 0x15d   : > { %v3635_v34 = vpop.f32.mrb[59].mxu1 }
 0x15e   : > { %v1103_v35 = vadd.f32 %v1090_v20, %v958_v31 }
 0x161   : > { %v1200_v19 = vpop.f32.mrb[60].mxu0 }
 0x162   : > { %v1239_v37 = vadd.f32 %v1200_v19, %v1094_v43  ;;  %v3646_v25 = vpop.f32.mrb[61].mxu0  ;;  %v1345_v38 = vpop.f32.mrb[60].mxu1  ;;  %v4652_v19 = vld [vmem:[%s5024_s2] ss:$0 sm:$0xff] }
 0x163   : > { %v1203_v39 = vpop.f32.mrb[62].mxu0  ;;  %v3674_v24 = vpop.f32.mrb[61].mxu1 }
 0x164   : > { %v1240_v40 = vadd.f32 %v1203_v39, %v1095_v47  ;;  %v1384_v42 = vadd.f32 %v1345_v38, %v1239_v37  ;;  %v3647_v44 = vpop.f32.mrb[63].mxu0  ;;  %v1348_v32 = vpop.f32.mrb[62].mxu1 }
 0x165   : > { %v3675_v30 = vpop.f32.mrb[63].mxu1  ;;  %v1579_v25 = vpop.permute.xlu0 %1578 }
 0x166   : > { %v1385_v45 = vadd.f32 %v1348_v32, %v1240_v40 }
 0x169   : > { %v1208_v48 = vpop.f32.mrb[64].mxu0 }
 0x16a   : > { %v1241_v49 = vadd.f32 %v1208_v48, %v1096_v56  ;;  %v3650_v36 = vpop.f32.mrb[65].mxu0  ;;  %v1353_v50 = vpop.f32.mrb[64].mxu1 }
 0x16b   : > { %v1211_v51 = vpop.f32.mrb[66].mxu0  ;;  %v3678_v52 = vpop.f32.mrb[65].mxu1 }
 0x16c   : > { %v1242_v53 = vadd.f32 %v1211_v51, %v1097_v61  ;;  %v1386_v54 = vadd.f32 %v1353_v50, %v1241_v49  ;;  %v3651_v41 = vpop.f32.mrb[67].mxu0  ;;  %v1356_v43 = vpop.f32.mrb[66].mxu1 }
 0x16d   : > { %v3679_v58 = vpop.f32.mrb[67].mxu1  ;;  %v1584_v48 = vpop.permute.xlu0 %1583 }
 0x16e   : > { %v1387_v59 = vadd.f32 %v1356_v43, %v1242_v53 }
 0x171   : > { %v1216_v63 = vpop.f32.mrb[68].mxu0 }
 0x172   : > { %v1243_v55 = vadd.f32 %v1216_v63, %v1098_v6  ;;  %v3654_v47 = vpop.f32.mrb[69].mxu0  ;;  %v1361_v46 = vpop.f32.mrb[68].mxu1  ;;  %v1684_v63 = vld [vmem:[#allocation2 + $0x1] sm:$0xff] }
 0x173   : > { %v1219_v0 = vpop.f32.mrb[70].mxu0  ;;  %v3682_v2 = vpop.f32.mrb[69].mxu1 }
 0x174   : > { %v1244_v4 = vadd.f32 %v1219_v0, %v1099_v11  ;;  %v4637_v5 = vadd.f32 %v1361_v46, %v1243_v55  ;;  %v3655_v56 = vpop.f32.mrb[71].mxu0  ;;  %v1364_v9 = vpop.f32.mrb[70].mxu1  ;;  %v1661_v55 = vld [vmem:[#allocation2] sm:$0xff] }
 0x175   : > { %v3683_v57 = vpop.f32.mrb[71].mxu1  ;;  %v4030_v56 = vld [vmem:[%s5025_s3 + $0x40] sm:$0xff]  }
 0x176   : > { %v4639_v10 = vadd.f32 %v1364_v9, %v1244_v4 }
 0x179   : > { %v1224_v61 = vpop.f32.mrb[72].mxu0 }
 0x17a   : > { %v1245_v60 = vadd.f32 %v1224_v61, %v1100_v3  ;;  %v3658_v13 = vpop.f32.mrb[73].mxu0  ;;  %v1369_v62 = vpop.f32.mrb[72].mxu1 }
 0x17b   : > { %v1227_v15 = vpop.f32.mrb[74].mxu0  ;;  %v3686_v16 = vpop.f32.mrb[73].mxu1 }
 0x17c   : > { %v1246_v17 = vadd.f32 %v1227_v15, %v1101_v23  ;;  %v4641_v6 = vadd.f32 %v1369_v62, %v1245_v60  ;;  %v3659_v18 = vpop.f32.mrb[75].mxu0  ;;  %v1372_v21 = vpop.f32.mrb[74].mxu1  ;;  %v4033_v62 = vld [vmem:[%s5025_s3 + $0x60] sm:$0xff]  }
 0x17d   : > { %v3687_v7 = vpop.f32.mrb[75].mxu1 }
 0x17e   : > { %v4643_v11 = vadd.f32 %v1372_v21, %v1246_v17  ;;  %v4034_v7 = vld [vmem:[%s5025_s3 + $0x68] sm:$0xff]  }
 0x181   : > { %v1232_v22 = vpop.f32.mrb[76].mxu0 }
 0x182   : > { %v1247_v8 = vadd.f32 %v1232_v22, %v1102_v14  ;;  %v3662_v26 = vpop.f32.mrb[77].mxu0  ;;  %v1377_v12 = vpop.f32.mrb[76].mxu1 }
 0x183   : > { %v1235_v27 = vpop.f32.mrb[78].mxu0  ;;  %v3690_v28 = vpop.f32.mrb[77].mxu1 }
 0x184   : > { %v1248_v29 = vadd.f32 %v1235_v27, %v1103_v35  ;;  %v4645_v3 = vadd.f32 %v1377_v12, %v1247_v8  ;;  %v3663_v31 = vpop.f32.mrb[79].mxu0  ;;  %v1380_v33 = vpop.f32.mrb[78].mxu1 }
 0x185   : > { %v3691_v20 = vpop.f32.mrb[79].mxu1 }
 0x186   : > { %v4647_v23 = vadd.f32 %v1380_v33, %v1248_v29 }
 0x189   : > { %v1490_v34 = vpop.f32.mrb[80].mxu0 }
 0x18a   : > { %v1529_v37 = vadd.f32 %v1490_v34, %v1384_v42  ;;  %v3702_v14 = vpop.f32.mrb[81].mxu0  ;;  %v1589_v42 = vpop.permute.xlu1 %1588 }
 0x18b   : > { %v1493_v38 = vpop.f32.mrb[82].mxu0 }
 0x18c   : > { %v1546_v39 = vadd.f32 %v4652_v19, %v1529_v37  ;;  %v1530_v35 = vadd.f32 %v1493_v38, %v1385_v45  ;;  %v3703_v24 = vpop.f32.mrb[83].mxu0 }
 0x18e   : > { %v1556_v40 = vmax.f32 %v1546_v39, 0.0  ;;  %v1547_v44 = vadd.f32 %v4652_v19, %v1530_v35  ;;  %v1594_v0 = vpop.permute.xlu1 %1593  ;;  %v4036_v39 = vld [vmem:[%s5025_s3 + $0x70] sm:$0xff]  }
 0x190   : > { %v1626_v32 = vmul.f32 %v1579_v25, %v1556_v40  ;;  %v1557_v30 = vmax.f32 %v1547_v44, 0.0  ;;  %v4032_v25 = vld [vmem:[%s5025_s3 + $0x50] sm:$0xff]  }
 0x191   : > { %v1498_v49 = vpop.f32.mrb[84].mxu0 }
 0x192   : > { %1650 = vst.msk [vmem:[#allocation2 + $0xb] sm:$0xff] %vm323_vm1, %v1626_v32  ;;  %v1627_v36 = vmul.f32 %v1584_v48, %v1557_v30  ;;  %v1531_v50 = vadd.f32 %v1498_v49, %v1386_v54  ;;  %v3706_v51 = vpop.f32.mrb[85].mxu0  ;;  %v1604_v12 = vpop.permute.xlu1 %1603  ;;  %v4035_v32 = vld [vmem:[%s5025_s3 + $0x58] sm:$0xff]  }
 0x193   : > { %v1501_v52 = vpop.f32.mrb[86].mxu0  ;;  %v4037_v30 = vld [vmem:[%s5025_s3 + $0x78] sm:$0xff]  }
 0x194   : > { %1651 = vst.msk [vmem:[#allocation2 + $0x13] sm:$0xff] %vm323_vm1, %v1627_v36  ;;  %v1548_v53 = vadd.f32 %v4652_v19, %v1531_v50  ;;  %v1532_v45 = vadd.f32 %v1501_v52, %v1387_v59  ;;  %v3707_v41 = vpop.f32.mrb[87].mxu0 }
 0x196   : > { %v1558_v43 = vmax.f32 %v1548_v53, 0.0  ;;  %v1549_v58 = vadd.f32 %v4652_v19, %v1532_v45  ;;  %v1614_v50 = vpop.permute.xlu1 %1613 }
 0x198   : > { %v1628_v47 = vmul.f32 %v1589_v42, %v1558_v43  ;;  %v1559_v46 = vmax.f32 %v1549_v58, 0.0 }
 0x199   : > { %v1506_v2 = vpop.f32.mrb[88].mxu0  ;;  %v1685_v4 = vld [vmem:[#allocation2 + $0x9] sm:$0xff] }
 0x19a   : > { %v1662_v54 = vld [vmem:[#allocation2 + $0x8] sm:$0xff]  ;;  %1652 = vst.msk [vmem:[#allocation2 + $0x1b] sm:$0xff] %vm323_vm1, %v1628_v47  ;;  %v1629_v9 = vmul.f32 %v1594_v0, %v1559_v46  ;;  %v1533_v59 = vadd.f32 %v1506_v2, %v4637_v5  ;;  %v3710_v57 = vpop.f32.mrb[89].mxu0  ;;  %v1694_v61 = vpack.c.bf16 %v1685_v4, %v1684_v63 }
 0x19b   : > { %v1671_v60 = vpack.c.bf16 %v1662_v54, %v1661_v55  ;;  %v1509_v13 = vpop.f32.mrb[90].mxu0  ;;  %v4031_v5 = vld [vmem:[%s5025_s3 + $0x48] sm:$0xff]   ;;  %v1686_v26 = vld [vmem:[#allocation2 + $0x11] sm:$0xff] }
 0x19c   : > { %1653 = vst.msk [vmem:[#allocation2 + $0x23] sm:$0xff] %vm323_vm1, %v1629_v9  ;;  %v1550_v15 = vadd.f32 %v4652_v19, %v1533_v59  ;;  %v1534_v16 = vadd.f32 %v1509_v13, %v4639_v10  ;;  %v3711_v17 = vpop.f32.mrb[91].mxu0  ;;  %3729 = vmatmul.mubr.msk.bf16.vlgmr.msra.gmra.mrb[80].mxu1 %vm323_vm1, %v1694_v61  ;;  %v1599_v10 = vpop.permute.xlu0 %1598  ;;  %v1663_v29 = vld [vmem:[#allocation2 + $0x10] sm:$0xff] }
 0x19d   : > { %3757 = vmatmul.mubr.msk.bf16.vlgmr.msra.gmra.mrb[100].mxu0 %vm323_vm1, %v1671_v60  ;;  %3777 = vmatpush3.bf16.msra.mxu1 %v4030_v56  ;;  %v1624_v9 = vpop.permute.xlu1 %1623 }
 0x19e   : > { %3732 = vmatprep.mubr.msk.bf16.mxu1 %vm4067_vm0, %v4066_v1  ;;  %v1560_v18 = vmax.f32 %v1550_v15, 0.0  ;;  %v1551_v21 = vadd.f32 %v4652_v19, %v1534_v16  ;;  %3760 = vmatprep.mubr.msk.bf16.mxu0 %vm4067_vm0, %v4066_v1 }
 0x19f   : > { %3778 = vmatprep.subr.bf16.mxu1 %v4066_v1  ;;  %3805 = vmatpush3.bf16.msra.mxu0 %v4033_v62 }
 0x1a0   : > { %v1630_v22 = vmul.f32 %v1599_v10, %v1560_v18  ;;  %v1561_v8 = vmax.f32 %v1551_v21, 0.0  ;;  %3806 = vmatprep.subr.bf16.mxu0 %v4066_v1  ;;  %v1931_v21 = vld [vmem:[#allocation2 + $0x2] sm:$0xff]  ;;  %v1932_v10 = vld [vmem:[#allocation2 + $0xa] sm:$0xff] }
 0x1a1   : > { %v1514_v27 = vpop.f32.mrb[92].mxu0  ;;  %v1687_v28 = vld [vmem:[#allocation2 + $0x19] sm:$0xff]  ;;  %3779 = vmatpush3.bf16.msra.mxu1 %v4031_v5 }
 0x1a2   : > { %v1664_v31 = vld [vmem:[#allocation2 + $0x18] sm:$0xff]  ;;  %1654 = vst.msk [vmem:[#allocation2 + $0x2b] sm:$0xff] %vm323_vm1, %v1630_v22  ;;  %v1631_v33 = vmul.f32 %v1604_v12, %v1561_v8  ;;  %v1535_v20 = vadd.f32 %v1514_v27, %v4641_v6  ;;  %v3714_v34 = vpop.f32.mrb[93].mxu0  ;;  %v1695_v37 = vpack.c.bf16 %v1687_v28, %v1686_v26  ;;  %3780 = vmatprep.subr.bf16.mxu1 %v4066_v1  ;;  %v4038_v22 = vld [vmem:[%s5025_s3 + $0x80] sm:$0xff]   ;;  %v4039_v27 = vld [vmem:[%s5025_s3 + $0x88] sm:$0xff]  }
 0x1a3   : > { %v1672_v14 = vpack.c.bf16 %v1664_v31, %v1663_v29  ;;  %v1517_v38 = vpop.f32.mrb[94].mxu0  ;;  %3807 = vmatpush3.bf16.msra.mxu0 %v4034_v7  ;;  %v1688_v36 = vld [vmem:[#allocation2 + $0x21] sm:$0xff]  ;;  %v2077_v7 = vld [vmem:[#allocation2 + $0x12] sm:$0xff]  ;;  %v1941_v8 = vpack.c.bf16 %v1932_v10, %v1931_v21 }
 0x1a4   : > { %1655 = vst.msk [vmem:[#allocation2 + $0x33] sm:$0xff] %vm323_vm1, %v1631_v33  ;;  %v1552_v35 = vadd.f32 %v4652_v19, %v1535_v20  ;;  %v1536_v6 = vadd.f32 %v1517_v38, %v4643_v11  ;;  %v3715_v24 = vpop.f32.mrb[95].mxu0  ;;  %3733 = vmatmul.mubr.msk.bf16.gmra.mrb[84].mxu1 %vm323_vm1, %v1695_v37  ;;  %3808 = vmatprep.subr.bf16.mxu0 %v4066_v1  ;;  %v1609_v11 = vpop.permute.xlu0 %1608  ;;  %v1665_v52 = vld [vmem:[#allocation2 + $0x20] sm:$0xff]  ;;  %v4042_v31 = vld [vmem:[%s5025_s3 + $0xa8] sm:$0xff]   ;;  %v4040_v34 = vld [vmem:[%s5025_s3 + $0x90] sm:$0xff]  }
 0x1a5   : > { %3761 = vmatmul.mubr.msk.bf16.gmra.mrb[104].mxu0 %vm323_vm1, %v1672_v14  ;;  %3736 = vmatprep.mubr.msk.bf16.mxu1 %vm4067_vm0, %v4066_v1  ;;  %v2086_v26 = vpack.c.bf16 %v2077_v7, %v1932_v10  ;;  %v4041_v12 = vld [vmem:[%s5025_s3 + $0xa0] sm:$0xff]   ;;  %v4044_v37 = vld [vmem:[%s5025_s3 + $0xb0] sm:$0xff]   ;;  %v4043_v14 = vld [vmem:[%s5025_s3 + $0x98] sm:$0xff]  }
 0x1a6   : > { %3764 = vmatprep.mubr.msk.bf16.mxu0 %vm4067_vm0, %v4066_v1  ;;  %v1562_v40 = vmax.f32 %v1552_v35, 0.0  ;;  %v1553_v44 = vadd.f32 %v4652_v19, %v1536_v6  ;;  %3781 = vmatpush3.bf16.msra.mxu1 %v4032_v25  ;;  %v1934_v28 = vld [vmem:[#allocation2 + $0x1a] sm:$0xff]  ;;  %v2079_v29 = vld [vmem:[#allocation2 + $0x22] sm:$0xff] }
 0x1a7   : > { %3782 = vmatprep.subr.bf16.mxu1 %v4066_v1  ;;  %3809 = vmatpush3.bf16.msra.mxu0 %v4036_v39  ;;  %v1942_v33 = vpack.c.bf16 %v1934_v28, %v2077_v7  ;;  %v2087_v20 = vpack.c.bf16 %v2079_v29, %v1934_v28  ;;  %v4045_v39 = vld [vmem:[%s5025_s3 + $0xb8] sm:$0xff]  }
 0x1a8   : > { %v1632_v48 = vmul.f32 %v1609_v11, %v1562_v40  ;;  %v1563_v49 = vmax.f32 %v1553_v44, 0.0  ;;  %3810 = vmatprep.subr.bf16.mxu0 %v4066_v1  ;;  %v1619_v4 = vpop.permute.xlu0 %1618 }
 0x1a9   : > { %v1522_v51 = vpop.f32.mrb[96].mxu0  ;;  %v1689_v42 = vld [vmem:[#allocation2 + $0x29] sm:$0xff] }
 0x1aa   : > { %v1666_v53 = vld [vmem:[#allocation2 + $0x28] sm:$0xff]  ;;  %1656 = vst.msk [vmem:[#allocation2 + $0x3b] sm:$0xff] %vm323_vm1, %v1632_v48  ;;  %v1633_v45 = vmul.f32 %v1614_v50, %v1563_v49  ;;  %v1537_v41 = vadd.f32 %v1522_v51, %v4645_v3  ;;  %v3718_v43 = vpop.f32.mrb[97].mxu0  ;;  %v1696_v58 = vpack.c.bf16 %v1689_v42, %v1688_v36  ;;  %3783 = vmatpush3.bf16.msra.mxu1 %v4035_v32  ;;  %v2222_v50 = vld [vmem:[#allocation2 + $0x13] sm:$0xff] }
 0x1ab   : > { %v1673_v63 = vpack.c.bf16 %v1666_v53, %v1665_v52  ;;  %v1525_v55 = vpop.f32.mrb[98].mxu0  ;;  %3811 = vmatpush3.bf16.msra.mxu0 %v4037_v30  ;;  %3832 = vmatprep.subr.bf16.mxu1 %v4066_v1  ;;  %v1667_v57 = vld [vmem:[#allocation2 + $0x30] sm:$0xff]  ;;  %v4046_v53 = vld [vmem:[%s5025_s3 + $0xc0] sm:$0xff]  }
 0x1ac   : > { %1657 = vst.msk [vmem:[#allocation2 + $0x43] sm:$0xff] %vm323_vm1, %v1633_v45  ;;  %v1554_v47 = vadd.f32 %v4652_v19, %v1537_v41  ;;  %v1538_v46 = vadd.f32 %v1525_v55, %v4647_v23  ;;  %v3719_v0 = vpop.f32.mrb[99].mxu0  ;;  %3737 = vmatmul.mubr.msk.bf16.gmra.mrb[88].mxu1 %vm323_vm1, %v1696_v58  ;;  %3860 = vmatprep.subr.bf16.mxu0 %v4066_v1  ;;  %v1690_v23 = vld [vmem:[#allocation2 + $0x31] sm:$0xff]  ;;  %v4049_v43 = vld [vmem:[%s5025_s3 + $0xe0] sm:$0xff]   ;;  %v4047_v58 = vld [vmem:[%s5025_s3 + $0xc8] sm:$0xff]  }
 0x1ad   : > { %3765 = vmatmul.mubr.msk.bf16.gmra.mrb[108].mxu0 %vm323_vm1, %v1673_v63  ;;  %3740 = vmatprep.mubr.msk.bf16.mxu1 %vm4067_vm0, %v4066_v1  ;;  %v1936_v25 = vld [vmem:[#allocation2 + $0x2a] sm:$0xff]  ;;  %v2081_v38 = vld [vmem:[#allocation2 + $0x32] sm:$0xff]  ;;  %v2368_v0 = vld [vmem:[#allocation2 + $0x1c] sm:$0xff] }
 0x1ae   : > { %3768 = vmatprep.mubr.msk.bf16.mxu0 %vm4067_vm0, %v4066_v1  ;;  %v1564_v3 = vmax.f32 %v1554_v47, 0.0  ;;  %v1555_v2 = vadd.f32 %v4652_v19, %v1538_v46  ;;  %v1943_v35 = vpack.c.bf16 %v1936_v25, %v2079_v29  ;;  %v2088_v6 = vpack.c.bf16 %v2081_v38, %v1936_v25  ;;  %v4804_v51 = vld [vmem:[#allocation2 + $0x14] sm:$0xff]  ;;  %v2221_v42 = vld [vmem:[#allocation2 + $0xb] sm:$0xff]  ;;  %v2224_v63 = vld [vmem:[#allocation2 + $0x23] sm:$0xff] }
 0x1af   : > { %v2366_v52 = vld [vmem:[#allocation2 + $0xc] sm:$0xff]  ;;  %v2231_v45 = vpack.c.bf16 %v2222_v50, %v2221_v42  ;;  %v4823_v55 = vld [vmem:[#allocation2 + $0x24] sm:$0xff]  ;;  %v2223_v46 = vld [vmem:[#allocation2 + $0x1b] sm:$0xff]  ;;  %v2521_v28 = vpack.c.bf16 %v2368_v0, %v4804_v51 }
 0x1b0   : > { %v1634_v54 = vmul.f32 %v1619_v4, %v1564_v3  ;;  %v1565_v56 = vmax.f32 %v1555_v2, 0.0  ;;  %v2376_v41 = vpack.c.bf16 %v4804_v51, %v2366_v52  ;;  %v4050_v47 = vld [vmem:[%s5025_s3 + $0xe8] sm:$0xff]   ;;  %v2232_v3 = vpack.c.bf16 %v2224_v63, %v2223_v46  ;;  %v4048_v4 = vld [vmem:[%s5025_s3 + $0xd0] sm:$0xff]   ;;  %v4057_v25 = vld [vmem:[%s5025_s3 + $0x118] sm:$0xff]  }
 0x1b1   : > { %v1691_v59 = vld [vmem:[#allocation2 + $0x39] sm:$0xff]  ;;  %v2377_v2 = vpack.c.bf16 %v4823_v55, %v2368_v0 }
 0x1b2   : > { %v1668_v61 = vld [vmem:[#allocation2 + $0x38] sm:$0xff]  ;;  %1658 = vst.msk [vmem:[#allocation2 + $0x4b] sm:$0xff] %vm323_vm1, %v1634_v54  ;;  %v1635_v60 = vmul.f32 %v1624_v9, %v1565_v56  ;;  %v1697_v13 = vpack.c.bf16 %v1691_v59, %v1690_v23  ;;  %v4052_v54 = vld [vmem:[%s5025_s3 + $0xf0] sm:$0xff]  }
 0x1b3   : > { %v1674_v62 = vpack.c.bf16 %v1668_v61, %v1667_v57  ;;  %v1692_v19 = vld [vmem:[#allocation2 + $0x41] sm:$0xff]  ;;  %v4051_v56 = vld [vmem:[%s5025_s3 + $0xd8] sm:$0xff]   ;;  %v2225_v57 = vld [vmem:[#allocation2 + $0x2b] sm:$0xff] }
 0x1b4   : > { %1660 = vst.msk [vmem:[#allocation2 + $0x53] sm:$0x3f] %vm1659_vm3, %v1635_v60  ;;  %3741 = vmatmul.mubr.msk.bf16.gmra.mrb[92].mxu1 %vm323_vm1, %v1697_v13  ;;  %v1669_v16 = vld [vmem:[#allocation2 + $0x40] sm:$0xff]  ;;  %v2226_v23 = vld [vmem:[#allocation2 + $0x33] sm:$0xff] }
 0x1b5   : > { %3769 = vmatmul.mubr.msk.bf16.gmra.mrb[112].mxu0 %vm323_vm1, %v1674_v62  ;;  %3744 = vmatprep.mubr.msk.bf16.mxu1 %vm4067_vm0, %v4066_v1  ;;  %v1938_v24 = vld [vmem:[#allocation2 + $0x3a] sm:$0xff]  ;;  %v2083_v40 = vld [vmem:[#allocation2 + $0x42] sm:$0xff]  ;;  %v2370_v61 = vld [vmem:[#allocation2 + $0x2c] sm:$0xff]  ;;  %v2233_v60 = vpack.c.bf16 %v2226_v23, %v2225_v57 }
 0x1b6   : > { %3772 = vmatprep.mubr.msk.bf16.mxu0 %vm4067_vm0, %v4066_v1  ;;  %v1944_v44 = vpack.c.bf16 %v1938_v24, %v2081_v38  ;;  %v2089_v32 = vpack.c.bf16 %v2083_v40, %v1938_v24  ;;  %v4847_v9 = vld [vmem:[#allocation2 + $0x34] sm:$0xff]  ;;  %v2228_v62 = vld [vmem:[#allocation2 + $0x43] sm:$0xff] }
 0x1b7   : > { %v4053_v59 = vld [vmem:[%s5025_s3 + $0xf8] sm:$0xff]   ;;  %v2378_v13 = vpack.c.bf16 %v4847_v9, %v2370_v61 }
 0x1b8   : > { %v2661_v38 = vld [vmem:[#allocation2 + $0x3d] sm:$0xff] }
 0x1b9   : > { %v1693_v15 = vld [vmem:[#allocation2 + $0x49] sm:$0x3f]  ;;  %v2802_v51 = vld [vmem:[#allocation2 + $0x1e] sm:$0xff]  ;;  %v2801_v42 = vld [vmem:[#allocation2 + $0x16] sm:$0xff] }
 0x1ba   : > { %v1670_v17 = vld [vmem:[#allocation2 + $0x48] sm:$0x3f]  ;;  %v1698_v5 = vpack.c.bf16 %v1693_v15, %v1692_v19  ;;  %v2227_v15 = vld [vmem:[#allocation2 + $0x3b] sm:$0xff]  ;;  %v2811_v52 = vpack.c.bf16 %v2802_v51, %v2801_v42 }
 0x1bb   : > { %v1675_v18 = vpack.c.bf16 %v1670_v17, %v1669_v16  ;;  %v1940_v11 = vld [vmem:[#allocation2 + $0x4a] sm:$0x3f]  ;;  %v2085_v30 = vld [vmem:[#allocation2 + $0x52] sm:$0x3f]  ;;  %v2372_v16 = vld [vmem:[#allocation2 + $0x3c] sm:$0xff]  ;;  %v2234_v17 = vpack.c.bf16 %v2228_v62, %v2227_v15 }
 0x1bc   : > { %3745 = vmatmul.mubr.msk.bf16.gmra.mrb[96].mxu1 %vm323_vm1, %v1698_v5  ;;  %v2084_v48 = vld [vmem:[#allocation2 + $0x4a] sm:$0xff]  ;;  %v1945_v49 = vpack.c.bf16 %v1940_v11, %v2083_v40  ;;  %v2375_v10 = vld [vmem:[#allocation2 + $0x54] sm:$0x3f]  ;;  %v2520_v11 = vld [vmem:[#allocation2 + $0x5c] sm:$0x3f] }
 0x1bd   : > { %3773 = vmatmul.mubr.msk.bf16.gmra.mrb[116].mxu0 %vm323_vm1, %v1675_v18  ;;  %3784 = vmatprep.mubr.msk.bf16.mxu1 %vm4067_vm0, %v4066_v1  ;;  %v2090_v36 = vpack.c.bf16 %v2085_v30, %v2084_v48  ;;  %v2373_v19 = vld [vmem:[#allocation2 + $0x44] sm:$0xff]  ;;  %v2230_v18 = vld [vmem:[#allocation2 + $0x53] sm:$0x3f] }
 0x1be   : > { %3812 = vmatprep.mubr.msk.bf16.mxu0 %vm4067_vm0, %v4066_v1  ;;  %v2379_v5 = vpack.c.bf16 %v2373_v19, %v2372_v16  ;;  %v2374_v21 = vld [vmem:[#allocation2 + $0x4c] sm:$0xff]  ;;  %v2519_v30 = vld [vmem:[#allocation2 + $0x54] sm:$0xff] }
 0x1bf   : > { %v2229_v7 = vld [vmem:[#allocation2 + $0x4b] sm:$0xff]  ;;  %v2664_v48 = vld [vmem:[#allocation2 + $0x55] sm:$0xff] }
 0x1c0   : > { %v2663_v24 = vld [vmem:[#allocation2 + $0x4d] sm:$0xff]  ;;  %v2662_v40 = vld [vmem:[#allocation2 + $0x45] sm:$0xff]  ;;  %v2809_v0 = vld [vmem:[#allocation2 + $0x56] sm:$0xff] }
 0x1c4   : > { %3785 = vmatmul.mubr.msk.bf16.vlgmr.msra.gmra.mrb[100].mxu1 %vm323_vm1, %v1941_v8  ;;  %v2380_v8 = vpack.c.bf16 %v2375_v10, %v2374_v21 }
 0x1c5   : > { %3813 = vmatmul.mubr.msk.bf16.vlgmr.msra.gmra.mrb[120].mxu0 %vm323_vm1, %v2086_v26  ;;  %3833 = vmatpush3.bf16.msra.mxu1 %v4038_v22  ;;  %v2235_v22 = vpack.c.bf16 %v2230_v18, %v2229_v7  ;;  %v2657_v26 = vld [vmem:[#allocation2 + $0x1d] sm:$0xff] }
 0x1c6   : > { %3788 = vmatprep.mubr.msk.bf16.mxu1 %vm4067_vm0, %v4066_v1  ;;  %3816 = vmatprep.mubr.msk.bf16.mxu0 %vm4067_vm0, %v4066_v1 }
 0x1c7   : > { %3834 = vmatprep.subr.bf16.mxu1 %v4066_v1  ;;  %3861 = vmatpush3.bf16.msra.mxu0 %v4041_v12  ;;  %v2656_v12 = vld [vmem:[#allocation2 + $0x15] sm:$0xff] }
 0x1c8   : > { %3862 = vmatprep.subr.bf16.mxu0 %v4066_v1  ;;  %v2666_v29 = vpack.c.bf16 %v2657_v26, %v2656_v12 }
 0x1c9   : > { %3835 = vmatpush3.bf16.msra.mxu1 %v4039_v27  ;;  %v4054_v27 = vld [vmem:[%s5025_s3 + $0x100] sm:$0xff]  }
 0x1ca   : > { %3836 = vmatprep.subr.bf16.mxu1 %v4066_v1 }
 0x1cb   : > { %3863 = vmatpush3.bf16.msra.mxu0 %v4042_v31  ;;  %v4055_v31 = vld [vmem:[%s5025_s3 + $0x108] sm:$0xff]  }
 0x1cc   : > { %3789 = vmatmul.mubr.msk.bf16.gmra.mrb[104].mxu1 %vm323_vm1, %v1942_v33  ;;  %3864 = vmatprep.subr.bf16.mxu0 %v4066_v1  ;;  %v2659_v33 = vld [vmem:[#allocation2 + $0x2d] sm:$0xff] }
 0x1cd   : > { %3817 = vmatmul.mubr.msk.bf16.gmra.mrb[124].mxu0 %vm323_vm1, %v2087_v20  ;;  %3792 = vmatprep.mubr.msk.bf16.mxu1 %vm4067_vm0, %v4066_v1  ;;  %v2658_v20 = vld [vmem:[#allocation2 + $0x25] sm:$0xff] }
 0x1ce   : > { %3820 = vmatprep.mubr.msk.bf16.mxu0 %vm4067_vm0, %v4066_v1  ;;  %3837 = vmatpush3.bf16.msra.mxu1 %v4040_v34  ;;  %v2522_v34 = vpack.c.bf16 %v2370_v61, %v4823_v55  ;;  %v2808_v55 = vld [vmem:[#allocation2 + $0x4e] sm:$0xff] }
 0x1cf   : > { %3838 = vmatprep.subr.bf16.mxu1 %v4066_v1  ;;  %3865 = vmatpush3.bf16.msra.mxu0 %v4044_v37  ;;  %v2667_v37 = vpack.c.bf16 %v2659_v33, %v2658_v20 }
 0x1d0   : > { %3866 = vmatprep.subr.bf16.mxu0 %v4066_v1 }
 0x1d2   : > { %3839 = vmatpush3.bf16.msra.mxu1 %v4043_v14  ;;  %v4056_v14 = vld [vmem:[%s5025_s3 + $0x110] sm:$0xff]  }
 0x1d3   : > { %3867 = vmatpush3.bf16.msra.mxu0 %v4045_v39  ;;  %3888 = vmatprep.subr.bf16.mxu1 %v4066_v1  ;;  %v2660_v39 = vld [vmem:[#allocation2 + $0x35] sm:$0xff] }
 0x1d4   : > { %3793 = vmatmul.mubr.msk.bf16.gmra.mrb[108].mxu1 %vm323_vm1, %v1943_v35  ;;  %3916 = vmatprep.subr.bf16.mxu0 %v4066_v1  ;;  %v2523_v35 = vpack.c.bf16 %v2372_v16, %v4847_v9 }
 0x1d5   : > { %3821 = vmatmul.mubr.msk.bf16.gmra.mrb[128].mxu0 %vm323_vm1, %v2088_v6  ;;  %3796 = vmatprep.mubr.msk.bf16.mxu1 %vm4067_vm0, %v4066_v1  ;;  %v2668_v6 = vpack.c.bf16 %v2661_v38, %v2660_v39 }
 0x1d6   : > { %3824 = vmatprep.mubr.msk.bf16.mxu0 %vm4067_vm0, %v4066_v1 }
 0x1dc   : > { %3797 = vmatmul.mubr.msk.bf16.gmra.mrb[112].mxu1 %vm323_vm1, %v1944_v44  ;;  %v2524_v44 = vpack.c.bf16 %v2374_v21, %v2373_v19 }
 0x1dd   : > { %3825 = vmatmul.mubr.msk.bf16.gmra.mrb[132].mxu0 %vm323_vm1, %v2089_v32  ;;  %3800 = vmatprep.mubr.msk.bf16.mxu1 %vm4067_vm0, %v4066_v1  ;;  %v2669_v32 = vpack.c.bf16 %v2663_v24, %v2662_v40 }
 0x1de   : > { %3828 = vmatprep.mubr.msk.bf16.mxu0 %vm4067_vm0, %v4066_v1 }
 0x1e4   : > { %3801 = vmatmul.mubr.msk.bf16.gmra.mrb[116].mxu1 %vm323_vm1, %v1945_v49  ;;  %v2665_v49 = vld [vmem:[#allocation2 + $0x5d] sm:$0x3f] }
 0x1e5   : > { %3829 = vmatmul.mubr.msk.bf16.gmra.mrb[136].mxu0 %vm323_vm1, %v2090_v36  ;;  %3840 = vmatprep.mubr.msk.bf16.mxu1 %vm4067_vm0, %v4066_v1  ;;  %v2525_v36 = vpack.c.bf16 %v2520_v11, %v2519_v30  ;;  %v2670_v50 = vpack.c.bf16 %v2665_v49, %v2664_v48 }
 0x1e6   : > { %3868 = vmatprep.mubr.msk.bf16.mxu0 %vm4067_vm0, %v4066_v1 }
 0x1ec   : > { %3841 = vmatmul.mubr.msk.bf16.vlgmr.msra.gmra.mrb[120].mxu1 %vm323_vm1, %v2231_v45  ;;  %v2803_v45 = vld [vmem:[#allocation2 + $0x26] sm:$0xff] }
 0x1ed   : > { %3869 = vmatmul.mubr.msk.bf16.vlgmr.msra.gmra.mrb[140].mxu0 %vm323_vm1, %v2376_v41  ;;  %3889 = vmatpush3.bf16.msra.mxu1 %v4046_v53  ;;  %v2804_v53 = vld [vmem:[#allocation2 + $0x2e] sm:$0xff] }
 0x1ee   : > { %3844 = vmatprep.mubr.msk.bf16.mxu1 %vm4067_vm0, %v4066_v1  ;;  %3872 = vmatprep.mubr.msk.bf16.mxu0 %vm4067_vm0, %v4066_v1  ;;  %v2812_v41 = vpack.c.bf16 %v2804_v53, %v2803_v45 }
 0x1ef   : > { %3890 = vmatprep.subr.bf16.mxu1 %v4066_v1  ;;  %3917 = vmatpush3.bf16.msra.mxu0 %v4049_v43  ;;  %v2806_v43 = vld [vmem:[#allocation2 + $0x3e] sm:$0xff] }
 0x1f0   : > { %3918 = vmatprep.subr.bf16.mxu0 %v4066_v1 }
 0x1f1   : > { %3891 = vmatpush3.bf16.msra.mxu1 %v4047_v58  ;;  %v2805_v58 = vld [vmem:[#allocation2 + $0x36] sm:$0xff] }
 0x1f2   : > { %3892 = vmatprep.subr.bf16.mxu1 %v4066_v1  ;;  %v2813_v63 = vpack.c.bf16 %v2806_v43, %v2805_v58 }
 0x1f3   : > { %3919 = vmatpush3.bf16.msra.mxu0 %v4050_v47  ;;  %v2807_v47 = vld [vmem:[#allocation2 + $0x46] sm:$0xff] }
 0x1f4   : > { %3845 = vmatmul.mubr.msk.bf16.gmra.mrb[124].mxu1 %vm323_vm1, %v2232_v3  ;;  %3920 = vmatprep.subr.bf16.mxu0 %v4066_v1  ;;  %v2814_v46 = vpack.c.bf16 %v2808_v55, %v2807_v47  ;;  %v2810_v3 = vld [vmem:[#allocation2 + $0x5e] sm:$0x3f] }
 0x1f5   : > { %3873 = vmatmul.mubr.msk.bf16.gmra.mrb[144].mxu0 %vm323_vm1, %v2377_v2  ;;  %3848 = vmatprep.mubr.msk.bf16.mxu1 %vm4067_vm0, %v4066_v1  ;;  %v2815_v2 = vpack.c.bf16 %v2810_v3, %v2809_v0 }
 0x1f6   : > { %3876 = vmatprep.mubr.msk.bf16.mxu0 %vm4067_vm0, %v4066_v1  ;;  %3893 = vmatpush3.bf16.msra.mxu1 %v4048_v4 }
 0x1f7   : > { %3894 = vmatprep.subr.bf16.mxu1 %v4066_v1  ;;  %3921 = vmatpush3.bf16.msra.mxu0 %v4052_v54 }
 0x1f8   : > { %3922 = vmatprep.subr.bf16.mxu0 %v4066_v1 }
 0x1fa   : > { %3895 = vmatpush3.bf16.msra.mxu1 %v4051_v56 }
 0x1fb   : > { %3923 = vmatpush3.bf16.msra.mxu0 %v4053_v59  ;;  %3944 = vmatprep.subr.bf16.mxu1 %v4066_v1 }
 0x1fc   : > { %3849 = vmatmul.mubr.msk.bf16.gmra.mrb[128].mxu1 %vm323_vm1, %v2233_v60 }
 0x1fd   : > { %3877 = vmatmul.mubr.msk.bf16.gmra.mrb[148].mxu0 %vm323_vm1, %v2378_v13  ;;  %3852 = vmatprep.mubr.msk.bf16.mxu1 %vm4067_vm0, %v4066_v1 }
 0x1fe   : > { %3880 = vmatprep.mubr.msk.bf16.mxu0 %vm4067_vm0, %v4066_v1 }
 0x204   : > { %3853 = vmatmul.mubr.msk.bf16.gmra.mrb[132].mxu1 %vm323_vm1, %v2234_v17 }
 0x205   : > { %3881 = vmatmul.mubr.msk.bf16.gmra.mrb[152].mxu0 %vm323_vm1, %v2379_v5  ;;  %3856 = vmatprep.mubr.msk.bf16.mxu1 %vm4067_vm0, %v4066_v1 }
 0x206   : > { %3884 = vmatprep.mubr.msk.bf16.mxu0 %vm4067_vm0, %v4066_v1 }
 0x20c   : > { %3857 = vmatmul.mubr.msk.bf16.gmra.mrb[136].mxu1 %vm323_vm1, %v2235_v22 }
 0x20d   : > { %3885 = vmatmul.mubr.msk.bf16.gmra.mrb[156].mxu0 %vm323_vm1, %v2380_v8  ;;  %3896 = vmatprep.mubr.msk.bf16.mxu1 %vm4067_vm0, %v4066_v1 }
 0x20e   : > { %3924 = vmatprep.mubr.msk.bf16.mxu0 %vm4067_vm0, %v4066_v1 }
 0x214   : > { %3897 = vmatmul.mubr.msk.bf16.vlgmr.msra.gmra.mrb[140].mxu1 %vm323_vm1, %v2521_v28 }
 0x215   : > { %3925 = vmatmul.mubr.msk.bf16.vlgmr.msra.gmra.mrb[160].mxu0 %vm323_vm1, %v2666_v29  ;;  %3945 = vmatpush3.bf16.msra.mxu1 %v4054_v27 }
 0x216   : > { %3900 = vmatprep.mubr.msk.bf16.mxu1 %vm4067_vm0, %v4066_v1  ;;  %3928 = vmatprep.mubr.msk.bf16.mxu0 %vm4067_vm0, %v4066_v1 }
 0x217   : > { %3946 = vmatprep.subr.bf16.mxu1 %v4066_v1 }
 0x219   : > { %3947 = vmatpush3.bf16.msra.mxu1 %v4055_v31 }
 0x21a   : > { %3948 = vmatprep.subr.bf16.mxu1 %v4066_v1 }
 0x21c   : > { %3901 = vmatmul.mubr.msk.bf16.gmra.mrb[144].mxu1 %vm323_vm1, %v2522_v34 }
 0x21d   : > { %3929 = vmatmul.mubr.msk.bf16.gmra.mrb[164].mxu0 %vm323_vm1, %v2667_v37  ;;  %3904 = vmatprep.mubr.msk.bf16.mxu1 %vm4067_vm0, %v4066_v1 }
 0x21e   : > { %3932 = vmatprep.mubr.msk.bf16.mxu0 %vm4067_vm0, %v4066_v1  ;;  %3949 = vmatpush3.bf16.msra.mxu1 %v4056_v14 }
 0x21f   : > { %3950 = vmatprep.subr.bf16.mxu1 %v4066_v1 }
 0x222   : > { %3951 = vmatpush3.bf16.msra.mxu1 %v4057_v25 }
 0x224   : > { %3905 = vmatmul.mubr.msk.bf16.gmra.mrb[148].mxu1 %vm323_vm1, %v2523_v35 }
 0x225   : > { %3933 = vmatmul.mubr.msk.bf16.gmra.mrb[168].mxu0 %vm323_vm1, %v2668_v6  ;;  %3908 = vmatprep.mubr.msk.bf16.mxu1 %vm4067_vm0, %v4066_v1 }
 0x226   : > { %3936 = vmatprep.mubr.msk.bf16.mxu0 %vm4067_vm0, %v4066_v1 }
 0x22c   : > { %3909 = vmatmul.mubr.msk.bf16.gmra.mrb[152].mxu1 %vm323_vm1, %v2524_v44 }
 0x22d   : > { %3937 = vmatmul.mubr.msk.bf16.gmra.mrb[172].mxu0 %vm323_vm1, %v2669_v32  ;;  %3912 = vmatprep.mubr.msk.bf16.mxu1 %vm4067_vm0, %v4066_v1 }
 0x22e   : > { %3940 = vmatprep.mubr.msk.bf16.mxu0 %vm4067_vm0, %v4066_v1 }
 0x234   : > { %3913 = vmatmul.mubr.msk.bf16.gmra.mrb[156].mxu1 %vm323_vm1, %v2525_v36 }
 0x235   : > { %3941 = vmatmul.mubr.msk.bf16.gmra.mrb[176].mxu0 %vm323_vm1, %v2670_v50  ;;  %3952 = vmatprep.mubr.msk.bf16.mxu1 %vm4067_vm0, %v4066_v1 }
 0x23c   : > { %3953 = vmatmul.mubr.msk.bf16.vlgmr.msra.gmra.mrb[160].mxu1 %vm323_vm1, %v2811_v52 }
 0x23d   : > { %3956 = vmatprep.mubr.msk.bf16.mxu1 %vm4067_vm0, %v4066_v1 }
 0x244   : > { %3957 = vmatmul.mubr.msk.bf16.gmra.mrb[164].mxu1 %vm323_vm1, %v2812_v41 }
 0x245   : > { %3960 = vmatprep.mubr.msk.bf16.mxu1 %vm4067_vm0, %v4066_v1 }
 0x24c   : > { %3961 = vmatmul.mubr.msk.bf16.gmra.mrb[168].mxu1 %vm323_vm1, %v2813_v63 }
 0x24d   : > { %3964 = vmatprep.mubr.msk.bf16.mxu1 %vm4067_vm0, %v4066_v1 }
 0x254   : > { %3965 = vmatmul.mubr.msk.bf16.gmra.mrb[172].mxu1 %vm323_vm1, %v2814_v46 }
 0x255   : > { %3968 = vmatprep.mubr.msk.bf16.mxu1 %vm4067_vm0, %v4066_v1 }
 0x25c   : > { %3969 = vmatmul.mubr.msk.bf16.gmra.mrb[176].mxu1 %vm323_vm1, %v2815_v2 }
 0x26f   : > { %v1780_v4 = vpop.f32.mrb[80].mxu1 }
 0x270   : > { %v1892_v54 = vpop.f32.mrb[100].mxu0  ;;  %v3730_v23 = vpop.f32.mrb[81].mxu1 }
 0x271   : > { %v1893_v56 = vadd.f32 %v1892_v54, %v1780_v4  ;;  %v3758_v9 = vpop.f32.mrb[101].mxu0  ;;  %v1783_v59 = vpop.f32.mrb[82].mxu1 }
 0x272   : > { %v1895_v57 = vpop.f32.mrb[102].mxu0  ;;  %v3731_v60 = vpop.f32.mrb[83].mxu1 }
 0x273   : > { %v1896_v61 = vadd.f32 %v1895_v57, %v1783_v59  ;;  %v3759_v13 = vpop.f32.mrb[103].mxu0 }
 0x277   : > { %v1788_v62 = vpop.f32.mrb[84].mxu1 }
 0x278   : > { %v1900_v19 = vpop.f32.mrb[104].mxu0  ;;  %v3734_v16 = vpop.f32.mrb[85].mxu1 }
 0x279   : > { %v1901_v15 = vadd.f32 %v1900_v19, %v1788_v62  ;;  %v3762_v17 = vpop.f32.mrb[105].mxu0  ;;  %v1791_v5 = vpop.f32.mrb[86].mxu1 }
 0x27a   : > { %v1903_v18 = vpop.f32.mrb[106].mxu0  ;;  %v3735_v10 = vpop.f32.mrb[87].mxu1 }
 0x27b   : > { %v1904_v21 = vadd.f32 %v1903_v18, %v1791_v5  ;;  %v3763_v7 = vpop.f32.mrb[107].mxu0 }
 0x27f   : > { %v1796_v22 = vpop.f32.mrb[88].mxu1 }
 0x280   : > { %v1908_v8 = vpop.f32.mrb[108].mxu0  ;;  %v3738_v12 = vpop.f32.mrb[89].mxu1 }
 0x281   : > { %v1909_v26 = vadd.f32 %v1908_v8, %v1796_v22  ;;  %v3766_v27 = vpop.f32.mrb[109].mxu0  ;;  %v1799_v28 = vpop.f32.mrb[90].mxu1 }
 0x282   : > { %v1911_v29 = vpop.f32.mrb[110].mxu0  ;;  %v3739_v33 = vpop.f32.mrb[91].mxu1 }
 0x283   : > { %v1912_v31 = vadd.f32 %v1911_v29, %v1799_v28  ;;  %v3767_v20 = vpop.f32.mrb[111].mxu0 }
 0x287   : > { %v1804_v34 = vpop.f32.mrb[92].mxu1 }
 0x288   : > { %v1916_v37 = vpop.f32.mrb[112].mxu0  ;;  %v3742_v25 = vpop.f32.mrb[93].mxu1 }
 0x289   : > { %v1917_v14 = vadd.f32 %v1916_v37, %v1804_v34  ;;  %v3770_v38 = vpop.f32.mrb[113].mxu0  ;;  %v1807_v39 = vpop.f32.mrb[94].mxu1 }
 0x28a   : > { %v1919_v35 = vpop.f32.mrb[114].mxu0  ;;  %v3743_v24 = vpop.f32.mrb[95].mxu1 }
 0x28b   : > { %v4933_v6 = vadd.f32 %v1919_v35, %v1807_v39  ;;  %v3771_v40 = vpop.f32.mrb[115].mxu0 }
 0x28f   : > { %v1812_v44 = vpop.f32.mrb[96].mxu1 }
 0x290   : > { %v1924_v32 = vpop.f32.mrb[116].mxu0  ;;  %v3746_v30 = vpop.f32.mrb[97].mxu1 }
 0x291   : > { %v1925_v11 = vadd.f32 %v1924_v32, %v1812_v44  ;;  %v3774_v48 = vpop.f32.mrb[117].mxu0  ;;  %v1815_v49 = vpop.f32.mrb[98].mxu1 }
 0x292   : > { %v1927_v36 = vpop.f32.mrb[118].mxu0  ;;  %v3747_v51 = vpop.f32.mrb[99].mxu1 }
 0x293   : > { %v1928_v50 = vadd.f32 %v1927_v36, %v1815_v49  ;;  %v3775_v42 = vpop.f32.mrb[119].mxu0 }
 0x297   : > { %v2027_v52 = vpop.f32.mrb[100].mxu1 }
 0x298   : > { %v2172_v53 = vpop.f32.mrb[120].mxu0  ;;  %v2066_v45 = vadd.f32 %v2027_v52, %v1893_v56  ;;  %v3786_v41 = vpop.f32.mrb[101].mxu1 }
 0x299   : > { %v3814_v43 = vpop.f32.mrb[121].mxu0  ;;  %v2030_v58 = vpop.f32.mrb[102].mxu1 }
 0x29a   : > { %v2175_v63 = vpop.f32.mrb[122].mxu0  ;;  %v2211_v55 = vadd.f32 %v2172_v53, %v2066_v45  ;;  %v2067_v47 = vadd.f32 %v2030_v58, %v1896_v61  ;;  %v3787_v46 = vpop.f32.mrb[103].mxu1 }
 0x29b   : > { %v3815_v0 = vpop.f32.mrb[123].mxu0 }
 0x29c   : > { %v2212_v3 = vadd.f32 %v2175_v63, %v2067_v47 }
 0x29f   : > { %v2035_v2 = vpop.f32.mrb[104].mxu1 }
 0x2a0   : > { %v2180_v4 = vpop.f32.mrb[124].mxu0  ;;  %v2068_v54 = vadd.f32 %v2035_v2, %v1901_v15  ;;  %v3790_v23 = vpop.f32.mrb[105].mxu1 }
 0x2a1   : > { %v3818_v9 = vpop.f32.mrb[125].mxu0  ;;  %v2038_v56 = vpop.f32.mrb[106].mxu1 }
 0x2a2   : > { %v2183_v59 = vpop.f32.mrb[126].mxu0  ;;  %v2213_v57 = vadd.f32 %v2180_v4, %v2068_v54  ;;  %v2069_v60 = vadd.f32 %v2038_v56, %v1904_v21  ;;  %v3791_v13 = vpop.f32.mrb[107].mxu1 }
 0x2a3   : > { %v3819_v62 = vpop.f32.mrb[127].mxu0 }
 0x2a4   : > { %v2214_v19 = vadd.f32 %v2183_v59, %v2069_v60 }
 0x2a7   : > { %v2043_v16 = vpop.f32.mrb[108].mxu1 }
 0x2a8   : > { %v2188_v17 = vpop.f32.mrb[128].mxu0  ;;  %v2070_v1 = vadd.f32 %v2043_v16, %v1909_v26  ;;  %v3794_v5 = vpop.f32.mrb[109].mxu1 }
 0x2a9   : > { %v3822_v61 = vpop.f32.mrb[129].mxu0  ;;  %v2046_v18 = vpop.f32.mrb[110].mxu1 }
 0x2aa   : > { %v2191_v10 = vpop.f32.mrb[130].mxu0  ;;  %v2215_v7 = vadd.f32 %v2188_v17, %v2070_v1  ;;  %v2071_v22 = vadd.f32 %v2046_v18, %v1912_v31  ;;  %v3795_v8 = vpop.f32.mrb[111].mxu1 }
 0x2ab   : > { %v3823_v15 = vpop.f32.mrb[131].mxu0 }
 0x2ac   : > { %v2216_v12 = vadd.f32 %v2191_v10, %v2071_v22 }
 0x2af   : > { %v2051_v27 = vpop.f32.mrb[112].mxu1 }
 0x2b0   : > { %v2196_v28 = vpop.f32.mrb[132].mxu0  ;;  %v2072_v29 = vadd.f32 %v2051_v27, %v1917_v14  ;;  %v3798_v33 = vpop.f32.mrb[113].mxu1 }
 0x2b1   : > { %v3826_v21 = vpop.f32.mrb[133].mxu0  ;;  %v2054_v20 = vpop.f32.mrb[114].mxu1 }
 0x2b2   : > { %v2199_v34 = vpop.f32.mrb[134].mxu0  ;;  %v2217_v37 = vadd.f32 %v2196_v28, %v2072_v29  ;;  %v2073_v25 = vadd.f32 %v2054_v20, %v4933_v6  ;;  %v3799_v26 = vpop.f32.mrb[115].mxu1 }
 0x2b3   : > { %v3827_v38 = vpop.f32.mrb[135].mxu0 }
 0x2b4   : > { %v2218_v39 = vadd.f32 %v2199_v34, %v2073_v25 }
 0x2b7   : > { %v2059_v35 = vpop.f32.mrb[116].mxu1 }
 0x2b8   : > { %v2204_v24 = vpop.f32.mrb[136].mxu0  ;;  %v2074_v40 = vadd.f32 %v2059_v35, %v1925_v11  ;;  %v3802_v31 = vpop.f32.mrb[117].mxu1 }
 0x2b9   : > { %v3830_v44 = vpop.f32.mrb[137].mxu0  ;;  %v2062_v32 = vpop.f32.mrb[118].mxu1 }
 0x2ba   : > { %v2207_v30 = vpop.f32.mrb[138].mxu0  ;;  %v2219_v48 = vadd.f32 %v2204_v24, %v2074_v40  ;;  %v2075_v49 = vadd.f32 %v2062_v32, %v1928_v50  ;;  %v3803_v14 = vpop.f32.mrb[119].mxu1 }
 0x2bb   : > { %v3831_v36 = vpop.f32.mrb[139].mxu0 }
 0x2bc   : > { %v2220_v51 = vadd.f32 %v2207_v30, %v2075_v49 }
 0x2bf   : > { %v2317_v42 = vpop.f32.mrb[120].mxu1 }
 0x2c0   : > { %v2462_v52 = vpop.f32.mrb[140].mxu0  ;;  %v2356_v53 = vadd.f32 %v2317_v42, %v2211_v55  ;;  %v3842_v45 = vpop.f32.mrb[121].mxu1 }
 0x2c1   : > { %v3870_v6 = vpop.f32.mrb[141].mxu0  ;;  %v2320_v41 = vpop.f32.mrb[122].mxu1 }
 0x2c2   : > { %v2465_v43 = vpop.f32.mrb[142].mxu0  ;;  %v2501_v58 = vadd.f32 %v2462_v52, %v2356_v53  ;;  %v2357_v63 = vadd.f32 %v2320_v41, %v2212_v3  ;;  %v3843_v47 = vpop.f32.mrb[123].mxu1 }
 0x2c3   : > { %v3871_v11 = vpop.f32.mrb[143].mxu0 }
 0x2c4   : > { %v2502_v46 = vadd.f32 %v2465_v43, %v2357_v63 }
 0x2c7   : > { %v2325_v0 = vpop.f32.mrb[124].mxu1 }
 0x2c8   : > { %v2470_v2 = vpop.f32.mrb[144].mxu0  ;;  %v2358_v4 = vadd.f32 %v2325_v0, %v2213_v57  ;;  %v3846_v54 = vpop.f32.mrb[125].mxu1 }
 0x2c9   : > { %v3874_v50 = vpop.f32.mrb[145].mxu0  ;;  %v2328_v23 = vpop.f32.mrb[126].mxu1 }
 0x2ca   : > { %v2473_v9 = vpop.f32.mrb[146].mxu0  ;;  %v2503_v56 = vadd.f32 %v2470_v2, %v2358_v4  ;;  %v2359_v59 = vadd.f32 %v2328_v23, %v2214_v19  ;;  %v3847_v60 = vpop.f32.mrb[127].mxu1 }
 0x2cb   : > { %v3875_v55 = vpop.f32.mrb[147].mxu0 }
 0x2cc   : > { %v2504_v13 = vadd.f32 %v2473_v9, %v2359_v59 }
 0x2cf   : > { %v2333_v62 = vpop.f32.mrb[128].mxu1 }
 0x2d0   : > { %v2478_v16 = vpop.f32.mrb[148].mxu0  ;;  %v2360_v17 = vadd.f32 %v2333_v62, %v2215_v7  ;;  %v3850_v1 = vpop.f32.mrb[129].mxu1 }
 0x2d1   : > { %v3878_v3 = vpop.f32.mrb[149].mxu0  ;;  %v2336_v5 = vpop.f32.mrb[130].mxu1 }
 0x2d2   : > { %v2481_v61 = vpop.f32.mrb[150].mxu0  ;;  %v2505_v18 = vadd.f32 %v2478_v16, %v2360_v17  ;;  %v2361_v10 = vadd.f32 %v2336_v5, %v2216_v12  ;;  %v3851_v22 = vpop.f32.mrb[131].mxu1 }
 0x2d3   : > { %v3879_v57 = vpop.f32.mrb[151].mxu0 }
 0x2d4   : > { %v2506_v8 = vadd.f32 %v2481_v61, %v2361_v10 }
 0x2d7   : > { %v2341_v15 = vpop.f32.mrb[132].mxu1 }
 0x2d8   : > { %v2486_v27 = vpop.f32.mrb[152].mxu0  ;;  %v2362_v28 = vadd.f32 %v2341_v15, %v2217_v37  ;;  %v3854_v29 = vpop.f32.mrb[133].mxu1 }
 0x2d9   : > { %v3882_v19 = vpop.f32.mrb[153].mxu0  ;;  %v2344_v33 = vpop.f32.mrb[134].mxu1 }
 0x2da   : > { %v2489_v21 = vpop.f32.mrb[154].mxu0  ;;  %v2507_v20 = vadd.f32 %v2486_v27, %v2362_v28  ;;  %v2363_v34 = vadd.f32 %v2344_v33, %v2218_v39  ;;  %v3855_v25 = vpop.f32.mrb[135].mxu1 }
 0x2db   : > { %v3883_v7 = vpop.f32.mrb[155].mxu0 }
 0x2dc   : > { %v2508_v26 = vadd.f32 %v2489_v21, %v2363_v34 }
 0x2df   : > { %v2349_v38 = vpop.f32.mrb[136].mxu1 }
 0x2e0   : > { %v2494_v35 = vpop.f32.mrb[156].mxu0  ;;  %v2364_v24 = vadd.f32 %v2349_v38, %v2219_v48  ;;  %v3858_v40 = vpop.f32.mrb[137].mxu1 }
 0x2e1   : > { %v3886_v12 = vpop.f32.mrb[157].mxu0  ;;  %v2352_v31 = vpop.f32.mrb[138].mxu1 }
 0x2e2   : > { %v2497_v44 = vpop.f32.mrb[158].mxu0  ;;  %v2509_v32 = vadd.f32 %v2494_v35, %v2364_v24  ;;  %v2365_v30 = vadd.f32 %v2352_v31, %v2220_v51  ;;  %v3859_v49 = vpop.f32.mrb[139].mxu1 }
 0x2e3   : > { %v3887_v37 = vpop.f32.mrb[159].mxu0 }
 0x2e4   : > { %v2510_v14 = vadd.f32 %v2497_v44, %v2365_v30  ;;  %v4970_v37 = vld [vmem:[%s5026_s4] ss:$0 sm:$0xff] }
 0x2e7   : > { %v2607_v36 = vpop.f32.mrb[140].mxu1 }
 0x2e8   : > { %v2752_v42 = vpop.f32.mrb[160].mxu0  ;;  %v2646_v52 = vadd.f32 %v2607_v36, %v2501_v58  ;;  %v3898_v53 = vpop.f32.mrb[141].mxu1 }
 0x2e9   : > { %v3926_v39 = vpop.f32.mrb[161].mxu0  ;;  %v2610_v45 = vpop.f32.mrb[142].mxu1 }
 0x2ea   : > { %v2755_v6 = vpop.f32.mrb[162].mxu0  ;;  %v2791_v41 = vadd.f32 %v2752_v42, %v2646_v52  ;;  %v2647_v43 = vadd.f32 %v2610_v45, %v2502_v46  ;;  %v3899_v63 = vpop.f32.mrb[143].mxu1  ;;  %v2946_v42 = vld [vmem:[%s4172_s14 + $0xb] sm:$0xff]  ;;  %v2947_v45 = vld [vmem:[%s4172_s14 + $0x13] sm:$0xff] }
 0x2eb   : > { %v3927_v48 = vpop.f32.mrb[163].mxu0 }
 0x2ec   : > { %v2792_v47 = vadd.f32 %v2755_v6, %v2647_v43 }
 0x2ef   : > { %v2615_v11 = vpop.f32.mrb[144].mxu1 }
 0x2f0   : > { %v2760_v0 = vpop.f32.mrb[164].mxu0  ;;  %v2648_v2 = vadd.f32 %v2615_v11, %v2503_v56  ;;  %v3902_v4 = vpop.f32.mrb[145].mxu1 }
 0x2f1   : > { %v3930_v51 = vpop.f32.mrb[165].mxu0  ;;  %v2618_v54 = vpop.f32.mrb[146].mxu1 }
 0x2f2   : > { %v2763_v50 = vpop.f32.mrb[166].mxu0  ;;  %v2793_v23 = vadd.f32 %v2760_v0, %v2648_v2  ;;  %v2649_v9 = vadd.f32 %v2618_v54, %v2504_v13  ;;  %v3903_v59 = vpop.f32.mrb[147].mxu1 }
 0x2f3   : > { %v3931_v58 = vpop.f32.mrb[167].mxu0  ;;  %v3006_v11 = vpop.permute.xlu0 %3005 }
 0x2f4   : > { %v4953_v60 = vadd.f32 %v2763_v50, %v2649_v9  ;;  %v3011_v54 = vpop.permute.xlu1 %3010  ;;  %v2948_v50 = vld [vmem:[%s4172_s14 + $0x1b] sm:$0xff] }
 0x2f7   : > { %v2623_v55 = vpop.f32.mrb[148].mxu1 }
 0x2f8   : > { %v2768_v62 = vpop.f32.mrb[168].mxu0  ;;  %v2650_v16 = vadd.f32 %v2623_v55, %v2505_v18  ;;  %v3906_v46 = vpop.f32.mrb[149].mxu1 }
 0x2f9   : > { %v3934_v17 = vpop.f32.mrb[169].mxu0  ;;  %v2626_v1 = vpop.f32.mrb[150].mxu1 }
 0x2fa   : > { %v2771_v3 = vpop.f32.mrb[170].mxu0  ;;  %v4955_v5 = vadd.f32 %v2768_v62, %v2650_v16  ;;  %v2651_v56 = vadd.f32 %v2626_v1, %v2506_v8  ;;  %v3907_v61 = vpop.f32.mrb[151].mxu1  ;;  %v2949_v62 = vld [vmem:[%s4172_s14 + $0x23] sm:$0xff] }
 0x2fb   : > { %v3935_v10 = vpop.f32.mrb[171].mxu0  ;;  %v3016_v1 = vpop.permute.xlu0 %3015 }
 0x2fc   : > { %v4957_v22 = vadd.f32 %v2771_v3, %v2651_v56 }
 0x2ff   : > { %v2631_v57 = vpop.f32.mrb[152].mxu1 }
 0x300   : > { %v2776_v13 = vpop.f32.mrb[172].mxu0  ;;  %v2652_v15 = vadd.f32 %v2631_v57, %v2507_v20  ;;  %v3910_v27 = vpop.f32.mrb[153].mxu1 }
 0x301   : > { %v3938_v28 = vpop.f32.mrb[173].mxu0  ;;  %v2634_v29 = vpop.f32.mrb[154].mxu1 }
 0x302   : > { %v2779_v19 = vpop.f32.mrb[174].mxu0  ;;  %v4959_v33 = vadd.f32 %v2776_v13, %v2652_v15  ;;  %v2653_v18 = vadd.f32 %v2634_v29, %v2508_v26  ;;  %v3911_v21 = vpop.f32.mrb[155].mxu1  ;;  %v2950_v13 = vld [vmem:[%s4172_s14 + $0x2b] sm:$0xff] }
 0x303   : > { %v3939_v34 = vpop.f32.mrb[175].mxu0 }
 0x304   : > { %v4961_v25 = vadd.f32 %v2779_v19, %v2653_v18  ;;  %v2951_v18 = vld [vmem:[%s4172_s14 + $0x33] sm:$0xff] }
 0x307   : > { %v2639_v7 = vpop.f32.mrb[156].mxu1 }
 0x308   : > { %v2784_v8 = vpop.f32.mrb[176].mxu0  ;;  %v2654_v38 = vadd.f32 %v2639_v7, %v2509_v32  ;;  %v3914_v35 = vpop.f32.mrb[157].mxu1 }
 0x309   : > { %v3942_v24 = vpop.f32.mrb[177].mxu0  ;;  %v2642_v40 = vpop.f32.mrb[158].mxu1 }
 0x30a   : > { %v2787_v20 = vpop.f32.mrb[178].mxu0  ;;  %v4963_v12 = vadd.f32 %v2784_v8, %v2654_v38  ;;  %v2655_v31 = vadd.f32 %v2642_v40, %v2510_v14  ;;  %v3915_v44 = vpop.f32.mrb[159].mxu1 }
 0x30b   : > { %v3943_v30 = vpop.f32.mrb[179].mxu0  ;;  %v3026_v8 = vpop.permute.xlu0 %3025 }
 0x30c   : > { %v4965_v49 = vadd.f32 %v2787_v20, %v2655_v31  ;;  %v2952_v31 = vld [vmem:[%s4172_s14 + $0x3b] sm:$0xff] }
 0x30f   : > { %v2897_v26 = vpop.f32.mrb[160].mxu1 }
 0x310   : > { %v2936_v36 = vadd.f32 %v2897_v26, %v2791_v41  ;;  %v3954_v32 = vpop.f32.mrb[161].mxu1 }
 0x311   : > { %v2900_v52 = vpop.f32.mrb[162].mxu1 }
 0x312   : > { %v2963_v53 = vadd.f32 %v4970_v37, %v2936_v36  ;;  %v2937_v39 = vadd.f32 %v2900_v52, %v2792_v47  ;;  %v3955_v14 = vpop.f32.mrb[163].mxu1 }
 0x313   : > { %v3036_v14 = vpop.permute.xlu0 %3035 }
 0x314   : > { %v2973_v6 = vadd.f32 %v2963_v53, %v2946_v42  ;;  %v2964_v43 = vadd.f32 %v4970_v37, %v2937_v39  ;;  %v2953_v42 = vld [vmem:[%s4172_s14 + $0x43] sm:$0xff] }
 0x316   : > { %v2983_v63 = vmax.f32 %v2973_v6, 0.0  ;;  %v2974_v48 = vadd.f32 %v2964_v43, %v2947_v45 }
 0x317   : > { %v2905_v0 = vpop.f32.mrb[164].mxu1 }
 0x318   : > { %v3053_v41 = vmul.f32 %v3006_v11, %v2983_v63  ;;  %v2984_v2 = vmax.f32 %v2974_v48, 0.0  ;;  %v2938_v4 = vadd.f32 %v2905_v0, %v2793_v23  ;;  %v3958_v51 = vpop.f32.mrb[165].mxu1  ;;  %v2954_v11 = vld [vmem:[%s4172_s14 + $0x4b] sm:$0xff] }
 0x319   : > { %v2908_v9 = vpop.f32.mrb[166].mxu1 }
 0x31a   : > { %3066 = vst.msk [vmem:[%s4940_s12 + $0xb] sm:$0xff] %vm323_vm1, %v3053_v41  ;;  %v3054_v47 = vmul.f32 %v3011_v54, %v2984_v2  ;;  %v2965_v59 = vadd.f32 %v4970_v37, %v2938_v4  ;;  %v2939_v58 = vadd.f32 %v2908_v9, %v4953_v60  ;;  %v3959_v55 = vpop.f32.mrb[167].mxu1  ;;  %v3021_v60 = vpop.permute.xlu1 %3020  ;;  %v2955_v54 = vld [vmem:[%s4172_s14 + $0x53] sm:$0x3f] }
 0x31c   : > { %3067 = vst.msk [vmem:[%s4940_s12 + $0x13] sm:$0xff] %vm323_vm1, %v3054_v47  ;;  %v2975_v16 = vadd.f32 %v2965_v59, %v2948_v50  ;;  %v2966_v23 = vadd.f32 %v4970_v37, %v2939_v58  ;;  %v3046_v59 = vpop.permute.xlu0 %3045 }
 0x31e   : > { %v2985_v46 = vmax.f32 %v2975_v16, 0.0  ;;  %v2976_v17 = vadd.f32 %v2966_v23, %v2949_v62 }
 0x31f   : > { %v2913_v3 = vpop.f32.mrb[168].mxu1 }
 0x320   : > { %v3055_v56 = vmul.f32 %v3016_v1, %v2985_v46  ;;  %v2986_v61 = vmax.f32 %v2976_v17, 0.0  ;;  %v2940_v10 = vadd.f32 %v2913_v3, %v4955_v5  ;;  %v3962_v57 = vpop.f32.mrb[169].mxu1 }
 0x321   : > { %v2916_v15 = vpop.f32.mrb[170].mxu1 }
 0x322   : > { %3068 = vst.msk [vmem:[%s4940_s12 + $0x1b] sm:$0xff] %vm323_vm1, %v3055_v56  ;;  %v3056_v27 = vmul.f32 %v3021_v60, %v2986_v61  ;;  %v2967_v28 = vadd.f32 %v4970_v37, %v2940_v10  ;;  %v2941_v29 = vadd.f32 %v2916_v15, %v4957_v22  ;;  %v3963_v19 = vpop.f32.mrb[171].mxu1  ;;  %v3031_v22 = vpop.permute.xlu1 %3030 }
 0x324   : > { %3069 = vst.msk [vmem:[%s4940_s12 + $0x23] sm:$0xff] %vm323_vm1, %v3056_v27  ;;  %v2977_v21 = vadd.f32 %v2967_v28, %v2950_v13  ;;  %v2968_v5 = vadd.f32 %v4970_v37, %v2941_v29 }
 0x326   : > { %v2987_v34 = vmax.f32 %v2977_v21, 0.0  ;;  %v2978_v7 = vadd.f32 %v2968_v5, %v2951_v18 }
 0x327   : > { %v2921_v38 = vpop.f32.mrb[172].mxu1 }
 0x328   : > { %v3057_v35 = vmul.f32 %v3026_v8, %v2987_v34  ;;  %v2988_v24 = vmax.f32 %v2978_v7, 0.0  ;;  %v2942_v40 = vadd.f32 %v2921_v38, %v4959_v33  ;;  %v3966_v20 = vpop.f32.mrb[173].mxu1 }
 0x329   : > { %v2924_v44 = vpop.f32.mrb[174].mxu1 }
 0x32a   : > { %3070 = vst.msk [vmem:[%s4940_s12 + $0x2b] sm:$0xff] %vm323_vm1, %v3057_v35  ;;  %v3058_v30 = vmul.f32 %v3031_v22, %v2988_v24  ;;  %v2969_v26 = vadd.f32 %v4970_v37, %v2942_v40  ;;  %v2943_v36 = vadd.f32 %v2924_v44, %v4961_v25  ;;  %v3967_v32 = vpop.f32.mrb[175].mxu1  ;;  %v3041_v25 = vpop.permute.xlu1 %3040 }
 0x32c   : > { %3071 = vst.msk [vmem:[%s4940_s12 + $0x33] sm:$0xff] %vm323_vm1, %v3058_v30  ;;  %v2979_v52 = vadd.f32 %v2969_v26, %v2952_v31  ;;  %v2970_v33 = vadd.f32 %v4970_v37, %v2943_v36 }
 0x32e   : > { %v2989_v53 = vmax.f32 %v2979_v52, 0.0  ;;  %v2980_v39 = vadd.f32 %v2970_v33, %v2953_v42  ;;  %v3051_v62 = vpop.permute.xlu1 %3050 }
 0x32f   : > { %v2929_v45 = vpop.f32.mrb[176].mxu1 }
 0x330   : > { %v3059_v6 = vmul.f32 %v3036_v14, %v2989_v53  ;;  %v2990_v43 = vmax.f32 %v2980_v39, 0.0  ;;  %v2944_v63 = vadd.f32 %v2929_v45, %v4963_v12  ;;  %v3970_v48 = vpop.f32.mrb[177].mxu1 }
 0x331   : > { %v2932_v0 = vpop.f32.mrb[178].mxu1 }
 0x332   : > { %3072 = vst.msk [vmem:[%s4940_s12 + $0x3b] sm:$0xff] %vm323_vm1, %v3059_v6  ;;  %v3060_v41 = vmul.f32 %v3041_v25, %v2990_v43  ;;  %v2971_v2 = vadd.f32 %v4970_v37, %v2944_v63  ;;  %v2945_v4 = vadd.f32 %v2932_v0, %v4965_v49  ;;  %v3971_v51 = vpop.f32.mrb[179].mxu1 }
 0x334   : > { %3073 = vst.msk [vmem:[%s4940_s12 + $0x43] sm:$0xff] %vm323_vm1, %v3060_v41  ;;  %v2981_v50 = vadd.f32 %v2971_v2, %v2954_v11  ;;  %v2972_v12 = vadd.f32 %v4970_v37, %v2945_v4 }
 0x336   : > { %v2991_v9 = vmax.f32 %v2981_v50, 0.0  ;;  %v2982_v47 = vadd.f32 %v2972_v12, %v2955_v54 }
 0x338   : > { %v3061_v58 = vmul.f32 %v3046_v59, %v2991_v9  ;;  %v2992_v55 = vmax.f32 %v2982_v47, 0.0 }
 0x33a   : > { %3074 = vst.msk [vmem:[%s4940_s12 + $0x4b] sm:$0xff] %vm323_vm1, %v3061_v58  ;;  %v3062_v16 = vmul.f32 %v3051_v62, %v2992_v55 }
 0x33c   : > { %3075 = vst.msk [vmem:[%s4940_s12 + $0x53] sm:$0x3f] %vm1659_vm3, %v3062_v16 }
 0x33d PF: > { %s16_s21 = sadd.s32 1, %s4064_s21  }
 0x33e   : > { %p13_p4 = scmp.ge.s32.totalorder %s16_s21, 4  }
 0x340   :  { %15 = sbr.rel (!%p13_p4) target bundleno = 1 (0x1), region = 74 }

// kernel: elim_resnet18_forward.8
= control target key start
LH: loop header
LB: loop body
LE: loop exit
PB: predicated region body
PF: predicated region fallthrough
CT: control target
= control target key end

     0   :  { %s2779_s30 = smov 0   ;;  %s3204_s0 = inlined_call_operand.vmem [shape: bf16[2,16,576], index: 0, kind: input, shape index: {}]   ;;  %s3205_s1 = inlined_call_operand.vmem [shape: bf16[2,16,64], index: 1, kind: input, shape index: {}]   ;;  %s3206_s2 = inlined_call_operand.vmem [shape: bf16[576,128], index: 2, kind: input, shape index: {}]   ;;  %s3207_s3 = inlined_call_operand.vmem [shape: f32[1,128], index: 3, kind: input, shape index: {}]   ;;  %s3208_s4 = inlined_call_operand.vmem [shape: bf16[64,128], index: 4, kind: input, shape index: {}]   ;;  %s3209_s5 = inlined_call_operand.vmem [shape: f32[1,128], index: 5, kind: input, shape index: {}]   ;;  %s3210_s6 = inlined_call_operand.vmem [shape: bf16[1152,128], index: 6, kind: input, shape index: {}]   ;;  %s3211_s7 = inlined_call_operand.vmem [shape: f32[1,128], index: 7, kind: input, shape index: {}]   ;;  %s3212_s8 = inlined_call_operand.vmem [shape: f32[22,1], index: 8, kind: input, shape index: {}]   ;;  %s3213_s9 = inlined_call_operand.vmem [shape: f32[2,36,128], index: 9, kind: output, shape index: {}]  }
   0x1 LB: > { %s2101_s10 = sadd.s32 4294967295, %s2724_s30   ;;  %p2105_p0 = scmp.ge.s32.totalorder %s2724_s30, 1  ;;  %s2724_s30 = sphi %s2779_s30, %s19_s30  }
   0x2   : > { %p297_p1 = scmp.lt.s32.totalorder %s2724_s30, 3 }
   0x4   : > { %p298_p2 = pnand %p2105_p0, %p297_p1 }
   0x5   : > { %v2598_v0 = vld [vmem:[%s3206_s2 + $0x40] sm:$0xff] (!%p298_p2)   ;;  %v2726_v3 = vmov (!%p298_p2), 0.0   ;;  %v2602_v5 = vld [vmem:[%s3206_s2 + $0x48] sm:$0xff] (!%p298_p2)   ;;  %v2606_v9 = vld [vmem:[%s3206_s2 + $0x50] sm:$0xff] (!%p298_p2)   ;;  %p338_p3 = scmp.lt.s32.totalorder (!%p298_p2), %s2101_s10, 1  ;;  %vm2727_vm0 = vmmov (!%p298_p2), 0  }
   0x6   : > { %301 = sbr.rel (%p298_p2) target bundleno = 638 (0x27e), region = 56  ;;  %v2599_v1 = vld [vmem:[%s3206_s2 + $0xc0] sm:$0xff] (!%p298_p2)   ;;  %2236 = vmatprep.subr.bf16.mxu0 (!%p298_p2), %v2598_v0  ;;  %899 = vst [vmem:[#allocation2] sm:$0xff] (!%p298_p2), %v2726_v3  ;;  %900 = vst [vmem:[#allocation2 + $0x8] sm:$0xff] (!%p298_p2), %v2726_v3  ;;  %v2603_v6 = vld [vmem:[%s3206_s2 + $0xc8] sm:$0xff] (!%p298_p2)   ;;  %vm680_vm1 = vcmask (!%p298_p2), 523264  }
   0x7   : > { %v2600_v2 = vld [vmem:[%s3206_s2] sm:$0xff] (!%p298_p2)   ;;  %901 = vst [vmem:[#allocation2 + $0x10] sm:$0xff] (!%p298_p2), %v2726_v3  ;;  %902 = vst [vmem:[#allocation2 + $0x18] sm:$0xff] (!%p298_p2), %v2726_v3  ;;  %2258 = vmatprep.subr.bf16.mxu1 (!%p298_p2), %v2599_v1  ;;  %v2604_v7 = vld [vmem:[%s3206_s2 + $0x8] sm:$0xff] (!%p298_p2)  }
   0x8   : > { %903 = vst [vmem:[#allocation2 + $0x20] sm:$0xf] (!%p298_p2), %v2726_v3  ;;  %904 = vst [vmem:[#allocation3] sm:$0xff] (!%p298_p2), %v2726_v3  ;;  %v2601_v4 = vld [vmem:[%s3206_s2 + $0x80] sm:$0xff] (!%p298_p2)   ;;  %2237 = vmatpush3.bf16.msra.mxu0 (!%p298_p2), %v2600_v2  ;;  %v2605_v8 = vld [vmem:[%s3206_s2 + $0x88] sm:$0xff] (!%p298_p2)  }
   0x9   : > { %905 = vst [vmem:[#allocation3 + $0x8] sm:$0xff] (!%p298_p2), %v2726_v3  ;;  %906 = vst [vmem:[#allocation3 + $0x10] sm:$0x3f] (!%p298_p2), %v2726_v3  ;;  %2259 = vmatpush3.bf16.msra.mxu1 (!%p298_p2), %v2601_v4  ;;  %2238 = vmatprep.subr.bf16.mxu0 (!%p298_p2), %v2602_v5  ;;  %v2607_v10 = vld [vmem:[%s3206_s2 + $0xd0] sm:$0xff] (!%p298_p2)   ;;  %v2610_v13 = vld [vmem:[%s3206_s2 + $0x58] sm:$0xff] (!%p298_p2)  }
   0xa   : > { %2260 = vmatprep.subr.bf16.mxu1 (!%p298_p2), %v2603_v6  ;;  %v2608_v11 = vld [vmem:[%s3206_s2 + $0x10] sm:$0xff] (!%p298_p2)   ;;  %v2611_v14 = vld [vmem:[%s3206_s2 + $0xd8] sm:$0xff] (!%p298_p2)   ;;  %v2614_v17 = vld [vmem:[%s3206_s2 + $0x60] sm:$0xff] (!%p298_p2)  }
   0xb   : > { %v2609_v12 = vld [vmem:[%s3206_s2 + $0x90] sm:$0xff] (!%p298_p2)   ;;  %v2612_v15 = vld [vmem:[%s3206_s2 + $0x18] sm:$0xff] (!%p298_p2)   ;;  %v2615_v18 = vld [vmem:[%s3206_s2 + $0xe0] sm:$0xff] (!%p298_p2)  }
   0xc   : > { %2239 = vmatpush3.bf16.msra.mxu0 (!%p298_p2), %v2604_v7  ;;  %v2613_v16 = vld [vmem:[%s3206_s2 + $0x98] sm:$0xff] (!%p298_p2)   ;;  %v2616_v19 = vld [vmem:[%s3206_s2 + $0x20] sm:$0xff] (!%p298_p2)   ;;  %v2618_v21 = vld [vmem:[%s3206_s2 + $0x68] sm:$0xff] (!%p298_p2)  }
   0xd   : > { %2261 = vmatpush3.bf16.msra.mxu1 %v2605_v8  ;;  %2240 = vmatprep.subr.bf16.mxu0 %v2606_v9  ;;  %v2617_v20 = vld [vmem:[%s3206_s2 + $0xa0] sm:$0xff]   ;;  %v2619_v22 = vld [vmem:[%s3206_s2 + $0xe8] sm:$0xff]   ;;  %s3215_s10 = smov (!%p338_p3, %s2101_s10), 1  ;;  %v2622_v25 = vld [vmem:[%s3206_s2 + $0x70] sm:$0xff]  }
   0xe   : > { %2262 = vmatprep.subr.bf16.mxu1 %v2607_v10  ;;  %v2620_v23 = vld [vmem:[%s3206_s2 + $0x28] sm:$0xff]   ;;  %v2623_v26 = vld [vmem:[%s3206_s2 + $0xf0] sm:$0xff]   ;;  %s2584_s25 = smul.u32 40, %s3215_s10  ;;  %v2626_v29 = vld [vmem:[%s3206_s2 + $0x78] sm:$0xff]   ;;  %s2235_s20 = sshll.u32 %s3215_s10, 3 }
   0xf   : > { %v2621_v24 = vld [vmem:[%s3206_s2 + $0xa8] sm:$0xff]   ;;  %v2624_v27 = vld [vmem:[%s3206_s2 + $0x30] sm:$0xff]   ;;  %v2627_v30 = vld [vmem:[%s3206_s2 + $0xf8] sm:$0xff]   ;;  %s347_s28 = scalar_lea.vmem %s3205_s1, %s2235_s20 }
  0x10   : > { %2241 = vmatpush3.bf16.msra.mxu0 %v2608_v11  ;;  %v2625_v28 = vld [vmem:[%s3206_s2 + $0xb0] sm:$0xff]   ;;  %s342_s17 = scalar_lea.vmem %s3204_s0, %s2584_s25  ;;  %v2628_v31 = vld [vmem:[%s3206_s2 + $0x38] sm:$0xff]   ;;  %v2636_v37 = vld [vmem:[%s3206_s2 + $0x100] sm:$0xff]   ;;  %s3189_s18 = scalar_lea.vmem %s3213_s9, %s2584_s25 }
  0x11   : > { %2263 = vmatpush3.bf16.msra.mxu1 %v2609_v12  ;;  %2242 = vmatprep.subr.bf16.mxu0 %v2610_v13  ;;  %v2629_v32 = vld [vmem:[%s3206_s2 + $0xb8] sm:$0xff]   ;;  %v2630_v33 = vld [vmem:[%s342_s17] ss:$20 sps:$4 sm:$0xff]   ;;  %v2637_v38 = vld [vmem:[%s3206_s2 + $0x108] sm:$0xff]   ;;  %2029 = vst [vmem:[%s3189_s18] sm:$0x7f] %v2726_v3 }
  0x12   : > { %2264 = vmatprep.subr.bf16.mxu1 %v2611_v14  ;;  %v2632_v34 = vld [vmem:[%s342_s17 + $0x4] ss:$20 sps:$4 sm:$0xff]   ;;  %v2633_v35 = vld [vmem:[%s342_s17 + $0x8] ss:$20 sps:$4 sm:$0xff]   ;;  %v2635_v36 = vld [vmem:[%s342_s17 + $0xc] ss:$20 sps:$4 sm:$0xff]  }
  0x13   : > { %716 = vmatprep.mubr.bf16.mxu0 %v2632_v34  ;;  %757 = vmatprep.mubr.bf16.mxu1 %v2635_v36  ;;  %v2638_v39 = vld [vmem:[%s3206_s2 + $0x110] sm:$0xff]   ;;  %v2639_v40 = vld [vmem:[%s3206_s2 + $0x118] sm:$0xff]   ;;  %v2641_v42 = vld [vmem:[%s3208_s4] sm:$0xff]   ;;  %2033 = vst [vmem:[%s3189_s18 + $0x1d] sm:$0x7f] %v2726_v3 }
  0x14   : > { %2243 = vmatpush3.bf16.msra.mxu0 %v2612_v15  ;;  %v2640_v41 = vld [vmem:[%s342_s17 + $0x10] ss:$20 sps:$4 sm:$0xff]   ;;  %v2642_v43 = vld [vmem:[%s3208_s4 + $0x8] sm:$0xff]   ;;  %v2644_v45 = vld [vmem:[%s3208_s4 + $0x18] sm:$0xff]  }
  0x15   : > { %2265 = vmatpush3.bf16.msra.mxu1 %v2613_v16  ;;  %2244 = vmatprep.subr.bf16.mxu0 %v2614_v17  ;;  %v2643_v44 = vld [vmem:[%s3208_s4 + $0x10] sm:$0xff]   ;;  %v2645_v46 = vld [vmem:[%s3210_s6 + $0x40] sm:$0xff]   ;;  %v2648_v49 = vld [vmem:[%s3210_s6 + $0x48] sm:$0xff]  }
  0x16   : > { %2266 = vmatprep.subr.bf16.mxu1 %v2615_v18  ;;  %v2646_v47 = vld [vmem:[%s3210_s6] sm:$0xff]   ;;  %v2649_v50 = vld [vmem:[%s3210_s6 + $0x8] sm:$0xff]   ;;  %v2650_v51 = vld [vmem:[%s3210_s6 + $0x50] sm:$0xff]  }
  0x17   : > { %v2647_v48 = vld [vmem:[%s347_s28] sm:$0xff]   ;;  %v2651_v52 = vld [vmem:[%s3210_s6 + $0x10] sm:$0xff]   ;;  %v2652_v53 = vld [vmem:[%s3210_s6 + $0x58] sm:$0xff]  }
  0x18   : > { %2245 = vmatpush3.bf16.msra.mxu0 %v2616_v19  ;;  %v2653_v54 = vld [vmem:[%s3210_s6 + $0x18] sm:$0xff]   ;;  %v2654_v55 = vld [vmem:[%s3210_s6 + $0x60] sm:$0xff]   ;;  %v2656_v57 = vld [vmem:[%s3210_s6 + $0x68] sm:$0xff]  }
  0x19   : > { %2267 = vmatpush3.bf16.msra.mxu1 %v2617_v20  ;;  %2246 = vmatprep.subr.bf16.mxu0 %v2618_v21  ;;  %v2655_v56 = vld [vmem:[%s3210_s6 + $0x20] sm:$0xff]   ;;  %v2657_v58 = vld [vmem:[%s3210_s6 + $0x28] sm:$0xff]   ;;  %v2658_v59 = vld [vmem:[%s3210_s6 + $0x70] sm:$0xff]  }
  0x1a   : > { %2268 = vmatprep.subr.bf16.mxu1 %v2619_v22  ;;  %v2659_v60 = vld [vmem:[%s3210_s6 + $0x30] sm:$0xff]   ;;  %v2660_v61 = vld [vmem:[%s3210_s6 + $0x78] sm:$0xff]   ;;  %v2662_v63 = vld [vmem:[%s3210_s6 + $0x80] sm:$0xff]  }
  0x1b   : > { %v2661_v62 = vld [vmem:[%s3210_s6 + $0x38] sm:$0xff]   ;;  %v2663_v0 = vld [vmem:[%s3210_s6 + $0xc0] sm:$0xff]  }
  0x1c   : > { %2247 = vmatpush3.bf16.msra.mxu0 %v2620_v23  ;;  %v2110_v4 = vld [vmem:[%s3207_s3] ss:$0 sm:$0xff] }
  0x1d   : > { %2269 = vmatpush3.bf16.msra.mxu1 %v2621_v24  ;;  %2248 = vmatprep.subr.bf16.mxu0 %v2622_v25 }
  0x1e   : > { %2270 = vmatprep.subr.bf16.mxu1 %v2623_v26 }
  0x20   : > { %2249 = vmatpush3.bf16.msra.mxu0 %v2624_v27 }
  0x21   : > { %2271 = vmatpush3.bf16.msra.mxu1 %v2625_v28  ;;  %2250 = vmatprep.subr.bf16.mxu0 %v2626_v29 }
  0x22   : > { %2272 = vmatprep.subr.bf16.mxu1 %v2627_v30 }
  0x24   : > { %2251 = vmatpush3.bf16.msra.mxu0 %v2628_v31 }
  0x25   : > { %2273 = vmatpush3.bf16.msra.mxu1 %v2629_v32  ;;  %2404 = vmatprep.subr.bf16.mxu0 %v2645_v46 }
  0x26   : > { %2380 = vmatprep.subr.bf16.mxu1 %v2726_v3 }
  0x27   : > { %717 = vmatmul.mubr.bf16.vlgmr.msra.gmra.mrb[0].mxu0 %v2630_v33 }
  0x28   : > { %758 = vmatmul.mubr.bf16.vlgmr.msra.gmra.mrb[0].mxu1 %v2633_v35  ;;  %2405 = vmatpush3.bf16.msra.mxu0 %v2645_v46  ;;  %v2667_v46 = vld [vmem:[%s3210_s6 + $0xd0] sm:$0xff]  }
  0x29   : > { %2381 = vmatpush3.bf16.msra.mxu1 %v2636_v37  ;;  %2388 = vmatprep.mubr.msk.bf16.mxu1 %vm2727_vm0, %v2726_v3 }
  0x2a   : > { %2382 = vmatprep.subr.bf16.mxu1 %v2726_v3  ;;  %2406 = vmatprep.subr.bf16.mxu0 %v2648_v49 }
  0x2c   : > { %2407 = vmatpush3.bf16.msra.mxu0 %v2648_v49  ;;  %v2670_v49 = vld [vmem:[%s3210_s6 + $0xa0] sm:$0xff]  }
  0x2d   : > { %2383 = vmatpush3.bf16.msra.mxu1 %v2637_v38  ;;  %2408 = vmatprep.subr.bf16.mxu0 %v2650_v51 }
  0x2e   : > { %2384 = vmatprep.subr.bf16.mxu1 %v2726_v3 }
  0x30   : > { %2409 = vmatpush3.bf16.msra.mxu0 %v2650_v51  ;;  %v2672_v51 = vld [vmem:[%s3210_s6 + $0xa8] sm:$0xff]  }
  0x31   : > { %2385 = vmatpush3.bf16.msra.mxu1 %v2638_v39  ;;  %2410 = vmatprep.subr.bf16.mxu0 %v2652_v53 }
  0x32   : > { %2386 = vmatprep.subr.bf16.mxu1 %v2726_v3 }
  0x34   : > { %2411 = vmatpush3.bf16.msra.mxu0 %v2652_v53  ;;  %v2674_v53 = vld [vmem:[%s3210_s6 + $0xb0] sm:$0xff]  }
  0x35   : > { %2387 = vmatpush3.bf16.msra.mxu1 %v2639_v40  ;;  %2412 = vmatprep.subr.bf16.mxu0 %v2654_v55 }
  0x36   : > { %2392 = vmatprep.subr.bf16.mxu1 %v2726_v3 }
  0x38   : > { %2389 = vmatmul.mubr.msk.bf16.vlgmr.msra.gmra.mrb[4].mxu1 %vm680_vm1, %v2640_v41  ;;  %2413 = vmatpush3.bf16.msra.mxu0 %v2654_v55  ;;  %v2676_v55 = vld [vmem:[%s3210_s6 + $0xb8] sm:$0xff]  }
  0x39   : > { %2393 = vmatpush3.bf16.msra.mxu1 %v2641_v42  ;;  %2400 = vmatprep.mubr.msk.bf16.mxu1 %vm2727_vm0, %v2726_v3  ;;  %v2664_v42 = vld [vmem:[%s3210_s6 + $0x88] sm:$0xff]  }
  0x3a   : > { %2394 = vmatprep.subr.bf16.mxu1 %v2726_v3  ;;  %2414 = vmatprep.subr.bf16.mxu0 %v2656_v57 }
  0x3c   : > { %2415 = vmatpush3.bf16.msra.mxu0 %v2656_v57  ;;  %v2678_v57 = vld [vmem:[%s3210_s6 + $0x100] sm:$0xff]  }
  0x3d   : > { %2395 = vmatpush3.bf16.msra.mxu1 %v2642_v43  ;;  %2416 = vmatprep.subr.bf16.mxu0 %v2658_v59  ;;  %v2665_v43 = vld [vmem:[%s3210_s6 + $0xc8] sm:$0xff]  }
  0x3e   : > { %2396 = vmatprep.subr.bf16.mxu1 %v2726_v3 }
  0x40   : > { %2417 = vmatpush3.bf16.msra.mxu0 %v2658_v59 }
  0x41   : > { %2397 = vmatpush3.bf16.msra.mxu1 %v2643_v44  ;;  %2418 = vmatprep.subr.bf16.mxu0 %v2660_v61 }
  0x42   : > { %2398 = vmatprep.subr.bf16.mxu1 %v2726_v3 }
  0x44   : > { %2419 = vmatpush3.bf16.msra.mxu0 %v2660_v61 }
  0x45   : > { %2399 = vmatpush3.bf16.msra.mxu1 %v2644_v45  ;;  %2444 = vmatprep.subr.bf16.mxu0 %v2662_v63  ;;  %v2666_v45 = vld [vmem:[%s3210_s6 + $0x90] sm:$0xff]  }
  0x46   : > { %2424 = vmatprep.subr.bf16.mxu1 %v2646_v47 }
  0x48   : > { %2401 = vmatmul.mubr.msk.bf16.vlgmr.msra.gmra.mrb[8].mxu1 %vm680_vm1, %v2647_v48  ;;  %v2669_v48 = vld [vmem:[%s3210_s6 + $0xd8] sm:$0xff]  }
  0x49   : > { %2425 = vmatpush3.bf16.msra.mxu1 %v2646_v47  ;;  %v2668_v47 = vld [vmem:[%s3210_s6 + $0x98] sm:$0xff]  }
  0x4a   : > { %2426 = vmatprep.subr.bf16.mxu1 %v2649_v50 }
  0x4d   : > { %2427 = vmatpush3.bf16.msra.mxu1 %v2649_v50  ;;  %v2671_v50 = vld [vmem:[%s3210_s6 + $0xe0] sm:$0xff]  }
  0x4e   : > { %2428 = vmatprep.subr.bf16.mxu1 %v2651_v52 }
  0x51   : > { %2429 = vmatpush3.bf16.msra.mxu1 %v2651_v52  ;;  %v2673_v52 = vld [vmem:[%s3210_s6 + $0xe8] sm:$0xff]  }
  0x52   : > { %2430 = vmatprep.subr.bf16.mxu1 %v2653_v54 }
  0x55   : > { %2431 = vmatpush3.bf16.msra.mxu1 %v2653_v54  ;;  %v2675_v54 = vld [vmem:[%s3210_s6 + $0xf0] sm:$0xff]  }
  0x56   : > { %2432 = vmatprep.subr.bf16.mxu1 %v2655_v56 }
  0x59   : > { %2433 = vmatpush3.bf16.msra.mxu1 %v2655_v56  ;;  %v2677_v56 = vld [vmem:[%s3210_s6 + $0xf8] sm:$0xff]  }
  0x5a   : > { %2434 = vmatprep.subr.bf16.mxu1 %v2657_v58 }
  0x5d   : > { %2435 = vmatpush3.bf16.msra.mxu1 %v2657_v58  ;;  %v2679_v58 = vld [vmem:[%s3210_s6 + $0x140] sm:$0xff]  }
  0x5e   : > { %2436 = vmatprep.subr.bf16.mxu1 %v2659_v60 }
  0x61   : > { %2437 = vmatpush3.bf16.msra.mxu1 %v2659_v60 }
  0x62   : > { %2438 = vmatprep.subr.bf16.mxu1 %v2661_v62 }
  0x65   : > { %2439 = vmatpush3.bf16.msra.mxu1 %v2661_v62 }
  0x66   : > { %2464 = vmatprep.subr.bf16.mxu1 %v2663_v0 }
  0xfa   : > { %v2252_v1 = vpop.f32.mrb[0].mxu0 }
  0xfb   : > { %v2274_v2 = vpop.f32.mrb[0].mxu1  ;;  %v2253_v5 = vpop.f32.mrb[1].mxu0 }
  0xfc   : > { %v2254_v6 = vadd.f32 %v2253_v5, %v2252_v1  ;;  %v2275_v7 = vpop.f32.mrb[1].mxu1  ;;  %v2255_v8 = vpop.f32.mrb[2].mxu0  ;;  %v2681_v5 = vld [vmem:[%s3210_s6 + $0x148] sm:$0xff]  }
  0xfd   : > { %v2276_v9 = vadd.f32 %v2275_v7, %v2274_v2  ;;  %v2277_v10 = vpop.f32.mrb[2].mxu1  ;;  %v2256_v11 = vpop.f32.mrb[3].mxu0  ;;  %v2682_v7 = vld [vmem:[%s3210_s6 + $0x110] sm:$0xff]  }
  0xfe   : > { %v719_v12 = vadd.f32 %v2254_v6, %v2110_v4  ;;  %v2257_v13 = vadd.f32 %v2256_v11, %v2255_v8  ;;  %v2278_v14 = vpop.f32.mrb[3].mxu1  ;;  %v2683_v8 = vld [vmem:[%s3210_s6 + $0x150] sm:$0xff]   ;;  %v2686_v11 = vld [vmem:[%s3210_s6 + $0x120] sm:$0xff]  }
  0xff   : > { %v2279_v15 = vadd.f32 %v2278_v14, %v2277_v10  ;;  %v2685_v10 = vld [vmem:[%s3210_s6 + $0x158] sm:$0xff]   ;;  %v2689_v14 = vld [vmem:[%s3210_s6 + $0x168] sm:$0xff]  }
 0x100   : > { %v722_v16 = vadd.f32 %v2257_v13, %v2110_v4  ;;  %v760_v17 = vadd.f32 %v2276_v9, %v719_v12  ;;  %v2680_v4 = vld [vmem:[%s3210_s6 + $0x108] sm:$0xff]   ;;  %v2684_v9 = vld [vmem:[%s3210_s6 + $0x118] sm:$0xff]   ;;  %v2687_v12 = vld [vmem:[%s3210_s6 + $0x160] sm:$0xff]  }
 0x101   : > { %v2688_v13 = vld [vmem:[%s3210_s6 + $0x128] sm:$0xff]  }
 0x102   : > { %v763_v18 = vadd.f32 %v2279_v15, %v722_v16  ;;  %v2153_v15 = vld [vmem:[%s3209_s5] ss:$0 sm:$0xff]  ;;  %v2690_v16 = vld [vmem:[%s3210_s6 + $0x130] sm:$0xff]  }
 0x10b   : > { %v800_v19 = vpop.f32.mrb[4].mxu1 }
 0x10c   : > { %v801_v20 = vadd.f32 %v800_v19, %v760_v17  ;;  %v2390_v21 = vpop.f32.mrb[5].mxu1  ;;  %v2691_v17 = vld [vmem:[%s3210_s6 + $0x170] sm:$0xff]  }
 0x10d   : > { %v803_v22 = vpop.f32.mrb[6].mxu1 }
 0x10e   : > { %v807_v23 = vmax.f32 %v801_v20, 0.0  ;;  %v804_v24 = vadd.f32 %v803_v22, %v763_v18  ;;  %v2391_v25 = vpop.f32.mrb[7].mxu1  ;;  %v2692_v22 = vld [vmem:[%s3210_s6 + $0x138] sm:$0xff]  }
 0x10f   : > { %v2693_v25 = vld [vmem:[%s3210_s6 + $0x178] sm:$0xff]  }
 0x110   : > { %907 = vst [vmem:[#allocation2 + $0x7] ss:$6 sps:$4 sm:$0xff] %v807_v23   ;;  %v808_v26 = vmax.f32 %v804_v24, 0.0 }
 0x112   : > { %911 = vst [vmem:[#allocation2 + $0x13] ss:$6 sps:$4 sm:$0xff] %v808_v26   ;;  %v2694_v26 = vld [vmem:[%s3210_s6 + $0x180] sm:$0xff]  }
 0x117   : > { %v936_v27 = vld [vmem:[#allocation2 + $0x1] sm:$0xff]  ;;  %v937_v28 = vld [vmem:[#allocation2 + $0x9] sm:$0xff] }
 0x118   : > { %v915_v29 = vld [vmem:[#allocation2] sm:$0xff]  ;;  %v939_v30 = vpack.c.bf16 %v937_v28, %v936_v27  ;;  %v3002_v31 = vld [vmem:[#allocation2 + $0x8] sm:$0xff] }
 0x119   : > { %v1149_v32 = vld [vmem:[#allocation2 + $0x2] sm:$0xff]  ;;  %v918_v33 = vpack.c.bf16 %v3002_v31, %v915_v29  ;;  %v938_v34 = vld [vmem:[#allocation2 + $0x11] sm:$0x3f]  ;;  %v1391_v27 = vld [vmem:[#allocation2 + $0x17] sm:$0x3f] }
 0x11a   : > { %v917_v35 = vld [vmem:[#allocation2 + $0x10] sm:$0x3f]  ;;  %2420 = vmatprep.mubr.bf16.mxu0 %v939_v30  ;;  %v940_v37 = vpack.c.bf16 %v938_v34, %v938_v34  ;;  %v1269_v39 = vld [vmem:[#allocation2 + $0x6] sm:$0xff]  ;;  %v1271_v60 = vld [vmem:[#allocation2 + $0x16] sm:$0x3f]  ;;  %v1393_v34 = vpack.c.bf16 %v1391_v27, %v1391_v27 }
 0x11b   : > { %v1150_v36 = vld [vmem:[#allocation2 + $0xa] sm:$0xff]  ;;  %v919_v38 = vpack.c.bf16 %v917_v35, %v917_v35  ;;  %2440 = vmatprep.mubr.bf16.mxu1 %v918_v33  ;;  %v1151_v59 = vld [vmem:[#allocation2 + $0x12] sm:$0x3f]  ;;  %v892_v18 = vpop.f32.mrb[8].mxu1  ;;  %v2695_v28 = vld [vmem:[%s3210_s6 + $0x1c0] sm:$0xff]  }
 0x11c   : > { %v3005_v40 = vld [vmem:[#allocation2 + $0xe] sm:$0xff]  ;;  %2421 = vmatmul.mubr.bf16.vlgmr.msra.gmra.mrb[4].mxu0 %v940_v37  ;;  %v1152_v44 = vpack.c.bf16 %v1150_v36, %v1149_v32  ;;  %v893_v19 = vadd.f32 %v2153_v15, %v892_v18  ;;  %v2402_v20 = vpop.f32.mrb[9].mxu1  ;;  %v1511_v29 = vld [vmem:[#allocation2 + $0x18] sm:$0x3f] }
 0x11d   : > { %v1272_v41 = vpack.c.bf16 %v3005_v40, %v1269_v39  ;;  %2441 = vmatmul.mubr.bf16.vlgmr.msra.gmra.mrb[12].mxu1 %v919_v38  ;;  %2445 = vmatpush3.bf16.msra.mxu0 %v2662_v63  ;;  %v1390_v61 = vld [vmem:[#allocation2 + $0xf] sm:$0xff]  ;;  %v1153_v63 = vpack.c.bf16 %v1151_v59, %v1151_v59  ;;  %v1389_v1 = vld [vmem:[#allocation2 + $0x7] sm:$0xff]  ;;  %v895_v21 = vpop.f32.mrb[10].mxu1  ;;  %v1513_v35 = vpack.c.bf16 %v1511_v29, %v1511_v29  ;;  %v1751_v59 = vld [vmem:[#allocation2 + $0x1d] sm:$0x3f] }
 0x11e   : > { %2465 = vmatpush3.bf16.msra.mxu1 %v2663_v0  ;;  %2460 = vmatprep.mubr.bf16.mxu0 %v1152_v44  ;;  %v1510_v62 = vld [vmem:[#allocation2 + $0x10] sm:$0xff]  ;;  %v1273_v0 = vpack.c.bf16 %v1271_v60, %v1271_v60  ;;  %v1392_v2 = vpack.c.bf16 %v1390_v61, %v1389_v1  ;;  %908 = vst [vmem:[#allocation3] ss:$6 sps:$4 sm:$0xff] %v893_v19   ;;  %v2403_v24 = vpop.f32.mrb[11].mxu1  ;;  %v2696_v36 = vld [vmem:[%s3210_s6 + $0x188] sm:$0xff]   ;;  %v2701_v44 = vld [vmem:[%s3210_s6 + $0x1d8] sm:$0xff]  }
 0x11f   : > { %2480 = vmatprep.mubr.bf16.mxu1 %v1272_v41  ;;  %2446 = vmatprep.subr.bf16.mxu0 %v2664_v42  ;;  %v1512_v6 = vpack.c.bf16 %v1510_v62, %v3002_v31  ;;  %v896_v23 = vadd.f32 %v2153_v15, %v895_v21  ;;  %v1629_v30 = vld [vmem:[#allocation2 + $0xc] sm:$0xff]  ;;  %v1630_v31 = vld [vmem:[#allocation2 + $0x14] sm:$0xff]  ;;  %v1753_v62 = vpack.c.bf16 %v1751_v59, %v1751_v59 }
 0x120   : > { %2466 = vmatprep.subr.bf16.mxu1 %v2665_v43  ;;  %v1749_v32 = vld [vmem:[#allocation2 + $0xd] sm:$0xff]  ;;  %v1750_v33 = vld [vmem:[#allocation2 + $0x15] sm:$0xff]  ;;  %v1632_v37 = vpack.c.bf16 %v1630_v31, %v1629_v30 }
 0x121   : > { %2447 = vmatpush3.bf16.msra.mxu0 %v2664_v42  ;;  %912 = vst [vmem:[#allocation3 + $0xc] ss:$6 sps:$4 sm:$0xff] %v896_v23   ;;  %v1752_v38 = vpack.c.bf16 %v1750_v33, %v1749_v32  ;;  %v2697_v39 = vld [vmem:[%s3210_s6 + $0x1c8] sm:$0xff]   ;;  %v2698_v41 = vld [vmem:[%s3210_s6 + $0x190] sm:$0xff]  }
 0x122   : > { %2467 = vmatpush3.bf16.msra.mxu1 %v2665_v43  ;;  %2448 = vmatprep.subr.bf16.mxu0 %v2666_v45  ;;  %v2699_v42 = vld [vmem:[%s3210_s6 + $0x1d0] sm:$0xff]   ;;  %v2700_v43 = vld [vmem:[%s3210_s6 + $0x198] sm:$0xff]  }
 0x123   : > { %2468 = vmatprep.subr.bf16.mxu1 %v2667_v46  ;;  %v1870_v60 = vld [vmem:[#allocation2 + $0x16] sm:$0xff] }
 0x124   : > { %v2712_v1 = vld [vmem:[%s3210_s6 + $0x210] sm:$0xff]  }
 0x125   : > { %2449 = vmatpush3.bf16.msra.mxu0 %v2666_v45  ;;  %v2702_v45 = vld [vmem:[%s3210_s6 + $0x1a0] sm:$0xff]  }
 0x126   : > { %2469 = vmatpush3.bf16.msra.mxu1 %v2667_v46  ;;  %2450 = vmatprep.subr.bf16.mxu0 %v2668_v47  ;;  %v2703_v46 = vld [vmem:[%s3210_s6 + $0x1e0] sm:$0xff]  }
 0x127   : > { %2470 = vmatprep.subr.bf16.mxu1 %v2669_v48 }
 0x129   : > { %2451 = vmatpush3.bf16.msra.mxu0 %v2668_v47  ;;  %v2704_v47 = vld [vmem:[%s3210_s6 + $0x1a8] sm:$0xff]  }
 0x12a   : > { %2471 = vmatpush3.bf16.msra.mxu1 %v2669_v48  ;;  %2452 = vmatprep.subr.bf16.mxu0 %v2670_v49  ;;  %v2705_v48 = vld [vmem:[%s3210_s6 + $0x1e8] sm:$0xff]  }
 0x12b   : > { %2472 = vmatprep.subr.bf16.mxu1 %v2671_v50 }
 0x12d   : > { %2453 = vmatpush3.bf16.msra.mxu0 %v2670_v49  ;;  %v2706_v49 = vld [vmem:[%s3210_s6 + $0x1b0] sm:$0xff]  }
 0x12e   : > { %2473 = vmatpush3.bf16.msra.mxu1 %v2671_v50  ;;  %2454 = vmatprep.subr.bf16.mxu0 %v2672_v51  ;;  %v2707_v50 = vld [vmem:[%s3210_s6 + $0x1f0] sm:$0xff]  }
 0x12f   : > { %2474 = vmatprep.subr.bf16.mxu1 %v2673_v52 }
 0x131   : > { %2455 = vmatpush3.bf16.msra.mxu0 %v2672_v51  ;;  %v2008_v51 = vld [vmem:[%s3212_s8] sm:$0xff] }
 0x132   : > { %2475 = vmatpush3.bf16.msra.mxu1 %v2673_v52  ;;  %2456 = vmatprep.subr.bf16.mxu0 %v2674_v53  ;;  %v2708_v52 = vld [vmem:[%s3210_s6 + $0x1b8] sm:$0xff]  }
 0x133   : > { %2476 = vmatprep.subr.bf16.mxu1 %v2675_v54 }
 0x135   : > { %2457 = vmatpush3.bf16.msra.mxu0 %v2674_v53  ;;  %v2728_v53 = vmov 0  }
 0x136   : > { %2477 = vmatpush3.bf16.msra.mxu1 %v2675_v54  ;;  %2458 = vmatprep.subr.bf16.mxu0 %v2676_v55  ;;  %v2010_v54 = vld [vmem:[%s3212_s8 + $0x10] sm:$0x3f] }
 0x137   : > { %2478 = vmatprep.subr.bf16.mxu1 %v2677_v56  ;;  %2596 = vset.pattern.permute.xlu0 %v2728_v53 }
 0x138   : > { %2013 = vperm.xlu0 %2596, %v2008_v51   ;;  %2597 = vset.pattern.permute.xlu1 %v2728_v53 }
 0x139   : > { %2459 = vmatpush3.bf16.msra.mxu0 %v2676_v55  ;;  %v2709_v55 = vld [vmem:[%s3210_s6 + $0x1f8] sm:$0xff]   ;;  %2023 = vperm.xlu1 %2597, %v2010_v54  }
 0x13a   : > { %2479 = vmatpush3.bf16.msra.mxu1 %v2677_v56  ;;  %2484 = vmatprep.subr.bf16.mxu0 %v2678_v57  ;;  %v2009_v56 = vld [vmem:[%s3212_s8 + $0x8] sm:$0xff] }
 0x13b   : > { %2504 = vmatprep.subr.bf16.mxu1 %v2679_v58 }
 0x13c   : > { %2461 = vmatmul.mubr.bf16.vlgmr.msra.gmra.mrb[8].mxu0 %v1153_v63  ;;  %2018 = vperm.xlu0 %2596, %v2009_v56   ;;  %v2711_v63 = vld [vmem:[%s3210_s6 + $0x208] sm:$0xff]  }
 0x13d   : > { %2481 = vmatmul.mubr.bf16.vlgmr.msra.gmra.mrb[16].mxu1 %v1273_v0  ;;  %2485 = vmatpush3.bf16.msra.mxu0 %v2678_v57  ;;  %v2710_v57 = vld [vmem:[%s3210_s6 + $0x200] sm:$0xff]   ;;  %v1872_v0 = vpack.c.bf16 %v1870_v60, %v3005_v40 }
 0x13e   : > { %2500 = vmatprep.mubr.bf16.mxu0 %v1392_v2  ;;  %2505 = vmatpush3.bf16.msra.mxu1 %v2679_v58  ;;  %v1631_v58 = vld [vmem:[#allocation2 + $0x1c] sm:$0x3f] }
 0x13f   : > { %2520 = vmatprep.mubr.bf16.mxu1 %v1512_v6  ;;  %2486 = vmatprep.subr.bf16.mxu0 %v2680_v4  ;;  %v1633_v61 = vpack.c.bf16 %v1631_v58, %v1631_v58  ;;  %v2713_v2 = vld [vmem:[%s3210_s6 + $0x218] sm:$0xff]   ;;  %v2714_v40 = vld [vmem:[%s3210_s6 + $0x220] sm:$0xff]  }
 0x140   : > { %2506 = vmatprep.subr.bf16.mxu1 %v2681_v5  ;;  %v2717_v6 = vld [vmem:[%s3210_s6 + $0x238] sm:$0xff]  }
 0x141   : > { %2487 = vmatpush3.bf16.msra.mxu0 %v2680_v4  ;;  %v2715_v4 = vld [vmem:[%s3210_s6 + $0x228] sm:$0xff]  }
 0x142   : > { %2507 = vmatpush3.bf16.msra.mxu1 %v2681_v5  ;;  %2488 = vmatprep.subr.bf16.mxu0 %v2682_v7  ;;  %v2716_v5 = vld [vmem:[%s3210_s6 + $0x230] sm:$0xff]  }
 0x143   : > { %2508 = vmatprep.subr.bf16.mxu1 %v2683_v8 }
 0x145   : > { %2489 = vmatpush3.bf16.msra.mxu0 %v2682_v7  ;;  %v1871_v7 = vld [vmem:[#allocation2 + $0x1e] sm:$0x3f] }
 0x146   : > { %2509 = vmatpush3.bf16.msra.mxu1 %v2683_v8  ;;  %2490 = vmatprep.subr.bf16.mxu0 %v2684_v9  ;;  %v1873_v8 = vpack.c.bf16 %v1871_v7, %v1871_v7 }
 0x147   : > { %2510 = vmatprep.subr.bf16.mxu1 %v2685_v10 }
 0x149   : > { %2491 = vmatpush3.bf16.msra.mxu0 %v2684_v9 }
 0x14a   : > { %2511 = vmatpush3.bf16.msra.mxu1 %v2685_v10  ;;  %2492 = vmatprep.subr.bf16.mxu0 %v2686_v11 }
 0x14b   : > { %2512 = vmatprep.subr.bf16.mxu1 %v2687_v12 }
 0x14d   : > { %2493 = vmatpush3.bf16.msra.mxu0 %v2686_v11 }
 0x14e   : > { %2513 = vmatpush3.bf16.msra.mxu1 %v2687_v12  ;;  %2494 = vmatprep.subr.bf16.mxu0 %v2688_v13 }
 0x14f   : > { %2514 = vmatprep.subr.bf16.mxu1 %v2689_v14 }
 0x151   : > { %2495 = vmatpush3.bf16.msra.mxu0 %v2688_v13 }
 0x152   : > { %2515 = vmatpush3.bf16.msra.mxu1 %v2689_v14  ;;  %2496 = vmatprep.subr.bf16.mxu0 %v2690_v16 }
 0x153   : > { %2516 = vmatprep.subr.bf16.mxu1 %v2691_v17 }
 0x155   : > { %2497 = vmatpush3.bf16.msra.mxu0 %v2690_v16 }
 0x156   : > { %2517 = vmatpush3.bf16.msra.mxu1 %v2691_v17  ;;  %2498 = vmatprep.subr.bf16.mxu0 %v2692_v22 }
 0x157   : > { %2518 = vmatprep.subr.bf16.mxu1 %v2693_v25 }
 0x159   : > { %2499 = vmatpush3.bf16.msra.mxu0 %v2692_v22 }
 0x15a   : > { %2519 = vmatpush3.bf16.msra.mxu1 %v2693_v25  ;;  %2524 = vmatprep.subr.bf16.mxu0 %v2694_v26 }
 0x15b   : > { %2544 = vmatprep.subr.bf16.mxu1 %v2695_v28 }
 0x15c   : > { %2501 = vmatmul.mubr.bf16.vlgmr.msra.gmra.mrb[12].mxu0 %v1393_v34 }
 0x15d   : > { %2521 = vmatmul.mubr.bf16.vlgmr.msra.gmra.mrb[20].mxu1 %v1513_v35  ;;  %2525 = vmatpush3.bf16.msra.mxu0 %v2694_v26 }
 0x15e   : > { %2540 = vmatprep.mubr.bf16.mxu0 %v1632_v37  ;;  %2560 = vmatprep.mubr.bf16.mxu1 %v1752_v38 }
 0x15f   : > { %2545 = vmatpush3.bf16.msra.mxu1 %v2695_v28  ;;  %2526 = vmatprep.subr.bf16.mxu0 %v2696_v36 }
 0x160   : > { %2546 = vmatprep.subr.bf16.mxu1 %v2697_v39 }
 0x161   : > { %2527 = vmatpush3.bf16.msra.mxu0 %v2696_v36 }
 0x162   : > { %2528 = vmatprep.subr.bf16.mxu0 %v2698_v41 }
 0x163   : > { %2547 = vmatpush3.bf16.msra.mxu1 %v2697_v39 }
 0x164   : > { %2548 = vmatprep.subr.bf16.mxu1 %v2699_v42 }
 0x165   : > { %2529 = vmatpush3.bf16.msra.mxu0 %v2698_v41 }
 0x166   : > { %2530 = vmatprep.subr.bf16.mxu0 %v2700_v43 }
 0x167   : > { %2549 = vmatpush3.bf16.msra.mxu1 %v2699_v42 }
 0x168   : > { %2550 = vmatprep.subr.bf16.mxu1 %v2701_v44 }
 0x169   : > { %2531 = vmatpush3.bf16.msra.mxu0 %v2700_v43 }
 0x16a   : > { %2532 = vmatprep.subr.bf16.mxu0 %v2702_v45 }
 0x16b   : > { %2551 = vmatpush3.bf16.msra.mxu1 %v2701_v44 }
 0x16c   : > { %2552 = vmatprep.subr.bf16.mxu1 %v2703_v46 }
 0x16d   : > { %2533 = vmatpush3.bf16.msra.mxu0 %v2702_v45 }
 0x16e   : > { %2534 = vmatprep.subr.bf16.mxu0 %v2704_v47 }
 0x16f   : > { %2553 = vmatpush3.bf16.msra.mxu1 %v2703_v46 }
 0x170   : > { %2554 = vmatprep.subr.bf16.mxu1 %v2705_v48 }
 0x171   : > { %2535 = vmatpush3.bf16.msra.mxu0 %v2704_v47 }
 0x172   : > { %2536 = vmatprep.subr.bf16.mxu0 %v2706_v49 }
 0x173   : > { %2555 = vmatpush3.bf16.msra.mxu1 %v2705_v48 }
 0x174   : > { %2556 = vmatprep.subr.bf16.mxu1 %v2707_v50 }
 0x175   : > { %2537 = vmatpush3.bf16.msra.mxu0 %v2706_v49 }
 0x176   : > { %2538 = vmatprep.subr.bf16.mxu0 %v2708_v52 }
 0x177   : > { %2557 = vmatpush3.bf16.msra.mxu1 %v2707_v50 }
 0x178   : > { %2558 = vmatprep.subr.bf16.mxu1 %v2709_v55 }
 0x179   : > { %2539 = vmatpush3.bf16.msra.mxu0 %v2708_v52 }
 0x17a   : > { %2564 = vmatprep.subr.bf16.mxu0 %v2710_v57 }
 0x17b   : > { %2559 = vmatpush3.bf16.msra.mxu1 %v2709_v55 }
 0x17c   : > { %2541 = vmatmul.mubr.bf16.vlgmr.msra.gmra.mrb[16].mxu0 %v1633_v61 }
 0x17d   : > { %2565 = vmatpush3.bf16.msra.mxu0 %v2710_v57  ;;  %2580 = vmatprep.mubr.bf16.mxu0 %v1872_v0 }
 0x17e   : > { %2561 = vmatmul.mubr.bf16.vlgmr.msra.gmra.mrb[24].mxu1 %v1753_v62  ;;  %2566 = vmatprep.subr.bf16.mxu0 %v2711_v63 }
 0x181   : > { %2567 = vmatpush3.bf16.msra.mxu0 %v2711_v63  ;;  %v2232_v63 = vld [vmem:[%s3211_s7] ss:$0 sm:$0xff] }
 0x182   : > { %2568 = vmatprep.subr.bf16.mxu0 %v2712_v1 }
 0x185   : > { %2569 = vmatpush3.bf16.msra.mxu0 %v2712_v1 }
 0x186   : > { %2570 = vmatprep.subr.bf16.mxu0 %v2713_v2 }
 0x189   : > { %2571 = vmatpush3.bf16.msra.mxu0 %v2713_v2 }
 0x18a   : > { %2572 = vmatprep.subr.bf16.mxu0 %v2714_v40 }
 0x18d   : > { %2573 = vmatpush3.bf16.msra.mxu0 %v2714_v40 }
 0x18e   : > { %2574 = vmatprep.subr.bf16.mxu0 %v2715_v4 }
 0x191   : > { %2575 = vmatpush3.bf16.msra.mxu0 %v2715_v4 }
 0x192   : > { %2576 = vmatprep.subr.bf16.mxu0 %v2716_v5 }
 0x195   : > { %2577 = vmatpush3.bf16.msra.mxu0 %v2716_v5 }
 0x196   : > { %2578 = vmatprep.subr.bf16.mxu0 %v2717_v6 }
 0x199   : > { %2579 = vmatpush3.bf16.msra.mxu0 %v2717_v6 }
 0x19c   : > { %2581 = vmatmul.mubr.bf16.vlgmr.msra.gmra.mrb[20].mxu0 %v1873_v8  ;;  %v2001_v8 = vld [vmem:[#allocation3 + $0x10] sm:$0x3f] }
 0x1ef   : > { %v2422_v9 = vpop.f32.mrb[4].mxu0 }
 0x1f0   : > { %v2442_v10 = vpop.f32.mrb[12].mxu1  ;;  %v1039_v12 = vpop.f32.mrb[5].mxu0 }
 0x1f1   : > { %v1144_v11 = vadd.f32 %v2442_v10, %v2422_v9  ;;  %v1135_v13 = vpop.f32.mrb[13].mxu1  ;;  %v2423_v15 = vpop.f32.mrb[6].mxu0  ;;  %v1999_v10 = vld [vmem:[#allocation3] sm:$0xff] }
 0x1f2   : > { %v1136_v14 = vadd.f32 %v1135_v13, %v1039_v12  ;;  %v2443_v16 = vpop.f32.mrb[14].mxu1  ;;  %v1042_v17 = vpop.f32.mrb[7].mxu0  ;;  %v2000_v15 = vld [vmem:[#allocation3 + $0x8] sm:$0xff] }
 0x1f3   : > { %v1138_v18 = vpop.f32.mrb[15].mxu1  ;;  %v2014_v9 = vpop.permute.xlu0 %2013 }
 0x1f4   : > { %v1139_v19 = vadd.f32 %v1138_v18, %v1042_v17 }
 0x20f   : > { %v2462_v20 = vpop.f32.mrb[8].mxu0 }
 0x210   : > { %v2482_v21 = vpop.f32.mrb[16].mxu1  ;;  %v1268_v22 = vadd.f32 %v2462_v20, %v1144_v11  ;;  %v1252_v23 = vpop.f32.mrb[9].mxu0 }
 0x211   : > { %v1372_v24 = vpop.f32.mrb[17].mxu1  ;;  %v1266_v25 = vadd.f32 %v1252_v23, %v1136_v14  ;;  %v2463_v26 = vpop.f32.mrb[10].mxu0 }
 0x212   : > { %v2483_v27 = vpop.f32.mrb[18].mxu1  ;;  %v1388_v28 = vadd.f32 %v2482_v21, %v1268_v22  ;;  %v1255_v29 = vpop.f32.mrb[11].mxu0 }
 0x213   : > { %v1375_v30 = vpop.f32.mrb[19].mxu1  ;;  %v1386_v31 = vadd.f32 %v1372_v24, %v1266_v25  ;;  %v1267_v32 = vadd.f32 %v1255_v29, %v1139_v19  ;;  %v2024_v14 = vpop.permute.xlu1 %2023 }
 0x214   : > { %v2019_v22 = vpop.permute.xlu0 %2018 }
 0x215   : > { %v1387_v33 = vadd.f32 %v1375_v30, %v1267_v32 }
 0x22f   : > { %v2502_v34 = vpop.f32.mrb[12].mxu0 }
 0x230   : > { %v1508_v35 = vadd.f32 %v2502_v34, %v1388_v28  ;;  %v2522_v36 = vpop.f32.mrb[20].mxu1  ;;  %v1492_v37 = vpop.f32.mrb[13].mxu0 }
 0x231   : > { %v1506_v38 = vadd.f32 %v1492_v37, %v1386_v31  ;;  %v1612_v3 = vpop.f32.mrb[21].mxu1  ;;  %v2503_v39 = vpop.f32.mrb[14].mxu0 }
 0x232   : > { %v1628_v41 = vadd.f32 %v2522_v36, %v1508_v35  ;;  %v2523_v42 = vpop.f32.mrb[22].mxu1  ;;  %v1495_v43 = vpop.f32.mrb[15].mxu0 }
 0x233   : > { %v1626_v44 = vadd.f32 %v1612_v3, %v1506_v38  ;;  %v1507_v45 = vadd.f32 %v1495_v43, %v1387_v33  ;;  %v1615_v46 = vpop.f32.mrb[23].mxu1 }
 0x235   : > { %v1627_v47 = vadd.f32 %v1615_v46, %v1507_v45 }
 0x24f   : > { %v2542_v48 = vpop.f32.mrb[16].mxu0 }
 0x250   : > { %v1748_v49 = vadd.f32 %v2542_v48, %v1628_v41  ;;  %v1732_v50 = vpop.f32.mrb[17].mxu0 }
 0x251   : > { %v1746_v51 = vadd.f32 %v1732_v50, %v1626_v44  ;;  %v2543_v52 = vpop.f32.mrb[18].mxu0  ;;  %v2562_v53 = vpop.f32.mrb[24].mxu1 }
 0x252   : > { %v1868_v54 = vadd.f32 %v2562_v53, %v1748_v49  ;;  %v1735_v55 = vpop.f32.mrb[19].mxu0  ;;  %v1852_v56 = vpop.f32.mrb[25].mxu1 }
 0x253   : > { %v1747_v57 = vadd.f32 %v1735_v55, %v1627_v47  ;;  %v1866_v58 = vadd.f32 %v1852_v56, %v1746_v51  ;;  %v2563_v59 = vpop.f32.mrb[26].mxu1 }
 0x254   : > { %v1855_v60 = vpop.f32.mrb[27].mxu1 }
 0x255   : > { %v1867_v61 = vadd.f32 %v1855_v60, %v1747_v57 }
 0x26f   : > { %v2582_v62 = vpop.f32.mrb[20].mxu0 }
 0x270   : > { %v1988_v0 = vadd.f32 %v2582_v62, %v1868_v54  ;;  %v1972_v1 = vpop.f32.mrb[21].mxu0 }
 0x271   : > { %v1986_v2 = vadd.f32 %v1972_v1, %v1866_v58  ;;  %v2583_v40 = vpop.f32.mrb[22].mxu0 }
 0x272   : > { %v1998_v4 = vadd.f32 %v2232_v63, %v1988_v0  ;;  %v1975_v5 = vpop.f32.mrb[23].mxu0 }
 0x273   : > { %v1996_v6 = vadd.f32 %v2232_v63, %v1986_v2  ;;  %v1987_v7 = vadd.f32 %v1975_v5, %v1867_v61 }
 0x274   : > { %v2004_v11 = vadd.f32 %v2001_v8, %v1998_v4 }
 0x275   : > { %v2002_v12 = vadd.f32 %v1999_v10, %v1996_v6  ;;  %v1997_v13 = vadd.f32 %v2232_v63, %v1987_v7 }
 0x276   : > { %v2007_v16 = vmax.f32 %v2004_v11, 0.0 }
 0x277   : > { %v2005_v17 = vmax.f32 %v2002_v12, 0.0  ;;  %v2003_v18 = vadd.f32 %v2000_v15, %v1997_v13 }
 0x278   : > { %v2028_v19 = vmul.f32 %v2024_v14, %v2007_v16 }
 0x279   : > { %v2026_v20 = vmul.f32 %v2014_v9, %v2005_v17  ;;  %v2006_v21 = vmax.f32 %v2003_v18, 0.0 }
 0x27a   : > { %2032 = vst [vmem:[%s3189_s18 + $0x17] sm:$0x3f] %v2028_v19 }
 0x27b   : > { %2030 = vst [vmem:[%s3189_s18 + $0x7] sm:$0xff] %v2026_v20  ;;  %v2027_v23 = vmul.f32 %v2019_v22, %v2006_v21 }
 0x27d   : > { %2031 = vst [vmem:[%s3189_s18 + $0xf] sm:$0xff] %v2027_v23 }
 0x27e PF: > { %s19_s30 = sadd.s32 1, %s2724_s30  }
 0x27f   : > { %p16_p4 = scmp.ge.s32.totalorder %s19_s30, 4  }
 0x281   :  { %18 = sbr.rel (!%p16_p4) target bundleno = 1 (0x1), region = 89 }

// kernel: elim_resnet18_forward.9
= control target key start
LH: loop header
LB: loop body
LE: loop exit
PB: predicated region body
PF: predicated region fallthrough
CT: control target
= control target key end

     0   :  { %13 = vsyncpa [#allocation4], 0  ;;  %s4422_s0 = inlined_call_operand.vmem [shape: f32[2,36,128], index: 0, kind: input, shape index: {}]   ;;  %s4423_s1 = inlined_call_operand.vmem [shape: bf16[1152,128], index: 1, kind: input, shape index: {}]   ;;  %s4424_s2 = inlined_call_operand.vmem [shape: f32[1,128], index: 2, kind: input, shape index: {}]   ;;  %s4425_s3 = inlined_call_operand.vmem [shape: bf16[1152,128], index: 3, kind: input, shape index: {}]   ;;  %s4426_s4 = inlined_call_operand.vmem [shape: f32[1,128], index: 4, kind: input, shape index: {}]   ;;  %s4427_s5 = inlined_call_operand.vmem [shape: f32[22,1], index: 5, kind: input, shape index: {}]   ;;  %s4428_s6 = inlined_call_operand.vmem [shape: bf16[128,6], index: 6, kind: input, shape index: {}]   ;;  %s4429_s7 = inlined_call_operand.vmem [shape: f32[1,6], index: 7, kind: input, shape index: {}]   ;;  %s4430_s8 = inlined_call_operand.hbm [shape: f32[2,1,6], index: 8, kind: output, shape index: {}]  }
   0x1   :  { %15 = vsyncpa [#allocation4 + $0x1], 0  ;;  %s3762_s27 = smov 0   ;;  %s3764_s28 = smov 0  }
   0x2   :  { %s3766_s29 = smov 0   ;;  %s3768_s30 = smov 0  }
   0x3 LB: > { %s3783_s9 = sadd.s32 4294967295, %s3711_s30   ;;  %s2721_s10 = sadd.s32 4294967294, %s3711_s30   ;;  %s3711_s30 = sphi %s3768_s30, %s4436_s30   ;;  %s3707_s29 = sphi %s3766_s29, %s4435_s29   ;;  %s3703_s28 = sphi %s3764_s28, %s4434_s28   ;;  %s3699_s27 = sphi %s3762_s27, %s4433_s27  }
   0x4   : > { %s3787_s11 = sadd.s32 1, %s3711_s30   ;;  %s201_s12 = sadd.s32 1, %s3707_s29 }
   0x5   : > { %s198_s13 = ssub.s32 %s3711_s30, %s3787_s11  ;;  %p211_p0 = scmp.ne.s32.totalorder %s3707_s29, %s3703_s28 }
   0x6   : > { %p199_p1 = scmp.eq.s32.totalorder %s198_s13, 0  ;;  %p212_p2 = scmp.eq.s32.totalorder %s3783_s9, 1 }
   0x7   : > { %p217_p3 = scmp.ne.s32.totalorder %s3703_s28, %s3699_s27  ;;  %p218_p4 = scmp.eq.s32.totalorder %s2721_s10, 1 }
   0x8   : > { %s3798_s14 = scalar_select %p199_p1, %s3707_s29, %s201_s12  }
   0x9   : > { %p3800_p5 = por %p212_p2, %p211_p0  ;;  %p3804_p6 = por %p218_p4, %p217_p3 }
   0xa   : > { %p2724_p7 = scmp.ge.s32.totalorder %s3711_s30, 1  ;;  %p265_p8 = scmp.lt.s32.totalorder %s3711_s30, 3 }
   0xc   : > { %p266_p9 = pnand %p2724_p7, %p265_p8 }
   0xd   : > { %v3497_v0 = vld [vmem:[%s4423_s1 + $0x40] sm:$0xff] (!%p266_p9)   ;;  %p298_p10 = scmp.lt.s32.totalorder (!%p266_p9), %s3783_s9, 1  ;;  %v3499_v2 = vld [vmem:[%s4423_s1 + $0x48] sm:$0xff] (!%p266_p9)   ;;  %v3501_v4 = vld [vmem:[%s4423_s1 + $0x50] sm:$0xff] (!%p266_p9)   ;;  %v3713_v38 = vmov (!%p266_p9), 0   ;;  %vm3715_vm0 = vmmov (!%p266_p9), 0  }
   0xe   : > { %269 = sbr.rel (%p266_p9) target bundleno = 1009 (0x3f1), region = 52  ;;  %v3498_v1 = vld [vmem:[%s4423_s1] sm:$0xff] (!%p266_p9)   ;;  %3072 = vmatprep.subr.bf16.mxu0 (!%p266_p9), %v3497_v0  ;;  %v3500_v3 = vld [vmem:[%s4423_s1 + $0x8] sm:$0xff] (!%p266_p9)   ;;  %v3502_v5 = vld [vmem:[%s4423_s1 + $0x10] sm:$0xff] (!%p266_p9)   ;;  %3495 = vset.pattern.permute.xlu0 (!%p266_p9), %v3713_v38  ;;  %vm2535_vm1 = vcmask (!%p266_p9), 1045504   ;;  %s2880_s26 = sshll.u32 (!%p266_p9), %s3783_s9, 4 }
   0xf   : > { %3092 = vmatprep.subr.bf16.mxu1 (!%p266_p9), %v3498_v1  ;;  %3073 = vmatpush3.bf16.msra.mxu0 (!%p266_p9), %v3497_v0  ;;  %v3503_v6 = vld [vmem:[%s4423_s1 + $0x58] sm:$0xff] (!%p266_p9)   ;;  %v3505_v8 = vld [vmem:[%s4423_s1 + $0x60] sm:$0xff] (!%p266_p9)   ;;  %v3507_v10 = vld [vmem:[%s4423_s1 + $0x68] sm:$0xff] (!%p266_p9)   ;;  %vm2651_vm2 = vcmask (!%p266_p9), 40960   ;;  %s4380_s19 = scalar_lea.hbm (!%p266_p9), %s4430_s8, %s2880_s26 }
  0x10   : > { %3093 = vmatpush3.bf16.msra.mxu1 (!%p266_p9), %v3498_v1  ;;  %3074 = vmatprep.subr.bf16.mxu0 (!%p266_p9), %v3499_v2  ;;  %v3504_v7 = vld [vmem:[%s4423_s1 + $0x18] sm:$0xff] (!%p266_p9)   ;;  %v3506_v9 = vld [vmem:[%s4423_s1 + $0x20] sm:$0xff] (!%p266_p9)   ;;  %v3508_v14 = vld [vmem:[%s4423_s1 + $0x28] sm:$0xff] (!%p266_p9)  }
  0x11   : > { %3094 = vmatprep.subr.bf16.mxu1 (!%p266_p9), %v3500_v3  ;;  %v3509_v18 = vld [vmem:[%s4423_s1 + $0x70] sm:$0xff] (!%p266_p9)   ;;  %v3511_v20 = vld [vmem:[%s4423_s1 + $0x78] sm:$0xff] (!%p266_p9)   ;;  %v3513_v24 = vld [vmem:[%s4423_s1 + $0x80] sm:$0xff] (!%p266_p9)   ;;  %3496 = vset.pattern.permute.xlu1 (!%p266_p9), %v3713_v38 }
  0x12   : > { %v3510_v19 = vld [vmem:[%s4423_s1 + $0x30] sm:$0xff] (!%p266_p9)   ;;  %v3512_v21 = vld [vmem:[%s4423_s1 + $0x38] sm:$0xff] (!%p266_p9)   ;;  %v3514_v25 = vld [vmem:[%s4423_s1 + $0xc0] sm:$0xff] (!%p266_p9)  }
  0x13   : > { %3075 = vmatpush3.bf16.msra.mxu0 (!%p266_p9), %v3499_v2  ;;  %v3515_v28 = vld [vmem:[%s4423_s1 + $0x88] sm:$0xff] (!%p266_p9)   ;;  %v3517_v33 = vld [vmem:[%s4423_s1 + $0x90] sm:$0xff] (!%p266_p9)   ;;  %v3519_v39 = vld [vmem:[%s4423_s1 + $0x98] sm:$0xff] (!%p266_p9)  }
  0x14   : > { %3095 = vmatpush3.bf16.msra.mxu1 (!%p266_p9), %v3500_v3  ;;  %3076 = vmatprep.subr.bf16.mxu0 (!%p266_p9), %v3501_v4  ;;  %v3516_v29 = vld [vmem:[%s4423_s1 + $0xc8] sm:$0xff] (!%p266_p9)   ;;  %v3518_v36 = vld [vmem:[%s4423_s1 + $0xd0] sm:$0xff] (!%p266_p9)   ;;  %v3520_v40 = vld [vmem:[%s4423_s1 + $0xd8] sm:$0xff] (!%p266_p9)  }
  0x15   : > { %s299_s13 = scalar_select %p298_p10, %s3783_s9, 1  ;;  %3096 = vmatprep.subr.bf16.mxu1 %v3502_v5  ;;  %v3521_v41 = vld [vmem:[%s4423_s1 + $0xa0] sm:$0xff]   ;;  %v3523_v43 = vld [vmem:[%s4423_s1 + $0xa8] sm:$0xff]   ;;  %v3525_v45 = vld [vmem:[%s4423_s1 + $0xb0] sm:$0xff]  }
  0x16   : > { %v3522_v42 = vld [vmem:[%s4423_s1 + $0xe0] sm:$0xff]   ;;  %v3524_v44 = vld [vmem:[%s4423_s1 + $0xe8] sm:$0xff]   ;;  %v3526_v46 = vld [vmem:[%s4423_s1 + $0xf0] sm:$0xff]  }
  0x17   : > { %s3452_s21 = smul.u32 40, %s299_s13  ;;  %3077 = vmatpush3.bf16.msra.mxu0 %v3501_v4  ;;  %v3527_v47 = vld [vmem:[%s4423_s1 + $0xb8] sm:$0xff]   ;;  %v3529_v50 = vld [vmem:[%s4423_s1 + $0x100] sm:$0xff]   ;;  %v3531_v58 = vld [vmem:[%s4423_s1 + $0x108] sm:$0xff]  }
  0x18   : > { %3097 = vmatpush3.bf16.msra.mxu1 %v3502_v5  ;;  %3078 = vmatprep.subr.bf16.mxu0 %v3503_v6  ;;  %v3528_v48 = vld [vmem:[%s4423_s1 + $0xf8] sm:$0xff]   ;;  %v3530_v52 = vld [vmem:[%s4423_s1 + $0x140] sm:$0xff]   ;;  %v3532_v59 = vld [vmem:[%s4423_s1 + $0x148] sm:$0xff]  }
  0x19   : > { %3098 = vmatprep.subr.bf16.mxu1 %v3504_v7  ;;  %s3845_s12 = scalar_lea.vmem %s4422_s0, %s3452_s21  ;;  %v3533_v62 = vld [vmem:[%s4423_s1 + $0x110] sm:$0xff]   ;;  %v3535_v0 = vld [vmem:[%s4423_s1 + $0x118] sm:$0xff]   ;;  %v3537_v2 = vld [vmem:[%s4423_s1 + $0x120] sm:$0xff]   ;;  %s3716_s21 = smov [#allocation3]  }
  0x1a   : > { %v325_v11 = vld [vmem:[%s3845_s12 + $0x1] sm:$0xff]  ;;  %v326_v12 = vld [vmem:[%s3845_s12 + $0x9] sm:$0xff]  ;;  %v327_v22 = vld [vmem:[%s3845_s12 + $0x11] sm:$0x3f]  ;;  %s3653_s22 = sshll.u32 %s3716_s21, 4  ;;  %s3654_s22 = int_to_ptr.vmem [resolvable:$false] %s3653_s22 }
  0x1b   : > { %3079 = vmatpush3.bf16.msra.mxu0 %v3503_v6  ;;  %v304_v13 = vld [vmem:[%s3845_s12] sm:$0xff]  ;;  %v328_v15 = vpack.c.bf16 %v326_v12, %v325_v11  ;;  %v3857_v16 = vld [vmem:[%s3845_s12 + $0x8] sm:$0xff]  ;;  %v306_v23 = vld [vmem:[%s3845_s12 + $0x10] sm:$0x3f]  ;;  %v329_v26 = vpack.c.bf16 %v327_v22, %v327_v22  ;;  %s3655_s23 = scalar_lea.vmem %s3654_s22, 32 }
  0x1c   : > { %3099 = vmatpush3.bf16.msra.mxu1 %v3504_v7  ;;  %3080 = vmatprep.subr.bf16.mxu0 %v3505_v8  ;;  %v307_v17 = vpack.c.bf16 %v3857_v16, %v304_v13  ;;  %v308_v27 = vpack.c.bf16 %v306_v23, %v306_v23  ;;  %v538_v30 = vld [vmem:[%s3845_s12 + $0x2] sm:$0xff]  ;;  %v539_v31 = vld [vmem:[%s3845_s12 + $0xa] sm:$0xff]  ;;  %v540_v49 = vld [vmem:[%s3845_s12 + $0x12] sm:$0x3f] }
  0x1d   : > { %3100 = vmatprep.subr.bf16.mxu1 %v3506_v9  ;;  %3088 = vmatprep.mubr.bf16.mxu0 %v328_v15  ;;  %v541_v32 = vpack.c.bf16 %v539_v31, %v538_v30  ;;  %v658_v34 = vld [vmem:[%s3845_s12 + $0x6] sm:$0xff]  ;;  %v3893_v35 = vld [vmem:[%s3845_s12 + $0xe] sm:$0xff]  ;;  %v660_v51 = vld [vmem:[%s3845_s12 + $0x16] sm:$0x3f]  ;;  %v542_v54 = vpack.c.bf16 %v540_v49, %v540_v49 }
  0x1e   : > { %3108 = vmatprep.mubr.bf16.mxu1 %v307_v17  ;;  %v661_v37 = vpack.c.bf16 %v3893_v35, %v658_v34  ;;  %v778_v53 = vld [vmem:[%s3845_s12 + $0x7] sm:$0xff]  ;;  %v779_v55 = vld [vmem:[%s3845_s12 + $0xf] sm:$0xff]  ;;  %v662_v56 = vpack.c.bf16 %v660_v51, %v660_v51  ;;  %v3536_v1 = vld [vmem:[%s4423_s1 + $0x158] sm:$0xff]  }
  0x1f   : > { %3081 = vmatpush3.bf16.msra.mxu0 %v3505_v8  ;;  %v899_v57 = vld [vmem:[%s3845_s12 + $0x10] sm:$0xff]  ;;  %v781_v60 = vpack.c.bf16 %v779_v55, %v778_v53  ;;  %v3538_v3 = vld [vmem:[%s4423_s1 + $0x160] sm:$0xff]   ;;  %v3539_v4 = vld [vmem:[%s4423_s1 + $0x128] sm:$0xff]  }
  0x20   : > { %3101 = vmatpush3.bf16.msra.mxu1 %v3506_v9  ;;  %3082 = vmatprep.subr.bf16.mxu0 %v3507_v10  ;;  %v901_v61 = vpack.c.bf16 %v899_v57, %v3857_v16  ;;  %v3534_v63 = vld [vmem:[%s4423_s1 + $0x150] sm:$0xff]   ;;  %v3540_v5 = vld [vmem:[%s4423_s1 + $0x168] sm:$0xff]   ;;  %v3974_v6 = vld [vmem:[%s4427_s5] sm:$0xff] }
  0x21   : > { %3102 = vmatprep.subr.bf16.mxu1 %v3508_v14  ;;  %1396 = vperm.xlu0 %3495, %v3974_v6   ;;  %v3541_v7 = vld [vmem:[%s4423_s1 + $0x130] sm:$0xff]   ;;  %v3543_v9 = vld [vmem:[%s4423_s1 + $0x138] sm:$0xff]   ;;  %v3545_v12 = vld [vmem:[%s4423_s1 + $0x180] sm:$0xff]  }
  0x22   : > { %v3542_v8 = vld [vmem:[%s4423_s1 + $0x170] sm:$0xff]   ;;  %v900_v13 = vld [vmem:[%s3845_s12 + $0x18] sm:$0x3f]  ;;  %v3548_v22 = vld [vmem:[%s4423_s1 + $0x1c8] sm:$0xff]  }
  0x23   : > { %3083 = vmatpush3.bf16.msra.mxu0 %v3507_v10  ;;  %v3544_v10 = vld [vmem:[%s4423_s1 + $0x178] sm:$0xff]   ;;  %v1018_v15 = vld [vmem:[%s3845_s12 + $0xc] sm:$0xff]  ;;  %v3554_v30 = vld [vmem:[%s4423_s1 + $0x1e0] sm:$0xff]  }
  0x24   : > { %3103 = vmatpush3.bf16.msra.mxu1 %v3508_v14  ;;  %3084 = vmatprep.subr.bf16.mxu0 %v3509_v18  ;;  %v780_v11 = vld [vmem:[%s3845_s12 + $0x17] sm:$0x3f]  ;;  %v3546_v14 = vld [vmem:[%s4423_s1 + $0x1c0] sm:$0xff]   ;;  %v1138_v17 = vld [vmem:[%s3845_s12 + $0xd] sm:$0xff] }
  0x25   : > { %3104 = vmatprep.subr.bf16.mxu1 %v3510_v19  ;;  %v1019_v16 = vld [vmem:[%s3845_s12 + $0x14] sm:$0xff]  ;;  %v3555_v31 = vld [vmem:[%s4423_s1 + $0x1a8] sm:$0xff]   ;;  %v1260_v53 = vld [vmem:[%s3845_s12 + $0x1e] sm:$0x3f] }
  0x26   : > { %v1021_v23 = vpack.c.bf16 %v1019_v16, %v1018_v15  ;;  %v3558_v34 = vld [vmem:[%s4423_s1 + $0x1f0] sm:$0xff]   ;;  %v1392_v38 = vld [vmem:[%s4427_s5 + $0x8] sm:$0xff]  ;;  %v3564_v49 = vld [vmem:[%s4423_s1 + $0x218] sm:$0xff]   ;;  %v1262_v55 = vpack.c.bf16 %v1260_v53, %v1260_v53 }
  0x27   : > { %3085 = vmatpush3.bf16.msra.mxu0 %v3509_v18  ;;  %v1139_v18 = vld [vmem:[%s3845_s12 + $0x15] sm:$0xff]  ;;  %1401 = vperm.xlu0 %3495, %v1392_v38   ;;  %v3570_v57 = vld [vmem:[%s4425_s3] sm:$0xff]   ;;  %v3580_v15 = vld [vmem:[%s4425_s3 + $0x28] sm:$0xff]  }
  0x28   : > { %3105 = vmatpush3.bf16.msra.mxu1 %v3510_v19  ;;  %3086 = vmatprep.subr.bf16.mxu0 %v3511_v20  ;;  %v782_v19 = vpack.c.bf16 %v780_v11, %v780_v11  ;;  %v3567_v51 = vld [vmem:[%s4423_s1 + $0x230] sm:$0xff]   ;;  %v3577_v11 = vld [vmem:[%s4425_s3 + $0x60] sm:$0xff]  }
  0x29   : > { %3106 = vmatprep.subr.bf16.mxu1 %v3512_v21  ;;  %v3581_v16 = vld [vmem:[%s4425_s3 + $0x70] sm:$0xff]  }
  0x2b   : > { %3087 = vmatpush3.bf16.msra.mxu0 %v3511_v20  ;;  %v3547_v20 = vld [vmem:[%s4423_s1 + $0x188] sm:$0xff]   ;;  %2523 = vperm.xlu0 %3495, %v1392_v38  }
  0x2c   : > { %3107 = vmatpush3.bf16.msra.mxu1 %v3512_v21  ;;  %3112 = vmatprep.subr.bf16.mxu0 %v3513_v24  ;;  %v902_v21 = vpack.c.bf16 %v900_v13, %v900_v13  ;;  %v3714_v13 = vmov 0.0  }
  0x2d   : > { %3132 = vmatprep.subr.bf16.mxu1 %v3514_v25  ;;  %1412 = vst [vmem:[#allocation2] sm:$0xff] %v3714_v13  ;;  %1413 = vst [vmem:[#allocation2 + $0x8] sm:$0xff] %v3714_v13 }
  0x2e   : > { %3089 = vmatmul.mubr.bf16.vlgmr.msra.gmra.mrb[0].mxu0 %v329_v26  ;;  %v3550_v26 = vld [vmem:[%s4423_s1 + $0x1d0] sm:$0xff]   ;;  %1414 = vst [vmem:[#allocation2 + $0x10] sm:$0xff] %v3714_v13  ;;  %1415 = vst [vmem:[#allocation2 + $0x18] sm:$0xff] %v3714_v13 }
  0x2f   : > { %3109 = vmatmul.mubr.bf16.vlgmr.msra.gmra.mrb[0].mxu1 %v308_v27  ;;  %3113 = vmatpush3.bf16.msra.mxu0 %v3513_v24  ;;  %v3549_v24 = vld [vmem:[%s4423_s1 + $0x190] sm:$0xff]   ;;  %v3551_v27 = vld [vmem:[%s4423_s1 + $0x198] sm:$0xff]   ;;  %1416 = vst [vmem:[#allocation2 + $0x20] sm:$0xf] %v3714_v13 }
  0x30   : > { %3133 = vmatpush3.bf16.msra.mxu1 %v3514_v25  ;;  %3114 = vmatprep.subr.bf16.mxu0 %v3515_v28  ;;  %v1141_v25 = vpack.c.bf16 %v1139_v18, %v1138_v17  ;;  %v3582_v17 = vld [vmem:[%s4425_s3 + $0x30] sm:$0xff]   ;;  %v3583_v18 = vld [vmem:[%s4425_s3 + $0x78] sm:$0xff]  }
  0x31   : > { %3134 = vmatprep.subr.bf16.mxu1 %v3516_v29  ;;  %3128 = vmatprep.mubr.bf16.mxu0 %v541_v32  ;;  %v3556_v32 = vld [vmem:[%s4423_s1 + $0x1e8] sm:$0xff]  }
  0x32   : > { %3148 = vmatprep.mubr.bf16.mxu1 %v661_v37  ;;  %v3560_v37 = vld [vmem:[%s4423_s1 + $0x1f8] sm:$0xff]  }
  0x33   : > { %3115 = vmatpush3.bf16.msra.mxu0 %v3515_v28  ;;  %v3552_v28 = vld [vmem:[%s4423_s1 + $0x1d8] sm:$0xff]  }
  0x34   : > { %3135 = vmatpush3.bf16.msra.mxu1 %v3516_v29  ;;  %3116 = vmatprep.subr.bf16.mxu0 %v3517_v33  ;;  %v3553_v29 = vld [vmem:[%s4423_s1 + $0x1a0] sm:$0xff]  }
  0x35   : > { %3136 = vmatprep.subr.bf16.mxu1 %v3518_v36 }
  0x37   : > { %3117 = vmatpush3.bf16.msra.mxu0 %v3517_v33  ;;  %v3557_v33 = vld [vmem:[%s4423_s1 + $0x1b0] sm:$0xff]  }
  0x38   : > { %3137 = vmatpush3.bf16.msra.mxu1 %v3518_v36  ;;  %3118 = vmatprep.subr.bf16.mxu0 %v3519_v39  ;;  %v3559_v36 = vld [vmem:[%s4423_s1 + $0x1b8] sm:$0xff]  }
  0x39   : > { %3138 = vmatprep.subr.bf16.mxu1 %v3520_v40 }
  0x3b   : > { %3119 = vmatpush3.bf16.msra.mxu0 %v3519_v39  ;;  %v1020_v39 = vld [vmem:[%s3845_s12 + $0x1c] sm:$0x3f] }
  0x3c   : > { %3139 = vmatpush3.bf16.msra.mxu1 %v3520_v40  ;;  %3120 = vmatprep.subr.bf16.mxu0 %v3521_v41  ;;  %v3561_v40 = vld [vmem:[%s4423_s1 + $0x200] sm:$0xff]  }
  0x3d   : > { %3140 = vmatprep.subr.bf16.mxu1 %v3522_v42 }
  0x3f   : > { %3121 = vmatpush3.bf16.msra.mxu0 %v3521_v41  ;;  %v1140_v41 = vld [vmem:[%s3845_s12 + $0x1d] sm:$0x3f] }
  0x40   : > { %3141 = vmatpush3.bf16.msra.mxu1 %v3522_v42  ;;  %3122 = vmatprep.subr.bf16.mxu0 %v3523_v43  ;;  %v1393_v42 = vld [vmem:[%s4427_s5 + $0x10] sm:$0x3f] }
  0x41   : > { %3142 = vmatprep.subr.bf16.mxu1 %v3524_v44  ;;  %1406 = vperm.xlu1 %3496, %v1393_v42  }
  0x43   : > { %3123 = vmatpush3.bf16.msra.mxu0 %v3523_v43  ;;  %v1259_v43 = vld [vmem:[%s3845_s12 + $0x16] sm:$0xff] }
  0x44   : > { %3143 = vmatpush3.bf16.msra.mxu1 %v3524_v44  ;;  %3124 = vmatprep.subr.bf16.mxu0 %v3525_v45  ;;  %v1022_v44 = vpack.c.bf16 %v1020_v39, %v1020_v39 }
  0x45   : > { %3144 = vmatprep.subr.bf16.mxu1 %v3526_v46  ;;  %2518 = vperm.xlu1 %3496, %v3974_v6  }
  0x47   : > { %3125 = vmatpush3.bf16.msra.mxu0 %v3525_v45  ;;  %v3562_v45 = vld [vmem:[%s4423_s1 + $0x208] sm:$0xff]  }
  0x48   : > { %3145 = vmatpush3.bf16.msra.mxu1 %v3526_v46  ;;  %3126 = vmatprep.subr.bf16.mxu0 %v3527_v47  ;;  %v1142_v46 = vpack.c.bf16 %v1140_v41, %v1140_v41 }
  0x49   : > { %3146 = vmatprep.subr.bf16.mxu1 %v3528_v48 }
  0x4b   : > { %3127 = vmatpush3.bf16.msra.mxu0 %v3527_v47  ;;  %v1261_v47 = vpack.c.bf16 %v1259_v43, %v3893_v35  ;;  %v3565_v35 = vld [vmem:[%s4423_s1 + $0x220] sm:$0xff]  }
  0x4c   : > { %3147 = vmatpush3.bf16.msra.mxu1 %v3528_v48  ;;  %3152 = vmatprep.subr.bf16.mxu0 %v3529_v50  ;;  %v3563_v48 = vld [vmem:[%s4423_s1 + $0x210] sm:$0xff]  }
  0x4d   : > { %3172 = vmatprep.subr.bf16.mxu1 %v3530_v52 }
  0x4e   : > { %3129 = vmatmul.mubr.bf16.vlgmr.msra.gmra.mrb[4].mxu0 %v542_v54  ;;  %v2515_v54 = vld [vmem:[%s4427_s5 + $0x10] sm:$0x3f] }
  0x4f   : > { %3153 = vmatpush3.bf16.msra.mxu0 %v3529_v50  ;;  %3149 = vmatmul.mubr.bf16.vlgmr.msra.gmra.mrb[4].mxu1 %v662_v56  ;;  %v3566_v50 = vld [vmem:[%s4423_s1 + $0x228] sm:$0xff]   ;;  %v3569_v56 = vld [vmem:[%s4425_s3 + $0x40] sm:$0xff]  }
  0x50   : > { %3173 = vmatpush3.bf16.msra.mxu1 %v3530_v52  ;;  %3154 = vmatprep.subr.bf16.mxu0 %v3531_v58  ;;  %v3568_v52 = vld [vmem:[%s4423_s1 + $0x238] sm:$0xff]  }
  0x51   : > { %3174 = vmatprep.subr.bf16.mxu1 %v3532_v59  ;;  %3168 = vmatprep.mubr.bf16.mxu0 %v781_v60  ;;  %v3573_v60 = vld [vmem:[%s4425_s3 + $0x50] sm:$0xff]  }
  0x52   : > { %3188 = vmatprep.mubr.bf16.mxu1 %v901_v61  ;;  %2528 = vperm.xlu1 %3496, %v2515_v54   ;;  %v3574_v61 = vld [vmem:[%s4425_s3 + $0x10] sm:$0xff]  }
  0x53   : > { %3155 = vmatpush3.bf16.msra.mxu0 %v3531_v58  ;;  %v3571_v58 = vld [vmem:[%s4425_s3 + $0x48] sm:$0xff]  }
  0x54   : > { %3175 = vmatpush3.bf16.msra.mxu1 %v3532_v59  ;;  %3156 = vmatprep.subr.bf16.mxu0 %v3533_v62  ;;  %v3572_v59 = vld [vmem:[%s4425_s3 + $0x8] sm:$0xff]  }
  0x55   : > { %3176 = vmatprep.subr.bf16.mxu1 %v3534_v63 }
  0x57   : > { %3157 = vmatpush3.bf16.msra.mxu0 %v3533_v62 }
  0x58   : > { %3177 = vmatpush3.bf16.msra.mxu1 %v3534_v63  ;;  %3158 = vmatprep.subr.bf16.mxu0 %v3535_v0 }
  0x59   : > { %3178 = vmatprep.subr.bf16.mxu1 %v3536_v1 }
  0x5b   : > { %3159 = vmatpush3.bf16.msra.mxu0 %v3535_v0 }
  0x5c   : > { %3179 = vmatpush3.bf16.msra.mxu1 %v3536_v1  ;;  %3160 = vmatprep.subr.bf16.mxu0 %v3537_v2  ;;  %v3575_v1 = vld [vmem:[%s4425_s3 + $0x58] sm:$0xff]  }
  0x5d   : > { %3180 = vmatprep.subr.bf16.mxu1 %v3538_v3 }
  0x5f   : > { %3161 = vmatpush3.bf16.msra.mxu0 %v3537_v2  ;;  %v3576_v2 = vld [vmem:[%s4425_s3 + $0x18] sm:$0xff]  }
  0x60   : > { %3181 = vmatpush3.bf16.msra.mxu1 %v3538_v3  ;;  %3162 = vmatprep.subr.bf16.mxu0 %v3539_v4 }
  0x61   : > { %3182 = vmatprep.subr.bf16.mxu1 %v3540_v5 }
  0x63   : > { %3163 = vmatpush3.bf16.msra.mxu0 %v3539_v4 }
  0x64   : > { %3183 = vmatpush3.bf16.msra.mxu1 %v3540_v5  ;;  %3164 = vmatprep.subr.bf16.mxu0 %v3541_v7 }
  0x65   : > { %3184 = vmatprep.subr.bf16.mxu1 %v3542_v8 }
  0x67   : > { %3165 = vmatpush3.bf16.msra.mxu0 %v3541_v7 }
  0x68   : > { %3185 = vmatpush3.bf16.msra.mxu1 %v3542_v8  ;;  %3166 = vmatprep.subr.bf16.mxu0 %v3543_v9 }
  0x69   : > { %3186 = vmatprep.subr.bf16.mxu1 %v3544_v10 }
  0x6b   : > { %3167 = vmatpush3.bf16.msra.mxu0 %v3543_v9 }
  0x6c   : > { %3187 = vmatpush3.bf16.msra.mxu1 %v3544_v10  ;;  %3192 = vmatprep.subr.bf16.mxu0 %v3545_v12 }
  0x6d   : > { %3212 = vmatprep.subr.bf16.mxu1 %v3546_v14 }
  0x6e   : > { %3169 = vmatmul.mubr.bf16.vlgmr.msra.gmra.mrb[8].mxu0 %v782_v19  ;;  %v3584_v19 = vld [vmem:[%s4425_s3 + $0x38] sm:$0xff]  }
  0x6f   : > { %3193 = vmatpush3.bf16.msra.mxu0 %v3545_v12  ;;  %3189 = vmatmul.mubr.bf16.vlgmr.msra.gmra.mrb[8].mxu1 %v902_v21  ;;  %v3578_v12 = vld [vmem:[%s4425_s3 + $0x20] sm:$0xff]  }
  0x70   : > { %3213 = vmatpush3.bf16.msra.mxu1 %v3546_v14  ;;  %3194 = vmatprep.subr.bf16.mxu0 %v3547_v20  ;;  %v3579_v14 = vld [vmem:[%s4425_s3 + $0x68] sm:$0xff]   ;;  %v4143_v21 = vld [vmem:[%s4425_s3 + $0xc0] sm:$0xff]  }
  0x71   : > { %3214 = vmatprep.subr.bf16.mxu1 %v3548_v22  ;;  %3208 = vmatprep.mubr.bf16.mxu0 %v1021_v23 }
  0x72   : > { %3228 = vmatprep.mubr.bf16.mxu1 %v1141_v25 }
  0x73   : > { %3195 = vmatpush3.bf16.msra.mxu0 %v3547_v20  ;;  %v4138_v20 = vld [vmem:[%s4425_s3 + $0x80] sm:$0xff]  }
  0x74   : > { %3215 = vmatpush3.bf16.msra.mxu1 %v3548_v22  ;;  %3196 = vmatprep.subr.bf16.mxu0 %v3549_v24 }
  0x75   : > { %3216 = vmatprep.subr.bf16.mxu1 %v3550_v26 }
  0x77   : > { %3197 = vmatpush3.bf16.msra.mxu0 %v3549_v24 }
  0x78   : > { %3217 = vmatpush3.bf16.msra.mxu1 %v3550_v26  ;;  %3198 = vmatprep.subr.bf16.mxu0 %v3551_v27 }
  0x79   : > { %3218 = vmatprep.subr.bf16.mxu1 %v3552_v28 }
  0x7b   : > { %3199 = vmatpush3.bf16.msra.mxu0 %v3551_v27 }
  0x7c   : > { %3219 = vmatpush3.bf16.msra.mxu1 %v3552_v28  ;;  %3200 = vmatprep.subr.bf16.mxu0 %v3553_v29 }
  0x7d   : > { %3220 = vmatprep.subr.bf16.mxu1 %v3554_v30 }
  0x7f   : > { %3201 = vmatpush3.bf16.msra.mxu0 %v3553_v29 }
  0x80   : > { %3221 = vmatpush3.bf16.msra.mxu1 %v3554_v30  ;;  %3202 = vmatprep.subr.bf16.mxu0 %v3555_v31 }
  0x81   : > { %3222 = vmatprep.subr.bf16.mxu1 %v3556_v32 }
  0x83   : > { %3203 = vmatpush3.bf16.msra.mxu0 %v3555_v31 }
  0x84   : > { %3223 = vmatpush3.bf16.msra.mxu1 %v3556_v32  ;;  %3204 = vmatprep.subr.bf16.mxu0 %v3557_v33 }
  0x85   : > { %3224 = vmatprep.subr.bf16.mxu1 %v3558_v34 }
  0x87   : > { %3205 = vmatpush3.bf16.msra.mxu0 %v3557_v33 }
  0x88   : > { %3225 = vmatpush3.bf16.msra.mxu1 %v3558_v34  ;;  %3206 = vmatprep.subr.bf16.mxu0 %v3559_v36 }
  0x89   : > { %3226 = vmatprep.subr.bf16.mxu1 %v3560_v37 }
  0x8b   : > { %3207 = vmatpush3.bf16.msra.mxu0 %v3559_v36 }
  0x8c   : > { %3227 = vmatpush3.bf16.msra.mxu1 %v3560_v37  ;;  %3232 = vmatprep.subr.bf16.mxu0 %v3561_v40 }
  0x8d   : > { %3252 = vmatprep.subr.bf16.mxu1 %v3569_v56 }
  0x8e   : > { %3209 = vmatmul.mubr.bf16.vlgmr.msra.gmra.mrb[12].mxu0 %v1022_v44 }
  0x8f   : > { %3233 = vmatpush3.bf16.msra.mxu0 %v3561_v40  ;;  %3229 = vmatmul.mubr.bf16.vlgmr.msra.gmra.mrb[12].mxu1 %v1142_v46 }
  0x90   : > { %3234 = vmatprep.subr.bf16.mxu0 %v3562_v45  ;;  %3248 = vmatprep.mubr.bf16.mxu0 %v1261_v47 }
  0x91   : > { %3253 = vmatpush3.bf16.msra.mxu1 %v3569_v56 }
  0x92   : > { %3254 = vmatprep.subr.bf16.mxu1 %v3571_v58 }
  0x93   : > { %3235 = vmatpush3.bf16.msra.mxu0 %v3562_v45 }
  0x94   : > { %3236 = vmatprep.subr.bf16.mxu0 %v3563_v48 }
  0x95   : > { %3255 = vmatpush3.bf16.msra.mxu1 %v3571_v58 }
  0x96   : > { %3256 = vmatprep.subr.bf16.mxu1 %v3573_v60 }
  0x97   : > { %3237 = vmatpush3.bf16.msra.mxu0 %v3563_v48 }
  0x98   : > { %3238 = vmatprep.subr.bf16.mxu0 %v3564_v49 }
  0x99   : > { %3257 = vmatpush3.bf16.msra.mxu1 %v3573_v60 }
  0x9a   : > { %3258 = vmatprep.subr.bf16.mxu1 %v3575_v1 }
  0x9b   : > { %3239 = vmatpush3.bf16.msra.mxu0 %v3564_v49 }
  0x9c   : > { %3240 = vmatprep.subr.bf16.mxu0 %v3565_v35 }
  0x9d   : > { %3259 = vmatpush3.bf16.msra.mxu1 %v3575_v1  ;;  %v2798_v1 = vld [vmem:[%s4424_s2] ss:$0 sm:$0xff] }
  0x9e   : > { %3260 = vmatprep.subr.bf16.mxu1 %v3577_v11 }
  0x9f   : > { %3241 = vmatpush3.bf16.msra.mxu0 %v3565_v35 }
  0xa0   : > { %3242 = vmatprep.subr.bf16.mxu0 %v3566_v50 }
  0xa1   : > { %3261 = vmatpush3.bf16.msra.mxu1 %v3577_v11 }
  0xa2   : > { %3262 = vmatprep.subr.bf16.mxu1 %v3579_v14 }
  0xa3   : > { %3243 = vmatpush3.bf16.msra.mxu0 %v3566_v50 }
  0xa4   : > { %3244 = vmatprep.subr.bf16.mxu0 %v3567_v51 }
  0xa5   : > { %3263 = vmatpush3.bf16.msra.mxu1 %v3579_v14 }
  0xa6   : > { %3264 = vmatprep.subr.bf16.mxu1 %v3581_v16 }
  0xa7   : > { %3245 = vmatpush3.bf16.msra.mxu0 %v3567_v51 }
  0xa8   : > { %3246 = vmatprep.subr.bf16.mxu0 %v3568_v52 }
  0xa9   : > { %3265 = vmatpush3.bf16.msra.mxu1 %v3581_v16 }
  0xaa   : > { %3266 = vmatprep.subr.bf16.mxu1 %v3583_v18 }
  0xab   : > { %3247 = vmatpush3.bf16.msra.mxu0 %v3568_v52 }
  0xac   : > { %3272 = vmatprep.subr.bf16.mxu0 %v3570_v57 }
  0xad   : > { %3267 = vmatpush3.bf16.msra.mxu1 %v3583_v18 }
  0xae   : > { %3249 = vmatmul.mubr.bf16.vlgmr.msra.gmra.mrb[16].mxu0 %v1262_v55  ;;  %3292 = vmatprep.subr.bf16.mxu1 %v4138_v20 }
  0xaf   : > { %3273 = vmatpush3.bf16.msra.mxu0 %v3570_v57 }
  0xb0   : > { %3274 = vmatprep.subr.bf16.mxu0 %v3572_v59 }
  0xb3   : > { %3275 = vmatpush3.bf16.msra.mxu0 %v3572_v59 }
  0xb4   : > { %3276 = vmatprep.subr.bf16.mxu0 %v3574_v61 }
  0xb7   : > { %3277 = vmatpush3.bf16.msra.mxu0 %v3574_v61 }
  0xb8   : > { %3278 = vmatprep.subr.bf16.mxu0 %v3576_v2 }
  0xbb   : > { %3279 = vmatpush3.bf16.msra.mxu0 %v3576_v2 }
  0xbc   : > { %3280 = vmatprep.subr.bf16.mxu0 %v3578_v12 }
  0xbf   : > { %3281 = vmatpush3.bf16.msra.mxu0 %v3578_v12 }
  0xc0   : > { %3282 = vmatprep.subr.bf16.mxu0 %v3580_v15  ;;  %v1407_v11 = vpop.permute.xlu1 %1406 }
  0xc3   : > { %3283 = vmatpush3.bf16.msra.mxu0 %v3580_v15 }
  0xc4   : > { %3284 = vmatprep.subr.bf16.mxu0 %v3582_v17 }
  0xc7   : > { %3285 = vmatpush3.bf16.msra.mxu0 %v3582_v17 }
  0xc8   : > { %3286 = vmatprep.subr.bf16.mxu0 %v3584_v19 }
  0xcb   : > { %3287 = vmatpush3.bf16.msra.mxu0 %v3584_v19 }
  0xcc   : > { %3312 = vmatprep.subr.bf16.mxu0 %v4143_v21 }
 0x101   : > { %v3090_v62 = vpop.f32.mrb[0].mxu0 }
 0x102   : > { %v3110_v63 = vpop.f32.mrb[0].mxu1  ;;  %v428_v0 = vpop.f32.mrb[1].mxu0 }
 0x103   : > { %v533_v3 = vadd.f32 %v3110_v63, %v3090_v62  ;;  %v524_v4 = vpop.f32.mrb[1].mxu1  ;;  %v3091_v5 = vpop.f32.mrb[2].mxu0 }
 0x104   : > { %v525_v6 = vadd.f32 %v524_v4, %v428_v0  ;;  %v3111_v7 = vpop.f32.mrb[2].mxu1  ;;  %v431_v8 = vpop.f32.mrb[3].mxu0 }
 0x105   : > { %v527_v9 = vpop.f32.mrb[3].mxu1 }
 0x106   : > { %v528_v10 = vadd.f32 %v527_v9, %v431_v8 }
 0x121   : > { %v3130_v22 = vpop.f32.mrb[4].mxu0 }
 0x122   : > { %v657_v23 = vadd.f32 %v3130_v22, %v533_v3  ;;  %v641_v24 = vpop.f32.mrb[5].mxu0  ;;  %v3150_v25 = vpop.f32.mrb[4].mxu1 }
 0x123   : > { %v655_v26 = vadd.f32 %v641_v24, %v525_v6  ;;  %v3131_v27 = vpop.f32.mrb[6].mxu0  ;;  %v761_v28 = vpop.f32.mrb[5].mxu1 }
 0x124   : > { %v777_v29 = vadd.f32 %v3150_v25, %v657_v23  ;;  %v644_v30 = vpop.f32.mrb[7].mxu0  ;;  %v3151_v31 = vpop.f32.mrb[6].mxu1 }
 0x125   : > { %v656_v32 = vadd.f32 %v644_v30, %v528_v10  ;;  %v775_v33 = vadd.f32 %v761_v28, %v655_v26  ;;  %v764_v34 = vpop.f32.mrb[7].mxu1  ;;  %v1397_v6 = vpop.permute.xlu0 %1396 }
 0x127   : > { %v776_v36 = vadd.f32 %v764_v34, %v656_v32 }
 0x129   : > { %v1402_v19 = vpop.permute.xlu0 %1401 }
 0x141   : > { %v3170_v37 = vpop.f32.mrb[8].mxu0 }
 0x142   : > { %v897_v38 = vadd.f32 %v3170_v37, %v777_v29  ;;  %v881_v39 = vpop.f32.mrb[9].mxu0  ;;  %v3190_v40 = vpop.f32.mrb[8].mxu1  ;;  %v3587_v37 = vld [vmem:[%s4425_s3 + $0x88] sm:$0xff]  }
 0x143   : > { %v895_v41 = vadd.f32 %v881_v39, %v775_v33  ;;  %v3171_v42 = vpop.f32.mrb[10].mxu0  ;;  %v1001_v43 = vpop.f32.mrb[9].mxu1 }
 0x144   : > { %v1017_v44 = vadd.f32 %v3190_v40, %v897_v38  ;;  %v884_v45 = vpop.f32.mrb[11].mxu0  ;;  %v3191_v46 = vpop.f32.mrb[10].mxu1  ;;  %v3588_v40 = vld [vmem:[%s4425_s3 + $0xc8] sm:$0xff]  }
 0x145   : > { %v896_v47 = vadd.f32 %v884_v45, %v776_v36  ;;  %v1015_v48 = vadd.f32 %v1001_v43, %v895_v41  ;;  %v1004_v49 = vpop.f32.mrb[11].mxu1  ;;  %v3589_v43 = vld [vmem:[%s4425_s3 + $0x90] sm:$0xff]   ;;  %v3593_v45 = vld [vmem:[%s4425_s3 + $0xa0] sm:$0xff]  }
 0x146   : > { %v3594_v46 = vld [vmem:[%s4425_s3 + $0xe0] sm:$0xff]  }
 0x147   : > { %v1016_v35 = vadd.f32 %v1004_v49, %v896_v47  ;;  %v3595_v47 = vld [vmem:[%s4425_s3 + $0xa8] sm:$0xff]   ;;  %v3597_v49 = vld [vmem:[%s4425_s3 + $0xb0] sm:$0xff]  }
 0x161   : > { %v3210_v50 = vpop.f32.mrb[12].mxu0 }
 0x162   : > { %v1137_v51 = vadd.f32 %v3210_v50, %v1017_v44  ;;  %v1121_v52 = vpop.f32.mrb[13].mxu0  ;;  %v3230_v53 = vpop.f32.mrb[12].mxu1  ;;  %v3590_v44 = vld [vmem:[%s4425_s3 + $0xd0] sm:$0xff]   ;;  %v3599_v50 = vld [vmem:[%s4425_s3 + $0xb8] sm:$0xff]  }
 0x163   : > { %v1135_v54 = vadd.f32 %v1121_v52, %v1015_v48  ;;  %v3211_v55 = vpop.f32.mrb[14].mxu0  ;;  %v1241_v56 = vpop.f32.mrb[13].mxu1  ;;  %v3596_v48 = vld [vmem:[%s4425_s3 + $0xe8] sm:$0xff]   ;;  %v3601_v52 = vld [vmem:[%s4425_s3 + $0x100] sm:$0xff]  }
 0x164   : > { %v1257_v57 = vadd.f32 %v3230_v53, %v1137_v51  ;;  %v1124_v58 = vpop.f32.mrb[15].mxu0  ;;  %v3231_v59 = vpop.f32.mrb[14].mxu1  ;;  %v3600_v51 = vld [vmem:[%s4425_s3 + $0xf8] sm:$0xff]   ;;  %v3602_v53 = vld [vmem:[%s4425_s3 + $0x140] sm:$0xff]  }
 0x165   : > { %v1136_v60 = vadd.f32 %v1124_v58, %v1016_v35  ;;  %v1255_v61 = vadd.f32 %v1241_v56, %v1135_v54  ;;  %v1244_v62 = vpop.f32.mrb[15].mxu1  ;;  %v3598_v35 = vld [vmem:[%s4425_s3 + $0xf0] sm:$0xff]   ;;  %v3603_v59 = vld [vmem:[%s4425_s3 + $0x108] sm:$0xff]  }
 0x167   : > { %v1256_v63 = vadd.f32 %v1244_v62, %v1136_v60  ;;  %v3604_v60 = vld [vmem:[%s4425_s3 + $0x148] sm:$0xff]   ;;  %v3605_v62 = vld [vmem:[%s4425_s3 + $0x110] sm:$0xff]  }
 0x181   : > { %v3250_v0 = vpop.f32.mrb[16].mxu0 }
 0x182   : > { %v1377_v2 = vadd.f32 %v3250_v0, %v1257_v57  ;;  %v1361_v3 = vpop.f32.mrb[17].mxu0  ;;  %v3607_v0 = vld [vmem:[%s4425_s3 + $0x118] sm:$0xff]  }
 0x183   : > { %v1375_v4 = vadd.f32 %v1361_v3, %v1255_v61  ;;  %v3251_v5 = vpop.f32.mrb[18].mxu0  ;;  %v3610_v3 = vld [vmem:[%s4425_s3 + $0x160] sm:$0xff]  }
 0x184   : > { %v1387_v7 = vadd.f32 %v2798_v1, %v1377_v2  ;;  %v1364_v8 = vpop.f32.mrb[19].mxu0  ;;  %v3609_v2 = vld [vmem:[%s4425_s3 + $0x120] sm:$0xff]   ;;  %v3612_v5 = vld [vmem:[%s4425_s3 + $0x168] sm:$0xff]  }
 0x185   : > { %v1385_v9 = vadd.f32 %v2798_v1, %v1375_v4  ;;  %v1376_v10 = vadd.f32 %v1364_v8, %v1256_v63  ;;  %v3606_v63 = vld [vmem:[%s4425_s3 + $0x150] sm:$0xff]   ;;  %v3611_v4 = vld [vmem:[%s4425_s3 + $0x128] sm:$0xff]   ;;  %v3615_v8 = vld [vmem:[%s4425_s3 + $0x138] sm:$0xff]  }
 0x186   : > { %v1390_v12 = vmax.f32 %v1387_v7, 0.0  ;;  %v3614_v7 = vld [vmem:[%s4425_s3 + $0x170] sm:$0xff]  }
 0x187   : > { %v1388_v14 = vmax.f32 %v1385_v9, 0.0  ;;  %v1386_v15 = vadd.f32 %v2798_v1, %v1376_v10  ;;  %v3608_v1 = vld [vmem:[%s4425_s3 + $0x158] sm:$0xff]   ;;  %v3617_v10 = vld [vmem:[%s4425_s3 + $0x180] sm:$0xff]  }
 0x188   : > { %v1411_v16 = vmul.f32 %v1407_v11, %v1390_v12  ;;  %v3616_v9 = vld [vmem:[%s4425_s3 + $0x178] sm:$0xff]   ;;  %v3618_v12 = vld [vmem:[%s4425_s3 + $0x1c0] sm:$0xff]  }
 0x189   : > { %v4150_v17 = vmul.f32 %v1397_v6, %v1388_v14  ;;  %v1389_v18 = vmax.f32 %v1386_v15, 0.0  ;;  %v3613_v6 = vld [vmem:[%s4425_s3 + $0x130] sm:$0xff]  }
 0x18a   : > { %1419 = vst [vmem:[#allocation2 + $0x17] sm:$0x3f] %v1411_v16 }
 0x18b   : > { %1417 = vst [vmem:[#allocation2 + $0x7] sm:$0xff] %v4150_v17  ;;  %v4153_v22 = vmul.f32 %v1402_v19, %v1389_v18 }
 0x18d   : > { %1418 = vst [vmem:[#allocation2 + $0xf] sm:$0xff] %v4153_v22  ;;  %v1897_v23 = vpack.c.bf16 %v4153_v22, %v4150_v17 }
 0x191   : > { %v1896_v11 = vld [vmem:[#allocation2 + $0x17] sm:$0x3f] }
 0x192   : > { %v1441_v24 = vld [vmem:[#allocation2 + $0x1] sm:$0xff]  ;;  %v2016_v14 = vld [vmem:[#allocation2 + $0x18] sm:$0x3f]  ;;  %v1898_v19 = vpack.c.bf16 %v1896_v11, %v1896_v11 }
 0x193   : > { %v1420_v25 = vld [vmem:[#allocation2] sm:$0xff]  ;;  %v2018_v22 = vpack.c.bf16 %v2016_v14, %v2016_v14 }
 0x194   : > { %v1442_v26 = vld [vmem:[#allocation2 + $0x9] sm:$0xff]  ;;  %v1443_v28 = vld [vmem:[#allocation2 + $0x11] sm:$0x3f] }
 0x195   : > { %v4158_v27 = vld [vmem:[#allocation2 + $0x8] sm:$0xff]  ;;  %v1444_v29 = vpack.c.bf16 %v1442_v26, %v1441_v24  ;;  %v1445_v31 = vpack.c.bf16 %v1443_v28, %v1443_v28  ;;  %v1422_v32 = vld [vmem:[#allocation2 + $0x10] sm:$0x3f]  ;;  %v1776_v55 = vld [vmem:[#allocation2 + $0x16] sm:$0x3f] }
 0x196   : > { %v1423_v30 = vpack.c.bf16 %v4158_v27, %v1420_v25  ;;  %v1655_v33 = vld [vmem:[#allocation2 + $0xa] sm:$0xff]  ;;  %v1424_v36 = vpack.c.bf16 %v1422_v32, %v1422_v32  ;;  %v1654_v38 = vld [vmem:[#allocation2 + $0x2] sm:$0xff]  ;;  %v1656_v54 = vld [vmem:[#allocation2 + $0x12] sm:$0x3f]  ;;  %v1778_v58 = vpack.c.bf16 %v1776_v55, %v1776_v55 }
 0x197   : > { %v4161_v34 = vld [vmem:[#allocation2 + $0xe] sm:$0xff]  ;;  %3268 = vmatprep.mubr.bf16.mxu1 %v1444_v29  ;;  %v1774_v39 = vld [vmem:[#allocation2 + $0x6] sm:$0xff]  ;;  %v1657_v41 = vpack.c.bf16 %v1655_v33, %v1654_v38  ;;  %v1658_v57 = vpack.c.bf16 %v1656_v54, %v1656_v54  ;;  %v3623_v29 = vld [vmem:[%s4425_s3 + $0x198] sm:$0xff]  }
 0x198   : > { %3288 = vmatprep.mubr.bf16.mxu0 %v1423_v30  ;;  %3269 = vmatmul.mubr.bf16.vlgmr.msra.gmra.mrb[16].mxu1 %v1445_v31  ;;  %v1777_v42 = vpack.c.bf16 %v4161_v34, %v1774_v39  ;;  %v2015_v56 = vld [vmem:[#allocation2 + $0x10] sm:$0xff]  ;;  %v3620_v26 = vld [vmem:[%s4425_s3 + $0x1c8] sm:$0xff]   ;;  %v3624_v30 = vld [vmem:[%s4425_s3 + $0x1d8] sm:$0xff]  }
 0x199   : > { %3289 = vmatmul.mubr.bf16.vlgmr.msra.gmra.mrb[20].mxu0 %v1424_v36  ;;  %3293 = vmatpush3.bf16.msra.mxu1 %v4138_v20  ;;  %v3591_v20 = vld [vmem:[%s4425_s3 + $0x98] sm:$0xff]   ;;  %v2017_v61 = vpack.c.bf16 %v2015_v56, %v4158_v27  ;;  %v2134_v15 = vld [vmem:[#allocation2 + $0xc] sm:$0xff]  ;;  %v3625_v31 = vld [vmem:[%s4425_s3 + $0x1a0] sm:$0xff]  }
 0x19a   : > { %3313 = vmatpush3.bf16.msra.mxu0 %v4143_v21  ;;  %3308 = vmatprep.mubr.bf16.mxu1 %v1657_v41  ;;  %v3592_v21 = vld [vmem:[%s4425_s3 + $0xd8] sm:$0xff]   ;;  %v2254_v17 = vld [vmem:[#allocation2 + $0xd] sm:$0xff]  ;;  %v3626_v32 = vld [vmem:[%s4425_s3 + $0x1e0] sm:$0xff]  }
 0x19b   : > { %3328 = vmatprep.mubr.bf16.mxu0 %v1777_v42  ;;  %3294 = vmatprep.subr.bf16.mxu1 %v3587_v37  ;;  %v2135_v16 = vld [vmem:[#allocation2 + $0x14] sm:$0xff]  ;;  %v3627_v33 = vld [vmem:[%s4425_s3 + $0x1a8] sm:$0xff]   ;;  %v3633_v41 = vld [vmem:[%s4425_s3 + $0x200] sm:$0xff]  }
 0x19c   : > { %3314 = vmatprep.subr.bf16.mxu0 %v3588_v40  ;;  %v2255_v18 = vld [vmem:[#allocation2 + $0x15] sm:$0xff]  ;;  %v2137_v24 = vpack.c.bf16 %v2135_v16, %v2134_v15  ;;  %v3628_v36 = vld [vmem:[%s4425_s3 + $0x1e8] sm:$0xff]  }
 0x19d   : > { %3295 = vmatpush3.bf16.msra.mxu1 %v3587_v37  ;;  %v2257_v25 = vpack.c.bf16 %v2255_v18, %v2254_v17  ;;  %v3621_v27 = vld [vmem:[%s4425_s3 + $0x190] sm:$0xff]   ;;  %v3631_v39 = vld [vmem:[%s4425_s3 + $0x1b8] sm:$0xff]  }
 0x19e   : > { %3315 = vmatpush3.bf16.msra.mxu0 %v3588_v40  ;;  %3296 = vmatprep.subr.bf16.mxu1 %v3589_v43  ;;  %v3622_v28 = vld [vmem:[%s4425_s3 + $0x1d0] sm:$0xff]   ;;  %v3632_v40 = vld [vmem:[%s4425_s3 + $0x1f8] sm:$0xff]  }
 0x19f   : > { %3316 = vmatprep.subr.bf16.mxu0 %v3590_v44  ;;  %v3629_v37 = vld [vmem:[%s4425_s3 + $0x1b0] sm:$0xff]   ;;  %v2136_v42 = vld [vmem:[#allocation2 + $0x1c] sm:$0x3f] }
 0x1a0   : > { %v3630_v38 = vld [vmem:[%s4425_s3 + $0x1f0] sm:$0xff]  }
 0x1a1   : > { %3297 = vmatpush3.bf16.msra.mxu1 %v3589_v43  ;;  %v2256_v43 = vld [vmem:[#allocation2 + $0x1d] sm:$0x3f] }
 0x1a2   : > { %3317 = vmatpush3.bf16.msra.mxu0 %v3590_v44  ;;  %3298 = vmatprep.subr.bf16.mxu1 %v3591_v20  ;;  %v2375_v44 = vld [vmem:[#allocation2 + $0x16] sm:$0xff] }
 0x1a3   : > { %3318 = vmatprep.subr.bf16.mxu0 %v3592_v21 }
 0x1a5   : > { %3299 = vmatpush3.bf16.msra.mxu1 %v3591_v20  ;;  %v2138_v20 = vpack.c.bf16 %v2136_v42, %v2136_v42 }
 0x1a6   : > { %3319 = vmatpush3.bf16.msra.mxu0 %v3592_v21  ;;  %3300 = vmatprep.subr.bf16.mxu1 %v3593_v45  ;;  %v2258_v21 = vpack.c.bf16 %v2256_v43, %v2256_v43 }
 0x1a7   : > { %3320 = vmatprep.subr.bf16.mxu0 %v3594_v46 }
 0x1a9   : > { %3301 = vmatpush3.bf16.msra.mxu1 %v3593_v45  ;;  %v3634_v45 = vld [vmem:[%s4425_s3 + $0x208] sm:$0xff]  }
 0x1aa   : > { %3321 = vmatpush3.bf16.msra.mxu0 %v3594_v46  ;;  %3302 = vmatprep.subr.bf16.mxu1 %v3595_v47  ;;  %v2377_v46 = vpack.c.bf16 %v2375_v44, %v4161_v34  ;;  %v3637_v34 = vld [vmem:[%s4425_s3 + $0x220] sm:$0xff]  }
 0x1ab   : > { %3322 = vmatprep.subr.bf16.mxu0 %v3596_v48 }
 0x1ad   : > { %3303 = vmatpush3.bf16.msra.mxu1 %v3595_v47  ;;  %v3635_v47 = vld [vmem:[%s4425_s3 + $0x210] sm:$0xff]  }
 0x1ae   : > { %3323 = vmatpush3.bf16.msra.mxu0 %v3596_v48  ;;  %3304 = vmatprep.subr.bf16.mxu1 %v3597_v49  ;;  %v3636_v48 = vld [vmem:[%s4425_s3 + $0x218] sm:$0xff]  }
 0x1af   : > { %3324 = vmatprep.subr.bf16.mxu0 %v3598_v35 }
 0x1b1   : > { %3305 = vmatpush3.bf16.msra.mxu1 %v3597_v49  ;;  %v3638_v49 = vld [vmem:[%s4425_s3 + $0x228] sm:$0xff]  }
 0x1b2   : > { %3325 = vmatpush3.bf16.msra.mxu0 %v3598_v35  ;;  %3306 = vmatprep.subr.bf16.mxu1 %v3599_v50  ;;  %v3639_v35 = vld [vmem:[%s4425_s3 + $0x230] sm:$0xff]  }
 0x1b3   : > { %3326 = vmatprep.subr.bf16.mxu0 %v3600_v51 }
 0x1b5   : > { %3307 = vmatpush3.bf16.msra.mxu1 %v3599_v50  ;;  %v3640_v50 = vld [vmem:[%s4425_s3 + $0x238] sm:$0xff]  }
 0x1b6   : > { %3327 = vmatpush3.bf16.msra.mxu0 %v3600_v51  ;;  %3332 = vmatprep.subr.bf16.mxu1 %v3601_v52  ;;  %v2376_v51 = vld [vmem:[#allocation2 + $0x1e] sm:$0x3f] }
 0x1b7   : > { %3352 = vmatprep.subr.bf16.mxu0 %v3602_v53 }
 0x1b8   : > { %3309 = vmatmul.mubr.bf16.vlgmr.msra.gmra.mrb[20].mxu1 %v1658_v57 }
 0x1b9   : > { %3329 = vmatmul.mubr.bf16.vlgmr.msra.gmra.mrb[24].mxu0 %v1778_v58  ;;  %3333 = vmatpush3.bf16.msra.mxu1 %v3601_v52  ;;  %v2378_v52 = vpack.c.bf16 %v2376_v51, %v2376_v51  ;;  %v2871_v51 = vld [vmem:[%s4426_s4] ss:$0 sm:$0xff] }
 0x1ba   : > { %3348 = vmatprep.mubr.bf16.mxu1 %v1897_v23  ;;  %3353 = vmatpush3.bf16.msra.mxu0 %v3602_v53  ;;  %v3619_v23 = vld [vmem:[%s4425_s3 + $0x188] sm:$0xff]  }
 0x1bb   : > { %3368 = vmatprep.mubr.bf16.mxu0 %v2017_v61  ;;  %3334 = vmatprep.subr.bf16.mxu1 %v3603_v59 }
 0x1bc   : > { %3354 = vmatprep.subr.bf16.mxu0 %v3604_v60 }
 0x1bd   : > { %3335 = vmatpush3.bf16.msra.mxu1 %v3603_v59 }
 0x1be   : > { %3355 = vmatpush3.bf16.msra.mxu0 %v3604_v60  ;;  %3336 = vmatprep.subr.bf16.mxu1 %v3605_v62 }
 0x1bf   : > { %3356 = vmatprep.subr.bf16.mxu0 %v3606_v63 }
 0x1c1   : > { %3337 = vmatpush3.bf16.msra.mxu1 %v3605_v62 }
 0x1c2   : > { %3357 = vmatpush3.bf16.msra.mxu0 %v3606_v63  ;;  %3338 = vmatprep.subr.bf16.mxu1 %v3607_v0 }
 0x1c3   : > { %3358 = vmatprep.subr.bf16.mxu0 %v3608_v1 }
 0x1c5   : > { %3339 = vmatpush3.bf16.msra.mxu1 %v3607_v0  ;;  %v3641_v0 = vld [vmem:[%s4428_s6] sm:$0xff]  }
 0x1c6   : > { %3359 = vmatpush3.bf16.msra.mxu0 %v3608_v1  ;;  %3340 = vmatprep.subr.bf16.mxu1 %v3609_v2  ;;  %v3642_v1 = vld [vmem:[%s4428_s6 + $0x8] sm:$0xff]  }
 0x1c7   : > { %3360 = vmatprep.subr.bf16.mxu0 %v3610_v3 }
 0x1c9   : > { %3341 = vmatpush3.bf16.msra.mxu1 %v3609_v2  ;;  %v3643_v2 = vld [vmem:[%s4428_s6 + $0x10] sm:$0xff]  }
 0x1ca   : > { %3361 = vmatpush3.bf16.msra.mxu0 %v3610_v3  ;;  %3342 = vmatprep.subr.bf16.mxu1 %v3611_v4  ;;  %v3644_v3 = vld [vmem:[%s4428_s6 + $0x18] sm:$0xff]  }
 0x1cb   : > { %3362 = vmatprep.subr.bf16.mxu0 %v3612_v5 }
 0x1cd   : > { %3343 = vmatpush3.bf16.msra.mxu1 %v3611_v4  ;;  %v3645_v4 = vld [vmem:[%s4428_s6 + $0x20] sm:$0xff]  }
 0x1ce   : > { %3363 = vmatpush3.bf16.msra.mxu0 %v3612_v5  ;;  %3344 = vmatprep.subr.bf16.mxu1 %v3613_v6  ;;  %v3646_v5 = vld [vmem:[%s4428_s6 + $0x28] sm:$0xff]  }
 0x1cf   : > { %3364 = vmatprep.subr.bf16.mxu0 %v3614_v7 }
 0x1d1   : > { %3345 = vmatpush3.bf16.msra.mxu1 %v3613_v6  ;;  %v3647_v6 = vld [vmem:[%s4428_s6 + $0x30] sm:$0xff]  }
 0x1d2   : > { %3365 = vmatpush3.bf16.msra.mxu0 %v3614_v7  ;;  %3346 = vmatprep.subr.bf16.mxu1 %v3615_v8  ;;  %v3648_v7 = vld [vmem:[%s4428_s6 + $0x38] sm:$0xff]  }
 0x1d3   : > { %3366 = vmatprep.subr.bf16.mxu0 %v3616_v9 }
 0x1d5   : > { %3347 = vmatpush3.bf16.msra.mxu1 %v3615_v8 }
 0x1d6   : > { %3367 = vmatpush3.bf16.msra.mxu0 %v3616_v9  ;;  %3372 = vmatprep.subr.bf16.mxu1 %v3617_v10 }
 0x1d7   : > { %3392 = vmatprep.subr.bf16.mxu0 %v3618_v12 }
 0x1d8   : > { %3349 = vmatmul.mubr.bf16.vlgmr.msra.gmra.mrb[24].mxu1 %v1898_v19 }
 0x1d9   : > { %3369 = vmatmul.mubr.bf16.vlgmr.msra.gmra.mrb[28].mxu0 %v2018_v22  ;;  %3373 = vmatpush3.bf16.msra.mxu1 %v3617_v10 }
 0x1da   : > { %3388 = vmatprep.mubr.bf16.mxu1 %v2137_v24  ;;  %3408 = vmatprep.mubr.bf16.mxu0 %v2257_v25 }
 0x1db   : > { %3393 = vmatpush3.bf16.msra.mxu0 %v3618_v12  ;;  %3374 = vmatprep.subr.bf16.mxu1 %v3619_v23 }
 0x1dc   : > { %3394 = vmatprep.subr.bf16.mxu0 %v3620_v26 }
 0x1dd   : > { %3375 = vmatpush3.bf16.msra.mxu1 %v3619_v23 }
 0x1de   : > { %3376 = vmatprep.subr.bf16.mxu1 %v3621_v27 }
 0x1df   : > { %3395 = vmatpush3.bf16.msra.mxu0 %v3620_v26 }
 0x1e0   : > { %3396 = vmatprep.subr.bf16.mxu0 %v3622_v28 }
 0x1e1   : > { %3377 = vmatpush3.bf16.msra.mxu1 %v3621_v27 }
 0x1e2   : > { %3378 = vmatprep.subr.bf16.mxu1 %v3623_v29 }
 0x1e3   : > { %3397 = vmatpush3.bf16.msra.mxu0 %v3622_v28 }
 0x1e4   : > { %3398 = vmatprep.subr.bf16.mxu0 %v3624_v30 }
 0x1e5   : > { %3379 = vmatpush3.bf16.msra.mxu1 %v3623_v29 }
 0x1e6   : > { %3380 = vmatprep.subr.bf16.mxu1 %v3625_v31 }
 0x1e7   : > { %3399 = vmatpush3.bf16.msra.mxu0 %v3624_v30 }
 0x1e8   : > { %3400 = vmatprep.subr.bf16.mxu0 %v3626_v32 }
 0x1e9   : > { %3381 = vmatpush3.bf16.msra.mxu1 %v3625_v31 }
 0x1ea   : > { %3382 = vmatprep.subr.bf16.mxu1 %v3627_v33 }
 0x1eb   : > { %3401 = vmatpush3.bf16.msra.mxu0 %v3626_v32 }
 0x1ec   : > { %3402 = vmatprep.subr.bf16.mxu0 %v3628_v36 }
 0x1ed   : > { %3383 = vmatpush3.bf16.msra.mxu1 %v3627_v33 }
 0x1ee   : > { %3384 = vmatprep.subr.bf16.mxu1 %v3629_v37 }
 0x1ef   : > { %3403 = vmatpush3.bf16.msra.mxu0 %v3628_v36 }
 0x1f0   : > { %3404 = vmatprep.subr.bf16.mxu0 %v3630_v38 }
 0x1f1   : > { %3385 = vmatpush3.bf16.msra.mxu1 %v3629_v37 }
 0x1f2   : > { %3386 = vmatprep.subr.bf16.mxu1 %v3631_v39 }
 0x1f3   : > { %3405 = vmatpush3.bf16.msra.mxu0 %v3630_v38 }
 0x1f4   : > { %3406 = vmatprep.subr.bf16.mxu0 %v3632_v40 }
 0x1f5   : > { %3387 = vmatpush3.bf16.msra.mxu1 %v3631_v39 }
 0x1f6   : > { %3412 = vmatprep.subr.bf16.mxu1 %v3633_v41 }
 0x1f7   : > { %3407 = vmatpush3.bf16.msra.mxu0 %v3632_v40 }
 0x1f8   : > { %3389 = vmatmul.mubr.bf16.vlgmr.msra.gmra.mrb[28].mxu1 %v2138_v20  ;;  %3432 = vmatprep.subr.bf16.mxu0 %v3714_v13 }
 0x1f9   : > { %3413 = vmatpush3.bf16.msra.mxu1 %v3633_v41  ;;  %3428 = vmatprep.mubr.bf16.mxu1 %v2377_v46 }
 0x1fa   : > { %3409 = vmatmul.mubr.bf16.vlgmr.msra.gmra.mrb[32].mxu0 %v2258_v21  ;;  %3414 = vmatprep.subr.bf16.mxu1 %v3634_v45 }
 0x1fb   : > { %3433 = vmatpush3.bf16.msra.mxu0 %v3641_v0  ;;  %3448 = vmatprep.mubr.msk.bf16.mxu0 %vm3715_vm0, %v3714_v13  ;;  %v2495_v0 = vld [vmem:[%s3845_s12 + $0xf] sm:$0xff] }
 0x1fc   : > { %3434 = vmatprep.subr.bf16.mxu0 %v3714_v13 }
 0x1fd   : > { %3415 = vmatpush3.bf16.msra.mxu1 %v3634_v45 }
 0x1fe   : > { %3416 = vmatprep.subr.bf16.mxu1 %v3635_v47 }
 0x1ff   : > { %3435 = vmatpush3.bf16.msra.mxu0 %v3642_v1 }
 0x200   : > { %3436 = vmatprep.subr.bf16.mxu0 %v3714_v13 }
 0x201   : > { %3417 = vmatpush3.bf16.msra.mxu1 %v3635_v47 }
 0x202   : > { %3418 = vmatprep.subr.bf16.mxu1 %v3636_v48 }
 0x203   : > { %3437 = vmatpush3.bf16.msra.mxu0 %v3643_v2 }
 0x204   : > { %3438 = vmatprep.subr.bf16.mxu0 %v3714_v13 }
 0x205   : > { %3419 = vmatpush3.bf16.msra.mxu1 %v3636_v48 }
 0x206   : > { %3420 = vmatprep.subr.bf16.mxu1 %v3637_v34 }
 0x207   : > { %3439 = vmatpush3.bf16.msra.mxu0 %v3644_v3 }
 0x208   : > { %3440 = vmatprep.subr.bf16.mxu0 %v3714_v13 }
 0x209   : > { %3421 = vmatpush3.bf16.msra.mxu1 %v3637_v34 }
 0x20a   : > { %3422 = vmatprep.subr.bf16.mxu1 %v3638_v49 }
 0x20b   : > { %3441 = vmatpush3.bf16.msra.mxu0 %v3645_v4 }
 0x20c   : > { %3442 = vmatprep.subr.bf16.mxu0 %v3714_v13 }
 0x20d   : > { %3423 = vmatpush3.bf16.msra.mxu1 %v3638_v49 }
 0x20e   : > { %3424 = vmatprep.subr.bf16.mxu1 %v3639_v35 }
 0x20f   : > { %3443 = vmatpush3.bf16.msra.mxu0 %v3646_v5 }
 0x210   : > { %3444 = vmatprep.subr.bf16.mxu0 %v3714_v13 }
 0x211   : > { %3425 = vmatpush3.bf16.msra.mxu1 %v3639_v35 }
 0x212   : > { %3426 = vmatprep.subr.bf16.mxu1 %v3640_v50 }
 0x213   : > { %3445 = vmatpush3.bf16.msra.mxu0 %v3647_v6 }
 0x214   : > { %3446 = vmatprep.subr.bf16.mxu0 %v3714_v13 }
 0x215   : > { %3427 = vmatpush3.bf16.msra.mxu1 %v3640_v50 }
 0x217   : > { %3447 = vmatpush3.bf16.msra.mxu0 %v3648_v7 }
 0x218   : > { %3429 = vmatmul.mubr.bf16.vlgmr.msra.gmra.mrb[32].mxu1 %v2378_v52 }
 0x26b   : > { %v3270_v53 = vpop.f32.mrb[16].mxu1 }
 0x26c   : > { %v3290_v54 = vpop.f32.mrb[20].mxu0  ;;  %v1544_v56 = vpop.f32.mrb[17].mxu1 }
 0x26d   : > { %v1649_v55 = vadd.f32 %v3290_v54, %v3270_v53  ;;  %v1640_v57 = vpop.f32.mrb[21].mxu0  ;;  %v3271_v59 = vpop.f32.mrb[18].mxu1  ;;  %v2496_v54 = vld [vmem:[%s3845_s12 + $0x17] sm:$0x3f] }
 0x26e   : > { %v1641_v58 = vadd.f32 %v1640_v57, %v1544_v56  ;;  %v3291_v60 = vpop.f32.mrb[22].mxu0  ;;  %v1547_v61 = vpop.f32.mrb[19].mxu1 }
 0x26f   : > { %v1643_v62 = vpop.f32.mrb[23].mxu0  ;;  %v2519_v60 = vpop.permute.xlu1 %2518 }
 0x270   : > { %v1644_v63 = vadd.f32 %v1643_v62, %v1547_v61 }
 0x273   : > { %v2529_v6 = vpop.permute.xlu1 %2528 }
 0x28b   : > { %v3310_v8 = vpop.f32.mrb[20].mxu1 }
 0x28c   : > { %v3330_v9 = vpop.f32.mrb[24].mxu0  ;;  %v1773_v10 = vadd.f32 %v3310_v8, %v1649_v55  ;;  %v1757_v11 = vpop.f32.mrb[21].mxu1 }
 0x28d   : > { %v1877_v12 = vpop.f32.mrb[25].mxu0  ;;  %v1771_v14 = vadd.f32 %v1757_v11, %v1641_v58  ;;  %v3311_v15 = vpop.f32.mrb[22].mxu1  ;;  %v2494_v58 = vld [vmem:[%s3845_s12 + $0x7] sm:$0xff]  ;;  %s296_s12 = sand.u32 1, %s3703_s28  }
 0x28e   : > { %v3331_v16 = vpop.f32.mrb[26].mxu0  ;;  %v1893_v17 = vadd.f32 %v3330_v9, %v1773_v10  ;;  %v1760_v18 = vpop.f32.mrb[23].mxu1  ;;  %s297_s10 = scalar_lea.vmem [#allocation3], %s296_s12  ;;  %s2654_s9 = scalar_lea.sflag [#allocation4], %s296_s12 }
 0x28f   : > { %v1880_v19 = vpop.f32.mrb[27].mxu0  ;;  %v1891_v22 = vadd.f32 %v1877_v12, %v1771_v14  ;;  %v1772_v23 = vadd.f32 %v1760_v18, %v1644_v63  ;;  %v2524_v8 = vpop.permute.xlu0 %2523  ;;  %s2666_s13 = sshll.u32 %s297_s10, 4  ;;  %s4382_s13 = int_to_ptr.vmem [resolvable:$true] %s2666_s13 }
 0x290   : > { %s3649_s20 = scalar_lea.vmem %s4382_s13, 16  ;;  %p3656_p0 = scmp.lt.s32.totalorder %s4382_s13, %s3654_s22 }
 0x291   : > { %v1892_v24 = vadd.f32 %v1880_v19, %v1772_v23  ;;  %p3650_p11 = scmp.ne.s32.totalorder %s4382_s13, %s3649_s20  ;;  %p3657_p1 = scmp.lt.s32.totalorder %s3655_s23, %s3649_s20 }
 0x293   : > { %p3651_p12 = pnand %p3650_p11, %p3800_p5  ;;  %p3658_p2 = por %p3657_p1, %p3656_p0 }
 0x295   : > { %p3652_p13 = pneg %p3651_p12 }
 0x297   : > { %p3659_p3 = pnand %p3658_p2, %p3652_p13 }
 0x2ab   : > { %v3350_v25 = vpop.f32.mrb[24].mxu1 }
 0x2ac   : > { %v2013_v26 = vadd.f32 %v3350_v25, %v1893_v17  ;;  %v3370_v27 = vpop.f32.mrb[28].mxu0  ;;  %v1997_v28 = vpop.f32.mrb[25].mxu1 }
 0x2ad   : > { %v2011_v13 = vadd.f32 %v1997_v28, %v1891_v22  ;;  %v2117_v29 = vpop.f32.mrb[29].mxu0  ;;  %v3351_v30 = vpop.f32.mrb[26].mxu1 }
 0x2ae   : > { %v2133_v31 = vadd.f32 %v3370_v27, %v2013_v26  ;;  %v3371_v32 = vpop.f32.mrb[30].mxu0  ;;  %v2000_v33 = vpop.f32.mrb[27].mxu1  ;;  %v2562_v26 = vld [vmem:[%s4429_s7] sm:$0x1] }
 0x2af   : > { %v2131_v36 = vadd.f32 %v2117_v29, %v2011_v13  ;;  %v2012_v37 = vadd.f32 %v2000_v33, %v1892_v24  ;;  %v2120_v38 = vpop.f32.mrb[31].mxu0 }
 0x2b1   : > { %v2132_v39 = vadd.f32 %v2120_v38, %v2012_v37 }
 0x2cb   : > { %v3390_v40 = vpop.f32.mrb[28].mxu1 }
 0x2cc   : > { %v2253_v41 = vadd.f32 %v3390_v40, %v2133_v31  ;;  %v2237_v42 = vpop.f32.mrb[29].mxu1 }
 0x2cd   : > { %v2251_v43 = vadd.f32 %v2237_v42, %v2131_v36  ;;  %v3391_v44 = vpop.f32.mrb[30].mxu1  ;;  %v3410_v20 = vpop.f32.mrb[32].mxu0 }
 0x2ce   : > { %v2373_v21 = vadd.f32 %v3410_v20, %v2253_v41  ;;  %v2240_v45 = vpop.f32.mrb[31].mxu1  ;;  %v2357_v46 = vpop.f32.mrb[33].mxu0 }
 0x2cf   : > { %v2252_v47 = vadd.f32 %v2240_v45, %v2132_v39  ;;  %v2371_v48 = vadd.f32 %v2357_v46, %v2251_v43  ;;  %v3411_v34 = vpop.f32.mrb[34].mxu0 }
 0x2d0   : > { %v2360_v49 = vpop.f32.mrb[35].mxu0 }
 0x2d1   : > { %v2372_v35 = vadd.f32 %v2360_v49, %v2252_v47 }
 0x2eb   : > { %v3430_v50 = vpop.f32.mrb[32].mxu1 }
 0x2ec   : > { %v2493_v52 = vadd.f32 %v3430_v50, %v2373_v21  ;;  %v2477_v53 = vpop.f32.mrb[33].mxu1 }
 0x2ed   : > { %v2491_v55 = vadd.f32 %v2477_v53, %v2371_v48  ;;  %v3431_v56 = vpop.f32.mrb[34].mxu1 }
 0x2ee   : > { %v2506_v57 = vadd.f32 %v2871_v51, %v2493_v52  ;;  %v2480_v59 = vpop.f32.mrb[35].mxu1 }
 0x2ef   : > { %v2504_v61 = vadd.f32 %v2871_v51, %v2491_v55  ;;  %v2492_v62 = vadd.f32 %v2480_v59, %v2372_v35 }
 0x2f0   : > { %v2509_v63 = vadd.f32 %v2506_v57, %v2496_v54 }
 0x2f1   : > { %v2507_v1 = vadd.f32 %v2504_v61, %v2494_v58  ;;  %v2505_v2 = vadd.f32 %v2871_v51, %v2492_v62 }
 0x2f2   : > { %v2512_v3 = vmax.f32 %v2509_v63, 0.0 }
 0x2f3   : > { %v2510_v4 = vmax.f32 %v2507_v1, 0.0  ;;  %v2508_v5 = vadd.f32 %v2505_v2, %v2495_v0 }
 0x2f4   : > { %v2533_v9 = vmul.f32 %v2529_v6, %v2512_v3 }
 0x2f5   : > { %v2511_v7 = vmax.f32 %v2508_v5, 0.0  ;;  %v2531_v10 = vmul.f32 %v2519_v60, %v2510_v4 }
 0x2f6   : > { %v2536_v14 = vsel %vm2535_vm1, %v2533_v9, 0.0 }
 0x2f7   : > { %v2532_v11 = vmul.f32 %v2524_v8, %v2511_v7 }
 0x2f9   : > { %v2534_v12 = vadd.f32 %v2532_v11, %v2531_v10 }
 0x2fb   : > { %v2537_v15 = vadd.f32 %v2536_v14, %v2534_v12 }
 0x2fd   : > { %v2538_v16 = vrot.slane %v2537_v15, 4 }
 0x2ff   : > { %v2539_v17 = vadd.f32 %v2538_v16, %v2537_v15 }
 0x301   : > { %v2540_v18 = vrot.slane %v2539_v17, 2 }
 0x303   : > { %v2541_v19 = vadd.f32 %v2540_v18, %v2539_v17 }
 0x305   : > { %v2542_v22 = vrot.slane %v2541_v19, 1 }
 0x307   : > { %v2543_v23 = vadd.f32 %v2542_v22, %v2541_v19 }
 0x309   : > { %v2544_v24 = vmul.f32 0.0625, %v2543_v23 }
 0x30b   : > { %v2545_v25 = vpack.c.bf16 %v2544_v24, %v2544_v24 }
 0x30d   : > { %3449 = vmatmul.mubr.bf16.vlgmr.msra.gmra.mrb[36].mxu0 %v2545_v25 }
 0x3e0   : > { %v2645_v27 = vpop.f32.mrb[36].mxu0 }
 0x3e1   : > { %v2646_v28 = vadd.f32 %v2645_v27, %v2562_v26  ;;  %v3450_v13 = vpop.f32.mrb[37].mxu0 }
 0x3e2   : > { %v2648_v29 = vpop.f32.mrb[38].mxu0 }
 0x3e3   : > { %v3451_v30 = vpop.f32.mrb[39].mxu0  ;;  %2652 = vst.msk [vmem:[%s297_s10] sm:$0x1] %vm2651_vm2, %v2646_v28 }
 0x3e4   : > { %3662 = shalt.err (!%p3659_p3)
}
 0x3e5   : > { %s3663_s12 = scalar_lea.hbm %s4380_s19, 16  ;;  %s3667_s26 = scalar_lea.hbm %s4430_s8, 32 }
 0x3e6   : > { %p3664_p4 = scmp.ne.s32.totalorder %s4380_s19, %s3663_s12  ;;  %p3668_p9 = scmp.lt.u32.totalorder %s4380_s19, %s4430_s8 }
 0x3e7   : > { %p3669_p10 = scmp.lt.u32.totalorder %s3667_s26, %s3663_s12  ;;  %p3671_p12 = scmp.lt.u32.totalorder %s3663_s12, %s4380_s19 }
 0x3e8   : > { %p3665_p7 = pnand %p3664_p4, %p3800_p5 }
 0x3e9   : > { %p3670_p11 = por %p3669_p10, %p3668_p9 }
 0x3ea   : > { %p3666_p8 = pneg %p3665_p7 }
 0x3eb   : > { %p3672_p13 = por %p3671_p12, %p3670_p11 }
 0x3ed   : > { %p3673_p0 = pnand %p3672_p13, %p3666_p8 }
 0x3ef   : > { %3676 = shalt.err (!%p3673_p0)
}
 0x3f0   : > { %3453 = dma.vmem_to_hbm [thread:$0]  (%p3800_p5), %s4382_s13, 16, %s4380_s19, %s2654_s9  }
 0x3f1 PF: > { %p3459_p1 = scmp.ge.s32.totalorder %s3711_s30, 2  ;;  %s2678_s18 = sand.u32 1, %s3699_s27  }
 0x3f2   : > { %s2679_s20 = scalar_lea.sflag [#allocation4], %s2678_s18 }
 0x3f3   : > { %p3456_p2 = pnand %p3459_p1, %p3804_p6 }
 0x3f5   : > { %3694 = dma.done.wait (!%p3456_p2), %s2679_s20, 16  }
 0x3f6   : > { %3696 = vsyncadd (!%p3456_p2), %s2679_s20, 4294967280  ;;  %p18_p3 = scmp.ge.s32.totalorder %s3787_s11, 4   ;;  %s4433_s27 = smov %s3703_s28 }
 0x3f7   : > { %s4434_s28 = smov %s3707_s29  ;;  %s4435_s29 = smov %s3798_s14 }
 0x3f8   : > { %s4436_s30 = smov %s3787_s11  ;;  %20 = sbr.rel (!%p18_p3) target bundleno = 3 (0x3), region = 87 }
 0x3ff   :  { %2683 = vsyncpa [#allocation4], 1 }
 0x400   :  { %2685 = vsyncpa [#allocation4 + $0x1], 1 }

</bundles_post_ra>
